<compile_context>
chip_gen: v5e
topology: v5e:2x2
jax: 0.10.0
libtpu: 0.0.40
codegen_flags: <defaults>
</compile_context>

<pallas_src>
import functools

import jax
import jax.numpy as jnp
from jax import lax
from jax.experimental import pallas as pl
from jax.experimental.pallas import tpu as pltpu


# (kernel_size, stride, padding, has_batchnorm+relu)  -- last layer uses tanh
LAYER_CFG = [
    (4, 1, 0, True),
    (4, 2, 1, True),
    (4, 2, 1, True),
    (4, 2, 1, True),
    (5, 3, 1, False),
]

_BN_EPS = 1e-5
_LANES = 128


def _round_up(x, m):
    return (x + m - 1) // m * m


def _ceil_div(a, b):
    return -(-a // b)


# ----------------------------- Pallas kernels --------------------------------


def _matmul_kernel(x_ref, w_ref, y_ref):
    # Subpixel ConvTranspose matmul: (M, Cin) @ (Cin, k*k*Cout) on the MXU;
    # bf16 inputs, f32 accumulation.  Used for layer 1 (no preceding BN/ReLU).
    y_ref[...] = jnp.dot(x_ref[...].astype(jnp.bfloat16), w_ref[...],
                         preferred_element_type=jnp.float32)


def _bn_relu_matmul_kernel(x_ref, g_ref, b_ref, w_ref, y_ref, *, inv_n):
    # Fused: previous layer's BatchNorm statistics (training-mode batch stats)
    # + affine + ReLU + bf16 cast + subpixel ConvTranspose matmul.
    x = x_ref[...]                                    # (Rp, Cin) f32
    s1 = jnp.sum(x, axis=0, keepdims=True)
    s2 = jnp.sum(x * x, axis=0, keepdims=True)
    mean = s1 * inv_n                                 # inv_n uses the true R,
    var = jnp.maximum(s2 * inv_n - mean * mean, 0.0)  # zero-padded rows add 0;
    scale = g_ref[...] * lax.rsqrt(var + _BN_EPS)     # clamp avoids rsqrt NaN.
    shift = b_ref[...] - mean * scale
    a = jnp.maximum(x * scale + shift, 0.0).astype(jnp.bfloat16)
    y_ref[...] = jnp.dot(a, w_ref[...], preferred_element_type=jnp.float32)


def _tanh_kernel(x_ref, o_ref):
    o_ref[...] = jnp.tanh(x_ref[...])


# ----------------------------- Pallas wrappers --------------------------------


def fused_layer_matmul(x_flat, gamma, beta, w_mat):
    """Per-layer fused kernel.

    x_flat : (R, Cin) f32 raw (pre-BN) activation of the previous layer
             (or the flattened noise for layer 1), R = B*H*W.
    gamma/beta : previous layer's BN parameters as (1, Cin) f32, or None.
    w_mat  : (Cin, Npad) bf16 subpixel weight slab, Npad % 128 == 0.
    Returns the per-tap matmul output (R, Npad) f32.
    """
    R, cin = x_flat.shape
    n_pad = w_mat.shape[1]
    Rp = _round_up(max(R, 8), 8)
    xp = jnp.pad(x_flat, ((0, Rp - R), (0, 0))) if Rp != R else x_flat

    # Explicit VMEM budget: grid-less call, so footprint = sum of resident
    # blocks (no double buffering).  2x margin, clamped to [4 MiB, 32 MiB]
    # which is safe for v5e (16 MiB scoped default raised explicitly) and v7x
    # (32 MiB scoped / 64 MiB physical).
    foot = Rp * cin * 4 + w_mat.size * 2 + Rp * n_pad * 4 + 2 * cin * 4
    cparams = pltpu.CompilerParams(
        vmem_limit_bytes=int(min(32 << 20, max(4 << 20, 2 * foot))))

    if gamma is None:
        y = pl.pallas_call(
            _matmul_kernel,
            out_shape=jax.ShapeDtypeStruct((Rp, n_pad), jnp.float32),
            compiler_params=cparams,
        )(xp, w_mat)
    else:
        y = pl.pallas_call(
            functools.partial(_bn_relu_matmul_kernel, inv_n=1.0 / R),
            out_shape=jax.ShapeDtypeStruct((Rp, n_pad), jnp.float32),
            compiler_params=cparams,
        )(xp, gamma, beta, w_mat)
    return y[:R] if Rp != R else y


def pallas_tanh(x):
    """Elementwise tanh on a lane-dense (rows, 128) view of the flat array."""
    shape = x.shape
    flat = x.reshape(-1)
    n = flat.shape[0]
    rows = _ceil_div(n, _LANES)
    # Two even row blocks when possible so v7x megacore has work to shard;
    # otherwise a single full-slab block (grid=1, no per-step overhead).
    if rows >= 16 and rows % 2 == 0 and (rows // 2) % 8 == 0:
        tile_r = rows // 2
    else:
        tile_r = _round_up(rows, 8)
    rows_p = _round_up(rows, tile_r)
    total = rows_p * _LANES
    if total != n:
        flat = jnp.pad(flat, (0, total - n))
    x2 = flat.reshape(rows_p, _LANES)

    out = pl.pallas_call(
        _tanh_kernel,
        out_shape=jax.ShapeDtypeStruct((rows_p, _LANES), jnp.float32),
        grid_spec=pltpu.PrefetchScalarGridSpec(
            num_scalar_prefetch=0,
            grid=(rows_p // tile_r,),
            in_specs=[pl.BlockSpec((tile_r, _LANES), lambda i: (i, 0))],
            out_specs=pl.BlockSpec((tile_r, _LANES), lambda i: (i, 0)),
        ),
        compiler_params=pltpu.CompilerParams(
            dimension_semantics=("parallel",)),
    )(x2)
    return out.reshape(-1)[:n].reshape(shape)


# ------------------ col2im: write-once phase decomposition --------------------


def col2im_phase(y6, k, s, p):
    """Overlap-add of the subpixel matmul taps, without read-modify-write.

    y6: (B, H, W, k, k, C) f32 tap contributions,
        y6[b,ih,iw,kh,kw,c] -> out_full[b, s*ih+kh, s*iw+kw, c].
    Returns (B, OH, OW, C) with OH = (H-1)*s + k - 2*p.

    Every output element belongs to exactly one phase (oh mod s, ow mod s) and
    is the sum of <= ceil(k/s)^2 shifted tap views, so each element is written
    exactly once (no k^2 RMW scatter chain).
    """
    B, H, W, _, _, C = y6.shape
    OH = (H - 1) * s + k - 2 * p
    OW = (W - 1) * s + k - 2 * p
    if H == 1 and W == 1 and s == 1:
        full = y6.reshape(B, k, k, C)
        return full[:, p:p + OH, p:p + OW, :]

    J = _ceil_div(k, s)                              # max taps per phase/axis
    taps = lambda r: _ceil_div(k - r, s)
    mmax_h = max(H + taps(r) - 1 for r in range(s))
    mmax_w = max(W + taps(r) - 1 for r in range(s))
    ypad = jnp.pad(y6, ((0, 0), (J - 1, J - 1), (J - 1, J - 1),
                        (0, 0), (0, 0), (0, 0)))

    row_phases = []
    for rh in range(s):
        jh_n = taps(rh)
        mh = H + jh_n - 1
        col_phases = []
        for rw in range(s):
            jw_n = taps(rw)
            mw = W + jw_n - 1
            acc = jnp.zeros((B, mh, mw, C), jnp.float32)
            for jh in range(jh_n):
                for jw in range(jw_n):
                    kh, kw = s * jh + rh, s * jw + rw
                    a0, b0 = J - 1 - jh, J - 1 - jw
                    acc = acc + ypad[:, a0:a0 + mh, b0:b0 + mw, kh, kw, :]
            acc = jnp.pad(acc, ((0, 0), (0, mmax_h - mh),
                                (0, mmax_w - mw), (0, 0)))
            col_phases.append(acc)
        row_phases.append(jnp.stack(col_phases, axis=0))
    ph = jnp.stack(row_phases, axis=0)               # (s, s, B, Mh, Mw, C)
    # interleave: out_full[b, s*m + rh, s*n + rw, c] = ph[rh, rw, b, m, n, c]
    full = jnp.transpose(ph, (2, 3, 0, 4, 1, 5)).reshape(
        B, s * mmax_h, s * mmax_w, C)
    return full[:, p:p + OH, p:p + OW, :]


# ------------------------------ Gnet forward ---------------------------------


def prepare_params(params):
    """Hoist the weight reshape / pad-to-128 / bf16 cast out of the forward."""
    prepped, couts = [], []
    for (k, _, _, has_bn), layer in zip(LAYER_CFG, params):
        w = layer["w"]                       # (Cin, Cout, k, k) PyTorch layout
        cin, cout = w.shape[0], w.shape[1]
        w_mat = jnp.transpose(w, (0, 2, 3, 1)).reshape(cin, k * k * cout)
        n_pad = _round_up(k * k * cout, _LANES)
        if n_pad != k * k * cout:
            w_mat = jnp.pad(w_mat, ((0, 0), (0, n_pad - k * k * cout)))
        entry = {"w_mat": w_mat.astype(jnp.bfloat16)}
        if has_bn:
            entry["gamma"] = layer["gamma"].astype(jnp.float32).reshape(1, cout)
            entry["beta"] = layer["beta"].astype(jnp.float32).reshape(1, cout)
        else:
            entry["gamma"] = None
            entry["beta"] = None
        prepped.append(entry)
        couts.append(int(cout))
    return tuple(prepped), tuple(couts)


@functools.partial(jax.jit, static_argnums=(2,))
def gnet_forward(x_nchw, prepped, couts):
    B = x_nchw.shape[0]
    act = jnp.transpose(x_nchw, (0, 2, 3, 1)).astype(jnp.float32)  # NCHW->NHWC
    H, W = act.shape[1], act.shape[2]
    flat = act.reshape(B * H * W, act.shape[3])
    prev_gamma = prev_beta = None
    for (k, s, p, has_bn), layer, cout in zip(LAYER_CFG, prepped, couts):
        # Fused kernel: (prev BN stats + affine + ReLU) -> bf16 -> MXU matmul.
        y = fused_layer_matmul(flat, prev_gamma, prev_beta, layer["w_mat"])
        y = y[:, : k * k * cout].reshape(B, H, W, k, k, cout)
        act = col2im_phase(y, k, s, p)       # raw (pre-BN / pre-tanh) output
        H, W = act.shape[1], act.shape[2]
        flat = act.reshape(B * H * W, cout)
        if has_bn:
            prev_gamma, prev_beta = layer["gamma"], layer["beta"]
        else:
            prev_gamma = prev_beta = None
    out = pallas_tanh(flat)                  # final activation
    return jnp.transpose(out.reshape(B, H, W, couts[-1]), (0, 3, 1, 2))


# ----------------------------- pure-JAX reference -----------------------------


def _ref_conv_transpose(x_nchw, w_torch, stride, pad):
    k = w_torch.shape[-1]
    w_conv = jnp.transpose(jnp.flip(w_torch, axis=(2, 3)), (1, 0, 2, 3))
    return lax.conv_general_dilated(
        x_nchw, w_conv, window_strides=(1, 1),
        padding=[(k - 1 - pad, k - 1 - pad)] * 2,
        lhs_dilation=(stride, stride),
        dimension_numbers=("NCHW", "OIHW", "NCHW"),
        precision=lax.Precision.HIGHEST,
    )


def ref_forward(x, params, eps=_BN_EPS):
    for (k, s, p, has_bn), layer in zip(LAYER_CFG, params):
        x = _ref_conv_transpose(x, layer["w"], s, p)
        if has_bn:
            mean = jnp.mean(x, axis=(0, 2, 3), keepdims=True)
            var = jnp.var(x, axis=(0, 2, 3), keepdims=True)
            g = layer["gamma"].reshape(1, -1, 1, 1)
            b = layer["beta"].reshape(1, -1, 1, 1)
            x = jnp.maximum((x - mean) * lax.rsqrt(var + eps) * g + b, 0.0)
        else:
            x = jnp.tanh(x)
    return x


# ------------------------------ params / main ---------------------------------


def init_params(key, noise_dim, feats):
    chans = [noise_dim, feats * 8, feats * 4, feats * 2, feats, 3]
    params = []
    for i, (k, _, _, has_bn) in enumerate(LAYER_CFG):
        key, wk, gk, bk = jax.random.split(key, 4)
        cin, cout = chans[i], chans[i + 1]
        w = 0.02 * jax.random.normal(wk, (cin, cout, k, k), jnp.float32)
        if has_bn:
            gamma = 1.0 + 0.1 * jax.random.normal(gk, (cout,), jnp.float32)
            beta = 0.1 * jax.random.normal(bk, (cout,), jnp.float32)
        else:
            gamma = beta = None
        params.append({"w": w, "gamma": gamma, "beta": beta})
    return params


if __name__ == "__main__":
    # small config: noise_dim=16, feats_channel=8, batch=2
    noise_dim, feats, batch = 16, 8, 2

    key = jax.random.PRNGKey(0)
    pkey, xkey = jax.random.split(key)
    params = init_params(pkey, noise_dim, feats)
    x = jax.random.normal(xkey, (batch, noise_dim, 1, 1), jnp.float32)

    prepped, couts = prepare_params(params)          # hoisted weight prep

    out = gnet_forward(x, prepped, couts)
    out = jax.block_until_ready(out)
    assert out.shape == (batch, 3, 96, 96), out.shape

    ref = jax.block_until_ready(ref_forward(x, params))
    max_err = float(jnp.max(jnp.abs(out - ref)))
    mean_err = float(jnp.mean(jnp.abs(out - ref)))
    # bf16 MXU inputs vs. the f32-HIGHEST reference: typical max error ~1e-3.
    assert max_err < 5e-2 and mean_err < 5e-3, (max_err, mean_err)

    print("KERNEL_OK")
</pallas_src>

<mosaic_0001>
module attributes {stable_mosaic.version = 11 : i64} {
  func.func @_matmul_kernel(%arg0: memref<8x16xf32, #tpu.memory_space<vmem>>, %arg1: memref<16x1024xbf16, #tpu.memory_space<vmem>>, %arg2: memref<8x1024xf32, #tpu.memory_space<vmem>>) attributes {dimension_semantics = [], scalar_prefetch = 0 : i64, scratch_operands = 0 : i64, tpu.core_type = #tpu.core_type<tc>} {
    %c0 = arith.constant 0 : index
    %c0_0 = arith.constant 0 : index
    %0 = vector.load %arg0[%c0, %c0_0] : memref<8x16xf32, #tpu.memory_space<vmem>>, vector<8x16xf32>
    %1 = arith.truncf %0 : vector<8x16xf32> to vector<8x16xbf16>
    %c0_1 = arith.constant 0 : index
    %c0_2 = arith.constant 0 : index
    %2 = vector.load %arg1[%c0_1, %c0_2] : memref<16x1024xbf16, #tpu.memory_space<vmem>>, vector<16x1024xbf16>
    %cst = arith.constant dense<0.000000e+00> : vector<8x1024xf32>
    %3 = tpu.matmul %1, %2, %cst {dimension_numbers = #tpu.dot_dimension_numbers<[1], [0], [0], [1], [0, 0, 1, 1], [], []>} : vector<8x16xbf16>, vector<16x1024xbf16>, vector<8x1024xf32> -> vector<8x1024xf32>
    %c0_3 = arith.constant 0 : index
    %c0_4 = arith.constant 0 : index
    %4 = vector.load %arg2[%c0_3, %c0_4] : memref<8x1024xf32, #tpu.memory_space<vmem>>, vector<8x1024xf32>
    tpu.vector_store %arg2[%c0_3, %c0_4], %3 {strides = array<i32>} : memref<8x1024xf32, #tpu.memory_space<vmem>>, vector<8x1024xf32>,
    return
  }
}

module attributes {stable_mosaic.version = 11 : i64} {
  func.func @_bn_relu_matmul_kernel(%arg0: memref<32x64xf32, #tpu.memory_space<vmem>>, %arg1: memref<1x64xf32, #tpu.memory_space<vmem>>, %arg2: memref<1x64xf32, #tpu.memory_space<vmem>>, %arg3: memref<64x512xbf16, #tpu.memory_space<vmem>>, %arg4: memref<32x512xf32, #tpu.memory_space<vmem>>) attributes {dimension_semantics = [], scalar_prefetch = 0 : i64, scratch_operands = 0 : i64, tpu.core_type = #tpu.core_type<tc>} {
    %c0 = arith.constant 0 : index
    %c0_0 = arith.constant 0 : index
    %0 = vector.load %arg0[%c0, %c0_0] : memref<32x64xf32, #tpu.memory_space<vmem>>, vector<32x64xf32>
    %cst = arith.constant dense<0.000000e+00> : vector<64xf32>
    %1 = vector.multi_reduction <add>, %0, %cst [0] : vector<32x64xf32> to vector<64xf32>
    %2 = vector.shape_cast %1 : vector<64xf32> to vector<1x64xf32>
    %3 = arith.mulf %0, %0 : vector<32x64xf32>
    %cst_1 = arith.constant dense<0.000000e+00> : vector<64xf32>
    %4 = vector.multi_reduction <add>, %3, %cst_1 [0] : vector<32x64xf32> to vector<64xf32>
    %5 = vector.shape_cast %4 : vector<64xf32> to vector<1x64xf32>
    %cst_2 = arith.constant 3.125000e-02 : f32
    %6 = vector.broadcast %cst_2 : f32 to vector<1x64xf32>
    %7 = arith.mulf %2, %6 : vector<1x64xf32>
    %cst_3 = arith.constant 3.125000e-02 : f32
    %8 = vector.broadcast %cst_3 : f32 to vector<1x64xf32>
    %9 = arith.mulf %5, %8 : vector<1x64xf32>
    %10 = arith.mulf %7, %7 : vector<1x64xf32>
    %11 = arith.subf %9, %10 : vector<1x64xf32>
    %cst_4 = arith.constant 0.000000e+00 : f32
    %12 = vector.broadcast %cst_4 : f32 to vector<1x64xf32>
    %13 = arith.maximumf %11, %12 : vector<1x64xf32>
    %c0_5 = arith.constant 0 : index
    %c0_6 = arith.constant 0 : index
    %14 = vector.load %arg1[%c0_5, %c0_6] : memref<1x64xf32, #tpu.memory_space<vmem>>, vector<1x64xf32>
    %cst_7 = arith.constant 9.99999974E-6 : f32
    %15 = vector.broadcast %cst_7 : f32 to vector<1x64xf32>
    %16 = arith.addf %13, %15 : vector<1x64xf32>
    %17 = math.rsqrt %16 : vector<1x64xf32>
    %18 = arith.mulf %14, %17 : vector<1x64xf32>
    %c0_8 = arith.constant 0 : index
    %c0_9 = arith.constant 0 : index
    %19 = vector.load %arg2[%c0_8, %c0_9] : memref<1x64xf32, #tpu.memory_space<vmem>>, vector<1x64xf32>
    %20 = arith.mulf %7, %18 : vector<1x64xf32>
    %21 = arith.subf %19, %20 : vector<1x64xf32>
    %22 = vector.broadcast %18 : vector<1x64xf32> to vector<32x64xf32>
    %23 = arith.mulf %0, %22 : vector<32x64xf32>
    %24 = vector.broadcast %21 : vector<1x64xf32> to vector<32x64xf32>
    %25 = arith.addf %23, %24 : vector<32x64xf32>
    %cst_10 = arith.constant 0.000000e+00 : f32
    %26 = vector.broadcast %cst_10 : f32 to vector<32x64xf32>
    %27 = arith.maximumf %25, %26 : vector<32x64xf32>
    %28 = arith.truncf %27 : vector<32x64xf32> to vector<32x64xbf16>
    %c0_11 = arith.constant 0 : index
    %c0_12 = arith.constant 0 : index
    %29 = vector.load %arg3[%c0_11, %c0_12] : memref<64x512xbf16, #tpu.memory_space<vmem>>, vector<64x512xbf16>
    %cst_13 = arith.constant dense<0.000000e+00> : vector<32x512xf32>
    %30 = tpu.matmul %28, %29, %cst_13 {dimension_numbers = #tpu.dot_dimension_numbers<[1], [0], [0], [1], [0, 0, 1, 1], [], []>} : vector<32x64xbf16>, vector<64x512xbf16>, vector<32x512xf32> -> vector<32x512xf32>
    %c0_14 = arith.constant 0 : index
    %c0_15 = arith.constant 0 : index
    %31 = vector.load %arg4[%c0_14, %c0_15] : memref<32x512xf32, #tpu.memory_space<vmem>>, vector<32x512xf32>
    tpu.vector_store %arg4[%c0_14, %c0_15], %30 {strides = array<i32>} : memref<32x512xf32, #tpu.memory_space<vmem>>, vector<32x512xf32>,
    return
  }
}

module attributes {stable_mosaic.version = 11 : i64} {
  func.func @_bn_relu_matmul_kernel(%arg0: memref<128x32xf32, #tpu.memory_space<vmem>>, %arg1: memref<1x32xf32, #tpu.memory_space<vmem>>, %arg2: memref<1x32xf32, #tpu.memory_space<vmem>>, %arg3: memref<32x256xbf16, #tpu.memory_space<vmem>>, %arg4: memref<128x256xf32, #tpu.memory_space<vmem>>) attributes {dimension_semantics = [], scalar_prefetch = 0 : i64, scratch_operands = 0 : i64, tpu.core_type = #tpu.core_type<tc>} {
    %c0 = arith.constant 0 : index
    %c0_0 = arith.constant 0 : index
    %0 = vector.load %arg0[%c0, %c0_0] : memref<128x32xf32, #tpu.memory_space<vmem>>, vector<128x32xf32>
    %cst = arith.constant dense<0.000000e+00> : vector<32xf32>
    %1 = vector.multi_reduction <add>, %0, %cst [0] : vector<128x32xf32> to vector<32xf32>
    %2 = vector.shape_cast %1 : vector<32xf32> to vector<1x32xf32>
    %3 = arith.mulf %0, %0 : vector<128x32xf32>
    %cst_1 = arith.constant dense<0.000000e+00> : vector<32xf32>
    %4 = vector.multi_reduction <add>, %3, %cst_1 [0] : vector<128x32xf32> to vector<32xf32>
    %5 = vector.shape_cast %4 : vector<32xf32> to vector<1x32xf32>
    %cst_2 = arith.constant 7.812500e-03 : f32
    %6 = vector.broadcast %cst_2 : f32 to vector<1x32xf32>
    %7 = arith.mulf %2, %6 : vector<1x32xf32>
    %cst_3 = arith.constant 7.812500e-03 : f32
    %8 = vector.broadcast %cst_3 : f32 to vector<1x32xf32>
    %9 = arith.mulf %5, %8 : vector<1x32xf32>
    %10 = arith.mulf %7, %7 : vector<1x32xf32>
    %11 = arith.subf %9, %10 : vector<1x32xf32>
    %cst_4 = arith.constant 0.000000e+00 : f32
    %12 = vector.broadcast %cst_4 : f32 to vector<1x32xf32>
    %13 = arith.maximumf %11, %12 : vector<1x32xf32>
    %c0_5 = arith.constant 0 : index
    %c0_6 = arith.constant 0 : index
    %14 = vector.load %arg1[%c0_5, %c0_6] : memref<1x32xf32, #tpu.memory_space<vmem>>, vector<1x32xf32>
    %cst_7 = arith.constant 9.99999974E-6 : f32
    %15 = vector.broadcast %cst_7 : f32 to vector<1x32xf32>
    %16 = arith.addf %13, %15 : vector<1x32xf32>
    %17 = math.rsqrt %16 : vector<1x32xf32>
    %18 = arith.mulf %14, %17 : vector<1x32xf32>
    %c0_8 = arith.constant 0 : index
    %c0_9 = arith.constant 0 : index
    %19 = vector.load %arg2[%c0_8, %c0_9] : memref<1x32xf32, #tpu.memory_space<vmem>>, vector<1x32xf32>
    %20 = arith.mulf %7, %18 : vector<1x32xf32>
    %21 = arith.subf %19, %20 : vector<1x32xf32>
    %22 = vector.broadcast %18 : vector<1x32xf32> to vector<128x32xf32>
    %23 = arith.mulf %0, %22 : vector<128x32xf32>
    %24 = vector.broadcast %21 : vector<1x32xf32> to vector<128x32xf32>
    %25 = arith.addf %23, %24 : vector<128x32xf32>
    %cst_10 = arith.constant 0.000000e+00 : f32
    %26 = vector.broadcast %cst_10 : f32 to vector<128x32xf32>
    %27 = arith.maximumf %25, %26 : vector<128x32xf32>
    %28 = arith.truncf %27 : vector<128x32xf32> to vector<128x32xbf16>
    %c0_11 = arith.constant 0 : index
    %c0_12 = arith.constant 0 : index
    %29 = vector.load %arg3[%c0_11, %c0_12] : memref<32x256xbf16, #tpu.memory_space<vmem>>, vector<32x256xbf16>
    %cst_13 = arith.constant dense<0.000000e+00> : vector<128x256xf32>
    %30 = tpu.matmul %28, %29, %cst_13 {dimension_numbers = #tpu.dot_dimension_numbers<[1], [0], [0], [1], [0, 0, 1, 1], [], []>} : vector<128x32xbf16>, vector<32x256xbf16>, vector<128x256xf32> -> vector<128x256xf32>
    %c0_14 = arith.constant 0 : index
    %c0_15 = arith.constant 0 : index
    %31 = vector.load %arg4[%c0_14, %c0_15] : memref<128x256xf32, #tpu.memory_space<vmem>>, vector<128x256xf32>
    tpu.vector_store %arg4[%c0_14, %c0_15], %30 {strides = array<i32>} : memref<128x256xf32, #tpu.memory_space<vmem>>, vector<128x256xf32>,
    return
  }
}

module attributes {stable_mosaic.version = 11 : i64} {
  func.func @_bn_relu_matmul_kernel(%arg0: memref<512x16xf32, #tpu.memory_space<vmem>>, %arg1: memref<1x16xf32, #tpu.memory_space<vmem>>, %arg2: memref<1x16xf32, #tpu.memory_space<vmem>>, %arg3: memref<16x128xbf16, #tpu.memory_space<vmem>>, %arg4: memref<512x128xf32, #tpu.memory_space<vmem>>) attributes {dimension_semantics = [], scalar_prefetch = 0 : i64, scratch_operands = 0 : i64, tpu.core_type = #tpu.core_type<tc>} {
    %c0 = arith.constant 0 : index
    %c0_0 = arith.constant 0 : index
    %0 = vector.load %arg0[%c0, %c0_0] : memref<512x16xf32, #tpu.memory_space<vmem>>, vector<512x16xf32>
    %cst = arith.constant dense<0.000000e+00> : vector<16xf32>
    %1 = vector.multi_reduction <add>, %0, %cst [0] : vector<512x16xf32> to vector<16xf32>
    %2 = vector.shape_cast %1 : vector<16xf32> to vector<1x16xf32>
    %3 = arith.mulf %0, %0 : vector<512x16xf32>
    %cst_1 = arith.constant dense<0.000000e+00> : vector<16xf32>
    %4 = vector.multi_reduction <add>, %3, %cst_1 [0] : vector<512x16xf32> to vector<16xf32>
    %5 = vector.shape_cast %4 : vector<16xf32> to vector<1x16xf32>
    %cst_2 = arith.constant 0.001953125 : f32
    %6 = vector.broadcast %cst_2 : f32 to vector<1x16xf32>
    %7 = arith.mulf %2, %6 : vector<1x16xf32>
    %cst_3 = arith.constant 0.001953125 : f32
    %8 = vector.broadcast %cst_3 : f32 to vector<1x16xf32>
    %9 = arith.mulf %5, %8 : vector<1x16xf32>
    %10 = arith.mulf %7, %7 : vector<1x16xf32>
    %11 = arith.subf %9, %10 : vector<1x16xf32>
    %cst_4 = arith.constant 0.000000e+00 : f32
    %12 = vector.broadcast %cst_4 : f32 to vector<1x16xf32>
    %13 = arith.maximumf %11, %12 : vector<1x16xf32>
    %c0_5 = arith.constant 0 : index
    %c0_6 = arith.constant 0 : index
    %14 = vector.load %arg1[%c0_5, %c0_6] : memref<1x16xf32, #tpu.memory_space<vmem>>, vector<1x16xf32>
    %cst_7 = arith.constant 9.99999974E-6 : f32
    %15 = vector.broadcast %cst_7 : f32 to vector<1x16xf32>
    %16 = arith.addf %13, %15 : vector<1x16xf32>
    %17 = math.rsqrt %16 : vector<1x16xf32>
    %18 = arith.mulf %14, %17 : vector<1x16xf32>
    %c0_8 = arith.constant 0 : index
    %c0_9 = arith.constant 0 : index
    %19 = vector.load %arg2[%c0_8, %c0_9] : memref<1x16xf32, #tpu.memory_space<vmem>>, vector<1x16xf32>
    %20 = arith.mulf %7, %18 : vector<1x16xf32>
    %21 = arith.subf %19, %20 : vector<1x16xf32>
    %22 = vector.broadcast %18 : vector<1x16xf32> to vector<512x16xf32>
    %23 = arith.mulf %0, %22 : vector<512x16xf32>
    %24 = vector.broadcast %21 : vector<1x16xf32> to vector<512x16xf32>
    %25 = arith.addf %23, %24 : vector<512x16xf32>
    %cst_10 = arith.constant 0.000000e+00 : f32
    %26 = vector.broadcast %cst_10 : f32 to vector<512x16xf32>
    %27 = arith.maximumf %25, %26 : vector<512x16xf32>
    %28 = arith.truncf %27 : vector<512x16xf32> to vector<512x16xbf16>
    %c0_11 = arith.constant 0 : index
    %c0_12 = arith.constant 0 : index
    %29 = vector.load %arg3[%c0_11, %c0_12] : memref<16x128xbf16, #tpu.memory_space<vmem>>, vector<16x128xbf16>
    %cst_13 = arith.constant dense<0.000000e+00> : vector<512x128xf32>
    %30 = tpu.matmul %28, %29, %cst_13 {dimension_numbers = #tpu.dot_dimension_numbers<[1], [0], [0], [1], [0, 0, 1, 1], [], []>} : vector<512x16xbf16>, vector<16x128xbf16>, vector<512x128xf32> -> vector<512x128xf32>
    %c0_14 = arith.constant 0 : index
    %c0_15 = arith.constant 0 : index
    %31 = vector.load %arg4[%c0_14, %c0_15] : memref<512x128xf32, #tpu.memory_space<vmem>>, vector<512x128xf32>
    tpu.vector_store %arg4[%c0_14, %c0_15], %30 {strides = array<i32>} : memref<512x128xf32, #tpu.memory_space<vmem>>, vector<512x128xf32>,
    return
  }
}

module attributes {stable_mosaic.version = 11 : i64} {
  func.func @_bn_relu_matmul_kernel(%arg0: memref<2048x8xf32, #tpu.memory_space<vmem>>, %arg1: memref<1x8xf32, #tpu.memory_space<vmem>>, %arg2: memref<1x8xf32, #tpu.memory_space<vmem>>, %arg3: memref<8x128xbf16, #tpu.memory_space<vmem>>, %arg4: memref<2048x128xf32, #tpu.memory_space<vmem>>) attributes {dimension_semantics = [], scalar_prefetch = 0 : i64, scratch_operands = 0 : i64, tpu.core_type = #tpu.core_type<tc>} {
    %c0 = arith.constant 0 : index
    %c0_0 = arith.constant 0 : index
    %0 = vector.load %arg0[%c0, %c0_0] : memref<2048x8xf32, #tpu.memory_space<vmem>>, vector<2048x8xf32>
    %cst = arith.constant dense<0.000000e+00> : vector<8xf32>
    %1 = vector.multi_reduction <add>, %0, %cst [0] : vector<2048x8xf32> to vector<8xf32>
    %2 = vector.shape_cast %1 : vector<8xf32> to vector<1x8xf32>
    %3 = arith.mulf %0, %0 : vector<2048x8xf32>
    %cst_1 = arith.constant dense<0.000000e+00> : vector<8xf32>
    %4 = vector.multi_reduction <add>, %3, %cst_1 [0] : vector<2048x8xf32> to vector<8xf32>
    %5 = vector.shape_cast %4 : vector<8xf32> to vector<1x8xf32>
    %cst_2 = arith.constant 4.8828125E-4 : f32
    %6 = vector.broadcast %cst_2 : f32 to vector<1x8xf32>
    %7 = arith.mulf %2, %6 : vector<1x8xf32>
    %cst_3 = arith.constant 4.8828125E-4 : f32
    %8 = vector.broadcast %cst_3 : f32 to vector<1x8xf32>
    %9 = arith.mulf %5, %8 : vector<1x8xf32>
    %10 = arith.mulf %7, %7 : vector<1x8xf32>
    %11 = arith.subf %9, %10 : vector<1x8xf32>
    %cst_4 = arith.constant 0.000000e+00 : f32
    %12 = vector.broadcast %cst_4 : f32 to vector<1x8xf32>
    %13 = arith.maximumf %11, %12 : vector<1x8xf32>
    %c0_5 = arith.constant 0 : index
    %c0_6 = arith.constant 0 : index
    %14 = vector.load %arg1[%c0_5, %c0_6] : memref<1x8xf32, #tpu.memory_space<vmem>>, vector<1x8xf32>
    %cst_7 = arith.constant 9.99999974E-6 : f32
    %15 = vector.broadcast %cst_7 : f32 to vector<1x8xf32>
    %16 = arith.addf %13, %15 : vector<1x8xf32>
    %17 = math.rsqrt %16 : vector<1x8xf32>
    %18 = arith.mulf %14, %17 : vector<1x8xf32>
    %c0_8 = arith.constant 0 : index
    %c0_9 = arith.constant 0 : index
    %19 = vector.load %arg2[%c0_8, %c0_9] : memref<1x8xf32, #tpu.memory_space<vmem>>, vector<1x8xf32>
    %20 = arith.mulf %7, %18 : vector<1x8xf32>
    %21 = arith.subf %19, %20 : vector<1x8xf32>
    %22 = vector.broadcast %18 : vector<1x8xf32> to vector<2048x8xf32>
    %23 = arith.mulf %0, %22 : vector<2048x8xf32>
    %24 = vector.broadcast %21 : vector<1x8xf32> to vector<2048x8xf32>
    %25 = arith.addf %23, %24 : vector<2048x8xf32>
    %cst_10 = arith.constant 0.000000e+00 : f32
    %26 = vector.broadcast %cst_10 : f32 to vector<2048x8xf32>
    %27 = arith.maximumf %25, %26 : vector<2048x8xf32>
    %28 = arith.truncf %27 : vector<2048x8xf32> to vector<2048x8xbf16>
    %c0_11 = arith.constant 0 : index
    %c0_12 = arith.constant 0 : index
    %29 = vector.load %arg3[%c0_11, %c0_12] : memref<8x128xbf16, #tpu.memory_space<vmem>>, vector<8x128xbf16>
    %cst_13 = arith.constant dense<0.000000e+00> : vector<2048x128xf32>
    %30 = tpu.matmul %28, %29, %cst_13 {dimension_numbers = #tpu.dot_dimension_numbers<[1], [0], [0], [1], [0, 0, 1, 1], [], []>} : vector<2048x8xbf16>, vector<8x128xbf16>, vector<2048x128xf32> -> vector<2048x128xf32>
    %c0_14 = arith.constant 0 : index
    %c0_15 = arith.constant 0 : index
    %31 = vector.load %arg4[%c0_14, %c0_15] : memref<2048x128xf32, #tpu.memory_space<vmem>>, vector<2048x128xf32>
    tpu.vector_store %arg4[%c0_14, %c0_15], %30 {strides = array<i32>} : memref<2048x128xf32, #tpu.memory_space<vmem>>, vector<2048x128xf32>,
    return
  }
}

module attributes {stable_mosaic.version = 11 : i64} {
  func.func @_tanh_kernel(%arg0: i32, %arg1: memref<216x128xf32, #tpu.memory_space<vmem>>, %arg2: memref<216x128xf32, #tpu.memory_space<vmem>>) attributes {dimension_semantics = [#tpu.dimension_semantics<parallel>], iteration_bounds = array<i64: 2>, scalar_prefetch = 0 : i64, scratch_operands = 0 : i64, tpu.core_type = #tpu.core_type<tc>, window_params = [{transform_indices = @transform_0, window_bounds = array<i64: 216, 128>}, {transform_indices = @transform_1, window_bounds = array<i64: 216, 128>}]} {
    %c0 = arith.constant 0 : index
    %c0_0 = arith.constant 0 : index
    %0 = vector.load %arg1[%c0, %c0_0] : memref<216x128xf32, #tpu.memory_space<vmem>>, vector<216x128xf32>
    %1 = math.tanh %0 : vector<216x128xf32>
    %c0_1 = arith.constant 0 : index
    %c0_2 = arith.constant 0 : index
    %2 = vector.load %arg2[%c0_1, %c0_2] : memref<216x128xf32, #tpu.memory_space<vmem>>, vector<216x128xf32>
    tpu.vector_store %arg2[%c0_1, %c0_2], %1 {strides = array<i32>} : memref<216x128xf32, #tpu.memory_space<vmem>>, vector<216x128xf32>,
    return
  }
  func.func @transform_0(%arg0: i32) -> (i32, i32) {
    %c0_i32 = arith.constant 0 : i32
    %c0_i32_0 = arith.constant 0 : i32
    return %arg0, %c0_i32 : i32, i32
  }
  func.func @transform_1(%arg0: i32) -> (i32, i32) {
    %c0_i32 = arith.constant 0 : i32
    %c0_i32_0 = arith.constant 0 : i32
    return %arg0, %c0_i32 : i32, i32
  }
}

</mosaic_0001>

<bundles_post_ra>
// kernel: gnet_forward.6
= control target key start
LH: loop header
LB: loop body
LE: loop exit
PB: predicated region body
PF: predicated region fallthrough
CT: control target
= control target key end

     0   :  { %7 = vsyncpa [#allocation3], 0  ;;  %s276_s12 = smov [#allocation2]   ;;  %s277_s14 = smov 512   ;;  %s332_s0 = inlined_call_operand.vmem [shape: f32[8,16], index: 0, kind: input, shape index: {}]   ;;  %s333_s1 = inlined_call_operand.hbm [shape: bf16[16,1024], index: 1, kind: input, shape index: {}]   ;;  %s334_s2 = inlined_call_operand.vmem [shape: f32[8,1024], index: 2, kind: output, shape index: {}]  }
   0x1   :  { %s14_s11 = sshll.u32 %s333_s1, 4  ;;  %s16_s13 = sshll.u32 %s276_s12, 4  ;;  %s15_s11 = int_to_ptr.hbm [resolvable:$true] %s14_s11  ;;  %s17_s13 = int_to_ptr.vmem [resolvable:$true] %s16_s13 }
   0x2   :  { %s278_s15 = smov 32  }
   0x3   :  { %22 = dma.hbm_to_vmem [thread:$0]  %s15_s11, 1024, %s17_s13, [#allocation3], %s277_s14, %s277_s14, %s278_s15  }
   0x4   :  { %274 = dma.done.wait [#allocation3], 1024  }
   0x5   :  { %275 = vsyncadd [#allocation3], 4294966272  ;;  %v201_v0 = vld [vmem:[#allocation2] sm:$0xf]  ;;  %v239_v2 = vld [vmem:[#allocation2 + $0x4] sm:$0xf] }
   0x6   :  { %v243_v1 = vld [vmem:[#allocation2 + $0x1c] sm:$0xf0]  ;;  %v203_v4 = vld [vmem:[#allocation2 + $0x20] sm:$0xf0]  ;;  %v209_v5 = vld [vmem:[#allocation2 + $0x8] sm:$0xf] }
   0x7   :  { %v202_v3 = vor.u32 %v243_v1, %v201_v0  ;;  %v244_v6 = vld [vmem:[#allocation2 + $0x24] sm:$0xf0]  ;;  %v206_v7 = vor.u32 %v239_v2, %v203_v4  ;;  %v240_v9 = vld [vmem:[#allocation2 + $0xc] sm:$0xf]  ;;  %v28_v11 = vld [vmem:[%s332_s0] sm:$0xff]  ;;  %vm78_vm0 = vcmask 130048  }
   0x8   :  { %v210_v8 = vor.u32 %v244_v6, %v209_v5  ;;  %v211_v10 = vld [vmem:[#allocation2 + $0x28] sm:$0xf0]  ;;  %v29_v13 = vpack.c.bf16 %v28_v11, %v28_v11  ;;  %v225_v14 = vld [vmem:[#allocation2 + $0x18] sm:$0xf]  ;;  %v242_v16 = vld [vmem:[#allocation2 + $0x1c] sm:$0xf] }
   0x9   :  { %89 = vmatpush.bf16.msra.mxu0 %v202_v3  ;;  %v214_v12 = vor.u32 %v240_v9, %v211_v10  ;;  %v246_v15 = vld [vmem:[#allocation2 + $0x34] sm:$0xf0]  ;;  %102 = vmatpush.bf16.msra.mxu1 %v206_v7  ;;  %v227_v18 = vld [vmem:[#allocation2 + $0x38] sm:$0xf0]  ;;  %v217_v19 = vld [vmem:[#allocation2 + $0x10] sm:$0xf] }
   0xa   :  { %115 = vmatpush.bf16.msra.mxu2 %v210_v8  ;;  %v226_v17 = vor.u32 %v246_v15, %v225_v14  ;;  %v245_v20 = vld [vmem:[#allocation2 + $0x2c] sm:$0xf0]  ;;  %v230_v21 = vor.u32 %v242_v16, %v227_v18  ;;  %v241_v23 = vld [vmem:[#allocation2 + $0x14] sm:$0xf] }
   0xb   :  { %128 = vmatpush.bf16.msra.mxu3 %v214_v12  ;;  %v218_v22 = vor.u32 %v245_v20, %v217_v19  ;;  %v219_v24 = vld [vmem:[#allocation2 + $0x30] sm:$0xf0] }
   0xc   :  { %231 = vmatmul.msk.bf16.vlgmr.msra.gmra.mxu0 %vm78_vm0, %v29_v13  ;;  %v222_v25 = vor.u32 %v241_v23, %v219_v24  ;;  %232 = vmatmul.msk.bf16.vlgmr.msra.gmra.mxu1 %vm78_vm0, %v29_v13 }
   0xd   :  { %233 = vmatmul.msk.bf16.vlgmr.msra.gmra.mxu2 %vm78_vm0, %v29_v13  ;;  %141 = vmatpush.bf16.msrb.mxu0 %v218_v22 }
   0xe   :  { %167 = vmatpush.bf16.msrb.mxu2 %v226_v17  ;;  %234 = vmatmul.msk.bf16.vlgmr.msra.gmra.mxu3 %vm78_vm0, %v29_v13 }
   0xf   :  { %180 = vmatpush.bf16.msrb.mxu3 %v230_v21  ;;  %154 = vmatpush.bf16.msrb.mxu1 %v222_v25 }
  0x1c   :  { %235 = vmatmul.msk.bf16.vlgmr.msrb.gmra.mxu0 %vm78_vm0, %v29_v13  ;;  %236 = vmatmul.msk.bf16.vlgmr.msrb.gmra.mxu1 %vm78_vm0, %v29_v13 }
  0x1d   :  { %237 = vmatmul.msk.bf16.vlgmr.msrb.gmra.mxu2 %vm78_vm0, %v29_v13 }
  0x1e   :  { %238 = vmatmul.msk.bf16.vlgmr.msrb.gmra.mxu3 %vm78_vm0, %v29_v13 }
  0x89   :  { %v91_v26 = vpop.f32.mrf.mxu0  ;;  %v104_v27 = vpop.f32.mrf.mxu1 }
  0x8a   :  { %186 = vst [vmem:[%s334_s2] sm:$0xff] %v91_v26 }
  0x8b   :  { %187 = vst [vmem:[%s334_s2 + $0x8] sm:$0xff] %v104_v27 }
  0x90   :  { %v117_v28 = vpop.f32.mrf.mxu2 }
  0x91   :  { %188 = vst [vmem:[%s334_s2 + $0x10] sm:$0xff] %v117_v28  ;;  %v130_v29 = vpop.f32.mrf.mxu3  ;;  %v93_v30 = vpop.f32.mrf.mxu0 }
  0x92   :  { %189 = vst [vmem:[%s334_s2 + $0x18] sm:$0xff] %v130_v29  ;;  %v106_v31 = vpop.f32.mrf.mxu1 }
  0x98   :  { %v119_v32 = vpop.f32.mrf.mxu2 }
  0x99   :  { %v132_v33 = vpop.f32.mrf.mxu3  ;;  %v143_v34 = vpop.f32.mrf.mxu0 }
  0x9a   :  { %190 = vst [vmem:[%s334_s2 + $0x20] sm:$0xff] %v143_v34  ;;  %v156_v35 = vpop.f32.mrf.mxu1 }
  0x9b   :  { %191 = vst [vmem:[%s334_s2 + $0x28] sm:$0xff] %v156_v35 }
  0xa0   :  { %v169_v36 = vpop.f32.mrf.mxu2 }
  0xa1   :  { %192 = vst [vmem:[%s334_s2 + $0x30] sm:$0xff] %v169_v36  ;;  %v182_v37 = vpop.f32.mrf.mxu3  ;;  %v145_v38 = vpop.f32.mrf.mxu0 }
  0xa2   :  { %193 = vst [vmem:[%s334_s2 + $0x38] sm:$0xff] %v182_v37  ;;  %v158_v39 = vpop.f32.mrf.mxu1 }
  0xa8   :  { %v171_v40 = vpop.f32.mrf.mxu2 }
  0xa9   :  { %v184_v41 = vpop.f32.mrf.mxu3 }
  0xaa   :  { %198 = vsyncpa [#allocation3], 1 }

// kernel: gnet_forward.7
= control target key start
LH: loop header
LB: loop body
LE: loop exit
PB: predicated region body
PF: predicated region fallthrough
CT: control target
= control target key end

     0   :  { %9 = vsyncpa [#allocation3], 0  ;;  %s647_s0 = inlined_call_operand.vmem [shape: f32[32,64], index: 0, kind: input, shape index: {}]   ;;  %s648_s1 = inlined_call_operand.hbm [shape: f32[1,64], index: 1, kind: input, shape index: {}]   ;;  %s649_s2 = inlined_call_operand.hbm [shape: f32[1,64], index: 2, kind: input, shape index: {}]   ;;  %s650_s3 = inlined_call_operand.hbm [shape: bf16[64,512], index: 3, kind: input, shape index: {}]   ;;  %s651_s4 = inlined_call_operand.vmem [shape: f32[32,512], index: 4, kind: output, shape index: {}]  }
   0x1   :  { %10 = vsyncpa [#allocation5], 0  ;;  %s29_s17 = sshll.u32 %s649_s2, 4  ;;  %s508_s18 = smov [#allocation4]   ;;  %s30_s17 = int_to_ptr.hbm [resolvable:$true] %s29_s17 }
   0x2   :  { %s31_s19 = sshll.u32 %s508_s18, 4  ;;  %s18_s22 = sshll.u32 %s648_s1, 4  ;;  %s32_s19 = int_to_ptr.vmem [resolvable:$true] %s31_s19  ;;  %s19_s22 = int_to_ptr.hbm [resolvable:$true] %s18_s22 }
   0x3   :  { %34 = dma.hbm_to_vmem [thread:$0]  %s30_s17, 16, %s32_s19, [#allocation5]  }
   0x4   :  { %s509_s23 = smov [#allocation2]   ;;  %s39_s27 = sshll.u32 %s650_s3, 4  ;;  %s40_s27 = int_to_ptr.hbm [resolvable:$true] %s39_s27 }
   0x5   :  { %s20_s24 = sshll.u32 %s509_s23, 4  ;;  %s510_s2 = smov [#allocation6]   ;;  %s21_s24 = int_to_ptr.vmem [resolvable:$true] %s20_s24 }
   0x6   :  { %23 = dma.hbm_to_vmem [thread:$0]  %s19_s22, 16, %s21_s24, [#allocation3]  }
   0x7   :  { %s41_s28 = sshll.u32 %s510_s2, 4  ;;  %s511_s29 = smov 256   ;;  %s42_s28 = int_to_ptr.vmem [resolvable:$true] %s41_s28 }
   0x8   :  { %s512_s30 = smov 16  }
   0x9   :  { %47 = dma.hbm_to_vmem [thread:$0]  %s40_s27, 2048, %s42_s28, [#allocation5], %s511_s29, %s511_s29, %s512_s30  }
   0xa   :  { %504 = dma.done.wait [#allocation3], 16  }
   0xb   :  { %505 = vsyncadd [#allocation3], 4294967280 }
   0xc   :  { %506 = dma.done.wait [#allocation5], 2064  }
   0xd   :  { %507 = vsyncadd [#allocation5], 4294965232  ;;  %v387_v0 = vld [vmem:[#allocation6 + $0x60] sm:$0xf]  ;;  %v423_v1 = vld [vmem:[#allocation6 + $0x6c] sm:$0xf0] }
   0xe   :  { %v421_v2 = vld [vmem:[#allocation6 + $0x64] sm:$0xf]  ;;  %vm65_vm0 = vcmask 523264   ;;  %v388_v3 = vor.u32 %v423_v1, %v387_v0  ;;  %v389_v4 = vld [vmem:[#allocation6 + $0x70] sm:$0xf0]  ;;  %v550_v45 = vld [vmem:[%s647_s0] sm:$0xff] }
   0xf   :  { %v395_v5 = vld [vmem:[#allocation6 + $0x68] sm:$0xf]  ;;  %v424_v6 = vld [vmem:[#allocation6 + $0x74] sm:$0xf0]  ;;  %v392_v7 = vor.u32 %v421_v2, %v389_v4  ;;  %v422_v9 = vld [vmem:[#allocation6 + $0x6c] sm:$0xf]  ;;  %v79_v52 = vmul.f32 %v550_v45, %v550_v45 }
  0x10   :  { %v396_v8 = vor.u32 %v424_v6, %v395_v5  ;;  %v397_v10 = vld [vmem:[#allocation6 + $0x78] sm:$0xf0]  ;;  %v371_v11 = vld [vmem:[#allocation6 + $0x40] sm:$0xf]  ;;  %243 = vmatpush.bf16.msra.mxu0 %v388_v3  ;;  %v419_v13 = vld [vmem:[#allocation6 + $0x4c] sm:$0xf0] }
  0x11   :  { %v400_v12 = vor.u32 %v422_v9, %v397_v10  ;;  %v417_v14 = vld [vmem:[#allocation6 + $0x44] sm:$0xf]  ;;  %v373_v15 = vld [vmem:[#allocation6 + $0x50] sm:$0xf0]  ;;  %262 = vmatpush.bf16.msra.mxu1 %v392_v7  ;;  %v372_v16 = vor.u32 %v419_v13, %v371_v11  ;;  %v379_v18 = vld [vmem:[#allocation6 + $0x48] sm:$0xf] }
  0x12   :  { %281 = vmatpush.bf16.msra.mxu2 %v396_v8  ;;  %v376_v17 = vor.u32 %v417_v14, %v373_v15  ;;  %v420_v19 = vld [vmem:[#allocation6 + $0x54] sm:$0xf0]  ;;  %v418_v20 = vld [vmem:[#allocation6 + $0x4c] sm:$0xf]  ;;  %v381_v22 = vld [vmem:[#allocation6 + $0x58] sm:$0xf0] }
  0x13   :  { %300 = vmatpush.bf16.msra.mxu3 %v400_v12  ;;  %v380_v21 = vor.u32 %v420_v19, %v379_v18  ;;  %v355_v23 = vld [vmem:[#allocation6 + $0x20] sm:$0xf]  ;;  %v415_v24 = vld [vmem:[#allocation6 + $0x2c] sm:$0xf0]  ;;  %v384_v25 = vor.u32 %v418_v20, %v381_v22  ;;  %v413_v26 = vld [vmem:[#allocation6 + $0x24] sm:$0xf] }
  0x14   :  { %v357_v27 = vld [vmem:[#allocation6 + $0x30] sm:$0xf0]  ;;  %v363_v28 = vld [vmem:[#allocation6 + $0x28] sm:$0xf]  ;;  %244 = vmatpush.bf16.msra.mxu0 %v372_v16  ;;  %v356_v29 = vor.u32 %v415_v24, %v355_v23  ;;  %v416_v30 = vld [vmem:[#allocation6 + $0x34] sm:$0xf0] }
  0x15   :  { %v414_v31 = vld [vmem:[#allocation6 + $0x2c] sm:$0xf]  ;;  %v365_v32 = vld [vmem:[#allocation6 + $0x38] sm:$0xf0]  ;;  %263 = vmatpush.bf16.msra.mxu1 %v376_v17  ;;  %v360_v33 = vor.u32 %v413_v26, %v357_v27  ;;  %v364_v34 = vor.u32 %v416_v30, %v363_v28  ;;  %v339_v35 = vld [vmem:[#allocation6] sm:$0xf] }
  0x16   :  { %282 = vmatpush.bf16.msra.mxu2 %v380_v21  ;;  %v411_v36 = vld [vmem:[#allocation6 + $0xc] sm:$0xf0]  ;;  %v409_v37 = vld [vmem:[#allocation6 + $0x4] sm:$0xf]  ;;  %v368_v38 = vor.u32 %v414_v31, %v365_v32  ;;  %v341_v39 = vld [vmem:[#allocation6 + $0x10] sm:$0xf0] }
  0x17   :  { %301 = vmatpush.bf16.msra.mxu3 %v384_v25  ;;  %v347_v40 = vld [vmem:[#allocation6 + $0x8] sm:$0xf]  ;;  %v412_v41 = vld [vmem:[#allocation6 + $0x14] sm:$0xf0]  ;;  %v340_v42 = vor.u32 %v411_v36, %v339_v35  ;;  %v410_v43 = vld [vmem:[#allocation6 + $0xc] sm:$0xf]  ;;  %v344_v46 = vor.u32 %v409_v37, %v341_v39 }
  0x18   :  { %v349_v44 = vld [vmem:[#allocation6 + $0x18] sm:$0xf0]  ;;  %245 = vmatpush.bf16.msra.mxu0 %v356_v29  ;;  %v348_v47 = vor.u32 %v412_v41, %v347_v40  ;;  %v555_v48 = vld [vmem:[%s647_s0 + $0x8] sm:$0xff]  ;;  %v560_v49 = vld [vmem:[%s647_s0 + $0x10] sm:$0xff]  ;;  %v66_v51 = vsel %vm65_vm0, %v550_v45, 0.0  ;;  %v83_v60 = vsel %vm65_vm0, %v79_v52, 0.0 }
  0x19   :  { %v565_v50 = vld [vmem:[%s647_s0 + $0x18] sm:$0xff]  ;;  %264 = vmatpush.bf16.msra.mxu1 %v360_v33  ;;  %v352_v53 = vor.u32 %v410_v43, %v349_v44  ;;  %v67_v54 = vsel %vm65_vm0, %v555_v48, 0.0  ;;  %v69_v55 = vsel %vm65_vm0, %v560_v49, 0.0  ;;  %v80_v56 = vmul.f32 %v555_v48, %v555_v48  ;;  %v101_v29 = vld [vmem:[#allocation2] sm:$0x1] }
  0x1a   :  { %283 = vmatpush.bf16.msra.mxu2 %v364_v34  ;;  %v68_v57 = vadd.f32 %v67_v54, %v66_v51  ;;  %v81_v58 = vmul.f32 %v560_v49, %v560_v49  ;;  %v82_v59 = vmul.f32 %v565_v50, %v565_v50  ;;  %v71_v61 = vsel %vm65_vm0, %v565_v50, 0.0  ;;  %v114_v33 = vld [vmem:[#allocation4] sm:$0x1] }
  0x1b   :  { %302 = vmatpush.bf16.msra.mxu3 %v368_v38  ;;  %v84_v62 = vsel %vm65_vm0, %v80_v56, 0.0 }
  0x1c   :  { %246 = vmatpush.bf16.msra.mxu0 %v340_v42  ;;  %v70_v63 = vadd.f32 %v69_v55, %v68_v57  ;;  %v85_v0 = vadd.f32 %v84_v62, %v83_v60  ;;  %v86_v1 = vsel %vm65_vm0, %v81_v58, 0.0  ;;  %v88_v2 = vsel %vm65_vm0, %v82_v59, 0.0 }
  0x1d   :  { %265 = vmatpush.bf16.msra.mxu1 %v344_v46 }
  0x1e   :  { %284 = vmatpush.bf16.msra.mxu2 %v348_v47  ;;  %v72_v3 = vadd.f32 %v71_v61, %v70_v63  ;;  %v87_v4 = vadd.f32 %v86_v1, %v85_v0 }
  0x1f   :  { %303 = vmatpush.bf16.msra.mxu3 %v352_v53 }
  0x20   :  { %v73_v5 = vrot.slane %v72_v3, 4  ;;  %v89_v6 = vadd.f32 %v88_v2, %v87_v4 }
  0x22   :  { %v74_v7 = vadd.f32 %v73_v5, %v72_v3  ;;  %v90_v8 = vrot.slane %v89_v6, 4 }
  0x24   :  { %v75_v9 = vrot.slane %v74_v7, 2  ;;  %v91_v10 = vadd.f32 %v90_v8, %v89_v6 }
  0x26   :  { %v76_v11 = vadd.f32 %v75_v9, %v74_v7  ;;  %v92_v12 = vrot.slane %v91_v10, 2 }
  0x28   :  { %v77_v13 = vrot.slane %v76_v11, 1  ;;  %v93_v14 = vadd.f32 %v92_v12, %v91_v10 }
  0x2a   :  { %v78_v15 = vadd.f32 %v77_v13, %v76_v11  ;;  %v94_v16 = vrot.slane %v93_v14, 1 }
  0x2c   :  { %v95_v17 = vadd.f32 %v94_v16, %v93_v14  ;;  %v96_v18 = vmul.f32 0.03125, %v78_v15 }
  0x2e   :  { %v97_v19 = vmul.f32 0.03125, %v95_v17  ;;  %v98_v20 = vmul.f32 %v96_v18, %v96_v18 }
  0x30   :  { %v99_v21 = vsub.f32 %v97_v19, %v98_v20 }
  0x32   :  { %v100_v22 = vmax.f32 %v99_v21, 0.0 }
  0x34   :  { %v102_v23 = vadd.f32 1e-05, %v100_v22 }
  0x36   :  { %430 = vrsqrt.f32 %v102_v23  ;;  %vm109_vm1 = vweird.f32 %v102_v23 }
  0x3c   :  { %v431_v24 = vpop.eup %430 }
  0x3d   :  { %v104_v25 = vmul.f32 %v431_v24, %v102_v23  ;;  %vm110_vm2 = vweird.f32 %v431_v24 }
  0x3e   :  { %vm111_vm3 = vmor %vm109_vm1, %vm110_vm2 }
  0x3f   :  { %v105_v26 = vmul.f32 %v431_v24, %v104_v25 }
  0x41   :  { %v106_v27 = vmul.f32 0.5, %v105_v26 }
  0x43   :  { %v107_v28 = vsub.f32 1.5, %v106_v27 }
  0x45   :  { %v108_v30 = vmul.f32 %v431_v24, %v107_v28 }
  0x47   :  { %v112_v31 = vsel %vm111_vm3, %v431_v24, %v108_v30 }
  0x48   :  { %v113_v32 = vmul.f32 %v112_v31, %v101_v29 }
  0x4a   :  { %v115_v34 = vmul.f32 %v113_v32, %v96_v18  ;;  %v118_v35 = vperm.slane %v113_v32, 0 }
  0x4c   :  { %v116_v36 = vsub.f32 %v114_v33, %v115_v34  ;;  %v120_v37 = vmul.f32 %v118_v35, %v550_v45  ;;  %v121_v38 = vmul.f32 %v118_v35, %v555_v48  ;;  %v122_v39 = vmul.f32 %v118_v35, %v560_v49 }
  0x4d   :  { %v123_v40 = vmul.f32 %v118_v35, %v565_v50 }
  0x4e   :  { %v125_v41 = vperm.slane %v116_v36, 0 }
  0x50   :  { %v127_v42 = vadd.f32 %v125_v41, %v120_v37  ;;  %v128_v43 = vadd.f32 %v125_v41, %v121_v38  ;;  %v129_v44 = vadd.f32 %v125_v41, %v122_v39  ;;  %v130_v46 = vadd.f32 %v125_v41, %v123_v40 }
  0x52   :  { %v131_v47 = vmax.f32 %v127_v42, 0.0  ;;  %v132_v51 = vmax.f32 %v128_v43, 0.0  ;;  %v133_v52 = vmax.f32 %v129_v44, 0.0  ;;  %v134_v53 = vmax.f32 %v130_v46, 0.0 }
  0x54   :  { %v135_v54 = vpack.c.bf16 %v132_v51, %v131_v47  ;;  %v136_v55 = vpack.c.bf16 %v134_v53, %v133_v52 }
  0x56   :  { %401 = vmatmul.msk.bf16.vlgmr.msra.gmra.mxu0 %vm65_vm0, %v135_v54  ;;  %403 = vmatmul.msk.bf16.vlgmr.msra.gmra.mxu1 %vm65_vm0, %v135_v54 }
  0x57   :  { %405 = vmatmul.msk.bf16.vlgmr.msra.gmra.mxu2 %vm65_vm0, %v135_v54  ;;  %407 = vmatmul.msk.bf16.vlgmr.msra.gmra.mxu3 %vm65_vm0, %v135_v54 }
  0x66   :  { %402 = vmatmul.msk.bf16.gmra.mxu0 %vm65_vm0, %v136_v55  ;;  %404 = vmatmul.msk.bf16.gmra.mxu1 %vm65_vm0, %v136_v55 }
  0x67   :  { %406 = vmatmul.msk.bf16.gmra.mxu2 %vm65_vm0, %v136_v55  ;;  %408 = vmatmul.msk.bf16.gmra.mxu3 %vm65_vm0, %v136_v55 }
  0xd3   :  { %v248_v45 = vpop.f32.mrf.mxu0  ;;  %v267_v48 = vpop.f32.mrf.mxu1 }
  0xd4   :  { %315 = vst [vmem:[%s651_s4] sm:$0xff] %v248_v45 }
  0xd5   :  { %316 = vst [vmem:[%s651_s4 + $0x8] sm:$0xff] %v267_v48 }
  0xda   :  { %v286_v49 = vpop.f32.mrf.mxu2  ;;  %v305_v50 = vpop.f32.mrf.mxu3 }
  0xdb   :  { %317 = vst [vmem:[%s651_s4 + $0x10] sm:$0xff] %v286_v49  ;;  %v250_v56 = vpop.f32.mrf.mxu0  ;;  %v269_v57 = vpop.f32.mrf.mxu1 }
  0xdc   :  { %318 = vst [vmem:[%s651_s4 + $0x18] sm:$0xff] %v305_v50 }
  0xdd   :  { %319 = vst [vmem:[%s651_s4 + $0x20] sm:$0xff] %v250_v56 }
  0xde   :  { %320 = vst [vmem:[%s651_s4 + $0x28] sm:$0xff] %v269_v57 }
  0xe2   :  { %v288_v58 = vpop.f32.mrf.mxu2  ;;  %v307_v59 = vpop.f32.mrf.mxu3 }
  0xe3   :  { %321 = vst [vmem:[%s651_s4 + $0x30] sm:$0xff] %v288_v58  ;;  %v253_v60 = vpop.f32.mrf.mxu0  ;;  %v272_v61 = vpop.f32.mrf.mxu1 }
  0xe4   :  { %322 = vst [vmem:[%s651_s4 + $0x38] sm:$0xff] %v307_v59 }
  0xe5   :  { %323 = vst [vmem:[%s651_s4 + $0x40] sm:$0xff] %v253_v60 }
  0xe6   :  { %324 = vst [vmem:[%s651_s4 + $0x48] sm:$0xff] %v272_v61 }
  0xea   :  { %v291_v62 = vpop.f32.mrf.mxu2  ;;  %v310_v63 = vpop.f32.mrf.mxu3 }
  0xeb   :  { %325 = vst [vmem:[%s651_s4 + $0x50] sm:$0xff] %v291_v62  ;;  %v255_v0 = vpop.f32.mrf.mxu0  ;;  %v274_v1 = vpop.f32.mrf.mxu1 }
  0xec   :  { %326 = vst [vmem:[%s651_s4 + $0x58] sm:$0xff] %v310_v63 }
  0xed   :  { %327 = vst [vmem:[%s651_s4 + $0x60] sm:$0xff] %v255_v0 }
  0xee   :  { %328 = vst [vmem:[%s651_s4 + $0x68] sm:$0xff] %v274_v1 }
  0xf2   :  { %v293_v2 = vpop.f32.mrf.mxu2  ;;  %v312_v3 = vpop.f32.mrf.mxu3 }
  0xf3   :  { %329 = vst [vmem:[%s651_s4 + $0x70] sm:$0xff] %v293_v2 }
  0xf4   :  { %330 = vst [vmem:[%s651_s4 + $0x78] sm:$0xff] %v312_v3 }
  0xf5   :  { %335 = vsyncpa [#allocation3], 1 }
  0xf6   :  { %336 = vsyncpa [#allocation5], 1 }

// kernel: gnet_forward.8
= control target key start
LH: loop header
LB: loop body
LE: loop exit
PB: predicated region body
PF: predicated region fallthrough
CT: control target
= control target key end

     0   :  { %9 = vsyncpa [#allocation3], 0  ;;  %s885_s0 = inlined_call_operand.vmem [shape: f32[128,32], index: 0, kind: input, shape index: {}]   ;;  %s886_s1 = inlined_call_operand.hbm [shape: f32[1,32], index: 1, kind: input, shape index: {}]   ;;  %s887_s2 = inlined_call_operand.hbm [shape: f32[1,32], index: 2, kind: input, shape index: {}]   ;;  %s888_s3 = inlined_call_operand.hbm [shape: bf16[32,256], index: 3, kind: input, shape index: {}]   ;;  %s889_s4 = inlined_call_operand.vmem [shape: f32[128,256], index: 4, kind: output, shape index: {}]  }
   0x1   :  { %10 = vsyncpa [#allocation5], 0  ;;  %s29_s17 = sshll.u32 %s887_s2, 4  ;;  %s558_s18 = smov [#allocation4]   ;;  %s30_s17 = int_to_ptr.hbm [resolvable:$true] %s29_s17 }
   0x2   :  { %s31_s19 = sshll.u32 %s558_s18, 4  ;;  %s18_s22 = sshll.u32 %s886_s1, 4  ;;  %s32_s19 = int_to_ptr.vmem [resolvable:$true] %s31_s19  ;;  %s19_s22 = int_to_ptr.hbm [resolvable:$true] %s18_s22 }
   0x3   :  { %34 = dma.hbm_to_vmem [thread:$0]  %s30_s17, 16, %s32_s19, [#allocation5]  }
   0x4   :  { %s559_s23 = smov [#allocation2]   ;;  %s39_s27 = sshll.u32 %s888_s3, 4  ;;  %s40_s27 = int_to_ptr.hbm [resolvable:$true] %s39_s27 }
   0x5   :  { %s20_s24 = sshll.u32 %s559_s23, 4  ;;  %s560_s2 = smov [#allocation6]   ;;  %s21_s24 = int_to_ptr.vmem [resolvable:$true] %s20_s24 }
   0x6   :  { %23 = dma.hbm_to_vmem [thread:$0]  %s19_s22, 16, %s21_s24, [#allocation3]  }
   0x7   :  { %s41_s28 = sshll.u32 %s560_s2, 4  ;;  %s561_s29 = smov 128   ;;  %s42_s28 = int_to_ptr.vmem [resolvable:$true] %s41_s28 }
   0x8   :  { %s562_s30 = smov 8  }
   0x9   :  { %47 = dma.hbm_to_vmem [thread:$0]  %s40_s27, 512, %s42_s28, [#allocation5], %s561_s29, %s561_s29, %s562_s30  }
   0xa   :  { %554 = dma.done.wait [#allocation3], 16  }
   0xb   :  { %555 = vsyncadd [#allocation3], 4294967280 }
   0xc   :  { %556 = dma.done.wait [#allocation5], 528  }
   0xd   :  { %557 = vsyncadd [#allocation5], 4294966768  ;;  %vm77_vm0 = vcmask 261120   ;;  %v445_v0 = vld [vmem:[#allocation6 + $0x10] sm:$0xf]  ;;  %v600_v10 = vld [vmem:[%s885_s0] sm:$0xff] }
   0xe   :  { %v470_v1 = vld [vmem:[#allocation6 + $0x14] sm:$0xf0]  ;;  %v469_v2 = vld [vmem:[#allocation6 + $0x14] sm:$0xf]  ;;  %v447_v4 = vld [vmem:[#allocation6 + $0x18] sm:$0xf0]  ;;  %v115_v25 = vmul.f32 %v600_v10, %v600_v10 }
   0xf   :  { %v446_v3 = vor.u32 %v470_v1, %v445_v0  ;;  %v437_v5 = vld [vmem:[#allocation6] sm:$0xf]  ;;  %v468_v6 = vld [vmem:[#allocation6 + $0x4] sm:$0xf0]  ;;  %v450_v7 = vor.u32 %v469_v2, %v447_v4  ;;  %v467_v8 = vld [vmem:[#allocation6 + $0x4] sm:$0xf] }
  0x10   :  { %v439_v9 = vld [vmem:[#allocation6 + $0x8] sm:$0xf0]  ;;  %v438_v11 = vor.u32 %v468_v6, %v437_v5  ;;  %v605_v12 = vld [vmem:[%s885_s0 + $0x8] sm:$0xff]  ;;  %v615_v14 = vld [vmem:[%s885_s0 + $0x18] sm:$0xff]  ;;  %v78_v15 = vsel %vm77_vm0, %v600_v10, 0.0  ;;  %v131_v36 = vsel %vm77_vm0, %v115_v25, 0.0 }
  0x11   :  { %305 = vmatpush.bf16.msra.mxu0 %v446_v3  ;;  %471 = vmatpush.bf16.msra.mxu2 %v446_v3  ;;  %v610_v13 = vld [vmem:[%s885_s0 + $0x10] sm:$0xff]  ;;  %v442_v16 = vor.u32 %v467_v8, %v439_v9  ;;  %v79_v17 = vsel %vm77_vm0, %v605_v12, 0.0  ;;  %v626_v19 = vld [vmem:[%s885_s0 + $0x20] sm:$0xff]  ;;  %v83_v21 = vsel %vm77_vm0, %v615_v14, 0.0  ;;  %v633_v22 = vld [vmem:[%s885_s0 + $0x28] sm:$0xff]  ;;  %v116_v26 = vmul.f32 %v605_v12, %v605_v12 }
  0x12   :  { %354 = vmatpush.bf16.msra.mxu1 %v450_v7  ;;  %473 = vmatpush.bf16.msra.mxu3 %v450_v7  ;;  %v81_v18 = vsel %vm77_vm0, %v610_v13, 0.0  ;;  %v80_v20 = vadd.f32 %v79_v17, %v78_v15  ;;  %v85_v24 = vsel %vm77_vm0, %v626_v19, 0.0  ;;  %v644_v27 = vld [vmem:[%s885_s0 + $0x30] sm:$0xff]  ;;  %v117_v29 = vmul.f32 %v610_v13, %v610_v13  ;;  %v655_v32 = vld [vmem:[%s885_s0 + $0x38] sm:$0xff]  ;;  %v666_v38 = vld [vmem:[%s885_s0 + $0x40] sm:$0xff] }
  0x13   :  { %v87_v30 = vsel %vm77_vm0, %v633_v22, 0.0  ;;  %v118_v31 = vmul.f32 %v615_v14, %v615_v14  ;;  %v89_v34 = vsel %vm77_vm0, %v644_v27, 0.0  ;;  %v119_v35 = vmul.f32 %v626_v19, %v626_v19  ;;  %v677_v45 = vld [vmem:[%s885_s0 + $0x48] sm:$0xff]  ;;  %v687_v51 = vld [vmem:[%s885_s0 + $0x50] sm:$0xff]  ;;  %v697_v57 = vld [vmem:[%s885_s0 + $0x58] sm:$0xff] }
  0x14   :  { %v82_v23 = vadd.f32 %v81_v18, %v80_v20  ;;  %v132_v37 = vsel %vm77_vm0, %v116_v26, 0.0  ;;  %v134_v41 = vsel %vm77_vm0, %v117_v29, 0.0  ;;  %v91_v42 = vsel %vm77_vm0, %v655_v32, 0.0  ;;  %v707_v63 = vld [vmem:[%s885_s0 + $0x60] sm:$0xff]  ;;  %v717_v5 = vld [vmem:[%s885_s0 + $0x68] sm:$0xff]  ;;  %v727_v15 = vld [vmem:[%s885_s0 + $0x70] sm:$0xff] }
  0x15   :  { %306 = vmatpush.bf16.msra.mxu0 %v438_v11  ;;  %472 = vmatpush.bf16.msra.mxu2 %v438_v11  ;;  %v133_v40 = vadd.f32 %v132_v37, %v131_v36  ;;  %v120_v43 = vmul.f32 %v633_v22, %v633_v22  ;;  %v136_v44 = vsel %vm77_vm0, %v118_v31, 0.0  ;;  %v93_v48 = vsel %vm77_vm0, %v666_v38, 0.0 }
  0x16   :  { %355 = vmatpush.bf16.msra.mxu1 %v442_v16  ;;  %474 = vmatpush.bf16.msra.mxu3 %v442_v16  ;;  %v84_v28 = vadd.f32 %v83_v21, %v82_v23  ;;  %v121_v49 = vmul.f32 %v644_v27, %v644_v27  ;;  %v138_v50 = vsel %vm77_vm0, %v119_v35, 0.0  ;;  %v95_v54 = vsel %vm77_vm0, %v677_v45, 0.0  ;;  %v737_v23 = vld [vmem:[%s885_s0 + $0x78] sm:$0xff] }
  0x17   :  { %v135_v47 = vadd.f32 %v134_v41, %v133_v40  ;;  %v122_v55 = vmul.f32 %v655_v32, %v655_v32  ;;  %v140_v56 = vsel %vm77_vm0, %v120_v43, 0.0  ;;  %v97_v60 = vsel %vm77_vm0, %v687_v51, 0.0 }
  0x18   :  { %v86_v33 = vadd.f32 %v85_v24, %v84_v28  ;;  %v123_v61 = vmul.f32 %v666_v38, %v666_v38  ;;  %v142_v62 = vsel %vm77_vm0, %v121_v49, 0.0  ;;  %v99_v2 = vsel %vm77_vm0, %v697_v57, 0.0 }
  0x19   :  { %v137_v53 = vadd.f32 %v136_v44, %v135_v47  ;;  %v124_v3 = vmul.f32 %v677_v45, %v677_v45  ;;  %v144_v4 = vsel %vm77_vm0, %v122_v55, 0.0  ;;  %v101_v8 = vsel %vm77_vm0, %v707_v63, 0.0 }
  0x1a   :  { %v88_v39 = vadd.f32 %v87_v30, %v86_v33  ;;  %v125_v9 = vmul.f32 %v687_v51, %v687_v51  ;;  %v146_v11 = vsel %vm77_vm0, %v123_v61, 0.0  ;;  %v103_v18 = vsel %vm77_vm0, %v717_v5, 0.0 }
  0x1b   :  { %v139_v59 = vadd.f32 %v138_v50, %v137_v53  ;;  %v126_v20 = vmul.f32 %v697_v57, %v697_v57  ;;  %v148_v21 = vsel %vm77_vm0, %v124_v3, 0.0  ;;  %v105_v26 = vsel %vm77_vm0, %v727_v15, 0.0 }
  0x1c   :  { %v90_v46 = vadd.f32 %v89_v34, %v88_v39  ;;  %v127_v28 = vmul.f32 %v707_v63, %v707_v63  ;;  %v150_v29 = vsel %vm77_vm0, %v125_v9, 0.0  ;;  %v107_v33 = vsel %vm77_vm0, %v737_v23, 0.0 }
  0x1d   :  { %v141_v1 = vadd.f32 %v140_v56, %v139_v59  ;;  %v128_v34 = vmul.f32 %v717_v5, %v717_v5  ;;  %v152_v35 = vsel %vm77_vm0, %v126_v20, 0.0  ;;  %v129_v39 = vmul.f32 %v727_v15, %v727_v15 }
  0x1e   :  { %v92_v52 = vadd.f32 %v91_v42, %v90_v46  ;;  %v154_v40 = vsel %vm77_vm0, %v127_v28, 0.0  ;;  %v130_v43 = vmul.f32 %v737_v23, %v737_v23  ;;  %v186_v28 = vld [vmem:[#allocation4] sm:$0x1] }
  0x1f   :  { %v143_v7 = vadd.f32 %v142_v62, %v141_v1  ;;  %v156_v44 = vsel %vm77_vm0, %v128_v34, 0.0 }
  0x20   :  { %v94_v58 = vadd.f32 %v93_v48, %v92_v52  ;;  %v158_v48 = vsel %vm77_vm0, %v129_v39, 0.0  ;;  %v160_v52 = vsel %vm77_vm0, %v130_v43, 0.0 }
  0x21   :  { %v145_v17 = vadd.f32 %v144_v4, %v143_v7 }
  0x22   :  { %v96_v0 = vadd.f32 %v95_v54, %v94_v58 }
  0x23   :  { %v147_v25 = vadd.f32 %v146_v11, %v145_v17 }
  0x24   :  { %v98_v6 = vadd.f32 %v97_v60, %v96_v0 }
  0x25   :  { %v149_v31 = vadd.f32 %v148_v21, %v147_v25  ;;  %v173_v21 = vld [vmem:[#allocation2] sm:$0x1] }
  0x26   :  { %v100_v16 = vadd.f32 %v99_v2, %v98_v6 }
  0x27   :  { %v151_v37 = vadd.f32 %v150_v29, %v149_v31 }
  0x28   :  { %v102_v24 = vadd.f32 %v101_v8, %v100_v16 }
  0x29   :  { %v153_v42 = vadd.f32 %v152_v35, %v151_v37 }
  0x2a   :  { %v104_v30 = vadd.f32 %v103_v18, %v102_v24 }
  0x2b   :  { %v155_v47 = vadd.f32 %v154_v40, %v153_v42 }
  0x2c   :  { %v106_v36 = vadd.f32 %v105_v26, %v104_v30 }
  0x2d   :  { %v157_v50 = vadd.f32 %v156_v44, %v155_v47 }
  0x2e   :  { %v108_v41 = vadd.f32 %v107_v33, %v106_v36 }
  0x2f   :  { %v159_v54 = vadd.f32 %v158_v48, %v157_v50 }
  0x30   :  { %v109_v46 = vrot.slane %v108_v41, 4 }
  0x31   :  { %v161_v56 = vadd.f32 %v160_v52, %v159_v54 }
  0x32   :  { %v110_v49 = vadd.f32 %v109_v46, %v108_v41 }
  0x33   :  { %v162_v59 = vrot.slane %v161_v56, 4 }
  0x34   :  { %v111_v53 = vrot.slane %v110_v49, 2 }
  0x35   :  { %v163_v61 = vadd.f32 %v162_v59, %v161_v56 }
  0x36   :  { %v112_v55 = vadd.f32 %v111_v53, %v110_v49 }
  0x37   :  { %v164_v62 = vrot.slane %v163_v61, 2 }
  0x38   :  { %v113_v58 = vrot.slane %v112_v55, 1 }
  0x39   :  { %v165_v0 = vadd.f32 %v164_v62, %v163_v61 }
  0x3a   :  { %v114_v60 = vadd.f32 %v113_v58, %v112_v55 }
  0x3b   :  { %v166_v2 = vrot.slane %v165_v0, 1 }
  0x3c   :  { %v168_v1 = vmul.f32 0.0078125, %v114_v60 }
  0x3d   :  { %v167_v3 = vadd.f32 %v166_v2, %v165_v0 }
  0x3e   :  { %v170_v4 = vmul.f32 %v168_v1, %v168_v1 }
  0x3f   :  { %v169_v6 = vmul.f32 0.0078125, %v167_v3 }
  0x41   :  { %v171_v7 = vsub.f32 %v169_v6, %v170_v4 }
  0x43   :  { %v172_v8 = vmax.f32 %v171_v7, 0.0 }
  0x45   :  { %v174_v9 = vadd.f32 1e-05, %v172_v8 }
  0x47   :  { %480 = vrsqrt.f32 %v174_v9  ;;  %vm181_vm1 = vweird.f32 %v174_v9 }
  0x4d   :  { %v481_v11 = vpop.eup %480 }
  0x4e   :  { %v176_v16 = vmul.f32 %v481_v11, %v174_v9  ;;  %vm182_vm2 = vweird.f32 %v481_v11 }
  0x4f   :  { %vm183_vm3 = vmor %vm181_vm1, %vm182_vm2 }
  0x50   :  { %v177_v17 = vmul.f32 %v481_v11, %v176_v16 }
  0x52   :  { %v178_v18 = vmul.f32 0.5, %v177_v17 }
  0x54   :  { %v179_v20 = vsub.f32 1.5, %v178_v18 }
  0x56   :  { %v180_v24 = vmul.f32 %v481_v11, %v179_v20 }
  0x58   :  { %v184_v25 = vsel %vm183_vm3, %v481_v11, %v180_v24 }
  0x59   :  { %v185_v26 = vmul.f32 %v184_v25, %v173_v21 }
  0x5b   :  { %v187_v29 = vmul.f32 %v185_v26, %v168_v1  ;;  %v190_v30 = vperm.slane %v185_v26, 0 }
  0x5d   :  { %v188_v31 = vsub.f32 %v186_v28, %v187_v29  ;;  %v192_v33 = vmul.f32 %v190_v30, %v600_v10  ;;  %v193_v34 = vmul.f32 %v190_v30, %v605_v12  ;;  %v200_v35 = vmul.f32 %v190_v30, %v666_v38 }
  0x5e   :  { %v201_v36 = vmul.f32 %v190_v30, %v677_v45  ;;  %v194_v50 = vmul.f32 %v190_v30, %v610_v13  ;;  %v195_v10 = vmul.f32 %v190_v30, %v615_v14  ;;  %v202_v12 = vmul.f32 %v190_v30, %v687_v51 }
  0x5f   :  { %v209_v37 = vperm.slane %v188_v31, 0  ;;  %v203_v38 = vmul.f32 %v190_v30, %v697_v57  ;;  %v196_v14 = vmul.f32 %v190_v30, %v626_v19  ;;  %v197_v51 = vmul.f32 %v190_v30, %v633_v22 }
  0x60   :  { %v204_v57 = vmul.f32 %v190_v30, %v707_v63  ;;  %v205_v61 = vmul.f32 %v190_v30, %v717_v5  ;;  %v198_v22 = vmul.f32 %v190_v30, %v644_v27  ;;  %v199_v63 = vmul.f32 %v190_v30, %v655_v32 }
  0x61   :  { %v211_v39 = vadd.f32 %v209_v37, %v192_v33  ;;  %v212_v40 = vadd.f32 %v209_v37, %v193_v34  ;;  %v219_v41 = vadd.f32 %v209_v37, %v200_v35  ;;  %v220_v42 = vadd.f32 %v209_v37, %v201_v36 }
  0x62   :  { %v213_v45 = vadd.f32 %v209_v37, %v194_v50  ;;  %v214_v52 = vadd.f32 %v209_v37, %v195_v10  ;;  %v221_v53 = vadd.f32 %v209_v37, %v202_v12  ;;  %v222_v54 = vadd.f32 %v209_v37, %v203_v38 }
  0x63   :  { %v227_v43 = vmax.f32 %v211_v39, 0.0  ;;  %v228_v44 = vmax.f32 %v212_v40, 0.0  ;;  %v235_v46 = vmax.f32 %v219_v41, 0.0  ;;  %v236_v47 = vmax.f32 %v220_v42, 0.0 }
  0x64   :  { %v229_v55 = vmax.f32 %v213_v45, 0.0  ;;  %v230_v13 = vmax.f32 %v214_v52, 0.0  ;;  %v237_v56 = vmax.f32 %v221_v53, 0.0  ;;  %v238_v58 = vmax.f32 %v222_v54, 0.0 }
  0x65   :  { %v243_v48 = vpack.c.bf16 %v228_v44, %v227_v43  ;;  %v247_v49 = vpack.c.bf16 %v236_v47, %v235_v46  ;;  %v215_v62 = vadd.f32 %v209_v37, %v196_v14  ;;  %v216_v0 = vadd.f32 %v209_v37, %v197_v51 }
  0x66   :  { %v244_v59 = vpack.c.bf16 %v230_v13, %v229_v55  ;;  %v248_v60 = vpack.c.bf16 %v238_v58, %v237_v56  ;;  %v223_v1 = vadd.f32 %v209_v37, %v204_v57  ;;  %v224_v2 = vadd.f32 %v209_v37, %v205_v61 }
  0x67   :  { %451 = vmatmul.msk.bf16.vlgmr.msra.gmra.mxu0 %vm77_vm0, %v243_v48  ;;  %455 = vmatmul.msk.bf16.vlgmr.msra.gmra.mxu2 %vm77_vm0, %v247_v49  ;;  %v231_v3 = vmax.f32 %v215_v62, 0.0  ;;  %v232_v19 = vmax.f32 %v216_v0, 0.0  ;;  %v206_v5 = vmul.f32 %v190_v30, %v727_v15  ;;  %v207_v9 = vmul.f32 %v190_v30, %v737_v23 }
  0x68   :  { %459 = vmatmul.msk.bf16.vlgmr.msra.gmra.mxu1 %vm77_vm0, %v243_v48  ;;  %463 = vmatmul.msk.bf16.vlgmr.msra.gmra.mxu3 %vm77_vm0, %v247_v49  ;;  %v239_v4 = vmax.f32 %v223_v1, 0.0  ;;  %v240_v6 = vmax.f32 %v224_v2, 0.0  ;;  %v217_v11 = vadd.f32 %v209_v37, %v198_v22  ;;  %v218_v16 = vadd.f32 %v209_v37, %v199_v63 }
  0x69   :  { %v245_v7 = vpack.c.bf16 %v232_v19, %v231_v3  ;;  %v225_v17 = vadd.f32 %v209_v37, %v206_v5  ;;  %v226_v18 = vadd.f32 %v209_v37, %v207_v9 }
  0x6a   :  { %v249_v8 = vpack.c.bf16 %v240_v6, %v239_v4  ;;  %v233_v20 = vmax.f32 %v217_v11, 0.0  ;;  %v234_v27 = vmax.f32 %v218_v16, 0.0 }
  0x6b   :  { %v241_v21 = vmax.f32 %v225_v17, 0.0  ;;  %v242_v24 = vmax.f32 %v226_v18, 0.0 }
  0x6c   :  { %v246_v25 = vpack.c.bf16 %v234_v27, %v233_v20 }
  0x6d   :  { %v250_v26 = vpack.c.bf16 %v242_v24, %v241_v21 }
  0x77   :  { %452 = vmatmul.msk.bf16.gmra.mxu0 %vm77_vm0, %v244_v59  ;;  %456 = vmatmul.msk.bf16.gmra.mxu2 %vm77_vm0, %v248_v60 }
  0x78   :  { %460 = vmatmul.msk.bf16.gmra.mxu1 %vm77_vm0, %v244_v59  ;;  %464 = vmatmul.msk.bf16.gmra.mxu3 %vm77_vm0, %v248_v60 }
  0x87   :  { %453 = vmatmul.msk.bf16.gmra.mxu0 %vm77_vm0, %v245_v7  ;;  %457 = vmatmul.msk.bf16.gmra.mxu2 %vm77_vm0, %v249_v8 }
  0x88   :  { %461 = vmatmul.msk.bf16.gmra.mxu1 %vm77_vm0, %v245_v7  ;;  %465 = vmatmul.msk.bf16.gmra.mxu3 %vm77_vm0, %v249_v8 }
  0x97   :  { %454 = vmatmul.msk.bf16.gmra.mxu0 %vm77_vm0, %v246_v25  ;;  %458 = vmatmul.msk.bf16.gmra.mxu2 %vm77_vm0, %v250_v26 }
  0x98   :  { %462 = vmatmul.msk.bf16.gmra.mxu1 %vm77_vm0, %v246_v25  ;;  %466 = vmatmul.msk.bf16.gmra.mxu3 %vm77_vm0, %v250_v26 }
  0xe4   :  { %v308_v32 = vpop.f32.mrf.mxu0 }
  0xe5   :  { %397 = vst [vmem:[%s889_s4] sm:$0xff] %v308_v32  ;;  %v357_v15 = vpop.f32.mrf.mxu1 }
  0xe6   :  { %398 = vst [vmem:[%s889_s4 + $0x8] sm:$0xff] %v357_v15 }
  0xea   :  { %v328_v23 = vpop.f32.mrf.mxu2 }
  0xeb   :  { %413 = vst [vmem:[%s889_s4 + $0x80] sm:$0xff] %v328_v23  ;;  %v377_v28 = vpop.f32.mrf.mxu3 }
  0xec   :  { %414 = vst [vmem:[%s889_s4 + $0x88] sm:$0xff] %v377_v28  ;;  %v310_v29 = vpop.f32.mrf.mxu0 }
  0xed   :  { %399 = vst [vmem:[%s889_s4 + $0x10] sm:$0xff] %v310_v29  ;;  %v359_v30 = vpop.f32.mrf.mxu1 }
  0xee   :  { %400 = vst [vmem:[%s889_s4 + $0x18] sm:$0xff] %v359_v30 }
  0xf2   :  { %v330_v31 = vpop.f32.mrf.mxu2 }
  0xf3   :  { %415 = vst [vmem:[%s889_s4 + $0x90] sm:$0xff] %v330_v31  ;;  %v379_v33 = vpop.f32.mrf.mxu3 }
  0xf4   :  { %416 = vst [vmem:[%s889_s4 + $0x98] sm:$0xff] %v379_v33  ;;  %v313_v34 = vpop.f32.mrf.mxu0 }
  0xf5   :  { %401 = vst [vmem:[%s889_s4 + $0x20] sm:$0xff] %v313_v34  ;;  %v362_v35 = vpop.f32.mrf.mxu1 }
  0xf6   :  { %402 = vst [vmem:[%s889_s4 + $0x28] sm:$0xff] %v362_v35 }
  0xfa   :  { %v333_v36 = vpop.f32.mrf.mxu2 }
  0xfb   :  { %417 = vst [vmem:[%s889_s4 + $0xa0] sm:$0xff] %v333_v36  ;;  %v382_v37 = vpop.f32.mrf.mxu3 }
  0xfc   :  { %418 = vst [vmem:[%s889_s4 + $0xa8] sm:$0xff] %v382_v37  ;;  %v315_v39 = vpop.f32.mrf.mxu0 }
  0xfd   :  { %403 = vst [vmem:[%s889_s4 + $0x30] sm:$0xff] %v315_v39  ;;  %v364_v40 = vpop.f32.mrf.mxu1 }
  0xfe   :  { %404 = vst [vmem:[%s889_s4 + $0x38] sm:$0xff] %v364_v40 }
 0x102   :  { %v335_v41 = vpop.f32.mrf.mxu2 }
 0x103   :  { %419 = vst [vmem:[%s889_s4 + $0xb0] sm:$0xff] %v335_v41  ;;  %v384_v42 = vpop.f32.mrf.mxu3 }
 0x104   :  { %420 = vst [vmem:[%s889_s4 + $0xb8] sm:$0xff] %v384_v42  ;;  %v318_v43 = vpop.f32.mrf.mxu0 }
 0x105   :  { %405 = vst [vmem:[%s889_s4 + $0x40] sm:$0xff] %v318_v43  ;;  %v367_v44 = vpop.f32.mrf.mxu1 }
 0x106   :  { %406 = vst [vmem:[%s889_s4 + $0x48] sm:$0xff] %v367_v44 }
 0x10a   :  { %v338_v46 = vpop.f32.mrf.mxu2 }
 0x10b   :  { %421 = vst [vmem:[%s889_s4 + $0xc0] sm:$0xff] %v338_v46  ;;  %v387_v47 = vpop.f32.mrf.mxu3 }
 0x10c   :  { %422 = vst [vmem:[%s889_s4 + $0xc8] sm:$0xff] %v387_v47  ;;  %v320_v48 = vpop.f32.mrf.mxu0 }
 0x10d   :  { %407 = vst [vmem:[%s889_s4 + $0x50] sm:$0xff] %v320_v48  ;;  %v369_v49 = vpop.f32.mrf.mxu1 }
 0x10e   :  { %408 = vst [vmem:[%s889_s4 + $0x58] sm:$0xff] %v369_v49 }
 0x112   :  { %v340_v50 = vpop.f32.mrf.mxu2 }
 0x113   :  { %423 = vst [vmem:[%s889_s4 + $0xd0] sm:$0xff] %v340_v50  ;;  %v389_v10 = vpop.f32.mrf.mxu3 }
 0x114   :  { %424 = vst [vmem:[%s889_s4 + $0xd8] sm:$0xff] %v389_v10  ;;  %v323_v12 = vpop.f32.mrf.mxu0 }
 0x115   :  { %409 = vst [vmem:[%s889_s4 + $0x60] sm:$0xff] %v323_v12  ;;  %v372_v38 = vpop.f32.mrf.mxu1 }
 0x116   :  { %410 = vst [vmem:[%s889_s4 + $0x68] sm:$0xff] %v372_v38 }
 0x11a   :  { %v343_v45 = vpop.f32.mrf.mxu2 }
 0x11b   :  { %425 = vst [vmem:[%s889_s4 + $0xe0] sm:$0xff] %v343_v45  ;;  %v392_v52 = vpop.f32.mrf.mxu3 }
 0x11c   :  { %426 = vst [vmem:[%s889_s4 + $0xe8] sm:$0xff] %v392_v52  ;;  %v325_v53 = vpop.f32.mrf.mxu0 }
 0x11d   :  { %411 = vst [vmem:[%s889_s4 + $0x70] sm:$0xff] %v325_v53  ;;  %v374_v54 = vpop.f32.mrf.mxu1 }
 0x11e   :  { %412 = vst [vmem:[%s889_s4 + $0x78] sm:$0xff] %v374_v54 }
 0x122   :  { %v345_v55 = vpop.f32.mrf.mxu2 }
 0x123   :  { %427 = vst [vmem:[%s889_s4 + $0xf0] sm:$0xff] %v345_v55  ;;  %v394_v13 = vpop.f32.mrf.mxu3 }
 0x124   :  { %428 = vst [vmem:[%s889_s4 + $0xf8] sm:$0xff] %v394_v13 }
 0x125   :  { %433 = vsyncpa [#allocation3], 1 }
 0x126   :  { %434 = vsyncpa [#allocation5], 1 }

// kernel: gnet_forward.9
= control target key start
LH: loop header
LB: loop body
LE: loop exit
PB: predicated region body
PF: predicated region fallthrough
CT: control target
= control target key end

     0   :  { %vm82_vm0 = vcmask 130048   ;;  %s2125_s3 = inlined_call_operand.vmem [shape: bf16[16,128], index: 3, kind: input, shape index: {}]   ;;  %s2126_s0 = inlined_call_operand.vmem [shape: f32[512,16], index: 0, kind: input, shape index: {}]   ;;  %s2127_s1 = inlined_call_operand.vmem [shape: f32[1,16], index: 1, kind: input, shape index: {}]   ;;  %s2128_s2 = inlined_call_operand.vmem [shape: f32[1,16], index: 2, kind: input, shape index: {}]   ;;  %s2129_s4 = inlined_call_operand.vmem [shape: f32[512,128], index: 4, kind: output, shape index: {}]  }
   0x1   :  { %v1041_v0 = vld [vmem:[%s2125_s3] sm:$0xff]  ;;  %v1091_v2 = vld [vmem:[%s2126_s0 + $0x8] sm:$0xff]  ;;  %v1096_v3 = vld [vmem:[%s2126_s0 + $0x10] sm:$0xff] }
   0x2   :  { %v1086_v1 = vld [vmem:[%s2126_s0] sm:$0xff]  ;;  %v1101_v4 = vld [vmem:[%s2126_s0 + $0x18] sm:$0xff]  ;;  %v84_v6 = vsel %vm82_vm0, %v1091_v2, 0.0  ;;  %775 = vmatpush.bf16.msra.mxu0 %v1041_v0  ;;  %1042 = vmatpush.bf16.msra.mxu1 %v1041_v0  ;;  %v86_v9 = vsel %vm82_vm0, %v1096_v3, 0.0  ;;  %v1119_v11 = vld [vmem:[%s2126_s0 + $0x28] sm:$0xff]  ;;  %v217_v25 = vmul.f32 %v1091_v2, %v1091_v2  ;;  %v218_v26 = vmul.f32 %v1096_v3, %v1096_v3 }
   0x3   :  { %v83_v5 = vsel %vm82_vm0, %v1086_v1, 0.0  ;;  %v1110_v7 = vld [vmem:[%s2126_s0 + $0x20] sm:$0xff]  ;;  %1043 = vmatpush.bf16.msra.mxu2 %v1041_v0  ;;  %1044 = vmatpush.bf16.msra.mxu3 %v1041_v0  ;;  %v88_v10 = vsel %vm82_vm0, %v1101_v4, 0.0  ;;  %v1126_v14 = vld [vmem:[%s2126_s0 + $0x30] sm:$0xff]  ;;  %v92_v16 = vsel %vm82_vm0, %v1119_v11, 0.0  ;;  %v1133_v17 = vld [vmem:[%s2126_s0 + $0x38] sm:$0xff]  ;;  %v216_v24 = vmul.f32 %v1086_v1, %v1086_v1 }
   0x4   :  { %v85_v8 = vadd.f32 %v84_v6, %v83_v5  ;;  %v90_v13 = vsel %vm82_vm0, %v1110_v7, 0.0  ;;  %v94_v19 = vsel %vm82_vm0, %v1126_v14, 0.0  ;;  %v26_v20 = vld [vmem:[%s2126_s0 + $0x40] sm:$0xff]  ;;  %v27_v22 = vld [vmem:[%s2126_s0 + $0x48] sm:$0xff]  ;;  %v96_v23 = vsel %vm82_vm0, %v1133_v17, 0.0  ;;  %v28_v30 = vld [vmem:[%s2126_s0 + $0x50] sm:$0xff] }
   0x5   :  { %v98_v28 = vsel %vm82_vm0, %v26_v20, 0.0  ;;  %v219_v29 = vmul.f32 %v1101_v4, %v1101_v4  ;;  %v100_v32 = vsel %vm82_vm0, %v27_v22, 0.0  ;;  %v220_v33 = vmul.f32 %v1110_v7, %v1110_v7  ;;  %v29_v37 = vld [vmem:[%s2126_s0 + $0x58] sm:$0xff]  ;;  %v30_v43 = vld [vmem:[%s2126_s0 + $0x60] sm:$0xff]  ;;  %v31_v49 = vld [vmem:[%s2126_s0 + $0x68] sm:$0xff] }
   0x6   :  { %v87_v12 = vadd.f32 %v86_v9, %v85_v8  ;;  %v280_v34 = vsel %vm82_vm0, %v216_v24, 0.0  ;;  %v281_v35 = vsel %vm82_vm0, %v217_v25, 0.0  ;;  %v283_v36 = vsel %vm82_vm0, %v218_v26, 0.0  ;;  %v32_v55 = vld [vmem:[%s2126_s0 + $0x70] sm:$0xff]  ;;  %v33_v61 = vld [vmem:[%s2126_s0 + $0x78] sm:$0xff]  ;;  %v1197_v8 = vld [vmem:[%s2126_s0 + $0x80] sm:$0xff] }
   0x7   :  { %v282_v39 = vadd.f32 %v281_v35, %v280_v34  ;;  %v102_v40 = vsel %vm82_vm0, %v28_v30, 0.0  ;;  %v221_v41 = vmul.f32 %v1119_v11, %v1119_v11  ;;  %v285_v42 = vsel %vm82_vm0, %v219_v29, 0.0  ;;  %v1220_v29 = vld [vmem:[%s2126_s0 + $0x98] sm:$0xff]  ;;  %v1228_v35 = vld [vmem:[%s2126_s0 + $0xa0] sm:$0xff] }
   0x8   :  { %v89_v15 = vadd.f32 %v88_v10, %v87_v12  ;;  %v104_v46 = vsel %vm82_vm0, %v29_v37, 0.0  ;;  %v222_v47 = vmul.f32 %v1126_v14, %v1126_v14  ;;  %v287_v48 = vsel %vm82_vm0, %v220_v33, 0.0 }
   0x9   :  { %v284_v45 = vadd.f32 %v283_v36, %v282_v39  ;;  %v106_v52 = vsel %vm82_vm0, %v30_v43, 0.0  ;;  %v223_v53 = vmul.f32 %v1133_v17, %v1133_v17  ;;  %v289_v54 = vsel %vm82_vm0, %v221_v41, 0.0  ;;  %v1236_v41 = vld [vmem:[%s2126_s0 + $0xa8] sm:$0xff] }
   0xa   :  { %v91_v18 = vadd.f32 %v90_v13, %v89_v15  ;;  %v108_v58 = vsel %vm82_vm0, %v31_v49, 0.0  ;;  %v224_v59 = vmul.f32 %v26_v20, %v26_v20  ;;  %v291_v60 = vsel %vm82_vm0, %v222_v47, 0.0  ;;  %v1244_v47 = vld [vmem:[%s2126_s0 + $0xb0] sm:$0xff] }
   0xb   :  { %v286_v51 = vadd.f32 %v285_v42, %v284_v45  ;;  %v110_v0 = vsel %vm82_vm0, %v32_v55, 0.0  ;;  %v225_v5 = vmul.f32 %v27_v22, %v27_v22  ;;  %v293_v6 = vsel %vm82_vm0, %v223_v53, 0.0  ;;  %v1254_v53 = vld [vmem:[%s2126_s0 + $0xb8] sm:$0xff] }
   0xc   :  { %v93_v21 = vadd.f32 %v92_v16, %v91_v18  ;;  %v112_v12 = vsel %vm82_vm0, %v33_v61, 0.0  ;;  %v226_v13 = vmul.f32 %v28_v30, %v28_v30  ;;  %v295_v15 = vsel %vm82_vm0, %v224_v59, 0.0  ;;  %v1204_v16 = vld [vmem:[%s2126_s0 + $0x88] sm:$0xff]  ;;  %v1264_v59 = vld [vmem:[%s2126_s0 + $0xc0] sm:$0xff] }
   0xd   :  { %v288_v57 = vadd.f32 %v287_v48, %v286_v51  ;;  %v114_v20 = vsel %vm82_vm0, %v1197_v8, 0.0  ;;  %v297_v22 = vsel %vm82_vm0, %v225_v5, 0.0  ;;  %v116_v26 = vsel %vm82_vm0, %v1204_v16, 0.0  ;;  %v1274_v5 = vld [vmem:[%s2126_s0 + $0xc8] sm:$0xff] }
   0xe   :  { %v95_v27 = vadd.f32 %v94_v19, %v93_v21  ;;  %v227_v21 = vmul.f32 %v29_v37, %v29_v37  ;;  %v229_v33 = vmul.f32 %v31_v49, %v31_v49  ;;  %v230_v39 = vmul.f32 %v32_v55, %v32_v55 }
   0xf   :  { %v290_v63 = vadd.f32 %v289_v54, %v288_v57  ;;  %v231_v45 = vmul.f32 %v33_v61, %v33_v61  ;;  %v232_v51 = vmul.f32 %v1197_v8, %v1197_v8  ;;  %v233_v57 = vmul.f32 %v1204_v16, %v1204_v16 }
  0x10   :  { %v97_v31 = vadd.f32 %v96_v23, %v95_v27  ;;  %v1212_v23 = vld [vmem:[%s2126_s0 + $0x90] sm:$0xff]  ;;  %v228_v27 = vmul.f32 %v30_v43, %v30_v43  ;;  %v301_v34 = vsel %vm82_vm0, %v227_v21, 0.0  ;;  %v236_v21 = vmul.f32 %v1228_v35, %v1228_v35 }
  0x11   :  { %v292_v10 = vadd.f32 %v291_v60, %v290_v63  ;;  %v234_v63 = vmul.f32 %v1212_v23, %v1212_v23 }
  0x12   :  { %v99_v38 = vadd.f32 %v98_v28, %v97_v31  ;;  %v299_v28 = vsel %vm82_vm0, %v226_v13, 0.0  ;;  %v313_v13 = vsel %vm82_vm0, %v233_v57, 0.0  ;;  %v241_v57 = vmul.f32 %v1274_v5, %v1274_v5 }
  0x13   :  { %v294_v19 = vadd.f32 %v293_v6, %v292_v10  ;;  %v130_v10 = vsel %vm82_vm0, %v1264_v59, 0.0 }
  0x14   :  { %v101_v44 = vadd.f32 %v100_v32, %v99_v38  ;;  %v118_v32 = vsel %vm82_vm0, %v1212_v23, 0.0  ;;  %v120_v38 = vsel %vm82_vm0, %v1220_v29, 0.0 }
  0x15   :  { %v296_v25 = vadd.f32 %v295_v15, %v294_v19  ;;  %v1284_v15 = vld [vmem:[%s2126_s0 + $0xd0] sm:$0xff] }
  0x16   :  { %v103_v50 = vadd.f32 %v102_v40, %v101_v44  ;;  %v303_v40 = vsel %vm82_vm0, %v228_v27, 0.0  ;;  %v122_v44 = vsel %vm82_vm0, %v1228_v35, 0.0  ;;  %2147 = vst [vmem:[#allocation2_spill] sm:$0xff] %v1284_v15  ;;  %v134_v27 = vsel %vm82_vm0, %v1284_v15, 0.0 }
  0x17   :  { %v298_v31 = vadd.f32 %v297_v22, %v296_v25  ;;  %v315_v22 = vsel %vm82_vm0, %v234_v63, 0.0 }
  0x18   :  { %v105_v56 = vadd.f32 %v104_v46, %v103_v50  ;;  %v305_v46 = vsel %vm82_vm0, %v229_v33, 0.0  ;;  %v124_v50 = vsel %vm82_vm0, %v1236_v41, 0.0 }
  0x19   :  { %v300_v37 = vadd.f32 %v299_v28, %v298_v31  ;;  %v237_v28 = vmul.f32 %v1236_v41, %v1236_v41  ;;  %v1304_v31 = vld [vmem:[%s2126_s0 + $0xe0] sm:$0xff] }
  0x1a   :  { %v107_v62 = vadd.f32 %v106_v52, %v105_v56  ;;  %v307_v52 = vsel %vm82_vm0, %v230_v39, 0.0  ;;  %v126_v56 = vsel %vm82_vm0, %v1244_v47, 0.0  ;;  %2149 = vst [vmem:[#allocation4_spill] sm:$0xff] %v1304_v31 }
  0x1b   :  { %v302_v43 = vadd.f32 %v301_v34, %v300_v37  ;;  %v319_v37 = vsel %vm82_vm0, %v236_v21, 0.0 }
  0x1c   :  { %v109_v9 = vadd.f32 %v108_v58, %v107_v62  ;;  %v309_v58 = vsel %vm82_vm0, %v231_v45, 0.0  ;;  %v128_v62 = vsel %vm82_vm0, %v1254_v53, 0.0  ;;  %v1324_v45 = vld [vmem:[%s2126_s0 + $0xf0] sm:$0xff] }
  0x1d   :  { %v304_v49 = vadd.f32 %v303_v40, %v302_v43  ;;  %v239_v43 = vmul.f32 %v1254_v53, %v1254_v53  ;;  %2151 = vst [vmem:[#allocation6_spill] sm:$0xff] %v1324_v45 }
  0x1e   :  { %v111_v18 = vadd.f32 %v110_v0, %v109_v9  ;;  %v311_v0 = vsel %vm82_vm0, %v232_v51, 0.0 }
  0x1f   :  { %v306_v55 = vadd.f32 %v305_v46, %v304_v49 }
  0x20   :  { %v113_v24 = vadd.f32 %v112_v12, %v111_v18  ;;  %v235_v12 = vmul.f32 %v1220_v29, %v1220_v29 }
  0x21   :  { %v308_v61 = vadd.f32 %v307_v52, %v306_v55  ;;  %v1334_v52 = vld [vmem:[%s2126_s0 + $0xf8] sm:$0xff] }
  0x22   :  { %v115_v30 = vadd.f32 %v114_v20, %v113_v24  ;;  %v132_v20 = vsel %vm82_vm0, %v1274_v5, 0.0  ;;  %v1294_v24 = vld [vmem:[%s2126_s0 + $0xd8] sm:$0xff]  ;;  %2152 = vst [vmem:[#allocation7_spill] sm:$0xff] %v1334_v52  ;;  %v144_v63 = vsel %vm82_vm0, %v1334_v52, 0.0 }
  0x23   :  { %v310_v9 = vadd.f32 %v309_v58, %v308_v61  ;;  %2148 = vst [vmem:[#allocation3_spill] sm:$0xff] %v1294_v24  ;;  %v136_v34 = vsel %vm82_vm0, %v1294_v24, 0.0  ;;  %v325_v58 = vsel %vm82_vm0, %v239_v43, 0.0  ;;  %v246_v43 = vmul.f32 %v1324_v45, %v1324_v45 }
  0x24   :  { %v117_v36 = vadd.f32 %v116_v26, %v115_v30  ;;  %v317_v30 = vsel %vm82_vm0, %v235_v12, 0.0 }
  0x25   :  { %v312_v19 = vadd.f32 %v311_v0, %v310_v9  ;;  %v242_v0 = vmul.f32 %v1284_v15, %v1284_v15  ;;  %v1354_v9 = vld [vmem:[%s2126_s0 + $0x108] sm:$0xff] }
  0x26   :  { %v119_v42 = vadd.f32 %v118_v32, %v117_v36  ;;  %v238_v36 = vmul.f32 %v1244_v47, %v1244_v47 }
  0x27   :  { %v314_v26 = vadd.f32 %v313_v13, %v312_v19  ;;  %v329_v19 = vsel %vm82_vm0, %v241_v57, 0.0 }
  0x28   :  { %v121_v48 = vadd.f32 %v120_v38, %v119_v42  ;;  %v1314_v38 = vld [vmem:[%s2126_s0 + $0xe8] sm:$0xff]  ;;  %v138_v42 = vsel %vm82_vm0, %v1304_v31, 0.0  ;;  %v323_v51 = vsel %vm82_vm0, %v238_v36, 0.0 }
  0x29   :  { %v316_v33 = vadd.f32 %v315_v22, %v314_v26  ;;  %2150 = vst [vmem:[#allocation5_spill] sm:$0xff] %v1314_v38  ;;  %v140_v49 = vsel %vm82_vm0, %v1314_v38, 0.0  ;;  %v244_v26 = vmul.f32 %v1304_v31, %v1304_v31 }
  0x2a   :  { %v123_v54 = vadd.f32 %v122_v44, %v121_v48  ;;  %v321_v44 = vsel %vm82_vm0, %v237_v28, 0.0  ;;  %v1374_v28 = vld [vmem:[%s2126_s0 + $0x118] sm:$0xff] }
  0x2b   :  { %v318_v40 = vadd.f32 %v317_v30, %v316_v33 }
  0x2c   :  { %v125_v60 = vadd.f32 %v124_v50, %v123_v54  ;;  %v240_v50 = vmul.f32 %v1264_v59, %v1264_v59 }
  0x2d   :  { %v320_v48 = vadd.f32 %v319_v37, %v318_v40  ;;  %v1384_v37 = vld [vmem:[%s2126_s0 + $0x120] sm:$0xff] }
  0x2e   :  { %v127_v6 = vadd.f32 %v126_v56, %v125_v60  ;;  %v142_v56 = vsel %vm82_vm0, %v1324_v45, 0.0  ;;  %v1344_v60 = vld [vmem:[%s2126_s0 + $0x100] sm:$0xff] }
  0x2f   :  { %v322_v55 = vadd.f32 %v321_v44, %v320_v48  ;;  %v146_v13 = vsel %vm82_vm0, %v1344_v60, 0.0  ;;  %v335_v44 = vsel %vm82_vm0, %v244_v26, 0.0 }
  0x30   :  { %v129_v18 = vadd.f32 %v128_v62, %v127_v6  ;;  %v327_v6 = vsel %vm82_vm0, %v240_v50, 0.0  ;;  %v154_v50 = vsel %vm82_vm0, %v1384_v37, 0.0 }
  0x31   :  { %v324_v62 = vadd.f32 %v323_v51, %v322_v55  ;;  %v247_v51 = vmul.f32 %v1334_v52, %v1334_v52  ;;  %v1404_v55 = vld [vmem:[%s2126_s0 + $0x130] sm:$0xff] }
  0x32   :  { %v131_v25 = vadd.f32 %v130_v10, %v129_v18  ;;  %v243_v18 = vmul.f32 %v1294_v24, %v1294_v24 }
  0x33   :  { %v326_v12 = vadd.f32 %v325_v58, %v324_v62  ;;  %v339_v62 = vsel %vm82_vm0, %v246_v43, 0.0 }
  0x34   :  { %v133_v32 = vadd.f32 %v132_v20, %v131_v25  ;;  %v1364_v20 = vld [vmem:[%s2126_s0 + $0x110] sm:$0xff]  ;;  %v148_v25 = vsel %vm82_vm0, %v1354_v9, 0.0  ;;  %v333_v36 = vsel %vm82_vm0, %v243_v18, 0.0  ;;  %v1424_v18 = vld [vmem:[%s2126_s0 + $0x140] sm:$0xff] }
  0x35   :  { %v328_v22 = vadd.f32 %v327_v6, %v326_v12  ;;  %v150_v33 = vsel %vm82_vm0, %v1364_v20, 0.0  ;;  %v249_v12 = vmul.f32 %v1354_v9, %v1354_v9 }
  0x36   :  { %v135_v39 = vadd.f32 %v134_v27, %v133_v32  ;;  %v331_v27 = vsel %vm82_vm0, %v242_v0, 0.0 }
  0x37   :  { %v330_v32 = vadd.f32 %v329_v19, %v328_v22 }
  0x38   :  { %v137_v46 = vadd.f32 %v136_v34, %v135_v39  ;;  %v245_v34 = vmul.f32 %v1314_v38, %v1314_v38 }
  0x39   :  { %v332_v40 = vadd.f32 %v331_v27, %v330_v32  ;;  %v1434_v27 = vld [vmem:[%s2126_s0 + $0x148] sm:$0xff] }
  0x3a   :  { %v139_v54 = vadd.f32 %v138_v42, %v137_v46  ;;  %v152_v42 = vsel %vm82_vm0, %v1374_v28, 0.0  ;;  %v1394_v46 = vld [vmem:[%s2126_s0 + $0x128] sm:$0xff]  ;;  %v164_v43 = vsel %vm82_vm0, %v1434_v27, 0.0 }
  0x3b   :  { %v156_v58 = vsel %vm82_vm0, %v1394_v46, 0.0 }
  0x3c   :  { %v141_v61 = vadd.f32 %v140_v49, %v139_v54  ;;  %v334_v49 = vadd.f32 %v333_v36, %v332_v40  ;;  %v337_v54 = vsel %vm82_vm0, %v245_v34, 0.0  ;;  %v251_v34 = vmul.f32 %v1374_v28, %v1374_v28 }
  0x3d   :  { %v345_v36 = vsel %vm82_vm0, %v249_v12, 0.0  ;;  %v1474_v12 = vld [vmem:[%s2126_s0 + $0x168] sm:$0xff] }
  0x3e   :  { %v143_v10 = vadd.f32 %v142_v56, %v141_v61  ;;  %v336_v57 = vadd.f32 %v335_v44, %v334_v49  ;;  %v248_v61 = vmul.f32 %v1344_v60, %v1344_v60  ;;  %v252_v44 = vmul.f32 %v1384_v37, %v1384_v37  ;;  %v1454_v49 = vld [vmem:[%s2126_s0 + $0x158] sm:$0xff]  ;;  %2156 = vst [vmem:[#allocation11_spill] sm:$0xff] %v1474_v12 }
  0x3f   :  { %2154 = vst [vmem:[#allocation9_spill] sm:$0xff] %v1454_v49 }
  0x40   :  { %v145_v21 = vadd.f32 %v144_v63, %v143_v10  ;;  %v1414_v63 = vld [vmem:[%s2126_s0 + $0x138] sm:$0xff]  ;;  %v338_v6 = vadd.f32 %v337_v54, %v336_v57  ;;  %v158_v10 = vsel %vm82_vm0, %v1404_v55, 0.0  ;;  %v343_v26 = vsel %vm82_vm0, %v248_v61, 0.0 }
  0x41   :  { %v160_v22 = vsel %vm82_vm0, %v1414_v63, 0.0  ;;  %v349_v57 = vsel %vm82_vm0, %v251_v34, 0.0  ;;  %v256_v34 = vmul.f32 %v1424_v18, %v1424_v18 }
  0x42   :  { %v147_v30 = vadd.f32 %v146_v13, %v145_v21  ;;  %v341_v13 = vsel %vm82_vm0, %v247_v51, 0.0  ;;  %v340_v21 = vadd.f32 %v339_v62, %v338_v6  ;;  %v254_v6 = vmul.f32 %v1404_v55, %v1404_v55 }
  0x44   :  { %v149_v39 = vadd.f32 %v148_v25, %v147_v30  ;;  %v250_v25 = vmul.f32 %v1364_v20, %v1364_v20  ;;  %v342_v32 = vadd.f32 %v341_v13, %v340_v21 }
  0x46   :  { %v151_v48 = vadd.f32 %v150_v33, %v149_v39  ;;  %v162_v33 = vsel %vm82_vm0, %v1424_v18, 0.0  ;;  %v1444_v39 = vld [vmem:[%s2126_s0 + $0x150] sm:$0xff] }
  0x47   :  { %2153 = vst [vmem:[#allocation8_spill] sm:$0xff] %v1444_v39  ;;  %v166_v54 = vsel %vm82_vm0, %v1444_v39, 0.0 }
  0x48   :  { %v153_v56 = vadd.f32 %v152_v42, %v151_v48  ;;  %v344_v42 = vadd.f32 %v343_v26, %v342_v32  ;;  %v347_v48 = vsel %vm82_vm0, %v250_v25, 0.0  ;;  %v1484_v26 = vld [vmem:[%s2126_s0 + $0x170] sm:$0xff] }
  0x49   :  { %2157 = vst [vmem:[#allocation12_spill] sm:$0xff] %v1484_v26 }
  0x4a   :  { %v155_v0 = vadd.f32 %v154_v50, %v153_v56  ;;  %v346_v51 = vadd.f32 %v345_v36, %v344_v42  ;;  %v253_v56 = vmul.f32 %v1394_v46, %v1394_v46  ;;  %v355_v36 = vsel %vm82_vm0, %v254_v6, 0.0 }
  0x4c   :  { %v157_v19 = vadd.f32 %v156_v58, %v155_v0  ;;  %v1464_v58 = vld [vmem:[%s2126_s0 + $0x160] sm:$0xff]  ;;  %v348_v62 = vadd.f32 %v347_v48, %v346_v51  ;;  %v168_v0 = vsel %vm82_vm0, %v1454_v49, 0.0  ;;  %v353_v25 = vsel %vm82_vm0, %v253_v56, 0.0 }
  0x4d   :  { %2155 = vst [vmem:[#allocation10_spill] sm:$0xff] %v1464_v58  ;;  %v170_v21 = vsel %vm82_vm0, %v1464_v58, 0.0  ;;  %v257_v48 = vmul.f32 %v1434_v27, %v1434_v27  ;;  %v1504_v51 = vld [vmem:[%s2126_s0 + $0x180] sm:$0xff] }
  0x4e   :  { %v159_v30 = vadd.f32 %v158_v10, %v157_v19  ;;  %v351_v10 = vsel %vm82_vm0, %v252_v44, 0.0  ;;  %v350_v19 = vadd.f32 %v349_v57, %v348_v62  ;;  %v174_v44 = vsel %vm82_vm0, %v1484_v26, 0.0 }
  0x4f   :  { %v359_v62 = vsel %vm82_vm0, %v256_v34, 0.0 }
  0x50   :  { %v161_v40 = vadd.f32 %v160_v22, %v159_v30  ;;  %v255_v22 = vmul.f32 %v1414_v63, %v1414_v63  ;;  %v352_v32 = vadd.f32 %v351_v10, %v350_v19  ;;  %v259_v19 = vmul.f32 %v1454_v49, %v1454_v49 }
  0x52   :  { %v163_v50 = vadd.f32 %v162_v33, %v161_v40  ;;  %v172_v33 = vsel %vm82_vm0, %v1474_v12, 0.0  ;;  %v1494_v40 = vld [vmem:[%s2126_s0 + $0x178] sm:$0xff] }
  0x53   :  { %2158 = vst [vmem:[#allocation13_spill] sm:$0xff] %v1494_v40  ;;  %v176_v57 = vsel %vm82_vm0, %v1494_v40, 0.0 }
  0x54   :  { %v165_v61 = vadd.f32 %v164_v43, %v163_v50  ;;  %v354_v43 = vadd.f32 %v353_v25, %v352_v32  ;;  %v357_v50 = vsel %vm82_vm0, %v255_v22, 0.0  ;;  %v1524_v22 = vld [vmem:[%s2126_s0 + $0x190] sm:$0xff] }
  0x56   :  { %v167_v13 = vadd.f32 %v166_v54, %v165_v61  ;;  %v356_v56 = vadd.f32 %v355_v36, %v354_v43  ;;  %v258_v61 = vmul.f32 %v1444_v39, %v1444_v39  ;;  %v1534_v36 = vld [vmem:[%s2126_s0 + $0x198] sm:$0xff] }
  0x58   :  { %v169_v30 = vadd.f32 %v168_v0, %v167_v13  ;;  %v1514_v0 = vld [vmem:[%s2126_s0 + $0x188] sm:$0xff]  ;;  %v358_v10 = vadd.f32 %v357_v50, %v356_v56  ;;  %v178_v13 = vsel %vm82_vm0, %v1504_v51, 0.0  ;;  %v363_v34 = vsel %vm82_vm0, %v258_v61, 0.0 }
  0x59   :  { %v180_v32 = vsel %vm82_vm0, %v1514_v0, 0.0  ;;  %v365_v50 = vsel %vm82_vm0, %v259_v19, 0.0  ;;  %v184_v61 = vsel %vm82_vm0, %v1534_v36, 0.0 }
  0x5a   :  { %v171_v42 = vadd.f32 %v170_v21, %v169_v30  ;;  %v361_v21 = vsel %vm82_vm0, %v257_v48, 0.0  ;;  %v360_v30 = vadd.f32 %v359_v62, %v358_v10  ;;  %v261_v48 = vmul.f32 %v1474_v12, %v1474_v12  ;;  %v1554_v10 = vld [vmem:[%s2126_s0 + $0x1a8] sm:$0xff] }
  0x5b   :  { %v262_v62 = vmul.f32 %v1484_v26, %v1484_v26 }
  0x5c   :  { %v173_v54 = vadd.f32 %v172_v33, %v171_v42  ;;  %v260_v33 = vmul.f32 %v1464_v58, %v1464_v58  ;;  %v362_v43 = vadd.f32 %v361_v21, %v360_v30  ;;  %v369_v30 = vsel %vm82_vm0, %v261_v48, 0.0 }
  0x5e   :  { %v175_v6 = vadd.f32 %v174_v44, %v173_v54  ;;  %v182_v44 = vsel %vm82_vm0, %v1524_v22, 0.0  ;;  %v1544_v54 = vld [vmem:[%s2126_s0 + $0x1a0] sm:$0xff] }
  0x5f   :  { %v186_v21 = vsel %vm82_vm0, %v1544_v54, 0.0 }
  0x60   :  { %v177_v25 = vadd.f32 %v176_v57, %v175_v6  ;;  %v364_v57 = vadd.f32 %v363_v34, %v362_v43  ;;  %v367_v6 = vsel %vm82_vm0, %v260_v33, 0.0  ;;  %v264_v43 = vmul.f32 %v1504_v51, %v1504_v51 }
  0x62   :  { %v179_v42 = vadd.f32 %v178_v13, %v177_v25  ;;  %v366_v19 = vadd.f32 %v365_v50, %v364_v57  ;;  %v263_v25 = vmul.f32 %v1494_v40, %v1494_v40  ;;  %v1574_v50 = vld [vmem:[%s2126_s0 + $0x1b8] sm:$0xff] }
  0x63   :  { %v192_v40 = vsel %vm82_vm0, %v1574_v50, 0.0 }
  0x64   :  { %v181_v56 = vadd.f32 %v180_v32, %v179_v42  ;;  %v1564_v32 = vld [vmem:[%s2126_s0 + $0x1b0] sm:$0xff]  ;;  %v368_v34 = vadd.f32 %v367_v6, %v366_v19  ;;  %v188_v42 = vsel %vm82_vm0, %v1554_v10, 0.0  ;;  %v373_v6 = vsel %vm82_vm0, %v263_v25, 0.0 }
  0x65   :  { %v190_v57 = vsel %vm82_vm0, %v1564_v32, 0.0 }
  0x66   :  { %v183_v13 = vadd.f32 %v182_v44, %v181_v56  ;;  %v371_v44 = vsel %vm82_vm0, %v262_v62, 0.0  ;;  %v370_v56 = vadd.f32 %v369_v30, %v368_v34  ;;  %v375_v30 = vsel %vm82_vm0, %v264_v43, 0.0 }
  0x68   :  { %v185_v33 = vadd.f32 %v184_v61, %v183_v13  ;;  %v265_v61 = vmul.f32 %v1514_v0, %v1514_v0  ;;  %v1584_v13 = vld [vmem:[%s2126_s0 + $0x1c0] sm:$0xff]  ;;  %v372_v19 = vadd.f32 %v371_v44, %v370_v56 }
  0x69   :  { %v194_v26 = vsel %vm82_vm0, %v1584_v13, 0.0 }
  0x6a   :  { %v187_v48 = vadd.f32 %v186_v21, %v185_v33  ;;  %v266_v21 = vmul.f32 %v1524_v22, %v1524_v22  ;;  %v1594_v33 = vld [vmem:[%s2126_s0 + $0x1c8] sm:$0xff]  ;;  %v374_v34 = vadd.f32 %v373_v6, %v372_v19  ;;  %v377_v44 = vsel %vm82_vm0, %v265_v61, 0.0 }
  0x6b   :  { %v196_v52 = vsel %vm82_vm0, %v1594_v33, 0.0 }
  0x6c   :  { %v189_v62 = vadd.f32 %v188_v42, %v187_v48  ;;  %v267_v42 = vmul.f32 %v1534_v36, %v1534_v36  ;;  %v1604_v48 = vld [vmem:[%s2126_s0 + $0x1d0] sm:$0xff]  ;;  %v376_v56 = vadd.f32 %v375_v30, %v374_v34  ;;  %v379_v6 = vsel %vm82_vm0, %v266_v21, 0.0 }
  0x6d   :  { %v198_v45 = vsel %vm82_vm0, %v1604_v48, 0.0  ;;  %v274_v49 = vmul.f32 %v1604_v48, %v1604_v48 }
  0x6e   :  { %v191_v25 = vadd.f32 %v190_v57, %v189_v62  ;;  %v268_v57 = vmul.f32 %v1544_v54, %v1544_v54  ;;  %v1614_v62 = vld [vmem:[%s2126_s0 + $0x1d8] sm:$0xff]  ;;  %v378_v19 = vadd.f32 %v377_v44, %v376_v56  ;;  %v381_v30 = vsel %vm82_vm0, %v267_v42, 0.0 }
  0x6f   :  { %2159 = vst [vmem:[#allocation14_spill] sm:$0xff] %v1614_v62  ;;  %v200_v12 = vsel %vm82_vm0, %v1614_v62, 0.0 }
  0x70   :  { %v193_v43 = vadd.f32 %v192_v40, %v191_v25  ;;  %v269_v40 = vmul.f32 %v1554_v10, %v1554_v10  ;;  %v1624_v25 = vld [vmem:[%s2126_s0 + $0x1e0] sm:$0xff]  ;;  %v380_v34 = vadd.f32 %v379_v6, %v378_v19  ;;  %v383_v44 = vsel %vm82_vm0, %v268_v57, 0.0 }
  0x71   :  { %2160 = vst [vmem:[#allocation15_spill] sm:$0xff] %v1624_v25  ;;  %v202_v58 = vsel %vm82_vm0, %v1624_v25, 0.0 }
  0x72   :  { %v195_v61 = vadd.f32 %v194_v26, %v193_v43  ;;  %v270_v26 = vmul.f32 %v1564_v32, %v1564_v32  ;;  %v1634_v43 = vld [vmem:[%s2126_s0 + $0x1e8] sm:$0xff]  ;;  %v382_v56 = vadd.f32 %v381_v30, %v380_v34  ;;  %v385_v6 = vsel %vm82_vm0, %v269_v40, 0.0 }
  0x73   :  { %2161 = vst [vmem:[#allocation16_spill] sm:$0xff] %v1634_v43  ;;  %v204_v38 = vsel %vm82_vm0, %v1634_v43, 0.0 }
  0x74   :  { %v197_v21 = vadd.f32 %v196_v52, %v195_v61  ;;  %v271_v52 = vmul.f32 %v1574_v50, %v1574_v50  ;;  %v1644_v61 = vld [vmem:[%s2126_s0 + $0x1f0] sm:$0xff]  ;;  %v384_v19 = vadd.f32 %v383_v44, %v382_v56  ;;  %v387_v30 = vsel %vm82_vm0, %v270_v26, 0.0 }
  0x75   :  { %2162 = vst [vmem:[#allocation17_spill] sm:$0xff] %v1644_v61  ;;  %v206_v31 = vsel %vm82_vm0, %v1644_v61, 0.0 }
  0x76   :  { %v199_v42 = vadd.f32 %v198_v45, %v197_v21  ;;  %v272_v45 = vmul.f32 %v1584_v13, %v1584_v13  ;;  %v1654_v21 = vld [vmem:[%s2126_s0 + $0x1f8] sm:$0xff]  ;;  %v386_v34 = vadd.f32 %v385_v6, %v384_v19  ;;  %v389_v44 = vsel %vm82_vm0, %v271_v52, 0.0 }
  0x77   :  { %2163 = vst [vmem:[#allocation18_spill] sm:$0xff] %v1654_v21  ;;  %v208_v26 = vsel %vm82_vm0, %v1654_v21, 0.0  ;;  %v395_v52 = vsel %vm82_vm0, %v274_v49, 0.0 }
  0x78   :  { %v201_v57 = vadd.f32 %v200_v12, %v199_v42  ;;  %v273_v12 = vmul.f32 %v1594_v33, %v1594_v33  ;;  %v388_v56 = vadd.f32 %v387_v30, %v386_v34  ;;  %v391_v39 = vsel %vm82_vm0, %v272_v45, 0.0 }
  0x79   :  { %v277_v34 = vmul.f32 %v1634_v43, %v1634_v43 }
  0x7a   :  { %v203_v40 = vadd.f32 %v202_v58, %v201_v57  ;;  %v390_v6 = vadd.f32 %v389_v44, %v388_v56  ;;  %v275_v57 = vmul.f32 %v1614_v62, %v1614_v62  ;;  %v393_v19 = vsel %vm82_vm0, %v273_v12, 0.0 }
  0x7b   :  { %v401_v49 = vsel %vm82_vm0, %v277_v34, 0.0 }
  0x7c   :  { %v205_v42 = vadd.f32 %v204_v38, %v203_v40  ;;  %v392_v15 = vadd.f32 %v391_v39, %v390_v6  ;;  %v276_v38 = vmul.f32 %v1624_v25, %v1624_v25 }
  0x7e   :  { %v207_v58 = vadd.f32 %v206_v31, %v205_v42  ;;  %v394_v40 = vadd.f32 %v393_v19, %v392_v15  ;;  %v397_v31 = vsel %vm82_vm0, %v275_v57, 0.0  ;;  %v278_v42 = vmul.f32 %v1644_v61, %v1644_v61 }
  0x7f   :  { %v399_v12 = vsel %vm82_vm0, %v276_v38, 0.0 }
  0x80   :  { %v209_v24 = vadd.f32 %v208_v26, %v207_v58  ;;  %v396_v44 = vadd.f32 %v395_v52, %v394_v40  ;;  %v279_v26 = vmul.f32 %v1654_v21, %v1654_v21  ;;  %v403_v58 = vsel %vm82_vm0, %v278_v42, 0.0 }
  0x82   :  { %v210_v30 = vrot.slane %v209_v24, 4  ;;  %v398_v56 = vadd.f32 %v397_v31, %v396_v44 }
  0x84   :  { %v211_v45 = vadd.f32 %v210_v30, %v209_v24  ;;  %v400_v15 = vadd.f32 %v399_v12, %v398_v56  ;;  %v405_v24 = vsel %vm82_vm0, %v279_v26, 0.0 }
  0x86   :  { %v212_v39 = vrot.slane %v211_v45, 2  ;;  %v402_v19 = vadd.f32 %v401_v49, %v400_v15 }
  0x88   :  { %v213_v6 = vadd.f32 %v212_v39, %v211_v45  ;;  %v404_v57 = vadd.f32 %v403_v58, %v402_v19 }
  0x8a   :  { %v214_v52 = vrot.slane %v213_v6, 1  ;;  %v406_v30 = vadd.f32 %v405_v24, %v404_v57 }
  0x8c   :  { %v407_v40 = vrot.slane %v406_v30, 4  ;;  %v215_v61 = vadd.f32 %v214_v52, %v213_v6 }
  0x8e   :  { %v408_v38 = vadd.f32 %v407_v40, %v406_v30  ;;  %v413_v44 = vmul.f32 0.001953125, %v215_v61 }
  0x90   :  { %v409_v43 = vrot.slane %v408_v38, 2  ;;  %v415_v62 = vmul.f32 %v413_v44, %v413_v44 }
  0x92   :  { %v410_v31 = vadd.f32 %v409_v43, %v408_v38  ;;  %v418_v43 = vld [vmem:[%s2127_s1] sm:$0x1] }
  0x94   :  { %v411_v25 = vrot.slane %v410_v31, 1 }
  0x96   :  { %v412_v21 = vadd.f32 %v411_v25, %v410_v31 }
  0x98   :  { %v414_v34 = vmul.f32 0.001953125, %v412_v21 }
  0x9a   :  { %v416_v12 = vsub.f32 %v414_v34, %v415_v62  ;;  %v431_v62 = vld [vmem:[%s2128_s2] sm:$0x1] }
  0x9c   :  { %v417_v56 = vmax.f32 %v416_v12, 0.0 }
  0x9e   :  { %v419_v42 = vadd.f32 1e-05, %v417_v56 }
  0xa0   :  { %1045 = vrsqrt.f32 %v419_v42  ;;  %vm426_vm1 = vweird.f32 %v419_v42 }
  0xa6   :  { %v1046_v45 = vpop.eup %1045 }
  0xa7   :  { %v421_v39 = vmul.f32 %v1046_v45, %v419_v42  ;;  %vm427_vm2 = vweird.f32 %v1046_v45 }
  0xa8   :  { %vm428_vm3 = vmor %vm426_vm1, %vm427_vm2 }
  0xa9   :  { %v422_v26 = vmul.f32 %v1046_v45, %v421_v39 }
  0xab   :  { %v423_v49 = vmul.f32 0.5, %v422_v26 }
  0xad   :  { %v424_v15 = vsub.f32 1.5, %v423_v49 }
  0xaf   :  { %v425_v61 = vmul.f32 %v1046_v45, %v424_v15 }
  0xb1   :  { %v429_v25 = vsel %vm428_vm3, %v1046_v45, %v425_v61 }
  0xb2   :  { %v430_v58 = vmul.f32 %v429_v25, %v418_v43 }
  0xb4   :  { %v432_v21 = vmul.f32 %v430_v58, %v413_v44  ;;  %v1689_v6 = vperm.slane %v430_v58, 0 }
  0xb6   :  { %v433_v19 = vsub.f32 %v431_v62, %v432_v21  ;;  %v437_v24 = vmul.f32 %v1689_v6, %v1086_v1  ;;  %v438_v57 = vmul.f32 %v1689_v6, %v1091_v2  ;;  %v453_v52 = vmul.f32 %v1689_v6, %v1197_v8 }
  0xb7   :  { %v454_v30 = vmul.f32 %v1689_v6, %v1204_v16  ;;  %v469_v40 = vmul.f32 %v1689_v6, %v1344_v60  ;;  %v470_v38 = vmul.f32 %v1689_v6, %v1354_v9  ;;  %v485_v31 = vmul.f32 %v1689_v6, %v1504_v51 }
  0xb8   :  { %v1705_v44 = vperm.slane %v433_v19, 0  ;;  %v486_v1 = vmul.f32 %v1689_v6, %v1514_v0  ;;  %v439_v62 = vmul.f32 %v1689_v6, %v1096_v3  ;;  %v440_v21 = vmul.f32 %v1689_v6, %v1101_v4 }
  0xb9   :  { %v455_v19 = vmul.f32 %v1689_v6, %v1212_v23  ;;  %v472_v3 = vmul.f32 %v1689_v6, %v1374_v28  ;;  %v487_v4 = vmul.f32 %v1689_v6, %v1524_v22 }
  0xba   :  { %v504_v2 = vadd.f32 %v1705_v44, %v437_v24  ;;  %v505_v8 = vadd.f32 %v1705_v44, %v438_v57  ;;  %v520_v16 = vadd.f32 %v1705_v44, %v453_v52  ;;  %v521_v34 = vadd.f32 %v1705_v44, %v454_v30 }
  0xbb   :  { %v536_v60 = vadd.f32 %v1705_v44, %v469_v40  ;;  %v537_v9 = vadd.f32 %v1705_v44, %v470_v38  ;;  %v552_v12 = vadd.f32 %v1705_v44, %v485_v31  ;;  %v553_v51 = vadd.f32 %v1705_v44, %v486_v1 }
  0xbc   :  { %v568_v56 = vmax.f32 %v504_v2, 0.0  ;;  %v569_v42 = vmax.f32 %v505_v8, 0.0  ;;  %v584_v45 = vmax.f32 %v520_v16, 0.0  ;;  %v585_v0 = vmax.f32 %v521_v34, 0.0 }
  0xbd   :  { %v600_v39 = vmax.f32 %v536_v60, 0.0  ;;  %v601_v26 = vmax.f32 %v537_v9, 0.0  ;;  %v616_v49 = vmax.f32 %v552_v12, 0.0  ;;  %v617_v15 = vmax.f32 %v553_v51, 0.0 }
  0xbe   :  { %v632_v43 = vpack.c.bf16 %v569_v42, %v568_v56  ;;  %v640_v61 = vpack.c.bf16 %v585_v0, %v584_v45  ;;  %v456_v24 = vmul.f32 %v1689_v6, %v1220_v29  ;;  %v471_v57 = vmul.f32 %v1689_v6, %v1364_v20 }
  0xbf   :  { %v648_v25 = vpack.c.bf16 %v601_v26, %v600_v39  ;;  %v656_v58 = vpack.c.bf16 %v617_v15, %v616_v49  ;;  %v488_v52 = vmul.f32 %v1689_v6, %v1534_v36  ;;  %v506_v23 = vadd.f32 %v1705_v44, %v439_v62 }
  0xc0   :  { %1009 = vmatmul.msk.bf16.vlgmr.msra.gmra.mxu0 %vm82_vm0, %v632_v43  ;;  %1017 = vmatmul.msk.bf16.vlgmr.msra.gmra.mxu1 %vm82_vm0, %v640_v61  ;;  %v507_v29 = vadd.f32 %v1705_v44, %v440_v21  ;;  %v522_v30 = vadd.f32 %v1705_v44, %v455_v19  ;;  %v523_v20 = vadd.f32 %v1705_v44, %v456_v24 }
  0xc1   :  { %1025 = vmatmul.msk.bf16.vlgmr.msra.gmra.mxu2 %vm82_vm0, %v648_v25  ;;  %1033 = vmatmul.msk.bf16.vlgmr.msra.gmra.mxu3 %vm82_vm0, %v656_v58  ;;  %v538_v40 = vadd.f32 %v1705_v44, %v471_v57  ;;  %v539_v38 = vadd.f32 %v1705_v44, %v472_v3  ;;  %v554_v28 = vadd.f32 %v1705_v44, %v487_v4  ;;  %v570_v22 = vmax.f32 %v506_v23, 0.0 }
  0xc2   :  { %v555_v31 = vadd.f32 %v1705_v44, %v488_v52  ;;  %v571_v1 = vmax.f32 %v507_v29, 0.0  ;;  %v586_v2 = vmax.f32 %v522_v30, 0.0  ;;  %v587_v36 = vmax.f32 %v523_v20, 0.0 }
  0xc3   :  { %v602_v8 = vmax.f32 %v538_v40, 0.0  ;;  %v603_v16 = vmax.f32 %v539_v38, 0.0  ;;  %v618_v34 = vmax.f32 %v554_v28, 0.0  ;;  %v441_v42 = vmul.f32 %v1689_v6, %v1110_v7 }
  0xc4   :  { %v619_v60 = vmax.f32 %v555_v31, 0.0  ;;  %v633_v9 = vpack.c.bf16 %v571_v1, %v570_v22  ;;  %v641_v12 = vpack.c.bf16 %v587_v36, %v586_v2  ;;  %v442_v45 = vmul.f32 %v1689_v6, %v1119_v11 }
  0xc5   :  { %v649_v51 = vpack.c.bf16 %v603_v16, %v602_v8  ;;  %v457_v0 = vmul.f32 %v1689_v6, %v1228_v35  ;;  %v458_v39 = vmul.f32 %v1689_v6, %v1236_v41  ;;  %v473_v26 = vmul.f32 %v1689_v6, %v1384_v37 }
  0xc6   :  { %v657_v56 = vpack.c.bf16 %v619_v60, %v618_v34  ;;  %v474_v7 = vmul.f32 %v1689_v6, %v1394_v46  ;;  %v489_v11 = vmul.f32 %v1689_v6, %v1544_v54  ;;  %v490_v49 = vmul.f32 %v1689_v6, %v1554_v10 }
  0xc7   :  { %v508_v35 = vadd.f32 %v1705_v44, %v441_v42  ;;  %v509_v41 = vadd.f32 %v1705_v44, %v442_v45  ;;  %v524_v15 = vadd.f32 %v1705_v44, %v457_v0  ;;  %v525_v37 = vadd.f32 %v1705_v44, %v458_v39  ;;  %v1047_v45 = vld [vmem:[%s2126_s0 + $0x40] sm:$0xff]  ;;  %v1048_v39 = vld [vmem:[%s2126_s0 + $0x48] sm:$0xff] }
  0xc8   :  { %v540_v43 = vadd.f32 %v1705_v44, %v473_v26  ;;  %v541_v61 = vadd.f32 %v1705_v44, %v474_v7  ;;  %v556_v46 = vadd.f32 %v1705_v44, %v489_v11  ;;  %v557_v25 = vadd.f32 %v1705_v44, %v490_v49 }
  0xc9   :  { %v572_v54 = vmax.f32 %v508_v35, 0.0  ;;  %v573_v58 = vmax.f32 %v509_v41, 0.0  ;;  %v588_v62 = vmax.f32 %v524_v15, 0.0  ;;  %v589_v10 = vmax.f32 %v525_v37, 0.0 }
  0xca   :  { %v604_v21 = vmax.f32 %v540_v43, 0.0  ;;  %v605_v19 = vmax.f32 %v541_v61, 0.0  ;;  %v620_v24 = vmax.f32 %v556_v46, 0.0  ;;  %v621_v57 = vmax.f32 %v557_v25, 0.0 }
  0xcb   :  { %v634_v3 = vpack.c.bf16 %v573_v58, %v572_v54  ;;  %v642_v4 = vpack.c.bf16 %v589_v10, %v588_v62  ;;  %v443_v29 = vmul.f32 %v1689_v6, %v1126_v14  ;;  %v444_v30 = vmul.f32 %v1689_v6, %v1133_v17 }
  0xcc   :  { %v650_v52 = vpack.c.bf16 %v605_v19, %v604_v21  ;;  %v658_v23 = vpack.c.bf16 %v621_v57, %v620_v24  ;;  %v459_v20 = vmul.f32 %v1689_v6, %v1244_v47  ;;  %v460_v40 = vmul.f32 %v1689_v6, %v1254_v53 }
  0xcd   :  { %v475_v38 = vmul.f32 %v1689_v6, %v1404_v55  ;;  %v476_v14 = vmul.f32 %v1689_v6, %v1414_v63  ;;  %v491_v17 = vmul.f32 %v1689_v6, %v1564_v32  ;;  %v492_v28 = vmul.f32 %v1689_v6, %v1574_v50 }
  0xce   :  { %v510_v47 = vadd.f32 %v1705_v44, %v443_v29  ;;  %v511_v53 = vadd.f32 %v1705_v44, %v444_v30  ;;  %v526_v31 = vadd.f32 %v1705_v44, %v459_v20  ;;  %v527_v55 = vadd.f32 %v1705_v44, %v460_v40  ;;  %v2164_v30 = vld [vmem:[#allocation2_spill] sm:$0xff]  ;;  %v2165_v40 = vld [vmem:[#allocation3_spill] sm:$0xff] }
  0xcf   :  { %v542_v22 = vadd.f32 %v1705_v44, %v475_v38  ;;  %v543_v1 = vadd.f32 %v1705_v44, %v476_v14  ;;  %v558_v63 = vadd.f32 %v1705_v44, %v491_v17  ;;  %v559_v2 = vadd.f32 %v1705_v44, %v492_v28  ;;  %v2166_v14 = vld [vmem:[#allocation8_spill] sm:$0xff]  ;;  %v2167_v28 = vld [vmem:[#allocation9_spill] sm:$0xff] }
  0xd0   :  { %1010 = vmatmul.msk.bf16.gmra.mxu0 %vm82_vm0, %v633_v9  ;;  %1018 = vmatmul.msk.bf16.gmra.mxu1 %vm82_vm0, %v641_v12  ;;  %v574_v32 = vmax.f32 %v510_v47, 0.0  ;;  %v575_v36 = vmax.f32 %v511_v53, 0.0  ;;  %v590_v8 = vmax.f32 %v526_v31, 0.0  ;;  %v591_v50 = vmax.f32 %v527_v55, 0.0  ;;  %v2168_v31 = vld [vmem:[#allocation14_spill] sm:$0xff] }
  0xd1   :  { %1026 = vmatmul.msk.bf16.gmra.mxu2 %vm82_vm0, %v649_v51  ;;  %1034 = vmatmul.msk.bf16.gmra.mxu3 %vm82_vm0, %v657_v56  ;;  %v606_v16 = vmax.f32 %v542_v22, 0.0  ;;  %v607_v34 = vmax.f32 %v543_v1, 0.0  ;;  %v622_v60 = vmax.f32 %v558_v63, 0.0  ;;  %v623_v9 = vmax.f32 %v559_v2, 0.0 }
  0xd2   :  { %v635_v12 = vpack.c.bf16 %v575_v36, %v574_v32  ;;  %v643_v51 = vpack.c.bf16 %v591_v50, %v590_v8  ;;  %v445_v0 = vmul.f32 %v1047_v45, %v1689_v6  ;;  %v446_v26 = vmul.f32 %v1048_v39, %v1689_v6 }
  0xd3   :  { %v651_v56 = vpack.c.bf16 %v607_v34, %v606_v16  ;;  %v659_v42 = vpack.c.bf16 %v623_v9, %v622_v60  ;;  %v461_v7 = vmul.f32 %v1689_v6, %v1264_v59  ;;  %v462_v11 = vmul.f32 %v1689_v6, %v1274_v5 }
  0xd4   :  { %v477_v49 = vmul.f32 %v1689_v6, %v1424_v18  ;;  %v478_v35 = vmul.f32 %v1689_v6, %v1434_v27  ;;  %v493_v41 = vmul.f32 %v1689_v6, %v1584_v13  ;;  %v494_v15 = vmul.f32 %v1689_v6, %v1594_v33 }
  0xd5   :  { %v512_v59 = vadd.f32 %v1705_v44, %v445_v0  ;;  %v513_v5 = vadd.f32 %v1705_v44, %v446_v26  ;;  %v528_v37 = vadd.f32 %v1705_v44, %v461_v7  ;;  %v529_v18 = vadd.f32 %v1705_v44, %v462_v11  ;;  %v1051_v26 = vld [vmem:[%s2126_s0 + $0x60] sm:$0xff]  ;;  %v1052_v11 = vld [vmem:[%s2126_s0 + $0x68] sm:$0xff] }
  0xd6   :  { %v544_v43 = vadd.f32 %v1705_v44, %v477_v49  ;;  %v545_v61 = vadd.f32 %v1705_v44, %v478_v35  ;;  %v560_v27 = vadd.f32 %v1705_v44, %v493_v41  ;;  %v561_v46 = vadd.f32 %v1705_v44, %v494_v15  ;;  %v2169_v35 = vld [vmem:[#allocation4_spill] sm:$0xff]  ;;  %v2170_v15 = vld [vmem:[#allocation5_spill] sm:$0xff] }
  0xd7   :  { %v576_v13 = vmax.f32 %v512_v59, 0.0  ;;  %v577_v25 = vmax.f32 %v513_v5, 0.0  ;;  %v592_v54 = vmax.f32 %v528_v37, 0.0  ;;  %v593_v33 = vmax.f32 %v529_v18, 0.0  ;;  %v2171_v5 = vld [vmem:[#allocation10_spill] sm:$0xff]  ;;  %v2172_v18 = vld [vmem:[#allocation11_spill] sm:$0xff] }
  0xd8   :  { %v608_v58 = vmax.f32 %v544_v43, 0.0  ;;  %v609_v62 = vmax.f32 %v545_v61, 0.0  ;;  %v624_v10 = vmax.f32 %v560_v27, 0.0  ;;  %v625_v21 = vmax.f32 %v561_v46, 0.0  ;;  %v2173_v61 = vld [vmem:[#allocation15_spill] sm:$0xff]  ;;  %v2174_v46 = vld [vmem:[#allocation16_spill] sm:$0xff] }
  0xd9   :  { %v636_v19 = vpack.c.bf16 %v577_v25, %v576_v13  ;;  %v644_v24 = vpack.c.bf16 %v593_v33, %v592_v54  ;;  %v463_v20 = vmul.f32 %v1689_v6, %v2164_v30  ;;  %v464_v38 = vmul.f32 %v1689_v6, %v2165_v40 }
  0xda   :  { %v652_v57 = vpack.c.bf16 %v609_v62, %v608_v58  ;;  %v479_v17 = vmul.f32 %v1689_v6, %v2166_v14  ;;  %v480_v47 = vmul.f32 %v1689_v6, %v2167_v28  ;;  %v495_v53 = vmul.f32 %v1689_v6, %v1604_v48 }
  0xdb   :  { %v496_v55 = vmul.f32 %v1689_v6, %v2168_v31  ;;  %v530_v63 = vadd.f32 %v1705_v44, %v463_v20  ;;  %v531_v2 = vadd.f32 %v1705_v44, %v464_v38  ;;  %v449_v7 = vmul.f32 %v1051_v26, %v1689_v6  ;;  %v2175_v31 = vld [vmem:[#allocation6_spill] sm:$0xff] }
  0xdc   :  { %v546_v32 = vadd.f32 %v1705_v44, %v479_v17  ;;  %v547_v36 = vadd.f32 %v1705_v44, %v480_v47  ;;  %v562_v8 = vadd.f32 %v1705_v44, %v495_v53  ;;  %v450_v49 = vmul.f32 %v1052_v11, %v1689_v6  ;;  %v1053_v17 = vld [vmem:[%s2126_s0 + $0x70] sm:$0xff]  ;;  %v1054_v47 = vld [vmem:[%s2126_s0 + $0x78] sm:$0xff] }
  0xdd   :  { %v563_v50 = vadd.f32 %v1705_v44, %v496_v55  ;;  %v594_v34 = vmax.f32 %v530_v63, 0.0  ;;  %v595_v60 = vmax.f32 %v531_v2, 0.0  ;;  %v465_v41 = vmul.f32 %v1689_v6, %v2169_v35  ;;  %v2177_v63 = vld [vmem:[#allocation12_spill] sm:$0xff] }
  0xde   :  { %v610_v9 = vmax.f32 %v546_v32, 0.0  ;;  %v466_v59 = vmul.f32 %v1689_v6, %v2170_v15  ;;  %v481_v37 = vmul.f32 %v1689_v6, %v2171_v5  ;;  %v482_v43 = vmul.f32 %v1689_v6, %v2172_v18  ;;  %v2178_v32 = vld [vmem:[#allocation13_spill] sm:$0xff] }
  0xdf   :  { %v645_v45 = vpack.c.bf16 %v595_v60, %v594_v34  ;;  %v497_v27 = vmul.f32 %v1689_v6, %v2173_v61  ;;  %v498_v13 = vmul.f32 %v1689_v6, %v2174_v46  ;;  %v516_v25 = vadd.f32 %v1705_v44, %v449_v7 }
  0xe0   :  { %1011 = vmatmul.msk.bf16.gmra.mxu0 %vm82_vm0, %v634_v3  ;;  %1019 = vmatmul.msk.bf16.gmra.mxu1 %vm82_vm0, %v642_v4  ;;  %v660_v3 = vpack.c.bf16 %v625_v21, %v624_v10  ;;  %v1049_v4 = vld [vmem:[%s2126_s0 + $0x50] sm:$0xff]  ;;  %v517_v54 = vadd.f32 %v1705_v44, %v450_v49  ;;  %v532_v33 = vadd.f32 %v1705_v44, %v465_v41 }
  0xe1   :  { %1027 = vmatmul.msk.bf16.gmra.mxu2 %vm82_vm0, %v650_v52  ;;  %1035 = vmatmul.msk.bf16.gmra.mxu3 %vm82_vm0, %v658_v23  ;;  %v447_v52 = vmul.f32 %v1049_v4, %v1689_v6  ;;  %v1050_v23 = vld [vmem:[%s2126_s0 + $0x58] sm:$0xff]  ;;  %v533_v58 = vadd.f32 %v1705_v44, %v466_v59  ;;  %v548_v62 = vadd.f32 %v1705_v44, %v481_v37 }
  0xe2   :  { %v448_v29 = vmul.f32 %v1050_v23, %v1689_v6  ;;  %v549_v10 = vadd.f32 %v1705_v44, %v482_v43  ;;  %v564_v21 = vadd.f32 %v1705_v44, %v497_v27  ;;  %v451_v28 = vmul.f32 %v1053_v17, %v1689_v6 }
  0xe3   :  { %v514_v22 = vadd.f32 %v1705_v44, %v447_v52  ;;  %v597_v4 = vmax.f32 %v533_v58, 0.0  ;;  %v612_v52 = vmax.f32 %v548_v62, 0.0  ;;  %v452_v53 = vmul.f32 %v1054_v47, %v1689_v6 }
  0xe4   :  { %v515_v1 = vadd.f32 %v1705_v44, %v448_v29  ;;  %v613_v23 = vmax.f32 %v549_v10, 0.0  ;;  %v628_v29 = vmax.f32 %v564_v21, 0.0  ;;  %v467_v55 = vmul.f32 %v1689_v6, %v2175_v31 }
  0xe5   :  { %v578_v48 = vmax.f32 %v514_v22, 0.0  ;;  %v2176_v22 = vld [vmem:[#allocation7_spill] sm:$0xff]  ;;  %v483_v2 = vmul.f32 %v1689_v6, %v2177_v63  ;;  %v518_v34 = vadd.f32 %v1705_v44, %v451_v28  ;;  %v519_v60 = vadd.f32 %v1705_v44, %v452_v53 }
  0xe6   :  { %v579_v16 = vmax.f32 %v515_v1, 0.0  ;;  %v654_v38 = vpack.c.bf16 %v613_v23, %v612_v52  ;;  %v468_v1 = vmul.f32 %v1689_v6, %v2176_v22 }
  0xf0   :  { %1012 = vmatmul.msk.bf16.gmra.mxu0 %vm82_vm0, %v635_v12  ;;  %1020 = vmatmul.msk.bf16.gmra.mxu1 %vm82_vm0, %v643_v51  ;;  %v611_v12 = vmax.f32 %v547_v36, 0.0  ;;  %v626_v51 = vmax.f32 %v562_v8, 0.0  ;;  %v484_v36 = vmul.f32 %v1689_v6, %v2178_v32  ;;  %v2179_v8 = vld [vmem:[#allocation17_spill] sm:$0xff] }
  0xf1   :  { %1028 = vmatmul.msk.bf16.gmra.mxu2 %vm82_vm0, %v651_v56  ;;  %1036 = vmatmul.msk.bf16.gmra.mxu3 %vm82_vm0, %v659_v42  ;;  %v627_v56 = vmax.f32 %v563_v50, 0.0  ;;  %v637_v42 = vpack.c.bf16 %v579_v16, %v578_v48  ;;  %v499_v50 = vmul.f32 %v1689_v6, %v2179_v8  ;;  %v2180_v48 = vld [vmem:[#allocation18_spill] sm:$0xff] }
  0xf2   :  { %v653_v0 = vpack.c.bf16 %v611_v12, %v610_v9  ;;  %v500_v16 = vmul.f32 %v1689_v6, %v2180_v48  ;;  %v534_v9 = vadd.f32 %v1705_v44, %v467_v55  ;;  %v535_v12 = vadd.f32 %v1705_v44, %v468_v1 }
  0xf3   :  { %v661_v39 = vpack.c.bf16 %v627_v56, %v626_v51  ;;  %v550_v51 = vadd.f32 %v1705_v44, %v483_v2  ;;  %v551_v56 = vadd.f32 %v1705_v44, %v484_v36 }
  0xf4   :  { %v598_v26 = vmax.f32 %v534_v9, 0.0  ;;  %v599_v6 = vmax.f32 %v535_v12, 0.0 }
  0xf5   :  { %v614_v7 = vmax.f32 %v550_v51, 0.0  ;;  %v615_v11 = vmax.f32 %v551_v56, 0.0 }
  0xf6   :  { %v647_v15 = vpack.c.bf16 %v599_v6, %v598_v26 }
  0xf7   :  { %v655_v59 = vpack.c.bf16 %v615_v11, %v614_v7 }
 0x100   :  { %1013 = vmatmul.msk.bf16.gmra.mxu0 %vm82_vm0, %v636_v19  ;;  %1021 = vmatmul.msk.bf16.gmra.mxu1 %vm82_vm0, %v644_v24  ;;  %v565_v19 = vadd.f32 %v1705_v44, %v498_v13  ;;  %v580_v24 = vmax.f32 %v516_v25, 0.0 }
 0x101   :  { %1029 = vmatmul.msk.bf16.gmra.mxu2 %vm82_vm0, %v652_v57  ;;  %1037 = vmatmul.msk.bf16.gmra.mxu3 %vm82_vm0, %v660_v3  ;;  %v581_v57 = vmax.f32 %v517_v54, 0.0  ;;  %v596_v3 = vmax.f32 %v532_v33, 0.0 }
 0x102   :  { %v629_v30 = vmax.f32 %v565_v19, 0.0 }
 0x103   :  { %v638_v20 = vpack.c.bf16 %v581_v57, %v580_v24  ;;  %v646_v40 = vpack.c.bf16 %v597_v4, %v596_v3 }
 0x104   :  { %v662_v14 = vpack.c.bf16 %v629_v30, %v628_v29 }
 0x110   :  { %1014 = vmatmul.msk.bf16.gmra.mxu0 %vm82_vm0, %v637_v42  ;;  %1022 = vmatmul.msk.bf16.gmra.mxu1 %vm82_vm0, %v645_v45  ;;  %v566_v42 = vadd.f32 %v1705_v44, %v499_v50  ;;  %v567_v45 = vadd.f32 %v1705_v44, %v500_v16 }
 0x111   :  { %1030 = vmatmul.msk.bf16.gmra.mxu2 %vm82_vm0, %v653_v0  ;;  %1038 = vmatmul.msk.bf16.gmra.mxu3 %vm82_vm0, %v661_v39  ;;  %v582_v0 = vmax.f32 %v518_v34, 0.0  ;;  %v583_v39 = vmax.f32 %v519_v60, 0.0 }
 0x112   :  { %v630_v49 = vmax.f32 %v566_v42, 0.0  ;;  %v631_v35 = vmax.f32 %v567_v45, 0.0 }
 0x113   :  { %v639_v41 = vpack.c.bf16 %v583_v39, %v582_v0 }
 0x114   :  { %v663_v5 = vpack.c.bf16 %v631_v35, %v630_v49 }
 0x120   :  { %1015 = vmatmul.msk.bf16.gmra.mxu0 %vm82_vm0, %v638_v20  ;;  %1023 = vmatmul.msk.bf16.gmra.mxu1 %vm82_vm0, %v646_v40 }
 0x121   :  { %1031 = vmatmul.msk.bf16.gmra.mxu2 %vm82_vm0, %v654_v38  ;;  %1039 = vmatmul.msk.bf16.gmra.mxu3 %vm82_vm0, %v662_v14 }
 0x130   :  { %1016 = vmatmul.msk.bf16.gmra.mxu0 %vm82_vm0, %v639_v41  ;;  %1024 = vmatmul.msk.bf16.gmra.mxu1 %vm82_vm0, %v647_v15 }
 0x131   :  { %1032 = vmatmul.msk.bf16.gmra.mxu2 %vm82_vm0, %v655_v59  ;;  %1040 = vmatmul.msk.bf16.gmra.mxu3 %vm82_vm0, %v663_v5 }
 0x13d   :  { %v777_v44 = vpop.f32.mrf.mxu0  ;;  %v817_v37 = vpop.f32.mrf.mxu1 }
 0x13e   :  { %937 = vst [vmem:[%s2129_s4] sm:$0xff] %v777_v44 }
 0x13f   :  { %953 = vst [vmem:[%s2129_s4 + $0x80] sm:$0xff] %v817_v37 }
 0x144   :  { %v857_v18 = vpop.f32.mrf.mxu2  ;;  %v897_v43 = vpop.f32.mrf.mxu3 }
 0x145   :  { %969 = vst [vmem:[%s2129_s4 + $0x100] sm:$0xff] %v857_v18  ;;  %v779_v61 = vpop.f32.mrf.mxu0  ;;  %v819_v27 = vpop.f32.mrf.mxu1 }
 0x146   :  { %985 = vst [vmem:[%s2129_s4 + $0x180] sm:$0xff] %v897_v43 }
 0x147   :  { %938 = vst [vmem:[%s2129_s4 + $0x8] sm:$0xff] %v779_v61 }
 0x148   :  { %954 = vst [vmem:[%s2129_s4 + $0x88] sm:$0xff] %v819_v27 }
 0x14c   :  { %v859_v46 = vpop.f32.mrf.mxu2  ;;  %v899_v13 = vpop.f32.mrf.mxu3 }
 0x14d   :  { %970 = vst [vmem:[%s2129_s4 + $0x108] sm:$0xff] %v859_v46  ;;  %v782_v25 = vpop.f32.mrf.mxu0  ;;  %v822_v54 = vpop.f32.mrf.mxu1 }
 0x14e   :  { %986 = vst [vmem:[%s2129_s4 + $0x188] sm:$0xff] %v899_v13 }
 0x14f   :  { %939 = vst [vmem:[%s2129_s4 + $0x10] sm:$0xff] %v782_v25 }
 0x150   :  { %955 = vst [vmem:[%s2129_s4 + $0x90] sm:$0xff] %v822_v54 }
 0x154   :  { %v862_v33 = vpop.f32.mrf.mxu2  ;;  %v902_v58 = vpop.f32.mrf.mxu3 }
 0x155   :  { %971 = vst [vmem:[%s2129_s4 + $0x110] sm:$0xff] %v862_v33  ;;  %v784_v62 = vpop.f32.mrf.mxu0  ;;  %v824_v10 = vpop.f32.mrf.mxu1 }
 0x156   :  { %987 = vst [vmem:[%s2129_s4 + $0x190] sm:$0xff] %v902_v58 }
 0x157   :  { %940 = vst [vmem:[%s2129_s4 + $0x18] sm:$0xff] %v784_v62 }
 0x158   :  { %956 = vst [vmem:[%s2129_s4 + $0x98] sm:$0xff] %v824_v10 }
 0x15c   :  { %v864_v21 = vpop.f32.mrf.mxu2  ;;  %v904_v19 = vpop.f32.mrf.mxu3 }
 0x15d   :  { %972 = vst [vmem:[%s2129_s4 + $0x118] sm:$0xff] %v864_v21  ;;  %v787_v24 = vpop.f32.mrf.mxu0  ;;  %v827_v57 = vpop.f32.mrf.mxu1 }
 0x15e   :  { %988 = vst [vmem:[%s2129_s4 + $0x198] sm:$0xff] %v904_v19 }
 0x15f   :  { %941 = vst [vmem:[%s2129_s4 + $0x20] sm:$0xff] %v787_v24 }
 0x160   :  { %957 = vst [vmem:[%s2129_s4 + $0xa0] sm:$0xff] %v827_v57 }
 0x164   :  { %v867_v3 = vpop.f32.mrf.mxu2  ;;  %v907_v4 = vpop.f32.mrf.mxu3 }
 0x165   :  { %973 = vst [vmem:[%s2129_s4 + $0x120] sm:$0xff] %v867_v3  ;;  %v789_v52 = vpop.f32.mrf.mxu0  ;;  %v829_v23 = vpop.f32.mrf.mxu1 }
 0x166   :  { %989 = vst [vmem:[%s2129_s4 + $0x1a0] sm:$0xff] %v907_v4 }
 0x167   :  { %942 = vst [vmem:[%s2129_s4 + $0x28] sm:$0xff] %v789_v52 }
 0x168   :  { %958 = vst [vmem:[%s2129_s4 + $0xa8] sm:$0xff] %v829_v23 }
 0x16c   :  { %v869_v29 = vpop.f32.mrf.mxu2  ;;  %v909_v30 = vpop.f32.mrf.mxu3 }
 0x16d   :  { %974 = vst [vmem:[%s2129_s4 + $0x128] sm:$0xff] %v869_v29  ;;  %v792_v20 = vpop.f32.mrf.mxu0  ;;  %v832_v40 = vpop.f32.mrf.mxu1 }
 0x16e   :  { %990 = vst [vmem:[%s2129_s4 + $0x1a8] sm:$0xff] %v909_v30 }
 0x16f   :  { %943 = vst [vmem:[%s2129_s4 + $0x30] sm:$0xff] %v792_v20 }
 0x170   :  { %959 = vst [vmem:[%s2129_s4 + $0xb0] sm:$0xff] %v832_v40 }
 0x174   :  { %v872_v38 = vpop.f32.mrf.mxu2  ;;  %v912_v14 = vpop.f32.mrf.mxu3 }
 0x175   :  { %975 = vst [vmem:[%s2129_s4 + $0x130] sm:$0xff] %v872_v38  ;;  %v794_v17 = vpop.f32.mrf.mxu0  ;;  %v834_v28 = vpop.f32.mrf.mxu1 }
 0x176   :  { %991 = vst [vmem:[%s2129_s4 + $0x1b0] sm:$0xff] %v912_v14 }
 0x177   :  { %944 = vst [vmem:[%s2129_s4 + $0x38] sm:$0xff] %v794_v17 }
 0x178   :  { %960 = vst [vmem:[%s2129_s4 + $0xb8] sm:$0xff] %v834_v28 }
 0x17c   :  { %v874_v47 = vpop.f32.mrf.mxu2  ;;  %v914_v53 = vpop.f32.mrf.mxu3 }
 0x17d   :  { %976 = vst [vmem:[%s2129_s4 + $0x138] sm:$0xff] %v874_v47  ;;  %v797_v31 = vpop.f32.mrf.mxu0  ;;  %v837_v55 = vpop.f32.mrf.mxu1 }
 0x17e   :  { %992 = vst [vmem:[%s2129_s4 + $0x1b8] sm:$0xff] %v914_v53 }
 0x17f   :  { %945 = vst [vmem:[%s2129_s4 + $0x40] sm:$0xff] %v797_v31 }
 0x180   :  { %961 = vst [vmem:[%s2129_s4 + $0xc0] sm:$0xff] %v837_v55 }
 0x184   :  { %v877_v22 = vpop.f32.mrf.mxu2  ;;  %v917_v1 = vpop.f32.mrf.mxu3 }
 0x185   :  { %977 = vst [vmem:[%s2129_s4 + $0x140] sm:$0xff] %v877_v22  ;;  %v799_v63 = vpop.f32.mrf.mxu0  ;;  %v839_v2 = vpop.f32.mrf.mxu1 }
 0x186   :  { %993 = vst [vmem:[%s2129_s4 + $0x1c0] sm:$0xff] %v917_v1 }
 0x187   :  { %946 = vst [vmem:[%s2129_s4 + $0x48] sm:$0xff] %v799_v63 }
 0x188   :  { %962 = vst [vmem:[%s2129_s4 + $0xc8] sm:$0xff] %v839_v2 }
 0x18c   :  { %v879_v32 = vpop.f32.mrf.mxu2  ;;  %v919_v36 = vpop.f32.mrf.mxu3 }
 0x18d   :  { %978 = vst [vmem:[%s2129_s4 + $0x148] sm:$0xff] %v879_v32  ;;  %v802_v8 = vpop.f32.mrf.mxu0  ;;  %v842_v50 = vpop.f32.mrf.mxu1 }
 0x18e   :  { %994 = vst [vmem:[%s2129_s4 + $0x1c8] sm:$0xff] %v919_v36 }
 0x18f   :  { %947 = vst [vmem:[%s2129_s4 + $0x50] sm:$0xff] %v802_v8 }
 0x190   :  { %963 = vst [vmem:[%s2129_s4 + $0xd0] sm:$0xff] %v842_v50 }
 0x194   :  { %v882_v48 = vpop.f32.mrf.mxu2  ;;  %v922_v16 = vpop.f32.mrf.mxu3 }
 0x195   :  { %979 = vst [vmem:[%s2129_s4 + $0x150] sm:$0xff] %v882_v48  ;;  %v804_v34 = vpop.f32.mrf.mxu0  ;;  %v844_v60 = vpop.f32.mrf.mxu1 }
 0x196   :  { %995 = vst [vmem:[%s2129_s4 + $0x1d0] sm:$0xff] %v922_v16 }
 0x197   :  { %948 = vst [vmem:[%s2129_s4 + $0x58] sm:$0xff] %v804_v34 }
 0x198   :  { %964 = vst [vmem:[%s2129_s4 + $0xd8] sm:$0xff] %v844_v60 }
 0x19c   :  { %v884_v9 = vpop.f32.mrf.mxu2  ;;  %v924_v12 = vpop.f32.mrf.mxu3 }
 0x19d   :  { %980 = vst [vmem:[%s2129_s4 + $0x158] sm:$0xff] %v884_v9  ;;  %v807_v51 = vpop.f32.mrf.mxu0  ;;  %v847_v56 = vpop.f32.mrf.mxu1 }
 0x19e   :  { %996 = vst [vmem:[%s2129_s4 + $0x1d8] sm:$0xff] %v924_v12 }
 0x19f   :  { %949 = vst [vmem:[%s2129_s4 + $0x60] sm:$0xff] %v807_v51 }
 0x1a0   :  { %965 = vst [vmem:[%s2129_s4 + $0xe0] sm:$0xff] %v847_v56 }
 0x1a4   :  { %v887_v42 = vpop.f32.mrf.mxu2  ;;  %v927_v45 = vpop.f32.mrf.mxu3 }
 0x1a5   :  { %981 = vst [vmem:[%s2129_s4 + $0x160] sm:$0xff] %v887_v42  ;;  %v809_v0 = vpop.f32.mrf.mxu0  ;;  %v849_v39 = vpop.f32.mrf.mxu1 }
 0x1a6   :  { %997 = vst [vmem:[%s2129_s4 + $0x1e0] sm:$0xff] %v927_v45 }
 0x1a7   :  { %950 = vst [vmem:[%s2129_s4 + $0x68] sm:$0xff] %v809_v0 }
 0x1a8   :  { %966 = vst [vmem:[%s2129_s4 + $0xe8] sm:$0xff] %v849_v39 }
 0x1ac   :  { %v889_v26 = vpop.f32.mrf.mxu2  ;;  %v929_v6 = vpop.f32.mrf.mxu3 }
 0x1ad   :  { %982 = vst [vmem:[%s2129_s4 + $0x168] sm:$0xff] %v889_v26  ;;  %v812_v7 = vpop.f32.mrf.mxu0  ;;  %v852_v11 = vpop.f32.mrf.mxu1 }
 0x1ae   :  { %998 = vst [vmem:[%s2129_s4 + $0x1e8] sm:$0xff] %v929_v6 }
 0x1af   :  { %951 = vst [vmem:[%s2129_s4 + $0x70] sm:$0xff] %v812_v7 }
 0x1b0   :  { %967 = vst [vmem:[%s2129_s4 + $0xf0] sm:$0xff] %v852_v11 }
 0x1b4   :  { %v892_v49 = vpop.f32.mrf.mxu2  ;;  %v932_v35 = vpop.f32.mrf.mxu3 }
 0x1b5   :  { %983 = vst [vmem:[%s2129_s4 + $0x170] sm:$0xff] %v892_v49  ;;  %v814_v41 = vpop.f32.mrf.mxu0  ;;  %v854_v15 = vpop.f32.mrf.mxu1 }
 0x1b6   :  { %999 = vst [vmem:[%s2129_s4 + $0x1f0] sm:$0xff] %v932_v35 }
 0x1b7   :  { %952 = vst [vmem:[%s2129_s4 + $0x78] sm:$0xff] %v814_v41 }
 0x1b8   :  { %968 = vst [vmem:[%s2129_s4 + $0xf8] sm:$0xff] %v854_v15 }
 0x1bc   :  { %v894_v59 = vpop.f32.mrf.mxu2  ;;  %v934_v5 = vpop.f32.mrf.mxu3 }
 0x1bd   :  { %984 = vst [vmem:[%s2129_s4 + $0x178] sm:$0xff] %v894_v59 }
 0x1be   :  { %1000 = vst [vmem:[%s2129_s4 + $0x1f8] sm:$0xff] %v934_v5 }

// kernel: gnet_forward.10
= control target key start
LH: loop header
LB: loop body
LE: loop exit
PB: predicated region body
PF: predicated region fallthrough
CT: control target
= control target key end

     0   :  { %vm2873_vm0 = vcmask 1043456   ;;  %vm274_vm1 = vcmask 64512   ;;  %s7683_s3 = inlined_call_operand.vmem [shape: bf16[8,128], index: 3, kind: input, shape index: {}]   ;;  %s7684_s0 = inlined_call_operand.vmem [shape: f32[2048,8], index: 0, kind: input, shape index: {}]   ;;  %s7685_s1 = inlined_call_operand.vmem [shape: f32[1,8], index: 1, kind: input, shape index: {}]   ;;  %s7686_s2 = inlined_call_operand.vmem [shape: f32[1,8], index: 2, kind: input, shape index: {}]   ;;  %s7687_s4 = inlined_call_operand.vmem [shape: f32[2048,128], index: 4, kind: output, shape index: {}]  }
   0x1   :  { %v2488_v0 = vld [vmem:[%s7683_s3] sm:$0xf]  ;;  %v19_v2 = vld [vmem:[%s7684_s0 + $0x8] sm:$0xff]  ;;  %v20_v4 = vld [vmem:[%s7684_s0 + $0x10] sm:$0xff] }
   0x2   :  { %v18_v1 = vld [vmem:[%s7684_s0] sm:$0xff]  ;;  %v2875_v3 = vsel %vm2873_vm0, %v2488_v0, 0  ;;  %v21_v5 = vld [vmem:[%s7684_s0 + $0x18] sm:$0xff]  ;;  %v276_v7 = vsel %vm274_vm1, %v19_v2, 0.0  ;;  %v278_v10 = vsel %vm274_vm1, %v20_v4, 0.0  ;;  %v23_v12 = vld [vmem:[%s7684_s0 + $0x28] sm:$0xff]  ;;  %v793_v25 = vmul.f32 %v19_v2, %v19_v2 }
   0x3   :  { %v275_v6 = vsel %vm274_vm1, %v18_v1, 0.0  ;;  %2884 = vmatpush.bf16.msra.mxu0 %v2875_v3  ;;  %3914 = vmatpush.bf16.msra.mxu1 %v2875_v3  ;;  %v22_v8 = vld [vmem:[%s7684_s0 + $0x20] sm:$0xff]  ;;  %v280_v11 = vsel %vm274_vm1, %v21_v5, 0.0  ;;  %v24_v15 = vld [vmem:[%s7684_s0 + $0x30] sm:$0xff]  ;;  %v284_v17 = vsel %vm274_vm1, %v23_v12, 0.0  ;;  %v25_v18 = vld [vmem:[%s7684_s0 + $0x38] sm:$0xff]  ;;  %v792_v23 = vmul.f32 %v18_v1, %v18_v1 }
   0x4   :  { %v277_v9 = vadd.f32 %v276_v7, %v275_v6  ;;  %3915 = vmatpush.bf16.msra.mxu2 %v2875_v3  ;;  %3916 = vmatpush.bf16.msra.mxu3 %v2875_v3  ;;  %v282_v14 = vsel %vm274_vm1, %v22_v8, 0.0  ;;  %v286_v20 = vsel %vm274_vm1, %v24_v15, 0.0  ;;  %v26_v21 = vld [vmem:[%s7684_s0 + $0x40] sm:$0xff]  ;;  %v288_v24 = vsel %vm274_vm1, %v25_v18, 0.0  ;;  %v27_v27 = vld [vmem:[%s7684_s0 + $0x48] sm:$0xff]  ;;  %v28_v31 = vld [vmem:[%s7684_s0 + $0x50] sm:$0xff] }
   0x5   :  { %v794_v26 = vmul.f32 %v20_v4, %v20_v4  ;;  %v290_v29 = vsel %vm274_vm1, %v26_v21, 0.0  ;;  %v795_v30 = vmul.f32 %v21_v5, %v21_v5  ;;  %v1048_v33 = vsel %vm274_vm1, %v792_v23, 0.0  ;;  %v29_v38 = vld [vmem:[%s7684_s0 + $0x58] sm:$0xff]  ;;  %v30_v44 = vld [vmem:[%s7684_s0 + $0x60] sm:$0xff]  ;;  %v31_v50 = vld [vmem:[%s7684_s0 + $0x68] sm:$0xff] }
   0x6   :  { %v279_v13 = vadd.f32 %v278_v10, %v277_v9  ;;  %v292_v34 = vsel %vm274_vm1, %v27_v27, 0.0  ;;  %v796_v35 = vmul.f32 %v22_v8, %v22_v8  ;;  %v1049_v36 = vsel %vm274_vm1, %v793_v25, 0.0  ;;  %v32_v56 = vld [vmem:[%s7684_s0 + $0x70] sm:$0xff]  ;;  %v33_v62 = vld [vmem:[%s7684_s0 + $0x78] sm:$0xff]  ;;  %v34_v4 = vld [vmem:[%s7684_s0 + $0x80] sm:$0xff] }
   0x7   :  { %v1051_v37 = vsel %vm274_vm1, %v794_v26, 0.0  ;;  %v1050_v40 = vadd.f32 %v1049_v36, %v1048_v33  ;;  %v294_v41 = vsel %vm274_vm1, %v28_v31, 0.0  ;;  %v797_v42 = vmul.f32 %v23_v12, %v23_v12  ;;  %v35_v10 = vld [vmem:[%s7684_s0 + $0x88] sm:$0xff] }
   0x8   :  { %v281_v16 = vadd.f32 %v280_v11, %v279_v13  ;;  %v1053_v43 = vsel %vm274_vm1, %v795_v30, 0.0  ;;  %v296_v47 = vsel %vm274_vm1, %v29_v38, 0.0  ;;  %v798_v48 = vmul.f32 %v24_v15, %v24_v15 }
   0x9   :  { %v1052_v46 = vadd.f32 %v1051_v37, %v1050_v40  ;;  %v1055_v49 = vsel %vm274_vm1, %v796_v35, 0.0  ;;  %v298_v53 = vsel %vm274_vm1, %v30_v44, 0.0  ;;  %v799_v54 = vmul.f32 %v25_v18, %v25_v18  ;;  %v40_v40 = vld [vmem:[%s7684_s0 + $0xb0] sm:$0xff] }
   0xa   :  { %v283_v19 = vadd.f32 %v282_v14, %v281_v16  ;;  %v1057_v55 = vsel %vm274_vm1, %v797_v42, 0.0  ;;  %v300_v59 = vsel %vm274_vm1, %v31_v50, 0.0  ;;  %v800_v60 = vmul.f32 %v26_v21, %v26_v21  ;;  %v36_v16 = vld [vmem:[%s7684_s0 + $0x90] sm:$0xff] }
   0xb   :  { %v1054_v52 = vadd.f32 %v1053_v43, %v1052_v46  ;;  %v1059_v61 = vsel %vm274_vm1, %v798_v48, 0.0  ;;  %v302_v1 = vsel %vm274_vm1, %v32_v56, 0.0  ;;  %v801_v2 = vmul.f32 %v27_v27, %v27_v27  ;;  %v41_v46 = vld [vmem:[%s7684_s0 + $0xb8] sm:$0xff] }
   0xc   :  { %v285_v22 = vadd.f32 %v284_v17, %v283_v19  ;;  %v1061_v3 = vsel %vm274_vm1, %v799_v54, 0.0  ;;  %v304_v7 = vsel %vm274_vm1, %v33_v62, 0.0  ;;  %v802_v8 = vmul.f32 %v28_v31, %v28_v31 }
   0xd   :  { %v1056_v58 = vadd.f32 %v1055_v49, %v1054_v52  ;;  %v1063_v9 = vsel %vm274_vm1, %v800_v60, 0.0  ;;  %v306_v13 = vsel %vm274_vm1, %v34_v4, 0.0  ;;  %v803_v14 = vmul.f32 %v29_v38, %v29_v38  ;;  %v42_v52 = vld [vmem:[%s7684_s0 + $0xc0] sm:$0xff] }
   0xe   :  { %v287_v28 = vadd.f32 %v286_v20, %v285_v22  ;;  %v1065_v15 = vsel %vm274_vm1, %v801_v2, 0.0  ;;  %v308_v19 = vsel %vm274_vm1, %v35_v10, 0.0  ;;  %v804_v20 = vmul.f32 %v30_v44, %v30_v44  ;;  %v37_v22 = vld [vmem:[%s7684_s0 + $0x98] sm:$0xff] }
   0xf   :  { %v1058_v0 = vadd.f32 %v1057_v55, %v1056_v58  ;;  %v1067_v21 = vsel %vm274_vm1, %v802_v8, 0.0  ;;  %v310_v25 = vsel %vm274_vm1, %v36_v16, 0.0  ;;  %v805_v26 = vmul.f32 %v31_v50, %v31_v50  ;;  %v43_v58 = vld [vmem:[%s7684_s0 + $0xc8] sm:$0xff] }
  0x10   :  { %v289_v32 = vadd.f32 %v288_v24, %v287_v28  ;;  %v1069_v27 = vsel %vm274_vm1, %v803_v14, 0.0  ;;  %v38_v28 = vld [vmem:[%s7684_s0 + $0xa0] sm:$0xff]  ;;  %v312_v31 = vsel %vm274_vm1, %v37_v22, 0.0  ;;  %v1071_v33 = vsel %vm274_vm1, %v804_v20, 0.0 }
  0x11   :  { %v1060_v6 = vadd.f32 %v1059_v61, %v1058_v0  ;;  %v314_v37 = vsel %vm274_vm1, %v38_v28, 0.0  ;;  %v807_v38 = vmul.f32 %v33_v62, %v33_v62  ;;  %v808_v44 = vmul.f32 %v34_v4, %v34_v4  ;;  %v44_v0 = vld [vmem:[%s7684_s0 + $0xd0] sm:$0xff] }
  0x12   :  { %v291_v39 = vadd.f32 %v290_v29, %v289_v32  ;;  %v806_v32 = vmul.f32 %v32_v56, %v32_v56  ;;  %v318_v49 = vsel %vm274_vm1, %v40_v40, 0.0  ;;  %v809_v50 = vmul.f32 %v35_v10, %v35_v10 }
  0x13   :  { %v1062_v12 = vadd.f32 %v1061_v3, %v1060_v6  ;;  %v320_v55 = vsel %vm274_vm1, %v41_v46, 0.0  ;;  %v810_v56 = vmul.f32 %v36_v16, %v36_v16  ;;  %v322_v61 = vsel %vm274_vm1, %v42_v52, 0.0  ;;  %v45_v6 = vld [vmem:[%s7684_s0 + $0xd8] sm:$0xff] }
  0x14   :  { %v293_v45 = vadd.f32 %v292_v34, %v291_v39  ;;  %v39_v34 = vld [vmem:[%s7684_s0 + $0xa8] sm:$0xff]  ;;  %v1073_v39 = vsel %vm274_vm1, %v805_v26, 0.0  ;;  %v811_v62 = vmul.f32 %v37_v22, %v37_v22  ;;  %v324_v3 = vsel %vm274_vm1, %v43_v58, 0.0 }
  0x15   :  { %v1064_v18 = vadd.f32 %v1063_v9, %v1062_v12  ;;  %v316_v43 = vsel %vm274_vm1, %v39_v34, 0.0  ;;  %v812_v4 = vmul.f32 %v38_v28, %v38_v28  ;;  %v326_v9 = vsel %vm274_vm1, %v44_v0, 0.0  ;;  %v46_v12 = vld [vmem:[%s7684_s0 + $0xe0] sm:$0xff] }
  0x16   :  { %v295_v51 = vadd.f32 %v294_v41, %v293_v45  ;;  %v1075_v45 = vsel %vm274_vm1, %v806_v32, 0.0  ;;  %v813_v10 = vmul.f32 %v39_v34, %v39_v34  ;;  %v814_v16 = vmul.f32 %v40_v40, %v40_v40 }
  0x17   :  { %v1066_v24 = vadd.f32 %v1065_v15, %v1064_v18  ;;  %v328_v15 = vsel %vm274_vm1, %v45_v6, 0.0  ;;  %v47_v18 = vld [vmem:[%s7684_s0 + $0xe8] sm:$0xff]  ;;  %v815_v22 = vmul.f32 %v41_v46, %v41_v46  ;;  %v816_v28 = vmul.f32 %v42_v52, %v42_v52 }
  0x18   :  { %v297_v57 = vadd.f32 %v296_v47, %v295_v51  ;;  %v1077_v51 = vsel %vm274_vm1, %v807_v38, 0.0  ;;  %v817_v34 = vmul.f32 %v43_v58, %v43_v58  ;;  %v818_v40 = vmul.f32 %v44_v0, %v44_v0 }
  0x19   :  { %v1068_v30 = vadd.f32 %v1067_v21, %v1066_v24  ;;  %v330_v21 = vsel %vm274_vm1, %v46_v12, 0.0  ;;  %v48_v24 = vld [vmem:[%s7684_s0 + $0xf0] sm:$0xff]  ;;  %v819_v46 = vmul.f32 %v45_v6, %v45_v6  ;;  %v820_v52 = vmul.f32 %v46_v12, %v46_v12 }
  0x1a   :  { %v299_v63 = vadd.f32 %v298_v53, %v297_v57  ;;  %v1079_v57 = vsel %vm274_vm1, %v808_v44, 0.0  ;;  %v821_v58 = vmul.f32 %v47_v18, %v47_v18  ;;  %v822_v0 = vmul.f32 %v48_v24, %v48_v24 }
  0x1b   :  { %v1070_v36 = vadd.f32 %v1069_v27, %v1068_v30  ;;  %v332_v27 = vsel %vm274_vm1, %v47_v18, 0.0  ;;  %v49_v30 = vld [vmem:[%s7684_s0 + $0xf8] sm:$0xff] }
  0x1c   :  { %v301_v5 = vadd.f32 %v300_v59, %v299_v63  ;;  %v1081_v63 = vsel %vm274_vm1, %v809_v50, 0.0  ;;  %v823_v6 = vmul.f32 %v49_v30, %v49_v30 }
  0x1d   :  { %v1072_v42 = vadd.f32 %v1071_v33, %v1070_v36  ;;  %v334_v33 = vsel %vm274_vm1, %v48_v24, 0.0  ;;  %v50_v36 = vld [vmem:[%s7684_s0 + $0x100] sm:$0xff] }
  0x1e   :  { %v303_v11 = vadd.f32 %v302_v1, %v301_v5  ;;  %v1083_v5 = vsel %vm274_vm1, %v810_v56, 0.0  ;;  %v824_v12 = vmul.f32 %v50_v36, %v50_v36 }
  0x1f   :  { %v1074_v48 = vadd.f32 %v1073_v39, %v1072_v42  ;;  %v336_v39 = vsel %vm274_vm1, %v49_v30, 0.0  ;;  %v51_v42 = vld [vmem:[%s7684_s0 + $0x108] sm:$0xff] }
  0x20   :  { %v305_v17 = vadd.f32 %v304_v7, %v303_v11  ;;  %v1085_v11 = vsel %vm274_vm1, %v811_v62, 0.0  ;;  %v825_v18 = vmul.f32 %v51_v42, %v51_v42 }
  0x21   :  { %v1076_v54 = vadd.f32 %v1075_v45, %v1074_v48  ;;  %v338_v45 = vsel %vm274_vm1, %v50_v36, 0.0  ;;  %v52_v48 = vld [vmem:[%s7684_s0 + $0x110] sm:$0xff] }
  0x22   :  { %v307_v23 = vadd.f32 %v306_v13, %v305_v17  ;;  %v1087_v17 = vsel %vm274_vm1, %v812_v4, 0.0  ;;  %v826_v24 = vmul.f32 %v52_v48, %v52_v48 }
  0x23   :  { %v1078_v60 = vadd.f32 %v1077_v51, %v1076_v54  ;;  %v340_v51 = vsel %vm274_vm1, %v51_v42, 0.0  ;;  %v53_v54 = vld [vmem:[%s7684_s0 + $0x118] sm:$0xff] }
  0x24   :  { %v309_v29 = vadd.f32 %v308_v19, %v307_v23  ;;  %v1089_v23 = vsel %vm274_vm1, %v813_v10, 0.0  ;;  %v827_v30 = vmul.f32 %v53_v54, %v53_v54 }
  0x25   :  { %v1080_v2 = vadd.f32 %v1079_v57, %v1078_v60  ;;  %v342_v57 = vsel %vm274_vm1, %v52_v48, 0.0  ;;  %v54_v60 = vld [vmem:[%s7684_s0 + $0x120] sm:$0xff] }
  0x26   :  { %v311_v35 = vadd.f32 %v310_v25, %v309_v29  ;;  %v1091_v29 = vsel %vm274_vm1, %v814_v16, 0.0  ;;  %v828_v36 = vmul.f32 %v54_v60, %v54_v60 }
  0x27   :  { %v1082_v8 = vadd.f32 %v1081_v63, %v1080_v2  ;;  %v344_v63 = vsel %vm274_vm1, %v53_v54, 0.0  ;;  %v55_v2 = vld [vmem:[%s7684_s0 + $0x128] sm:$0xff] }
  0x28   :  { %v313_v41 = vadd.f32 %v312_v31, %v311_v35  ;;  %v1093_v35 = vsel %vm274_vm1, %v815_v22, 0.0  ;;  %v829_v42 = vmul.f32 %v55_v2, %v55_v2 }
  0x29   :  { %v1084_v14 = vadd.f32 %v1083_v5, %v1082_v8  ;;  %v346_v5 = vsel %vm274_vm1, %v54_v60, 0.0  ;;  %v56_v8 = vld [vmem:[%s7684_s0 + $0x130] sm:$0xff] }
  0x2a   :  { %v315_v47 = vadd.f32 %v314_v37, %v313_v41  ;;  %v1095_v41 = vsel %vm274_vm1, %v816_v28, 0.0  ;;  %v830_v48 = vmul.f32 %v56_v8, %v56_v8 }
  0x2b   :  { %v1086_v20 = vadd.f32 %v1085_v11, %v1084_v14  ;;  %v348_v11 = vsel %vm274_vm1, %v55_v2, 0.0  ;;  %v57_v14 = vld [vmem:[%s7684_s0 + $0x138] sm:$0xff] }
  0x2c   :  { %v317_v53 = vadd.f32 %v316_v43, %v315_v47  ;;  %v1097_v47 = vsel %vm274_vm1, %v817_v34, 0.0  ;;  %v831_v54 = vmul.f32 %v57_v14, %v57_v14 }
  0x2d   :  { %v1088_v26 = vadd.f32 %v1087_v17, %v1086_v20  ;;  %v350_v17 = vsel %vm274_vm1, %v56_v8, 0.0  ;;  %v58_v20 = vld [vmem:[%s7684_s0 + $0x140] sm:$0xff] }
  0x2e   :  { %v319_v59 = vadd.f32 %v318_v49, %v317_v53  ;;  %v1099_v53 = vsel %vm274_vm1, %v818_v40, 0.0  ;;  %v832_v60 = vmul.f32 %v58_v20, %v58_v20 }
  0x2f   :  { %v1090_v32 = vadd.f32 %v1089_v23, %v1088_v26  ;;  %v352_v23 = vsel %vm274_vm1, %v57_v14, 0.0  ;;  %v59_v26 = vld [vmem:[%s7684_s0 + $0x148] sm:$0xff] }
  0x30   :  { %v321_v1 = vadd.f32 %v320_v55, %v319_v59  ;;  %v1101_v59 = vsel %vm274_vm1, %v819_v46, 0.0  ;;  %v833_v2 = vmul.f32 %v59_v26, %v59_v26 }
  0x31   :  { %v1092_v38 = vadd.f32 %v1091_v29, %v1090_v32  ;;  %v354_v29 = vsel %vm274_vm1, %v58_v20, 0.0  ;;  %v60_v32 = vld [vmem:[%s7684_s0 + $0x150] sm:$0xff] }
  0x32   :  { %v323_v7 = vadd.f32 %v322_v61, %v321_v1  ;;  %v1103_v1 = vsel %vm274_vm1, %v820_v52, 0.0  ;;  %v834_v8 = vmul.f32 %v60_v32, %v60_v32 }
  0x33   :  { %v1094_v44 = vadd.f32 %v1093_v35, %v1092_v38  ;;  %v356_v35 = vsel %vm274_vm1, %v59_v26, 0.0  ;;  %v61_v38 = vld [vmem:[%s7684_s0 + $0x158] sm:$0xff] }
  0x34   :  { %v325_v13 = vadd.f32 %v324_v3, %v323_v7  ;;  %v1105_v7 = vsel %vm274_vm1, %v821_v58, 0.0  ;;  %v835_v14 = vmul.f32 %v61_v38, %v61_v38 }
  0x35   :  { %v1096_v50 = vadd.f32 %v1095_v41, %v1094_v44  ;;  %v358_v41 = vsel %vm274_vm1, %v60_v32, 0.0  ;;  %v62_v44 = vld [vmem:[%s7684_s0 + $0x160] sm:$0xff] }
  0x36   :  { %v327_v19 = vadd.f32 %v326_v9, %v325_v13  ;;  %v1107_v13 = vsel %vm274_vm1, %v822_v0, 0.0  ;;  %v836_v20 = vmul.f32 %v62_v44, %v62_v44 }
  0x37   :  { %v1098_v56 = vadd.f32 %v1097_v47, %v1096_v50  ;;  %v360_v47 = vsel %vm274_vm1, %v61_v38, 0.0  ;;  %v63_v50 = vld [vmem:[%s7684_s0 + $0x168] sm:$0xff] }
  0x38   :  { %v329_v25 = vadd.f32 %v328_v15, %v327_v19  ;;  %v1109_v19 = vsel %vm274_vm1, %v823_v6, 0.0  ;;  %v837_v26 = vmul.f32 %v63_v50, %v63_v50 }
  0x39   :  { %v1100_v62 = vadd.f32 %v1099_v53, %v1098_v56  ;;  %v362_v53 = vsel %vm274_vm1, %v62_v44, 0.0  ;;  %v64_v56 = vld [vmem:[%s7684_s0 + $0x170] sm:$0xff] }
  0x3a   :  { %v331_v31 = vadd.f32 %v330_v21, %v329_v25  ;;  %v1111_v25 = vsel %vm274_vm1, %v824_v12, 0.0  ;;  %v838_v32 = vmul.f32 %v64_v56, %v64_v56 }
  0x3b   :  { %v1102_v4 = vadd.f32 %v1101_v59, %v1100_v62  ;;  %v364_v59 = vsel %vm274_vm1, %v63_v50, 0.0  ;;  %v65_v62 = vld [vmem:[%s7684_s0 + $0x178] sm:$0xff] }
  0x3c   :  { %v333_v37 = vadd.f32 %v332_v27, %v331_v31  ;;  %v1113_v31 = vsel %vm274_vm1, %v825_v18, 0.0  ;;  %v839_v38 = vmul.f32 %v65_v62, %v65_v62 }
  0x3d   :  { %v1104_v10 = vadd.f32 %v1103_v1, %v1102_v4  ;;  %v366_v1 = vsel %vm274_vm1, %v64_v56, 0.0  ;;  %v66_v4 = vld [vmem:[%s7684_s0 + $0x180] sm:$0xff] }
  0x3e   :  { %v335_v43 = vadd.f32 %v334_v33, %v333_v37  ;;  %v1115_v37 = vsel %vm274_vm1, %v826_v24, 0.0  ;;  %v840_v44 = vmul.f32 %v66_v4, %v66_v4 }
  0x3f   :  { %v1106_v16 = vadd.f32 %v1105_v7, %v1104_v10  ;;  %v368_v7 = vsel %vm274_vm1, %v65_v62, 0.0  ;;  %v67_v10 = vld [vmem:[%s7684_s0 + $0x188] sm:$0xff] }
  0x40   :  { %v337_v49 = vadd.f32 %v336_v39, %v335_v43  ;;  %v1117_v43 = vsel %vm274_vm1, %v827_v30, 0.0  ;;  %v841_v50 = vmul.f32 %v67_v10, %v67_v10 }
  0x41   :  { %v1108_v22 = vadd.f32 %v1107_v13, %v1106_v16  ;;  %v370_v13 = vsel %vm274_vm1, %v66_v4, 0.0  ;;  %v68_v16 = vld [vmem:[%s7684_s0 + $0x190] sm:$0xff] }
  0x42   :  { %v339_v55 = vadd.f32 %v338_v45, %v337_v49  ;;  %v1119_v49 = vsel %vm274_vm1, %v828_v36, 0.0  ;;  %v842_v56 = vmul.f32 %v68_v16, %v68_v16 }
  0x43   :  { %v1110_v28 = vadd.f32 %v1109_v19, %v1108_v22  ;;  %v372_v19 = vsel %vm274_vm1, %v67_v10, 0.0  ;;  %v69_v22 = vld [vmem:[%s7684_s0 + $0x198] sm:$0xff] }
  0x44   :  { %v341_v61 = vadd.f32 %v340_v51, %v339_v55  ;;  %v1121_v55 = vsel %vm274_vm1, %v829_v42, 0.0  ;;  %v843_v62 = vmul.f32 %v69_v22, %v69_v22 }
  0x45   :  { %v1112_v34 = vadd.f32 %v1111_v25, %v1110_v28  ;;  %v374_v25 = vsel %vm274_vm1, %v68_v16, 0.0  ;;  %v70_v28 = vld [vmem:[%s7684_s0 + $0x1a0] sm:$0xff] }
  0x46   :  { %v343_v3 = vadd.f32 %v342_v57, %v341_v61  ;;  %v1123_v61 = vsel %vm274_vm1, %v830_v48, 0.0  ;;  %v844_v4 = vmul.f32 %v70_v28, %v70_v28 }
  0x47   :  { %v1114_v40 = vadd.f32 %v1113_v31, %v1112_v34  ;;  %v376_v31 = vsel %vm274_vm1, %v69_v22, 0.0  ;;  %v71_v34 = vld [vmem:[%s7684_s0 + $0x1a8] sm:$0xff] }
  0x48   :  { %v345_v9 = vadd.f32 %v344_v63, %v343_v3  ;;  %v1125_v3 = vsel %vm274_vm1, %v831_v54, 0.0  ;;  %v845_v10 = vmul.f32 %v71_v34, %v71_v34 }
  0x49   :  { %v1116_v46 = vadd.f32 %v1115_v37, %v1114_v40  ;;  %v378_v37 = vsel %vm274_vm1, %v70_v28, 0.0  ;;  %v72_v40 = vld [vmem:[%s7684_s0 + $0x1b0] sm:$0xff] }
  0x4a   :  { %v347_v15 = vadd.f32 %v346_v5, %v345_v9  ;;  %v1127_v9 = vsel %vm274_vm1, %v832_v60, 0.0  ;;  %v846_v16 = vmul.f32 %v72_v40, %v72_v40 }
  0x4b   :  { %v1118_v52 = vadd.f32 %v1117_v43, %v1116_v46  ;;  %v380_v43 = vsel %vm274_vm1, %v71_v34, 0.0  ;;  %v73_v46 = vld [vmem:[%s7684_s0 + $0x1b8] sm:$0xff] }
  0x4c   :  { %v349_v21 = vadd.f32 %v348_v11, %v347_v15  ;;  %v1129_v15 = vsel %vm274_vm1, %v833_v2, 0.0  ;;  %v847_v22 = vmul.f32 %v73_v46, %v73_v46 }
  0x4d   :  { %v1120_v58 = vadd.f32 %v1119_v49, %v1118_v52  ;;  %v382_v49 = vsel %vm274_vm1, %v72_v40, 0.0  ;;  %v74_v52 = vld [vmem:[%s7684_s0 + $0x1c0] sm:$0xff] }
  0x4e   :  { %v351_v27 = vadd.f32 %v350_v17, %v349_v21  ;;  %v1131_v21 = vsel %vm274_vm1, %v834_v8, 0.0  ;;  %v848_v28 = vmul.f32 %v74_v52, %v74_v52 }
  0x4f   :  { %v1122_v0 = vadd.f32 %v1121_v55, %v1120_v58  ;;  %v384_v55 = vsel %vm274_vm1, %v73_v46, 0.0  ;;  %v75_v58 = vld [vmem:[%s7684_s0 + $0x1c8] sm:$0xff] }
  0x50   :  { %v353_v33 = vadd.f32 %v352_v23, %v351_v27  ;;  %v1133_v27 = vsel %vm274_vm1, %v835_v14, 0.0  ;;  %v849_v34 = vmul.f32 %v75_v58, %v75_v58 }
  0x51   :  { %v1124_v6 = vadd.f32 %v1123_v61, %v1122_v0  ;;  %v386_v61 = vsel %vm274_vm1, %v74_v52, 0.0  ;;  %v76_v0 = vld [vmem:[%s7684_s0 + $0x1d0] sm:$0xff] }
  0x52   :  { %v355_v39 = vadd.f32 %v354_v29, %v353_v33  ;;  %v1135_v33 = vsel %vm274_vm1, %v836_v20, 0.0  ;;  %v850_v40 = vmul.f32 %v76_v0, %v76_v0 }
  0x53   :  { %v1126_v12 = vadd.f32 %v1125_v3, %v1124_v6  ;;  %v388_v3 = vsel %vm274_vm1, %v75_v58, 0.0  ;;  %v77_v6 = vld [vmem:[%s7684_s0 + $0x1d8] sm:$0xff] }
  0x54   :  { %v357_v45 = vadd.f32 %v356_v35, %v355_v39  ;;  %v1137_v39 = vsel %vm274_vm1, %v837_v26, 0.0  ;;  %v851_v46 = vmul.f32 %v77_v6, %v77_v6 }
  0x55   :  { %v1128_v18 = vadd.f32 %v1127_v9, %v1126_v12  ;;  %v390_v9 = vsel %vm274_vm1, %v76_v0, 0.0  ;;  %v78_v12 = vld [vmem:[%s7684_s0 + $0x1e0] sm:$0xff] }
  0x56   :  { %v359_v51 = vadd.f32 %v358_v41, %v357_v45  ;;  %v1139_v45 = vsel %vm274_vm1, %v838_v32, 0.0  ;;  %v852_v52 = vmul.f32 %v78_v12, %v78_v12 }
  0x57   :  { %v1130_v24 = vadd.f32 %v1129_v15, %v1128_v18  ;;  %v392_v15 = vsel %vm274_vm1, %v77_v6, 0.0  ;;  %v79_v18 = vld [vmem:[%s7684_s0 + $0x1e8] sm:$0xff] }
  0x58   :  { %v361_v57 = vadd.f32 %v360_v47, %v359_v51  ;;  %v1141_v51 = vsel %vm274_vm1, %v839_v38, 0.0  ;;  %v853_v58 = vmul.f32 %v79_v18, %v79_v18 }
  0x59   :  { %v1132_v30 = vadd.f32 %v1131_v21, %v1130_v24  ;;  %v394_v21 = vsel %vm274_vm1, %v78_v12, 0.0  ;;  %v80_v24 = vld [vmem:[%s7684_s0 + $0x1f0] sm:$0xff] }
  0x5a   :  { %v363_v63 = vadd.f32 %v362_v53, %v361_v57  ;;  %v1143_v57 = vsel %vm274_vm1, %v840_v44, 0.0  ;;  %v854_v0 = vmul.f32 %v80_v24, %v80_v24 }
  0x5b   :  { %v1134_v36 = vadd.f32 %v1133_v27, %v1132_v30  ;;  %v396_v27 = vsel %vm274_vm1, %v79_v18, 0.0  ;;  %v81_v30 = vld [vmem:[%s7684_s0 + $0x1f8] sm:$0xff] }
  0x5c   :  { %v365_v5 = vadd.f32 %v364_v59, %v363_v63  ;;  %v1145_v63 = vsel %vm274_vm1, %v841_v50, 0.0  ;;  %v855_v6 = vmul.f32 %v81_v30, %v81_v30 }
  0x5d   :  { %v1136_v42 = vadd.f32 %v1135_v33, %v1134_v36  ;;  %v398_v33 = vsel %vm274_vm1, %v80_v24, 0.0  ;;  %v82_v36 = vld [vmem:[%s7684_s0 + $0x200] sm:$0xff] }
  0x5e   :  { %v367_v11 = vadd.f32 %v366_v1, %v365_v5  ;;  %v1147_v5 = vsel %vm274_vm1, %v842_v56, 0.0  ;;  %v856_v12 = vmul.f32 %v82_v36, %v82_v36 }
  0x5f   :  { %v1138_v48 = vadd.f32 %v1137_v39, %v1136_v42  ;;  %v400_v39 = vsel %vm274_vm1, %v81_v30, 0.0  ;;  %v83_v42 = vld [vmem:[%s7684_s0 + $0x208] sm:$0xff] }
  0x60   :  { %v369_v17 = vadd.f32 %v368_v7, %v367_v11  ;;  %v1149_v11 = vsel %vm274_vm1, %v843_v62, 0.0  ;;  %v857_v18 = vmul.f32 %v83_v42, %v83_v42 }
  0x61   :  { %v1140_v54 = vadd.f32 %v1139_v45, %v1138_v48  ;;  %v402_v45 = vsel %vm274_vm1, %v82_v36, 0.0  ;;  %v84_v48 = vld [vmem:[%s7684_s0 + $0x210] sm:$0xff] }
  0x62   :  { %v371_v23 = vadd.f32 %v370_v13, %v369_v17  ;;  %v1151_v17 = vsel %vm274_vm1, %v844_v4, 0.0  ;;  %v858_v24 = vmul.f32 %v84_v48, %v84_v48 }
  0x63   :  { %v1142_v60 = vadd.f32 %v1141_v51, %v1140_v54  ;;  %v404_v51 = vsel %vm274_vm1, %v83_v42, 0.0  ;;  %v85_v54 = vld [vmem:[%s7684_s0 + $0x218] sm:$0xff] }
  0x64   :  { %v373_v29 = vadd.f32 %v372_v19, %v371_v23  ;;  %v1153_v23 = vsel %vm274_vm1, %v845_v10, 0.0  ;;  %v859_v30 = vmul.f32 %v85_v54, %v85_v54 }
  0x65   :  { %v1144_v2 = vadd.f32 %v1143_v57, %v1142_v60  ;;  %v406_v57 = vsel %vm274_vm1, %v84_v48, 0.0  ;;  %v86_v60 = vld [vmem:[%s7684_s0 + $0x220] sm:$0xff] }
  0x66   :  { %v375_v35 = vadd.f32 %v374_v25, %v373_v29  ;;  %v1155_v29 = vsel %vm274_vm1, %v846_v16, 0.0  ;;  %v860_v36 = vmul.f32 %v86_v60, %v86_v60 }
  0x67   :  { %v1146_v8 = vadd.f32 %v1145_v63, %v1144_v2  ;;  %v408_v63 = vsel %vm274_vm1, %v85_v54, 0.0  ;;  %v87_v2 = vld [vmem:[%s7684_s0 + $0x228] sm:$0xff] }
  0x68   :  { %v377_v41 = vadd.f32 %v376_v31, %v375_v35  ;;  %v1157_v35 = vsel %vm274_vm1, %v847_v22, 0.0  ;;  %v861_v42 = vmul.f32 %v87_v2, %v87_v2 }
  0x69   :  { %v1148_v14 = vadd.f32 %v1147_v5, %v1146_v8  ;;  %v410_v5 = vsel %vm274_vm1, %v86_v60, 0.0  ;;  %v88_v8 = vld [vmem:[%s7684_s0 + $0x230] sm:$0xff] }
  0x6a   :  { %v379_v47 = vadd.f32 %v378_v37, %v377_v41  ;;  %v1159_v41 = vsel %vm274_vm1, %v848_v28, 0.0  ;;  %v862_v48 = vmul.f32 %v88_v8, %v88_v8 }
  0x6b   :  { %v1150_v20 = vadd.f32 %v1149_v11, %v1148_v14  ;;  %v412_v11 = vsel %vm274_vm1, %v87_v2, 0.0  ;;  %v89_v14 = vld [vmem:[%s7684_s0 + $0x238] sm:$0xff] }
  0x6c   :  { %v381_v53 = vadd.f32 %v380_v43, %v379_v47  ;;  %v1161_v47 = vsel %vm274_vm1, %v849_v34, 0.0  ;;  %v863_v54 = vmul.f32 %v89_v14, %v89_v14 }
  0x6d   :  { %v1152_v26 = vadd.f32 %v1151_v17, %v1150_v20  ;;  %v414_v17 = vsel %vm274_vm1, %v88_v8, 0.0  ;;  %v90_v20 = vld [vmem:[%s7684_s0 + $0x240] sm:$0xff] }
  0x6e   :  { %v383_v59 = vadd.f32 %v382_v49, %v381_v53  ;;  %v1163_v53 = vsel %vm274_vm1, %v850_v40, 0.0  ;;  %v864_v60 = vmul.f32 %v90_v20, %v90_v20 }
  0x6f   :  { %v1154_v32 = vadd.f32 %v1153_v23, %v1152_v26  ;;  %v416_v23 = vsel %vm274_vm1, %v89_v14, 0.0  ;;  %v91_v26 = vld [vmem:[%s7684_s0 + $0x248] sm:$0xff] }
  0x70   :  { %v385_v1 = vadd.f32 %v384_v55, %v383_v59  ;;  %v1165_v59 = vsel %vm274_vm1, %v851_v46, 0.0  ;;  %v865_v2 = vmul.f32 %v91_v26, %v91_v26 }
  0x71   :  { %v1156_v38 = vadd.f32 %v1155_v29, %v1154_v32  ;;  %v418_v29 = vsel %vm274_vm1, %v90_v20, 0.0  ;;  %v92_v32 = vld [vmem:[%s7684_s0 + $0x250] sm:$0xff] }
  0x72   :  { %v387_v7 = vadd.f32 %v386_v61, %v385_v1  ;;  %v1167_v1 = vsel %vm274_vm1, %v852_v52, 0.0  ;;  %v866_v8 = vmul.f32 %v92_v32, %v92_v32 }
  0x73   :  { %v1158_v44 = vadd.f32 %v1157_v35, %v1156_v38  ;;  %v420_v35 = vsel %vm274_vm1, %v91_v26, 0.0  ;;  %v93_v38 = vld [vmem:[%s7684_s0 + $0x258] sm:$0xff] }
  0x74   :  { %v389_v13 = vadd.f32 %v388_v3, %v387_v7  ;;  %v1169_v7 = vsel %vm274_vm1, %v853_v58, 0.0  ;;  %v867_v14 = vmul.f32 %v93_v38, %v93_v38 }
  0x75   :  { %v1160_v50 = vadd.f32 %v1159_v41, %v1158_v44  ;;  %v422_v41 = vsel %vm274_vm1, %v92_v32, 0.0  ;;  %v94_v44 = vld [vmem:[%s7684_s0 + $0x260] sm:$0xff] }
  0x76   :  { %v391_v19 = vadd.f32 %v390_v9, %v389_v13  ;;  %v1171_v13 = vsel %vm274_vm1, %v854_v0, 0.0  ;;  %v868_v20 = vmul.f32 %v94_v44, %v94_v44 }
  0x77   :  { %v1162_v56 = vadd.f32 %v1161_v47, %v1160_v50  ;;  %v424_v47 = vsel %vm274_vm1, %v93_v38, 0.0  ;;  %v95_v50 = vld [vmem:[%s7684_s0 + $0x268] sm:$0xff] }
  0x78   :  { %v393_v25 = vadd.f32 %v392_v15, %v391_v19  ;;  %v1173_v19 = vsel %vm274_vm1, %v855_v6, 0.0  ;;  %v869_v26 = vmul.f32 %v95_v50, %v95_v50 }
  0x79   :  { %v1164_v62 = vadd.f32 %v1163_v53, %v1162_v56  ;;  %v426_v53 = vsel %vm274_vm1, %v94_v44, 0.0  ;;  %v96_v56 = vld [vmem:[%s7684_s0 + $0x270] sm:$0xff] }
  0x7a   :  { %v395_v31 = vadd.f32 %v394_v21, %v393_v25  ;;  %v1175_v25 = vsel %vm274_vm1, %v856_v12, 0.0  ;;  %v870_v32 = vmul.f32 %v96_v56, %v96_v56 }
  0x7b   :  { %v1166_v4 = vadd.f32 %v1165_v59, %v1164_v62  ;;  %v428_v59 = vsel %vm274_vm1, %v95_v50, 0.0  ;;  %v97_v62 = vld [vmem:[%s7684_s0 + $0x278] sm:$0xff] }
  0x7c   :  { %v397_v37 = vadd.f32 %v396_v27, %v395_v31  ;;  %v1177_v31 = vsel %vm274_vm1, %v857_v18, 0.0  ;;  %v871_v38 = vmul.f32 %v97_v62, %v97_v62 }
  0x7d   :  { %v1168_v10 = vadd.f32 %v1167_v1, %v1166_v4  ;;  %v430_v1 = vsel %vm274_vm1, %v96_v56, 0.0  ;;  %v98_v4 = vld [vmem:[%s7684_s0 + $0x280] sm:$0xff] }
  0x7e   :  { %v399_v43 = vadd.f32 %v398_v33, %v397_v37  ;;  %v1179_v37 = vsel %vm274_vm1, %v858_v24, 0.0  ;;  %v872_v44 = vmul.f32 %v98_v4, %v98_v4 }
  0x7f   :  { %v1170_v16 = vadd.f32 %v1169_v7, %v1168_v10  ;;  %v432_v7 = vsel %vm274_vm1, %v97_v62, 0.0  ;;  %v99_v10 = vld [vmem:[%s7684_s0 + $0x288] sm:$0xff] }
  0x80   :  { %v401_v49 = vadd.f32 %v400_v39, %v399_v43  ;;  %v1181_v43 = vsel %vm274_vm1, %v859_v30, 0.0  ;;  %v873_v50 = vmul.f32 %v99_v10, %v99_v10 }
  0x81   :  { %v1172_v22 = vadd.f32 %v1171_v13, %v1170_v16  ;;  %v434_v13 = vsel %vm274_vm1, %v98_v4, 0.0  ;;  %v100_v16 = vld [vmem:[%s7684_s0 + $0x290] sm:$0xff] }
  0x82   :  { %v403_v55 = vadd.f32 %v402_v45, %v401_v49  ;;  %v1183_v49 = vsel %vm274_vm1, %v860_v36, 0.0  ;;  %v874_v56 = vmul.f32 %v100_v16, %v100_v16 }
  0x83   :  { %v1174_v28 = vadd.f32 %v1173_v19, %v1172_v22  ;;  %v436_v19 = vsel %vm274_vm1, %v99_v10, 0.0  ;;  %v101_v22 = vld [vmem:[%s7684_s0 + $0x298] sm:$0xff] }
  0x84   :  { %v405_v61 = vadd.f32 %v404_v51, %v403_v55  ;;  %v1185_v55 = vsel %vm274_vm1, %v861_v42, 0.0  ;;  %v875_v62 = vmul.f32 %v101_v22, %v101_v22 }
  0x85   :  { %v1176_v34 = vadd.f32 %v1175_v25, %v1174_v28  ;;  %v438_v25 = vsel %vm274_vm1, %v100_v16, 0.0  ;;  %v102_v28 = vld [vmem:[%s7684_s0 + $0x2a0] sm:$0xff] }
  0x86   :  { %v407_v3 = vadd.f32 %v406_v57, %v405_v61  ;;  %v1187_v61 = vsel %vm274_vm1, %v862_v48, 0.0  ;;  %v876_v4 = vmul.f32 %v102_v28, %v102_v28 }
  0x87   :  { %v1178_v40 = vadd.f32 %v1177_v31, %v1176_v34  ;;  %v440_v31 = vsel %vm274_vm1, %v101_v22, 0.0  ;;  %v103_v34 = vld [vmem:[%s7684_s0 + $0x2a8] sm:$0xff] }
  0x88   :  { %v409_v9 = vadd.f32 %v408_v63, %v407_v3  ;;  %v1189_v3 = vsel %vm274_vm1, %v863_v54, 0.0  ;;  %v877_v10 = vmul.f32 %v103_v34, %v103_v34 }
  0x89   :  { %v1180_v46 = vadd.f32 %v1179_v37, %v1178_v40  ;;  %v442_v37 = vsel %vm274_vm1, %v102_v28, 0.0  ;;  %v104_v40 = vld [vmem:[%s7684_s0 + $0x2b0] sm:$0xff] }
  0x8a   :  { %v411_v15 = vadd.f32 %v410_v5, %v409_v9  ;;  %v1191_v9 = vsel %vm274_vm1, %v864_v60, 0.0  ;;  %v878_v16 = vmul.f32 %v104_v40, %v104_v40 }
  0x8b   :  { %v1182_v52 = vadd.f32 %v1181_v43, %v1180_v46  ;;  %v444_v43 = vsel %vm274_vm1, %v103_v34, 0.0  ;;  %v105_v46 = vld [vmem:[%s7684_s0 + $0x2b8] sm:$0xff] }
  0x8c   :  { %v413_v21 = vadd.f32 %v412_v11, %v411_v15  ;;  %v1193_v15 = vsel %vm274_vm1, %v865_v2, 0.0  ;;  %v879_v22 = vmul.f32 %v105_v46, %v105_v46 }
  0x8d   :  { %v1184_v58 = vadd.f32 %v1183_v49, %v1182_v52  ;;  %v446_v49 = vsel %vm274_vm1, %v104_v40, 0.0  ;;  %v106_v52 = vld [vmem:[%s7684_s0 + $0x2c0] sm:$0xff] }
  0x8e   :  { %v415_v27 = vadd.f32 %v414_v17, %v413_v21  ;;  %v1195_v21 = vsel %vm274_vm1, %v866_v8, 0.0  ;;  %v880_v28 = vmul.f32 %v106_v52, %v106_v52 }
  0x8f   :  { %v1186_v0 = vadd.f32 %v1185_v55, %v1184_v58  ;;  %v448_v55 = vsel %vm274_vm1, %v105_v46, 0.0  ;;  %v107_v58 = vld [vmem:[%s7684_s0 + $0x2c8] sm:$0xff] }
  0x90   :  { %v417_v33 = vadd.f32 %v416_v23, %v415_v27  ;;  %v1197_v27 = vsel %vm274_vm1, %v867_v14, 0.0  ;;  %v881_v34 = vmul.f32 %v107_v58, %v107_v58 }
  0x91   :  { %v1188_v6 = vadd.f32 %v1187_v61, %v1186_v0  ;;  %v450_v61 = vsel %vm274_vm1, %v106_v52, 0.0  ;;  %v108_v0 = vld [vmem:[%s7684_s0 + $0x2d0] sm:$0xff] }
  0x92   :  { %v419_v39 = vadd.f32 %v418_v29, %v417_v33  ;;  %v1199_v33 = vsel %vm274_vm1, %v868_v20, 0.0  ;;  %v882_v40 = vmul.f32 %v108_v0, %v108_v0 }
  0x93   :  { %v1190_v12 = vadd.f32 %v1189_v3, %v1188_v6  ;;  %v452_v3 = vsel %vm274_vm1, %v107_v58, 0.0  ;;  %v109_v6 = vld [vmem:[%s7684_s0 + $0x2d8] sm:$0xff] }
  0x94   :  { %v421_v45 = vadd.f32 %v420_v35, %v419_v39  ;;  %v1201_v39 = vsel %vm274_vm1, %v869_v26, 0.0  ;;  %v883_v46 = vmul.f32 %v109_v6, %v109_v6 }
  0x95   :  { %v1192_v18 = vadd.f32 %v1191_v9, %v1190_v12  ;;  %v454_v9 = vsel %vm274_vm1, %v108_v0, 0.0  ;;  %v110_v12 = vld [vmem:[%s7684_s0 + $0x2e0] sm:$0xff] }
  0x96   :  { %v423_v51 = vadd.f32 %v422_v41, %v421_v45  ;;  %v1203_v45 = vsel %vm274_vm1, %v870_v32, 0.0  ;;  %v884_v52 = vmul.f32 %v110_v12, %v110_v12 }
  0x97   :  { %v1194_v24 = vadd.f32 %v1193_v15, %v1192_v18  ;;  %v456_v15 = vsel %vm274_vm1, %v109_v6, 0.0  ;;  %v111_v18 = vld [vmem:[%s7684_s0 + $0x2e8] sm:$0xff] }
  0x98   :  { %v425_v57 = vadd.f32 %v424_v47, %v423_v51  ;;  %v1205_v51 = vsel %vm274_vm1, %v871_v38, 0.0  ;;  %v885_v58 = vmul.f32 %v111_v18, %v111_v18 }
  0x99   :  { %v1196_v30 = vadd.f32 %v1195_v21, %v1194_v24  ;;  %v458_v21 = vsel %vm274_vm1, %v110_v12, 0.0  ;;  %v112_v24 = vld [vmem:[%s7684_s0 + $0x2f0] sm:$0xff] }
  0x9a   :  { %v427_v63 = vadd.f32 %v426_v53, %v425_v57  ;;  %v1207_v57 = vsel %vm274_vm1, %v872_v44, 0.0  ;;  %v886_v0 = vmul.f32 %v112_v24, %v112_v24 }
  0x9b   :  { %v1198_v36 = vadd.f32 %v1197_v27, %v1196_v30  ;;  %v460_v27 = vsel %vm274_vm1, %v111_v18, 0.0  ;;  %v113_v30 = vld [vmem:[%s7684_s0 + $0x2f8] sm:$0xff] }
  0x9c   :  { %v429_v5 = vadd.f32 %v428_v59, %v427_v63  ;;  %v1209_v63 = vsel %vm274_vm1, %v873_v50, 0.0  ;;  %v887_v6 = vmul.f32 %v113_v30, %v113_v30 }
  0x9d   :  { %v1200_v42 = vadd.f32 %v1199_v33, %v1198_v36  ;;  %v462_v33 = vsel %vm274_vm1, %v112_v24, 0.0  ;;  %v114_v36 = vld [vmem:[%s7684_s0 + $0x300] sm:$0xff] }
  0x9e   :  { %v431_v11 = vadd.f32 %v430_v1, %v429_v5  ;;  %v1211_v5 = vsel %vm274_vm1, %v874_v56, 0.0  ;;  %v888_v12 = vmul.f32 %v114_v36, %v114_v36 }
  0x9f   :  { %v1202_v48 = vadd.f32 %v1201_v39, %v1200_v42  ;;  %v464_v39 = vsel %vm274_vm1, %v113_v30, 0.0  ;;  %v115_v42 = vld [vmem:[%s7684_s0 + $0x308] sm:$0xff] }
  0xa0   :  { %v433_v17 = vadd.f32 %v432_v7, %v431_v11  ;;  %v1213_v11 = vsel %vm274_vm1, %v875_v62, 0.0  ;;  %v889_v18 = vmul.f32 %v115_v42, %v115_v42 }
  0xa1   :  { %v1204_v54 = vadd.f32 %v1203_v45, %v1202_v48  ;;  %v466_v45 = vsel %vm274_vm1, %v114_v36, 0.0  ;;  %v116_v48 = vld [vmem:[%s7684_s0 + $0x310] sm:$0xff] }
  0xa2   :  { %v435_v23 = vadd.f32 %v434_v13, %v433_v17  ;;  %v1215_v17 = vsel %vm274_vm1, %v876_v4, 0.0  ;;  %v890_v24 = vmul.f32 %v116_v48, %v116_v48 }
  0xa3   :  { %v1206_v60 = vadd.f32 %v1205_v51, %v1204_v54  ;;  %v468_v51 = vsel %vm274_vm1, %v115_v42, 0.0  ;;  %v117_v54 = vld [vmem:[%s7684_s0 + $0x318] sm:$0xff] }
  0xa4   :  { %v437_v29 = vadd.f32 %v436_v19, %v435_v23  ;;  %v1217_v23 = vsel %vm274_vm1, %v877_v10, 0.0  ;;  %v891_v30 = vmul.f32 %v117_v54, %v117_v54 }
  0xa5   :  { %v1208_v2 = vadd.f32 %v1207_v57, %v1206_v60  ;;  %v470_v57 = vsel %vm274_vm1, %v116_v48, 0.0  ;;  %v118_v60 = vld [vmem:[%s7684_s0 + $0x320] sm:$0xff] }
  0xa6   :  { %v439_v35 = vadd.f32 %v438_v25, %v437_v29  ;;  %v1219_v29 = vsel %vm274_vm1, %v878_v16, 0.0  ;;  %v892_v36 = vmul.f32 %v118_v60, %v118_v60 }
  0xa7   :  { %v1210_v8 = vadd.f32 %v1209_v63, %v1208_v2  ;;  %v472_v63 = vsel %vm274_vm1, %v117_v54, 0.0  ;;  %v119_v2 = vld [vmem:[%s7684_s0 + $0x328] sm:$0xff] }
  0xa8   :  { %v441_v41 = vadd.f32 %v440_v31, %v439_v35  ;;  %v1221_v35 = vsel %vm274_vm1, %v879_v22, 0.0  ;;  %v893_v42 = vmul.f32 %v119_v2, %v119_v2 }
  0xa9   :  { %v1212_v14 = vadd.f32 %v1211_v5, %v1210_v8  ;;  %v474_v5 = vsel %vm274_vm1, %v118_v60, 0.0  ;;  %v120_v8 = vld [vmem:[%s7684_s0 + $0x330] sm:$0xff] }
  0xaa   :  { %v443_v47 = vadd.f32 %v442_v37, %v441_v41  ;;  %v1223_v41 = vsel %vm274_vm1, %v880_v28, 0.0  ;;  %v894_v48 = vmul.f32 %v120_v8, %v120_v8 }
  0xab   :  { %v1214_v20 = vadd.f32 %v1213_v11, %v1212_v14  ;;  %v476_v11 = vsel %vm274_vm1, %v119_v2, 0.0  ;;  %v121_v14 = vld [vmem:[%s7684_s0 + $0x338] sm:$0xff] }
  0xac   :  { %v445_v53 = vadd.f32 %v444_v43, %v443_v47  ;;  %v1225_v47 = vsel %vm274_vm1, %v881_v34, 0.0  ;;  %v895_v54 = vmul.f32 %v121_v14, %v121_v14 }
  0xad   :  { %v1216_v26 = vadd.f32 %v1215_v17, %v1214_v20  ;;  %v478_v17 = vsel %vm274_vm1, %v120_v8, 0.0  ;;  %v122_v20 = vld [vmem:[%s7684_s0 + $0x340] sm:$0xff] }
  0xae   :  { %v447_v59 = vadd.f32 %v446_v49, %v445_v53  ;;  %v1227_v53 = vsel %vm274_vm1, %v882_v40, 0.0  ;;  %v896_v60 = vmul.f32 %v122_v20, %v122_v20 }
  0xaf   :  { %v1218_v32 = vadd.f32 %v1217_v23, %v1216_v26  ;;  %v480_v23 = vsel %vm274_vm1, %v121_v14, 0.0  ;;  %v123_v26 = vld [vmem:[%s7684_s0 + $0x348] sm:$0xff] }
  0xb0   :  { %v449_v1 = vadd.f32 %v448_v55, %v447_v59  ;;  %v1229_v59 = vsel %vm274_vm1, %v883_v46, 0.0  ;;  %v897_v2 = vmul.f32 %v123_v26, %v123_v26 }
  0xb1   :  { %v1220_v38 = vadd.f32 %v1219_v29, %v1218_v32  ;;  %v482_v29 = vsel %vm274_vm1, %v122_v20, 0.0  ;;  %v124_v32 = vld [vmem:[%s7684_s0 + $0x350] sm:$0xff] }
  0xb2   :  { %v451_v7 = vadd.f32 %v450_v61, %v449_v1  ;;  %v1231_v1 = vsel %vm274_vm1, %v884_v52, 0.0  ;;  %v898_v8 = vmul.f32 %v124_v32, %v124_v32 }
  0xb3   :  { %v1222_v44 = vadd.f32 %v1221_v35, %v1220_v38  ;;  %v484_v35 = vsel %vm274_vm1, %v123_v26, 0.0  ;;  %v125_v38 = vld [vmem:[%s7684_s0 + $0x358] sm:$0xff] }
  0xb4   :  { %v453_v13 = vadd.f32 %v452_v3, %v451_v7  ;;  %v1233_v7 = vsel %vm274_vm1, %v885_v58, 0.0  ;;  %v899_v14 = vmul.f32 %v125_v38, %v125_v38 }
  0xb5   :  { %v1224_v50 = vadd.f32 %v1223_v41, %v1222_v44  ;;  %v486_v41 = vsel %vm274_vm1, %v124_v32, 0.0  ;;  %v126_v44 = vld [vmem:[%s7684_s0 + $0x360] sm:$0xff] }
  0xb6   :  { %v455_v19 = vadd.f32 %v454_v9, %v453_v13  ;;  %v1235_v13 = vsel %vm274_vm1, %v886_v0, 0.0  ;;  %v900_v20 = vmul.f32 %v126_v44, %v126_v44 }
  0xb7   :  { %v1226_v56 = vadd.f32 %v1225_v47, %v1224_v50  ;;  %v488_v47 = vsel %vm274_vm1, %v125_v38, 0.0  ;;  %v127_v50 = vld [vmem:[%s7684_s0 + $0x368] sm:$0xff] }
  0xb8   :  { %v457_v25 = vadd.f32 %v456_v15, %v455_v19  ;;  %v1237_v19 = vsel %vm274_vm1, %v887_v6, 0.0  ;;  %v901_v26 = vmul.f32 %v127_v50, %v127_v50 }
  0xb9   :  { %v1228_v62 = vadd.f32 %v1227_v53, %v1226_v56  ;;  %v490_v53 = vsel %vm274_vm1, %v126_v44, 0.0  ;;  %v128_v56 = vld [vmem:[%s7684_s0 + $0x370] sm:$0xff] }
  0xba   :  { %v459_v31 = vadd.f32 %v458_v21, %v457_v25  ;;  %v1239_v25 = vsel %vm274_vm1, %v888_v12, 0.0  ;;  %v902_v32 = vmul.f32 %v128_v56, %v128_v56 }
  0xbb   :  { %v1230_v4 = vadd.f32 %v1229_v59, %v1228_v62  ;;  %v492_v59 = vsel %vm274_vm1, %v127_v50, 0.0  ;;  %v129_v62 = vld [vmem:[%s7684_s0 + $0x378] sm:$0xff] }
  0xbc   :  { %v461_v37 = vadd.f32 %v460_v27, %v459_v31  ;;  %v1241_v31 = vsel %vm274_vm1, %v889_v18, 0.0  ;;  %v903_v38 = vmul.f32 %v129_v62, %v129_v62 }
  0xbd   :  { %v1232_v10 = vadd.f32 %v1231_v1, %v1230_v4  ;;  %v494_v1 = vsel %vm274_vm1, %v128_v56, 0.0  ;;  %v130_v4 = vld [vmem:[%s7684_s0 + $0x380] sm:$0xff] }
  0xbe   :  { %v463_v43 = vadd.f32 %v462_v33, %v461_v37  ;;  %v1243_v37 = vsel %vm274_vm1, %v890_v24, 0.0  ;;  %v904_v44 = vmul.f32 %v130_v4, %v130_v4 }
  0xbf   :  { %v1234_v16 = vadd.f32 %v1233_v7, %v1232_v10  ;;  %v496_v7 = vsel %vm274_vm1, %v129_v62, 0.0  ;;  %v131_v10 = vld [vmem:[%s7684_s0 + $0x388] sm:$0xff] }
  0xc0   :  { %v465_v49 = vadd.f32 %v464_v39, %v463_v43  ;;  %v1245_v43 = vsel %vm274_vm1, %v891_v30, 0.0  ;;  %v905_v50 = vmul.f32 %v131_v10, %v131_v10 }
  0xc1   :  { %v1236_v22 = vadd.f32 %v1235_v13, %v1234_v16  ;;  %v498_v13 = vsel %vm274_vm1, %v130_v4, 0.0  ;;  %v132_v16 = vld [vmem:[%s7684_s0 + $0x390] sm:$0xff] }
  0xc2   :  { %v467_v55 = vadd.f32 %v466_v45, %v465_v49  ;;  %v1247_v49 = vsel %vm274_vm1, %v892_v36, 0.0  ;;  %v906_v56 = vmul.f32 %v132_v16, %v132_v16 }
  0xc3   :  { %v1238_v28 = vadd.f32 %v1237_v19, %v1236_v22  ;;  %v500_v19 = vsel %vm274_vm1, %v131_v10, 0.0  ;;  %v133_v22 = vld [vmem:[%s7684_s0 + $0x398] sm:$0xff] }
  0xc4   :  { %v469_v61 = vadd.f32 %v468_v51, %v467_v55  ;;  %v1249_v55 = vsel %vm274_vm1, %v893_v42, 0.0  ;;  %v907_v62 = vmul.f32 %v133_v22, %v133_v22 }
  0xc5   :  { %v1240_v34 = vadd.f32 %v1239_v25, %v1238_v28  ;;  %v502_v25 = vsel %vm274_vm1, %v132_v16, 0.0  ;;  %v134_v28 = vld [vmem:[%s7684_s0 + $0x3a0] sm:$0xff] }
  0xc6   :  { %v471_v3 = vadd.f32 %v470_v57, %v469_v61  ;;  %v1251_v61 = vsel %vm274_vm1, %v894_v48, 0.0  ;;  %v908_v4 = vmul.f32 %v134_v28, %v134_v28 }
  0xc7   :  { %v1242_v40 = vadd.f32 %v1241_v31, %v1240_v34  ;;  %v504_v31 = vsel %vm274_vm1, %v133_v22, 0.0  ;;  %v135_v34 = vld [vmem:[%s7684_s0 + $0x3a8] sm:$0xff] }
  0xc8   :  { %v473_v9 = vadd.f32 %v472_v63, %v471_v3  ;;  %v1253_v3 = vsel %vm274_vm1, %v895_v54, 0.0  ;;  %v909_v10 = vmul.f32 %v135_v34, %v135_v34 }
  0xc9   :  { %v1244_v46 = vadd.f32 %v1243_v37, %v1242_v40  ;;  %v506_v37 = vsel %vm274_vm1, %v134_v28, 0.0  ;;  %v136_v40 = vld [vmem:[%s7684_s0 + $0x3b0] sm:$0xff] }
  0xca   :  { %v475_v15 = vadd.f32 %v474_v5, %v473_v9  ;;  %v1255_v9 = vsel %vm274_vm1, %v896_v60, 0.0  ;;  %v910_v16 = vmul.f32 %v136_v40, %v136_v40 }
  0xcb   :  { %v1246_v52 = vadd.f32 %v1245_v43, %v1244_v46  ;;  %v508_v43 = vsel %vm274_vm1, %v135_v34, 0.0  ;;  %v137_v46 = vld [vmem:[%s7684_s0 + $0x3b8] sm:$0xff] }
  0xcc   :  { %v477_v21 = vadd.f32 %v476_v11, %v475_v15  ;;  %v1257_v15 = vsel %vm274_vm1, %v897_v2, 0.0  ;;  %v911_v22 = vmul.f32 %v137_v46, %v137_v46 }
  0xcd   :  { %v1248_v58 = vadd.f32 %v1247_v49, %v1246_v52  ;;  %v510_v49 = vsel %vm274_vm1, %v136_v40, 0.0  ;;  %v138_v52 = vld [vmem:[%s7684_s0 + $0x3c0] sm:$0xff] }
  0xce   :  { %v479_v27 = vadd.f32 %v478_v17, %v477_v21  ;;  %v1259_v21 = vsel %vm274_vm1, %v898_v8, 0.0  ;;  %v912_v28 = vmul.f32 %v138_v52, %v138_v52 }
  0xcf   :  { %v1250_v0 = vadd.f32 %v1249_v55, %v1248_v58  ;;  %v512_v55 = vsel %vm274_vm1, %v137_v46, 0.0  ;;  %v139_v58 = vld [vmem:[%s7684_s0 + $0x3c8] sm:$0xff] }
  0xd0   :  { %v481_v33 = vadd.f32 %v480_v23, %v479_v27  ;;  %v1261_v27 = vsel %vm274_vm1, %v899_v14, 0.0  ;;  %v913_v34 = vmul.f32 %v139_v58, %v139_v58 }
  0xd1   :  { %v1252_v6 = vadd.f32 %v1251_v61, %v1250_v0  ;;  %v514_v61 = vsel %vm274_vm1, %v138_v52, 0.0  ;;  %v140_v0 = vld [vmem:[%s7684_s0 + $0x3d0] sm:$0xff] }
  0xd2   :  { %v483_v39 = vadd.f32 %v482_v29, %v481_v33  ;;  %v1263_v33 = vsel %vm274_vm1, %v900_v20, 0.0  ;;  %v914_v40 = vmul.f32 %v140_v0, %v140_v0 }
  0xd3   :  { %v1254_v12 = vadd.f32 %v1253_v3, %v1252_v6  ;;  %v516_v3 = vsel %vm274_vm1, %v139_v58, 0.0  ;;  %v141_v6 = vld [vmem:[%s7684_s0 + $0x3d8] sm:$0xff] }
  0xd4   :  { %v485_v45 = vadd.f32 %v484_v35, %v483_v39  ;;  %v1265_v39 = vsel %vm274_vm1, %v901_v26, 0.0  ;;  %v915_v46 = vmul.f32 %v141_v6, %v141_v6 }
  0xd5   :  { %v1256_v18 = vadd.f32 %v1255_v9, %v1254_v12  ;;  %v518_v9 = vsel %vm274_vm1, %v140_v0, 0.0  ;;  %v142_v12 = vld [vmem:[%s7684_s0 + $0x3e0] sm:$0xff] }
  0xd6   :  { %v487_v51 = vadd.f32 %v486_v41, %v485_v45  ;;  %v1267_v45 = vsel %vm274_vm1, %v902_v32, 0.0  ;;  %v916_v52 = vmul.f32 %v142_v12, %v142_v12 }
  0xd7   :  { %v1258_v24 = vadd.f32 %v1257_v15, %v1256_v18  ;;  %v520_v15 = vsel %vm274_vm1, %v141_v6, 0.0  ;;  %v143_v18 = vld [vmem:[%s7684_s0 + $0x3e8] sm:$0xff] }
  0xd8   :  { %v489_v57 = vadd.f32 %v488_v47, %v487_v51  ;;  %v1269_v51 = vsel %vm274_vm1, %v903_v38, 0.0  ;;  %v917_v58 = vmul.f32 %v143_v18, %v143_v18 }
  0xd9   :  { %v1260_v30 = vadd.f32 %v1259_v21, %v1258_v24  ;;  %v522_v21 = vsel %vm274_vm1, %v142_v12, 0.0  ;;  %v144_v24 = vld [vmem:[%s7684_s0 + $0x3f0] sm:$0xff] }
  0xda   :  { %v491_v63 = vadd.f32 %v490_v53, %v489_v57  ;;  %v1271_v57 = vsel %vm274_vm1, %v904_v44, 0.0  ;;  %v918_v0 = vmul.f32 %v144_v24, %v144_v24 }
  0xdb   :  { %v1262_v36 = vadd.f32 %v1261_v27, %v1260_v30  ;;  %v524_v27 = vsel %vm274_vm1, %v143_v18, 0.0  ;;  %v145_v30 = vld [vmem:[%s7684_s0 + $0x3f8] sm:$0xff] }
  0xdc   :  { %v493_v5 = vadd.f32 %v492_v59, %v491_v63  ;;  %v1273_v63 = vsel %vm274_vm1, %v905_v50, 0.0  ;;  %v919_v6 = vmul.f32 %v145_v30, %v145_v30 }
  0xdd   :  { %v1264_v42 = vadd.f32 %v1263_v33, %v1262_v36  ;;  %v526_v33 = vsel %vm274_vm1, %v144_v24, 0.0  ;;  %v146_v36 = vld [vmem:[%s7684_s0 + $0x400] sm:$0xff] }
  0xde   :  { %v495_v11 = vadd.f32 %v494_v1, %v493_v5  ;;  %v1275_v5 = vsel %vm274_vm1, %v906_v56, 0.0  ;;  %v920_v12 = vmul.f32 %v146_v36, %v146_v36 }
  0xdf   :  { %v1266_v48 = vadd.f32 %v1265_v39, %v1264_v42  ;;  %v528_v39 = vsel %vm274_vm1, %v145_v30, 0.0  ;;  %v147_v42 = vld [vmem:[%s7684_s0 + $0x408] sm:$0xff] }
  0xe0   :  { %v497_v17 = vadd.f32 %v496_v7, %v495_v11  ;;  %v1277_v11 = vsel %vm274_vm1, %v907_v62, 0.0  ;;  %v921_v18 = vmul.f32 %v147_v42, %v147_v42 }
  0xe1   :  { %v1268_v54 = vadd.f32 %v1267_v45, %v1266_v48  ;;  %v530_v45 = vsel %vm274_vm1, %v146_v36, 0.0  ;;  %v148_v48 = vld [vmem:[%s7684_s0 + $0x410] sm:$0xff] }
  0xe2   :  { %v499_v23 = vadd.f32 %v498_v13, %v497_v17  ;;  %v1279_v17 = vsel %vm274_vm1, %v908_v4, 0.0  ;;  %v922_v24 = vmul.f32 %v148_v48, %v148_v48 }
  0xe3   :  { %v1270_v60 = vadd.f32 %v1269_v51, %v1268_v54  ;;  %v532_v51 = vsel %vm274_vm1, %v147_v42, 0.0  ;;  %v149_v54 = vld [vmem:[%s7684_s0 + $0x418] sm:$0xff] }
  0xe4   :  { %v501_v29 = vadd.f32 %v500_v19, %v499_v23  ;;  %v1281_v23 = vsel %vm274_vm1, %v909_v10, 0.0  ;;  %v923_v30 = vmul.f32 %v149_v54, %v149_v54 }
  0xe5   :  { %v1272_v2 = vadd.f32 %v1271_v57, %v1270_v60  ;;  %v534_v57 = vsel %vm274_vm1, %v148_v48, 0.0  ;;  %v150_v60 = vld [vmem:[%s7684_s0 + $0x420] sm:$0xff] }
  0xe6   :  { %v503_v35 = vadd.f32 %v502_v25, %v501_v29  ;;  %v1283_v29 = vsel %vm274_vm1, %v910_v16, 0.0  ;;  %v924_v36 = vmul.f32 %v150_v60, %v150_v60 }
  0xe7   :  { %v1274_v8 = vadd.f32 %v1273_v63, %v1272_v2  ;;  %v536_v63 = vsel %vm274_vm1, %v149_v54, 0.0  ;;  %v151_v2 = vld [vmem:[%s7684_s0 + $0x428] sm:$0xff] }
  0xe8   :  { %v505_v41 = vadd.f32 %v504_v31, %v503_v35  ;;  %v1285_v35 = vsel %vm274_vm1, %v911_v22, 0.0  ;;  %v925_v42 = vmul.f32 %v151_v2, %v151_v2 }
  0xe9   :  { %v1276_v14 = vadd.f32 %v1275_v5, %v1274_v8  ;;  %v538_v5 = vsel %vm274_vm1, %v150_v60, 0.0  ;;  %v152_v8 = vld [vmem:[%s7684_s0 + $0x430] sm:$0xff] }
  0xea   :  { %v507_v47 = vadd.f32 %v506_v37, %v505_v41  ;;  %v1287_v41 = vsel %vm274_vm1, %v912_v28, 0.0  ;;  %v926_v48 = vmul.f32 %v152_v8, %v152_v8 }
  0xeb   :  { %v1278_v20 = vadd.f32 %v1277_v11, %v1276_v14  ;;  %v540_v11 = vsel %vm274_vm1, %v151_v2, 0.0  ;;  %v153_v14 = vld [vmem:[%s7684_s0 + $0x438] sm:$0xff] }
  0xec   :  { %v509_v53 = vadd.f32 %v508_v43, %v507_v47  ;;  %v1289_v47 = vsel %vm274_vm1, %v913_v34, 0.0  ;;  %v927_v54 = vmul.f32 %v153_v14, %v153_v14 }
  0xed   :  { %v1280_v26 = vadd.f32 %v1279_v17, %v1278_v20  ;;  %v542_v17 = vsel %vm274_vm1, %v152_v8, 0.0  ;;  %v154_v20 = vld [vmem:[%s7684_s0 + $0x440] sm:$0xff] }
  0xee   :  { %v511_v59 = vadd.f32 %v510_v49, %v509_v53  ;;  %v1291_v53 = vsel %vm274_vm1, %v914_v40, 0.0  ;;  %v928_v60 = vmul.f32 %v154_v20, %v154_v20 }
  0xef   :  { %v1282_v32 = vadd.f32 %v1281_v23, %v1280_v26  ;;  %v544_v23 = vsel %vm274_vm1, %v153_v14, 0.0  ;;  %v155_v26 = vld [vmem:[%s7684_s0 + $0x448] sm:$0xff] }
  0xf0   :  { %v513_v1 = vadd.f32 %v512_v55, %v511_v59  ;;  %v1293_v59 = vsel %vm274_vm1, %v915_v46, 0.0  ;;  %v929_v2 = vmul.f32 %v155_v26, %v155_v26 }
  0xf1   :  { %v1284_v38 = vadd.f32 %v1283_v29, %v1282_v32  ;;  %v546_v29 = vsel %vm274_vm1, %v154_v20, 0.0  ;;  %v156_v32 = vld [vmem:[%s7684_s0 + $0x450] sm:$0xff] }
  0xf2   :  { %v515_v7 = vadd.f32 %v514_v61, %v513_v1  ;;  %v1295_v1 = vsel %vm274_vm1, %v916_v52, 0.0  ;;  %v930_v8 = vmul.f32 %v156_v32, %v156_v32 }
  0xf3   :  { %v1286_v44 = vadd.f32 %v1285_v35, %v1284_v38  ;;  %v548_v35 = vsel %vm274_vm1, %v155_v26, 0.0  ;;  %v157_v38 = vld [vmem:[%s7684_s0 + $0x458] sm:$0xff] }
  0xf4   :  { %v517_v13 = vadd.f32 %v516_v3, %v515_v7  ;;  %v1297_v7 = vsel %vm274_vm1, %v917_v58, 0.0  ;;  %v931_v14 = vmul.f32 %v157_v38, %v157_v38 }
  0xf5   :  { %v1288_v50 = vadd.f32 %v1287_v41, %v1286_v44  ;;  %v550_v41 = vsel %vm274_vm1, %v156_v32, 0.0  ;;  %v158_v44 = vld [vmem:[%s7684_s0 + $0x460] sm:$0xff] }
  0xf6   :  { %v519_v19 = vadd.f32 %v518_v9, %v517_v13  ;;  %v1299_v13 = vsel %vm274_vm1, %v918_v0, 0.0  ;;  %v932_v20 = vmul.f32 %v158_v44, %v158_v44 }
  0xf7   :  { %v1290_v56 = vadd.f32 %v1289_v47, %v1288_v50  ;;  %v552_v47 = vsel %vm274_vm1, %v157_v38, 0.0  ;;  %v159_v50 = vld [vmem:[%s7684_s0 + $0x468] sm:$0xff] }
  0xf8   :  { %v521_v25 = vadd.f32 %v520_v15, %v519_v19  ;;  %v1301_v19 = vsel %vm274_vm1, %v919_v6, 0.0  ;;  %v933_v26 = vmul.f32 %v159_v50, %v159_v50 }
  0xf9   :  { %v1292_v62 = vadd.f32 %v1291_v53, %v1290_v56  ;;  %v554_v53 = vsel %vm274_vm1, %v158_v44, 0.0  ;;  %v160_v56 = vld [vmem:[%s7684_s0 + $0x470] sm:$0xff] }
  0xfa   :  { %v523_v31 = vadd.f32 %v522_v21, %v521_v25  ;;  %v1303_v25 = vsel %vm274_vm1, %v920_v12, 0.0  ;;  %v934_v32 = vmul.f32 %v160_v56, %v160_v56 }
  0xfb   :  { %v1294_v4 = vadd.f32 %v1293_v59, %v1292_v62  ;;  %v556_v59 = vsel %vm274_vm1, %v159_v50, 0.0  ;;  %v161_v62 = vld [vmem:[%s7684_s0 + $0x478] sm:$0xff] }
  0xfc   :  { %v525_v37 = vadd.f32 %v524_v27, %v523_v31  ;;  %v1305_v31 = vsel %vm274_vm1, %v921_v18, 0.0  ;;  %v935_v38 = vmul.f32 %v161_v62, %v161_v62 }
  0xfd   :  { %v1296_v10 = vadd.f32 %v1295_v1, %v1294_v4  ;;  %v558_v1 = vsel %vm274_vm1, %v160_v56, 0.0  ;;  %v162_v4 = vld [vmem:[%s7684_s0 + $0x480] sm:$0xff] }
  0xfe   :  { %v527_v43 = vadd.f32 %v526_v33, %v525_v37  ;;  %v1307_v37 = vsel %vm274_vm1, %v922_v24, 0.0  ;;  %v936_v44 = vmul.f32 %v162_v4, %v162_v4 }
  0xff   :  { %v1298_v16 = vadd.f32 %v1297_v7, %v1296_v10  ;;  %v560_v7 = vsel %vm274_vm1, %v161_v62, 0.0  ;;  %v163_v10 = vld [vmem:[%s7684_s0 + $0x488] sm:$0xff] }
 0x100   :  { %v529_v49 = vadd.f32 %v528_v39, %v527_v43  ;;  %v1309_v43 = vsel %vm274_vm1, %v923_v30, 0.0  ;;  %v937_v50 = vmul.f32 %v163_v10, %v163_v10 }
 0x101   :  { %v1300_v22 = vadd.f32 %v1299_v13, %v1298_v16  ;;  %v562_v13 = vsel %vm274_vm1, %v162_v4, 0.0  ;;  %v164_v16 = vld [vmem:[%s7684_s0 + $0x490] sm:$0xff] }
 0x102   :  { %v531_v55 = vadd.f32 %v530_v45, %v529_v49  ;;  %v1311_v49 = vsel %vm274_vm1, %v924_v36, 0.0  ;;  %v938_v56 = vmul.f32 %v164_v16, %v164_v16 }
 0x103   :  { %v1302_v28 = vadd.f32 %v1301_v19, %v1300_v22  ;;  %v564_v19 = vsel %vm274_vm1, %v163_v10, 0.0  ;;  %v165_v22 = vld [vmem:[%s7684_s0 + $0x498] sm:$0xff] }
 0x104   :  { %v533_v61 = vadd.f32 %v532_v51, %v531_v55  ;;  %v1313_v55 = vsel %vm274_vm1, %v925_v42, 0.0  ;;  %v939_v62 = vmul.f32 %v165_v22, %v165_v22 }
 0x105   :  { %v1304_v34 = vadd.f32 %v1303_v25, %v1302_v28  ;;  %v566_v25 = vsel %vm274_vm1, %v164_v16, 0.0  ;;  %v166_v28 = vld [vmem:[%s7684_s0 + $0x4a0] sm:$0xff] }
 0x106   :  { %v535_v3 = vadd.f32 %v534_v57, %v533_v61  ;;  %v1315_v61 = vsel %vm274_vm1, %v926_v48, 0.0  ;;  %v940_v4 = vmul.f32 %v166_v28, %v166_v28 }
 0x107   :  { %v1306_v40 = vadd.f32 %v1305_v31, %v1304_v34  ;;  %v568_v31 = vsel %vm274_vm1, %v165_v22, 0.0  ;;  %v167_v34 = vld [vmem:[%s7684_s0 + $0x4a8] sm:$0xff] }
 0x108   :  { %v537_v9 = vadd.f32 %v536_v63, %v535_v3  ;;  %v1317_v3 = vsel %vm274_vm1, %v927_v54, 0.0  ;;  %v941_v10 = vmul.f32 %v167_v34, %v167_v34 }
 0x109   :  { %v1308_v46 = vadd.f32 %v1307_v37, %v1306_v40  ;;  %v570_v37 = vsel %vm274_vm1, %v166_v28, 0.0  ;;  %v168_v40 = vld [vmem:[%s7684_s0 + $0x4b0] sm:$0xff] }
 0x10a   :  { %v539_v15 = vadd.f32 %v538_v5, %v537_v9  ;;  %v1319_v9 = vsel %vm274_vm1, %v928_v60, 0.0  ;;  %v942_v16 = vmul.f32 %v168_v40, %v168_v40 }
 0x10b   :  { %v1310_v52 = vadd.f32 %v1309_v43, %v1308_v46  ;;  %v572_v43 = vsel %vm274_vm1, %v167_v34, 0.0  ;;  %v169_v46 = vld [vmem:[%s7684_s0 + $0x4b8] sm:$0xff] }
 0x10c   :  { %v541_v21 = vadd.f32 %v540_v11, %v539_v15  ;;  %v1321_v15 = vsel %vm274_vm1, %v929_v2, 0.0  ;;  %v943_v22 = vmul.f32 %v169_v46, %v169_v46 }
 0x10d   :  { %v1312_v58 = vadd.f32 %v1311_v49, %v1310_v52  ;;  %v574_v49 = vsel %vm274_vm1, %v168_v40, 0.0  ;;  %v170_v52 = vld [vmem:[%s7684_s0 + $0x4c0] sm:$0xff] }
 0x10e   :  { %v543_v27 = vadd.f32 %v542_v17, %v541_v21  ;;  %v1323_v21 = vsel %vm274_vm1, %v930_v8, 0.0  ;;  %v944_v28 = vmul.f32 %v170_v52, %v170_v52 }
 0x10f   :  { %v1314_v0 = vadd.f32 %v1313_v55, %v1312_v58  ;;  %v576_v55 = vsel %vm274_vm1, %v169_v46, 0.0  ;;  %v171_v58 = vld [vmem:[%s7684_s0 + $0x4c8] sm:$0xff] }
 0x110   :  { %v545_v33 = vadd.f32 %v544_v23, %v543_v27  ;;  %v1325_v27 = vsel %vm274_vm1, %v931_v14, 0.0  ;;  %v945_v34 = vmul.f32 %v171_v58, %v171_v58 }
 0x111   :  { %v1316_v6 = vadd.f32 %v1315_v61, %v1314_v0  ;;  %v578_v61 = vsel %vm274_vm1, %v170_v52, 0.0  ;;  %v172_v0 = vld [vmem:[%s7684_s0 + $0x4d0] sm:$0xff] }
 0x112   :  { %v547_v39 = vadd.f32 %v546_v29, %v545_v33  ;;  %v1327_v33 = vsel %vm274_vm1, %v932_v20, 0.0  ;;  %v946_v40 = vmul.f32 %v172_v0, %v172_v0 }
 0x113   :  { %v1318_v12 = vadd.f32 %v1317_v3, %v1316_v6  ;;  %v580_v3 = vsel %vm274_vm1, %v171_v58, 0.0  ;;  %v173_v6 = vld [vmem:[%s7684_s0 + $0x4d8] sm:$0xff] }
 0x114   :  { %v549_v45 = vadd.f32 %v548_v35, %v547_v39  ;;  %v1329_v39 = vsel %vm274_vm1, %v933_v26, 0.0  ;;  %v947_v46 = vmul.f32 %v173_v6, %v173_v6 }
 0x115   :  { %v1320_v18 = vadd.f32 %v1319_v9, %v1318_v12  ;;  %v582_v9 = vsel %vm274_vm1, %v172_v0, 0.0  ;;  %v174_v12 = vld [vmem:[%s7684_s0 + $0x4e0] sm:$0xff] }
 0x116   :  { %v551_v51 = vadd.f32 %v550_v41, %v549_v45  ;;  %v1331_v45 = vsel %vm274_vm1, %v934_v32, 0.0  ;;  %v948_v52 = vmul.f32 %v174_v12, %v174_v12 }
 0x117   :  { %v1322_v24 = vadd.f32 %v1321_v15, %v1320_v18  ;;  %v584_v15 = vsel %vm274_vm1, %v173_v6, 0.0  ;;  %v175_v18 = vld [vmem:[%s7684_s0 + $0x4e8] sm:$0xff] }
 0x118   :  { %v553_v57 = vadd.f32 %v552_v47, %v551_v51  ;;  %v1333_v51 = vsel %vm274_vm1, %v935_v38, 0.0  ;;  %v949_v58 = vmul.f32 %v175_v18, %v175_v18 }
 0x119   :  { %v1324_v30 = vadd.f32 %v1323_v21, %v1322_v24  ;;  %v586_v21 = vsel %vm274_vm1, %v174_v12, 0.0  ;;  %v176_v24 = vld [vmem:[%s7684_s0 + $0x4f0] sm:$0xff] }
 0x11a   :  { %v555_v63 = vadd.f32 %v554_v53, %v553_v57  ;;  %v1335_v57 = vsel %vm274_vm1, %v936_v44, 0.0  ;;  %v950_v0 = vmul.f32 %v176_v24, %v176_v24 }
 0x11b   :  { %v1326_v36 = vadd.f32 %v1325_v27, %v1324_v30  ;;  %v588_v27 = vsel %vm274_vm1, %v175_v18, 0.0  ;;  %v177_v30 = vld [vmem:[%s7684_s0 + $0x4f8] sm:$0xff] }
 0x11c   :  { %v557_v5 = vadd.f32 %v556_v59, %v555_v63  ;;  %v1337_v63 = vsel %vm274_vm1, %v937_v50, 0.0  ;;  %v951_v6 = vmul.f32 %v177_v30, %v177_v30 }
 0x11d   :  { %v1328_v42 = vadd.f32 %v1327_v33, %v1326_v36  ;;  %v590_v33 = vsel %vm274_vm1, %v176_v24, 0.0  ;;  %v178_v36 = vld [vmem:[%s7684_s0 + $0x500] sm:$0xff] }
 0x11e   :  { %v559_v11 = vadd.f32 %v558_v1, %v557_v5  ;;  %v1339_v5 = vsel %vm274_vm1, %v938_v56, 0.0  ;;  %v952_v12 = vmul.f32 %v178_v36, %v178_v36 }
 0x11f   :  { %v1330_v48 = vadd.f32 %v1329_v39, %v1328_v42  ;;  %v592_v39 = vsel %vm274_vm1, %v177_v30, 0.0  ;;  %v179_v42 = vld [vmem:[%s7684_s0 + $0x508] sm:$0xff] }
 0x120   :  { %v561_v17 = vadd.f32 %v560_v7, %v559_v11  ;;  %v1341_v11 = vsel %vm274_vm1, %v939_v62, 0.0  ;;  %v953_v18 = vmul.f32 %v179_v42, %v179_v42 }
 0x121   :  { %v1332_v54 = vadd.f32 %v1331_v45, %v1330_v48  ;;  %v594_v45 = vsel %vm274_vm1, %v178_v36, 0.0  ;;  %v180_v48 = vld [vmem:[%s7684_s0 + $0x510] sm:$0xff] }
 0x122   :  { %v563_v23 = vadd.f32 %v562_v13, %v561_v17  ;;  %v1343_v17 = vsel %vm274_vm1, %v940_v4, 0.0  ;;  %v954_v24 = vmul.f32 %v180_v48, %v180_v48 }
 0x123   :  { %v1334_v60 = vadd.f32 %v1333_v51, %v1332_v54  ;;  %v596_v51 = vsel %vm274_vm1, %v179_v42, 0.0  ;;  %v181_v54 = vld [vmem:[%s7684_s0 + $0x518] sm:$0xff] }
 0x124   :  { %v565_v29 = vadd.f32 %v564_v19, %v563_v23  ;;  %v1345_v23 = vsel %vm274_vm1, %v941_v10, 0.0  ;;  %v955_v30 = vmul.f32 %v181_v54, %v181_v54 }
 0x125   :  { %v1336_v2 = vadd.f32 %v1335_v57, %v1334_v60  ;;  %v598_v57 = vsel %vm274_vm1, %v180_v48, 0.0  ;;  %v182_v60 = vld [vmem:[%s7684_s0 + $0x520] sm:$0xff] }
 0x126   :  { %v567_v35 = vadd.f32 %v566_v25, %v565_v29  ;;  %v1347_v29 = vsel %vm274_vm1, %v942_v16, 0.0  ;;  %v956_v36 = vmul.f32 %v182_v60, %v182_v60 }
 0x127   :  { %v1338_v8 = vadd.f32 %v1337_v63, %v1336_v2  ;;  %v600_v63 = vsel %vm274_vm1, %v181_v54, 0.0  ;;  %v183_v2 = vld [vmem:[%s7684_s0 + $0x528] sm:$0xff] }
 0x128   :  { %v569_v41 = vadd.f32 %v568_v31, %v567_v35  ;;  %v1349_v35 = vsel %vm274_vm1, %v943_v22, 0.0  ;;  %v957_v42 = vmul.f32 %v183_v2, %v183_v2 }
 0x129   :  { %v1340_v14 = vadd.f32 %v1339_v5, %v1338_v8  ;;  %v602_v5 = vsel %vm274_vm1, %v182_v60, 0.0  ;;  %v184_v8 = vld [vmem:[%s7684_s0 + $0x530] sm:$0xff] }
 0x12a   :  { %v571_v47 = vadd.f32 %v570_v37, %v569_v41  ;;  %v1351_v41 = vsel %vm274_vm1, %v944_v28, 0.0  ;;  %v958_v48 = vmul.f32 %v184_v8, %v184_v8 }
 0x12b   :  { %v1342_v20 = vadd.f32 %v1341_v11, %v1340_v14  ;;  %v604_v11 = vsel %vm274_vm1, %v183_v2, 0.0  ;;  %v185_v14 = vld [vmem:[%s7684_s0 + $0x538] sm:$0xff] }
 0x12c   :  { %v573_v53 = vadd.f32 %v572_v43, %v571_v47  ;;  %v1353_v47 = vsel %vm274_vm1, %v945_v34, 0.0  ;;  %v959_v54 = vmul.f32 %v185_v14, %v185_v14 }
 0x12d   :  { %v1344_v26 = vadd.f32 %v1343_v17, %v1342_v20  ;;  %v606_v17 = vsel %vm274_vm1, %v184_v8, 0.0  ;;  %v186_v20 = vld [vmem:[%s7684_s0 + $0x540] sm:$0xff] }
 0x12e   :  { %v575_v59 = vadd.f32 %v574_v49, %v573_v53  ;;  %v1355_v53 = vsel %vm274_vm1, %v946_v40, 0.0  ;;  %v960_v60 = vmul.f32 %v186_v20, %v186_v20 }
 0x12f   :  { %v1346_v32 = vadd.f32 %v1345_v23, %v1344_v26  ;;  %v608_v23 = vsel %vm274_vm1, %v185_v14, 0.0  ;;  %v187_v26 = vld [vmem:[%s7684_s0 + $0x548] sm:$0xff] }
 0x130   :  { %v577_v1 = vadd.f32 %v576_v55, %v575_v59  ;;  %v1357_v59 = vsel %vm274_vm1, %v947_v46, 0.0  ;;  %v961_v2 = vmul.f32 %v187_v26, %v187_v26 }
 0x131   :  { %v1348_v38 = vadd.f32 %v1347_v29, %v1346_v32  ;;  %v610_v29 = vsel %vm274_vm1, %v186_v20, 0.0  ;;  %v188_v32 = vld [vmem:[%s7684_s0 + $0x550] sm:$0xff] }
 0x132   :  { %v579_v7 = vadd.f32 %v578_v61, %v577_v1  ;;  %v1359_v1 = vsel %vm274_vm1, %v948_v52, 0.0  ;;  %v962_v8 = vmul.f32 %v188_v32, %v188_v32 }
 0x133   :  { %v1350_v44 = vadd.f32 %v1349_v35, %v1348_v38  ;;  %v612_v35 = vsel %vm274_vm1, %v187_v26, 0.0  ;;  %v189_v38 = vld [vmem:[%s7684_s0 + $0x558] sm:$0xff] }
 0x134   :  { %v581_v13 = vadd.f32 %v580_v3, %v579_v7  ;;  %v1361_v7 = vsel %vm274_vm1, %v949_v58, 0.0  ;;  %v963_v14 = vmul.f32 %v189_v38, %v189_v38 }
 0x135   :  { %v1352_v50 = vadd.f32 %v1351_v41, %v1350_v44  ;;  %v614_v41 = vsel %vm274_vm1, %v188_v32, 0.0  ;;  %v190_v44 = vld [vmem:[%s7684_s0 + $0x560] sm:$0xff] }
 0x136   :  { %v583_v19 = vadd.f32 %v582_v9, %v581_v13  ;;  %v1363_v13 = vsel %vm274_vm1, %v950_v0, 0.0  ;;  %v964_v20 = vmul.f32 %v190_v44, %v190_v44 }
 0x137   :  { %v1354_v56 = vadd.f32 %v1353_v47, %v1352_v50  ;;  %v616_v47 = vsel %vm274_vm1, %v189_v38, 0.0  ;;  %v191_v50 = vld [vmem:[%s7684_s0 + $0x568] sm:$0xff] }
 0x138   :  { %v585_v25 = vadd.f32 %v584_v15, %v583_v19  ;;  %v1365_v19 = vsel %vm274_vm1, %v951_v6, 0.0  ;;  %v965_v26 = vmul.f32 %v191_v50, %v191_v50 }
 0x139   :  { %v1356_v62 = vadd.f32 %v1355_v53, %v1354_v56  ;;  %v618_v53 = vsel %vm274_vm1, %v190_v44, 0.0  ;;  %v192_v56 = vld [vmem:[%s7684_s0 + $0x570] sm:$0xff] }
 0x13a   :  { %v587_v31 = vadd.f32 %v586_v21, %v585_v25  ;;  %v1367_v25 = vsel %vm274_vm1, %v952_v12, 0.0  ;;  %v966_v32 = vmul.f32 %v192_v56, %v192_v56 }
 0x13b   :  { %v1358_v4 = vadd.f32 %v1357_v59, %v1356_v62  ;;  %v620_v59 = vsel %vm274_vm1, %v191_v50, 0.0  ;;  %v193_v62 = vld [vmem:[%s7684_s0 + $0x578] sm:$0xff] }
 0x13c   :  { %v589_v37 = vadd.f32 %v588_v27, %v587_v31  ;;  %v1369_v31 = vsel %vm274_vm1, %v953_v18, 0.0  ;;  %v967_v38 = vmul.f32 %v193_v62, %v193_v62 }
 0x13d   :  { %v1360_v10 = vadd.f32 %v1359_v1, %v1358_v4  ;;  %v622_v1 = vsel %vm274_vm1, %v192_v56, 0.0  ;;  %v194_v4 = vld [vmem:[%s7684_s0 + $0x580] sm:$0xff] }
 0x13e   :  { %v591_v43 = vadd.f32 %v590_v33, %v589_v37  ;;  %v1371_v37 = vsel %vm274_vm1, %v954_v24, 0.0  ;;  %v968_v44 = vmul.f32 %v194_v4, %v194_v4 }
 0x13f   :  { %v1362_v16 = vadd.f32 %v1361_v7, %v1360_v10  ;;  %v624_v7 = vsel %vm274_vm1, %v193_v62, 0.0  ;;  %v195_v10 = vld [vmem:[%s7684_s0 + $0x588] sm:$0xff] }
 0x140   :  { %v593_v49 = vadd.f32 %v592_v39, %v591_v43  ;;  %v1373_v43 = vsel %vm274_vm1, %v955_v30, 0.0  ;;  %v969_v50 = vmul.f32 %v195_v10, %v195_v10 }
 0x141   :  { %v1364_v22 = vadd.f32 %v1363_v13, %v1362_v16  ;;  %v626_v13 = vsel %vm274_vm1, %v194_v4, 0.0  ;;  %v196_v16 = vld [vmem:[%s7684_s0 + $0x590] sm:$0xff] }
 0x142   :  { %v595_v55 = vadd.f32 %v594_v45, %v593_v49  ;;  %v1375_v49 = vsel %vm274_vm1, %v956_v36, 0.0  ;;  %v970_v56 = vmul.f32 %v196_v16, %v196_v16 }
 0x143   :  { %v1366_v28 = vadd.f32 %v1365_v19, %v1364_v22  ;;  %v628_v19 = vsel %vm274_vm1, %v195_v10, 0.0  ;;  %v197_v22 = vld [vmem:[%s7684_s0 + $0x598] sm:$0xff] }
 0x144   :  { %v597_v61 = vadd.f32 %v596_v51, %v595_v55  ;;  %v1377_v55 = vsel %vm274_vm1, %v957_v42, 0.0  ;;  %v971_v62 = vmul.f32 %v197_v22, %v197_v22 }
 0x145   :  { %v1368_v34 = vadd.f32 %v1367_v25, %v1366_v28  ;;  %v630_v25 = vsel %vm274_vm1, %v196_v16, 0.0  ;;  %v198_v28 = vld [vmem:[%s7684_s0 + $0x5a0] sm:$0xff] }
 0x146   :  { %v599_v3 = vadd.f32 %v598_v57, %v597_v61  ;;  %v1379_v61 = vsel %vm274_vm1, %v958_v48, 0.0  ;;  %v972_v4 = vmul.f32 %v198_v28, %v198_v28 }
 0x147   :  { %v1370_v40 = vadd.f32 %v1369_v31, %v1368_v34  ;;  %v632_v31 = vsel %vm274_vm1, %v197_v22, 0.0  ;;  %v199_v34 = vld [vmem:[%s7684_s0 + $0x5a8] sm:$0xff] }
 0x148   :  { %v601_v9 = vadd.f32 %v600_v63, %v599_v3  ;;  %v1381_v3 = vsel %vm274_vm1, %v959_v54, 0.0  ;;  %v973_v10 = vmul.f32 %v199_v34, %v199_v34 }
 0x149   :  { %v1372_v46 = vadd.f32 %v1371_v37, %v1370_v40  ;;  %v634_v37 = vsel %vm274_vm1, %v198_v28, 0.0  ;;  %v200_v40 = vld [vmem:[%s7684_s0 + $0x5b0] sm:$0xff] }
 0x14a   :  { %v603_v15 = vadd.f32 %v602_v5, %v601_v9  ;;  %v1383_v9 = vsel %vm274_vm1, %v960_v60, 0.0  ;;  %v974_v16 = vmul.f32 %v200_v40, %v200_v40 }
 0x14b   :  { %v1374_v52 = vadd.f32 %v1373_v43, %v1372_v46  ;;  %v636_v43 = vsel %vm274_vm1, %v199_v34, 0.0  ;;  %v201_v46 = vld [vmem:[%s7684_s0 + $0x5b8] sm:$0xff] }
 0x14c   :  { %v605_v21 = vadd.f32 %v604_v11, %v603_v15  ;;  %v1385_v15 = vsel %vm274_vm1, %v961_v2, 0.0  ;;  %v975_v22 = vmul.f32 %v201_v46, %v201_v46 }
 0x14d   :  { %v1376_v58 = vadd.f32 %v1375_v49, %v1374_v52  ;;  %v638_v49 = vsel %vm274_vm1, %v200_v40, 0.0  ;;  %v202_v52 = vld [vmem:[%s7684_s0 + $0x5c0] sm:$0xff] }
 0x14e   :  { %v607_v27 = vadd.f32 %v606_v17, %v605_v21  ;;  %v1387_v21 = vsel %vm274_vm1, %v962_v8, 0.0  ;;  %v976_v28 = vmul.f32 %v202_v52, %v202_v52 }
 0x14f   :  { %v1378_v0 = vadd.f32 %v1377_v55, %v1376_v58  ;;  %v640_v55 = vsel %vm274_vm1, %v201_v46, 0.0  ;;  %v203_v58 = vld [vmem:[%s7684_s0 + $0x5c8] sm:$0xff] }
 0x150   :  { %v609_v33 = vadd.f32 %v608_v23, %v607_v27  ;;  %v1389_v27 = vsel %vm274_vm1, %v963_v14, 0.0  ;;  %v977_v34 = vmul.f32 %v203_v58, %v203_v58 }
 0x151   :  { %v1380_v6 = vadd.f32 %v1379_v61, %v1378_v0  ;;  %v642_v61 = vsel %vm274_vm1, %v202_v52, 0.0  ;;  %v204_v0 = vld [vmem:[%s7684_s0 + $0x5d0] sm:$0xff] }
 0x152   :  { %v611_v39 = vadd.f32 %v610_v29, %v609_v33  ;;  %v1391_v33 = vsel %vm274_vm1, %v964_v20, 0.0  ;;  %v978_v40 = vmul.f32 %v204_v0, %v204_v0 }
 0x153   :  { %v1382_v12 = vadd.f32 %v1381_v3, %v1380_v6  ;;  %v644_v3 = vsel %vm274_vm1, %v203_v58, 0.0  ;;  %v205_v6 = vld [vmem:[%s7684_s0 + $0x5d8] sm:$0xff] }
 0x154   :  { %v613_v45 = vadd.f32 %v612_v35, %v611_v39  ;;  %v1393_v39 = vsel %vm274_vm1, %v965_v26, 0.0  ;;  %v979_v46 = vmul.f32 %v205_v6, %v205_v6 }
 0x155   :  { %v1384_v18 = vadd.f32 %v1383_v9, %v1382_v12  ;;  %v646_v9 = vsel %vm274_vm1, %v204_v0, 0.0  ;;  %v206_v12 = vld [vmem:[%s7684_s0 + $0x5e0] sm:$0xff] }
 0x156   :  { %v615_v51 = vadd.f32 %v614_v41, %v613_v45  ;;  %v1395_v45 = vsel %vm274_vm1, %v966_v32, 0.0  ;;  %v980_v52 = vmul.f32 %v206_v12, %v206_v12 }
 0x157   :  { %v1386_v24 = vadd.f32 %v1385_v15, %v1384_v18  ;;  %v648_v15 = vsel %vm274_vm1, %v205_v6, 0.0  ;;  %v207_v18 = vld [vmem:[%s7684_s0 + $0x5e8] sm:$0xff] }
 0x158   :  { %v617_v57 = vadd.f32 %v616_v47, %v615_v51  ;;  %v1397_v51 = vsel %vm274_vm1, %v967_v38, 0.0  ;;  %v981_v58 = vmul.f32 %v207_v18, %v207_v18 }
 0x159   :  { %v1388_v30 = vadd.f32 %v1387_v21, %v1386_v24  ;;  %v650_v21 = vsel %vm274_vm1, %v206_v12, 0.0  ;;  %v208_v24 = vld [vmem:[%s7684_s0 + $0x5f0] sm:$0xff] }
 0x15a   :  { %v619_v63 = vadd.f32 %v618_v53, %v617_v57  ;;  %v1399_v57 = vsel %vm274_vm1, %v968_v44, 0.0  ;;  %v982_v0 = vmul.f32 %v208_v24, %v208_v24 }
 0x15b   :  { %v1390_v36 = vadd.f32 %v1389_v27, %v1388_v30  ;;  %v652_v27 = vsel %vm274_vm1, %v207_v18, 0.0  ;;  %v209_v30 = vld [vmem:[%s7684_s0 + $0x5f8] sm:$0xff] }
 0x15c   :  { %v621_v5 = vadd.f32 %v620_v59, %v619_v63  ;;  %v1401_v63 = vsel %vm274_vm1, %v969_v50, 0.0  ;;  %v983_v6 = vmul.f32 %v209_v30, %v209_v30 }
 0x15d   :  { %v1392_v42 = vadd.f32 %v1391_v33, %v1390_v36  ;;  %v654_v33 = vsel %vm274_vm1, %v208_v24, 0.0  ;;  %v5150_v36 = vld [vmem:[%s7684_s0 + $0x600] sm:$0xff] }
 0x15e   :  { %v623_v11 = vadd.f32 %v622_v1, %v621_v5  ;;  %v1403_v5 = vsel %vm274_vm1, %v970_v56, 0.0  ;;  %v984_v12 = vmul.f32 %v5150_v36, %v5150_v36 }
 0x15f   :  { %v1394_v48 = vadd.f32 %v1393_v39, %v1392_v42  ;;  %v656_v39 = vsel %vm274_vm1, %v209_v30, 0.0  ;;  %v5157_v42 = vld [vmem:[%s7684_s0 + $0x608] sm:$0xff] }
 0x160   :  { %v625_v17 = vadd.f32 %v624_v7, %v623_v11  ;;  %v1405_v11 = vsel %vm274_vm1, %v971_v62, 0.0  ;;  %v985_v18 = vmul.f32 %v5157_v42, %v5157_v42 }
 0x161   :  { %v1396_v54 = vadd.f32 %v1395_v45, %v1394_v48  ;;  %v658_v45 = vsel %vm274_vm1, %v5150_v36, 0.0  ;;  %v5165_v48 = vld [vmem:[%s7684_s0 + $0x610] sm:$0xff] }
 0x162   :  { %v627_v23 = vadd.f32 %v626_v13, %v625_v17  ;;  %v1407_v17 = vsel %vm274_vm1, %v972_v4, 0.0  ;;  %v986_v24 = vmul.f32 %v5165_v48, %v5165_v48 }
 0x163   :  { %v1398_v60 = vadd.f32 %v1397_v51, %v1396_v54  ;;  %v660_v51 = vsel %vm274_vm1, %v5157_v42, 0.0  ;;  %v5173_v54 = vld [vmem:[%s7684_s0 + $0x618] sm:$0xff] }
 0x164   :  { %v629_v29 = vadd.f32 %v628_v19, %v627_v23  ;;  %v1409_v23 = vsel %vm274_vm1, %v973_v10, 0.0  ;;  %v987_v30 = vmul.f32 %v5173_v54, %v5173_v54 }
 0x165   :  { %v1400_v2 = vadd.f32 %v1399_v57, %v1398_v60  ;;  %v662_v57 = vsel %vm274_vm1, %v5165_v48, 0.0  ;;  %v5181_v60 = vld [vmem:[%s7684_s0 + $0x620] sm:$0xff] }
 0x166   :  { %v631_v35 = vadd.f32 %v630_v25, %v629_v29  ;;  %v1411_v29 = vsel %vm274_vm1, %v974_v16, 0.0 }
 0x167   :  { %v1402_v8 = vadd.f32 %v1401_v63, %v1400_v2  ;;  %v664_v63 = vsel %vm274_vm1, %v5173_v54, 0.0  ;;  %v5189_v2 = vld [vmem:[%s7684_s0 + $0x628] sm:$0xff] }
 0x168   :  { %v633_v41 = vadd.f32 %v632_v31, %v631_v35  ;;  %v1413_v35 = vsel %vm274_vm1, %v975_v22, 0.0 }
 0x169   :  { %v1404_v14 = vadd.f32 %v1403_v5, %v1402_v8  ;;  %v666_v5 = vsel %vm274_vm1, %v5181_v60, 0.0  ;;  %v216_v8 = vld [vmem:[%s7684_s0 + $0x630] sm:$0xff] }
 0x16a   :  { %v635_v47 = vadd.f32 %v634_v37, %v633_v41  ;;  %v1415_v41 = vsel %vm274_vm1, %v976_v28, 0.0 }
 0x16b   :  { %v1406_v20 = vadd.f32 %v1405_v11, %v1404_v14  ;;  %v668_v11 = vsel %vm274_vm1, %v5189_v2, 0.0  ;;  %v5205_v14 = vld [vmem:[%s7684_s0 + $0x638] sm:$0xff] }
 0x16c   :  { %v637_v53 = vadd.f32 %v636_v43, %v635_v47  ;;  %v1417_v47 = vsel %vm274_vm1, %v977_v34, 0.0 }
 0x16d   :  { %v1408_v26 = vadd.f32 %v1407_v17, %v1406_v20  ;;  %v670_v17 = vsel %vm274_vm1, %v216_v8, 0.0  ;;  %v218_v20 = vld [vmem:[%s7684_s0 + $0x640] sm:$0xff] }
 0x16e   :  { %v639_v59 = vadd.f32 %v638_v49, %v637_v53  ;;  %v1419_v53 = vsel %vm274_vm1, %v978_v40, 0.0 }
 0x16f   :  { %v1410_v32 = vadd.f32 %v1409_v23, %v1408_v26  ;;  %v672_v23 = vsel %vm274_vm1, %v5205_v14, 0.0  ;;  %v219_v26 = vld [vmem:[%s7684_s0 + $0x648] sm:$0xff] }
 0x170   :  { %v641_v1 = vadd.f32 %v640_v55, %v639_v59  ;;  %v1421_v59 = vsel %vm274_vm1, %v979_v46, 0.0  ;;  %v222_v46 = vld [vmem:[%s7684_s0 + $0x660] sm:$0xff] }
 0x171   :  { %v1412_v38 = vadd.f32 %v1411_v29, %v1410_v32  ;;  %v674_v29 = vsel %vm274_vm1, %v218_v20, 0.0  ;;  %v220_v32 = vld [vmem:[%s7684_s0 + $0x650] sm:$0xff] }
 0x172   :  { %v643_v7 = vadd.f32 %v642_v61, %v641_v1  ;;  %v1423_v1 = vsel %vm274_vm1, %v980_v52, 0.0 }
 0x173   :  { %v1414_v44 = vadd.f32 %v1413_v35, %v1412_v38  ;;  %v676_v35 = vsel %vm274_vm1, %v219_v26, 0.0  ;;  %v1435_v38 = vsel %vm274_vm1, %v986_v24, 0.0 }
 0x174   :  { %v645_v13 = vadd.f32 %v644_v3, %v643_v7  ;;  %v1425_v7 = vsel %vm274_vm1, %v981_v58, 0.0  ;;  %v991_v58 = vmul.f32 %v5205_v14, %v5205_v14 }
 0x175   :  { %v1416_v50 = vadd.f32 %v1415_v41, %v1414_v44  ;;  %v989_v44 = vmul.f32 %v5189_v2, %v5189_v2 }
 0x176   :  { %v647_v19 = vadd.f32 %v646_v9, %v645_v13  ;;  %v1427_v13 = vsel %vm274_vm1, %v982_v0, 0.0 }
 0x177   :  { %v1418_v56 = vadd.f32 %v1417_v47, %v1416_v50 }
 0x178   :  { %v649_v25 = vadd.f32 %v648_v15, %v647_v19  ;;  %v1429_v19 = vsel %vm274_vm1, %v983_v6, 0.0 }
 0x179   :  { %v1420_v62 = vadd.f32 %v1419_v53, %v1418_v56  ;;  %v223_v53 = vld [vmem:[%s7684_s0 + $0x668] sm:$0xff] }
 0x17a   :  { %v651_v31 = vadd.f32 %v650_v21, %v649_v25  ;;  %v1431_v25 = vsel %vm274_vm1, %v984_v12, 0.0  ;;  %v684_v0 = vsel %vm274_vm1, %v223_v53, 0.0 }
 0x17b   :  { %v1422_v4 = vadd.f32 %v1421_v59, %v1420_v62  ;;  %v1441_v59 = vsel %vm274_vm1, %v989_v44, 0.0 }
 0x17c   :  { %v653_v37 = vadd.f32 %v652_v27, %v651_v31  ;;  %v1433_v31 = vsel %vm274_vm1, %v985_v18, 0.0 }
 0x17d   :  { %v1424_v10 = vadd.f32 %v1423_v1, %v1422_v4  ;;  %v992_v1 = vmul.f32 %v218_v20, %v218_v20  ;;  %v225_v4 = vld [vmem:[%s7684_s0 + $0x678] sm:$0xff] }
 0x17e   :  { %v655_v43 = vadd.f32 %v654_v33, %v653_v37  ;;  %v988_v37 = vmul.f32 %v5181_v60, %v5181_v60 }
 0x17f   :  { %v1426_v16 = vadd.f32 %v1425_v7, %v1424_v10  ;;  %v226_v10 = vld [vmem:[%s7684_s0 + $0x680] sm:$0xff] }
 0x180   :  { %v657_v49 = vadd.f32 %v656_v39, %v655_v43  ;;  %v221_v39 = vld [vmem:[%s7684_s0 + $0x658] sm:$0xff]  ;;  %v678_v43 = vsel %vm274_vm1, %v220_v32, 0.0  ;;  %v1439_v52 = vsel %vm274_vm1, %v988_v37, 0.0  ;;  %v690_v20 = vsel %vm274_vm1, %v226_v10, 0.0 }
 0x181   :  { %v1428_v22 = vadd.f32 %v1427_v13, %v1426_v16  ;;  %v680_v50 = vsel %vm274_vm1, %v221_v39, 0.0  ;;  %v688_v13 = vsel %vm274_vm1, %v225_v4, 0.0  ;;  %v1447_v16 = vsel %vm274_vm1, %v992_v1, 0.0 }
 0x182   :  { %v659_v55 = vadd.f32 %v658_v45, %v657_v49  ;;  %v1437_v45 = vsel %vm274_vm1, %v987_v30, 0.0 }
 0x183   :  { %v1430_v28 = vadd.f32 %v1429_v19, %v1428_v22 }
 0x184   :  { %v661_v61 = vadd.f32 %v660_v51, %v659_v55  ;;  %v990_v51 = vmul.f32 %v216_v8, %v216_v8  ;;  %v993_v8 = vmul.f32 %v219_v26, %v219_v26 }
 0x185   :  { %v1432_v34 = vadd.f32 %v1431_v25, %v1430_v28 }
 0x186   :  { %v663_v3 = vadd.f32 %v662_v57, %v661_v61  ;;  %v682_v57 = vsel %vm274_vm1, %v222_v46, 0.0  ;;  %v224_v61 = vld [vmem:[%s7684_s0 + $0x670] sm:$0xff]  ;;  %v1449_v22 = vsel %vm274_vm1, %v993_v8, 0.0 }
 0x187   :  { %v1434_v41 = vadd.f32 %v1433_v31, %v1432_v34  ;;  %v686_v7 = vsel %vm274_vm1, %v224_v61, 0.0 }
 0x188   :  { %v665_v9 = vadd.f32 %v664_v63, %v663_v3  ;;  %v1443_v3 = vsel %vm274_vm1, %v990_v51, 0.0 }
 0x189   :  { %v1436_v49 = vadd.f32 %v1435_v38, %v1434_v41 }
 0x18a   :  { %v667_v15 = vadd.f32 %v666_v5, %v665_v9  ;;  %v1445_v9 = vsel %vm274_vm1, %v991_v58, 0.0 }
 0x18b   :  { %v1438_v56 = vadd.f32 %v1437_v45, %v1436_v49 }
 0x18c   :  { %v669_v21 = vadd.f32 %v668_v11, %v667_v15  ;;  %v994_v15 = vmul.f32 %v220_v32, %v220_v32 }
 0x18d   :  { %v1440_v63 = vadd.f32 %v1439_v52, %v1438_v56 }
 0x18e   :  { %v671_v27 = vadd.f32 %v670_v17, %v669_v21  ;;  %v227_v17 = vld [vmem:[%s7684_s0 + $0x688] sm:$0xff]  ;;  %v995_v21 = vmul.f32 %v221_v39, %v221_v39  ;;  %v1451_v28 = vsel %vm274_vm1, %v994_v15, 0.0 }
 0x18f   :  { %v1442_v6 = vadd.f32 %v1441_v59, %v1440_v63  ;;  %v692_v26 = vsel %vm274_vm1, %v227_v17, 0.0 }
 0x190   :  { %v673_v33 = vadd.f32 %v672_v23, %v671_v27  ;;  %v228_v23 = vld [vmem:[%s7684_s0 + $0x690] sm:$0xff]  ;;  %v996_v27 = vmul.f32 %v222_v46, %v222_v46  ;;  %v1453_v34 = vsel %vm274_vm1, %v995_v21, 0.0 }
 0x191   :  { %v1444_v12 = vadd.f32 %v1443_v3, %v1442_v6  ;;  %v694_v32 = vsel %vm274_vm1, %v228_v23, 0.0 }
 0x192   :  { %v675_v40 = vadd.f32 %v674_v29, %v673_v33  ;;  %v229_v29 = vld [vmem:[%s7684_s0 + $0x698] sm:$0xff]  ;;  %v997_v33 = vmul.f32 %v223_v53, %v223_v53  ;;  %v1455_v41 = vsel %vm274_vm1, %v996_v27, 0.0 }
 0x193   :  { %v1446_v19 = vadd.f32 %v1445_v9, %v1444_v12  ;;  %v696_v39 = vsel %vm274_vm1, %v229_v29, 0.0 }
 0x194   :  { %v677_v47 = vadd.f32 %v676_v35, %v675_v40  ;;  %v230_v35 = vld [vmem:[%s7684_s0 + $0x6a0] sm:$0xff]  ;;  %v998_v40 = vmul.f32 %v224_v61, %v224_v61  ;;  %v1457_v49 = vsel %vm274_vm1, %v997_v33, 0.0 }
 0x195   :  { %v1448_v25 = vadd.f32 %v1447_v16, %v1446_v19  ;;  %v698_v46 = vsel %vm274_vm1, %v230_v35, 0.0 }
 0x196   :  { %v679_v55 = vadd.f32 %v678_v43, %v677_v47  ;;  %v231_v43 = vld [vmem:[%s7684_s0 + $0x6a8] sm:$0xff]  ;;  %v999_v47 = vmul.f32 %v225_v4, %v225_v4  ;;  %v1459_v56 = vsel %vm274_vm1, %v998_v40, 0.0 }
 0x197   :  { %v1450_v31 = vadd.f32 %v1449_v22, %v1448_v25  ;;  %v700_v53 = vsel %vm274_vm1, %v231_v43, 0.0 }
 0x198   :  { %v681_v62 = vadd.f32 %v680_v50, %v679_v55  ;;  %v232_v50 = vld [vmem:[%s7684_s0 + $0x6b0] sm:$0xff]  ;;  %v1000_v55 = vmul.f32 %v226_v10, %v226_v10  ;;  %v1461_v63 = vsel %vm274_vm1, %v999_v47, 0.0 }
 0x199   :  { %v1452_v38 = vadd.f32 %v1451_v28, %v1450_v31  ;;  %v702_v61 = vsel %vm274_vm1, %v232_v50, 0.0 }
 0x19a   :  { %v683_v5 = vadd.f32 %v682_v57, %v681_v62  ;;  %v233_v57 = vld [vmem:[%s7684_s0 + $0x6b8] sm:$0xff]  ;;  %v1001_v62 = vmul.f32 %v227_v17, %v227_v17  ;;  %v1463_v6 = vsel %vm274_vm1, %v1000_v55, 0.0 }
 0x19b   :  { %v1454_v45 = vadd.f32 %v1453_v34, %v1452_v38  ;;  %v704_v4 = vsel %vm274_vm1, %v233_v57, 0.0 }
 0x19c   :  { %v685_v11 = vadd.f32 %v684_v0, %v683_v5  ;;  %v234_v0 = vld [vmem:[%s7684_s0 + $0x6c0] sm:$0xff]  ;;  %v1002_v5 = vmul.f32 %v228_v23, %v228_v23  ;;  %v1465_v12 = vsel %vm274_vm1, %v1001_v62, 0.0 }
 0x19d   :  { %v1456_v52 = vadd.f32 %v1455_v41, %v1454_v45  ;;  %v706_v10 = vsel %vm274_vm1, %v234_v0, 0.0 }
 0x19e   :  { %v687_v18 = vadd.f32 %v686_v7, %v685_v11  ;;  %v235_v7 = vld [vmem:[%s7684_s0 + $0x6c8] sm:$0xff]  ;;  %v1003_v11 = vmul.f32 %v229_v29, %v229_v29  ;;  %v1467_v19 = vsel %vm274_vm1, %v1002_v5, 0.0 }
 0x19f   :  { %v1458_v59 = vadd.f32 %v1457_v49, %v1456_v52  ;;  %v708_v17 = vsel %vm274_vm1, %v235_v7, 0.0 }
 0x1a0   :  { %v689_v24 = vadd.f32 %v688_v13, %v687_v18  ;;  %v236_v13 = vld [vmem:[%s7684_s0 + $0x6d0] sm:$0xff]  ;;  %v1004_v18 = vmul.f32 %v230_v35, %v230_v35  ;;  %v1469_v25 = vsel %vm274_vm1, %v1003_v11, 0.0 }
 0x1a1   :  { %v1460_v3 = vadd.f32 %v1459_v56, %v1458_v59  ;;  %v710_v23 = vsel %vm274_vm1, %v236_v13, 0.0 }
 0x1a2   :  { %v691_v30 = vadd.f32 %v690_v20, %v689_v24  ;;  %v237_v20 = vld [vmem:[%s7684_s0 + $0x6d8] sm:$0xff]  ;;  %v1005_v24 = vmul.f32 %v231_v43, %v231_v43  ;;  %v1471_v31 = vsel %vm274_vm1, %v1004_v18, 0.0 }
 0x1a3   :  { %v1462_v9 = vadd.f32 %v1461_v63, %v1460_v3  ;;  %v712_v29 = vsel %vm274_vm1, %v237_v20, 0.0 }
 0x1a4   :  { %v693_v37 = vadd.f32 %v692_v26, %v691_v30  ;;  %v238_v26 = vld [vmem:[%s7684_s0 + $0x6e0] sm:$0xff]  ;;  %v1006_v30 = vmul.f32 %v232_v50, %v232_v50  ;;  %v1473_v38 = vsel %vm274_vm1, %v1005_v24, 0.0 }
 0x1a5   :  { %v1464_v16 = vadd.f32 %v1463_v6, %v1462_v9  ;;  %v714_v35 = vsel %vm274_vm1, %v238_v26, 0.0 }
 0x1a6   :  { %v695_v44 = vadd.f32 %v694_v32, %v693_v37  ;;  %v239_v32 = vld [vmem:[%s7684_s0 + $0x6e8] sm:$0xff]  ;;  %v1007_v37 = vmul.f32 %v233_v57, %v233_v57  ;;  %v1475_v45 = vsel %vm274_vm1, %v1006_v30, 0.0 }
 0x1a7   :  { %v1466_v22 = vadd.f32 %v1465_v12, %v1464_v16  ;;  %v716_v43 = vsel %vm274_vm1, %v239_v32, 0.0 }
 0x1a8   :  { %v697_v51 = vadd.f32 %v696_v39, %v695_v44  ;;  %v240_v39 = vld [vmem:[%s7684_s0 + $0x6f0] sm:$0xff]  ;;  %v1008_v44 = vmul.f32 %v234_v0, %v234_v0  ;;  %v1477_v52 = vsel %vm274_vm1, %v1007_v37, 0.0 }
 0x1a9   :  { %v1468_v28 = vadd.f32 %v1467_v19, %v1466_v22  ;;  %v718_v50 = vsel %vm274_vm1, %v240_v39, 0.0 }
 0x1aa   :  { %v699_v58 = vadd.f32 %v698_v46, %v697_v51  ;;  %v241_v46 = vld [vmem:[%s7684_s0 + $0x6f8] sm:$0xff]  ;;  %v1009_v51 = vmul.f32 %v235_v7, %v235_v7  ;;  %v1479_v59 = vsel %vm274_vm1, %v1008_v44, 0.0 }
 0x1ab   :  { %v1470_v34 = vadd.f32 %v1469_v25, %v1468_v28  ;;  %v720_v57 = vsel %vm274_vm1, %v241_v46, 0.0 }
 0x1ac   :  { %v701_v1 = vadd.f32 %v700_v53, %v699_v58  ;;  %v242_v53 = vld [vmem:[%s7684_s0 + $0x700] sm:$0xff]  ;;  %v1010_v58 = vmul.f32 %v236_v13, %v236_v13  ;;  %v1481_v3 = vsel %vm274_vm1, %v1009_v51, 0.0 }
 0x1ad   :  { %v1472_v41 = vadd.f32 %v1471_v31, %v1470_v34  ;;  %v722_v0 = vsel %vm274_vm1, %v242_v53, 0.0 }
 0x1ae   :  { %v703_v8 = vadd.f32 %v702_v61, %v701_v1  ;;  %v243_v61 = vld [vmem:[%s7684_s0 + $0x708] sm:$0xff]  ;;  %v1011_v1 = vmul.f32 %v237_v20, %v237_v20  ;;  %v1483_v9 = vsel %vm274_vm1, %v1010_v58, 0.0 }
 0x1af   :  { %v1474_v49 = vadd.f32 %v1473_v38, %v1472_v41  ;;  %v724_v7 = vsel %vm274_vm1, %v243_v61, 0.0 }
 0x1b0   :  { %v705_v15 = vadd.f32 %v704_v4, %v703_v8  ;;  %v244_v4 = vld [vmem:[%s7684_s0 + $0x710] sm:$0xff]  ;;  %v1012_v8 = vmul.f32 %v238_v26, %v238_v26  ;;  %v1485_v16 = vsel %vm274_vm1, %v1011_v1, 0.0 }
 0x1b1   :  { %v1476_v56 = vadd.f32 %v1475_v45, %v1474_v49  ;;  %v726_v13 = vsel %vm274_vm1, %v244_v4, 0.0 }
 0x1b2   :  { %v707_v21 = vadd.f32 %v706_v10, %v705_v15  ;;  %v245_v10 = vld [vmem:[%s7684_s0 + $0x718] sm:$0xff]  ;;  %v1013_v15 = vmul.f32 %v239_v32, %v239_v32  ;;  %v1487_v22 = vsel %vm274_vm1, %v1012_v8, 0.0 }
 0x1b3   :  { %v1478_v63 = vadd.f32 %v1477_v52, %v1476_v56  ;;  %v728_v20 = vsel %vm274_vm1, %v245_v10, 0.0 }
 0x1b4   :  { %v709_v27 = vadd.f32 %v708_v17, %v707_v21  ;;  %v246_v17 = vld [vmem:[%s7684_s0 + $0x720] sm:$0xff]  ;;  %v1014_v21 = vmul.f32 %v240_v39, %v240_v39  ;;  %v1489_v28 = vsel %vm274_vm1, %v1013_v15, 0.0 }
 0x1b5   :  { %v1480_v6 = vadd.f32 %v1479_v59, %v1478_v63  ;;  %v730_v26 = vsel %vm274_vm1, %v246_v17, 0.0 }
 0x1b6   :  { %v711_v33 = vadd.f32 %v710_v23, %v709_v27  ;;  %v247_v23 = vld [vmem:[%s7684_s0 + $0x728] sm:$0xff]  ;;  %v1015_v27 = vmul.f32 %v241_v46, %v241_v46  ;;  %v1491_v34 = vsel %vm274_vm1, %v1014_v21, 0.0 }
 0x1b7   :  { %v1482_v12 = vadd.f32 %v1481_v3, %v1480_v6  ;;  %v732_v32 = vsel %vm274_vm1, %v247_v23, 0.0 }
 0x1b8   :  { %v713_v40 = vadd.f32 %v712_v29, %v711_v33  ;;  %v248_v29 = vld [vmem:[%s7684_s0 + $0x730] sm:$0xff]  ;;  %v1016_v33 = vmul.f32 %v242_v53, %v242_v53  ;;  %v1493_v41 = vsel %vm274_vm1, %v1015_v27, 0.0 }
 0x1b9   :  { %v1484_v19 = vadd.f32 %v1483_v9, %v1482_v12  ;;  %v734_v39 = vsel %vm274_vm1, %v248_v29, 0.0 }
 0x1ba   :  { %v715_v47 = vadd.f32 %v714_v35, %v713_v40  ;;  %v249_v35 = vld [vmem:[%s7684_s0 + $0x738] sm:$0xff]  ;;  %v1017_v40 = vmul.f32 %v243_v61, %v243_v61  ;;  %v1495_v49 = vsel %vm274_vm1, %v1016_v33, 0.0 }
 0x1bb   :  { %v1486_v25 = vadd.f32 %v1485_v16, %v1484_v19  ;;  %v736_v46 = vsel %vm274_vm1, %v249_v35, 0.0 }
 0x1bc   :  { %v717_v55 = vadd.f32 %v716_v43, %v715_v47  ;;  %v250_v43 = vld [vmem:[%s7684_s0 + $0x740] sm:$0xff]  ;;  %v1018_v47 = vmul.f32 %v244_v4, %v244_v4  ;;  %v1497_v56 = vsel %vm274_vm1, %v1017_v40, 0.0 }
 0x1bd   :  { %v1488_v31 = vadd.f32 %v1487_v22, %v1486_v25  ;;  %v738_v53 = vsel %vm274_vm1, %v250_v43, 0.0 }
 0x1be   :  { %v719_v62 = vadd.f32 %v718_v50, %v717_v55  ;;  %v251_v50 = vld [vmem:[%s7684_s0 + $0x748] sm:$0xff]  ;;  %v1019_v55 = vmul.f32 %v245_v10, %v245_v10  ;;  %v1499_v63 = vsel %vm274_vm1, %v1018_v47, 0.0 }
 0x1bf   :  { %v1490_v38 = vadd.f32 %v1489_v28, %v1488_v31  ;;  %v740_v61 = vsel %vm274_vm1, %v251_v50, 0.0 }
 0x1c0   :  { %v721_v5 = vadd.f32 %v720_v57, %v719_v62  ;;  %v252_v57 = vld [vmem:[%s7684_s0 + $0x750] sm:$0xff]  ;;  %v1020_v62 = vmul.f32 %v246_v17, %v246_v17  ;;  %v1501_v6 = vsel %vm274_vm1, %v1019_v55, 0.0 }
 0x1c1   :  { %v1492_v45 = vadd.f32 %v1491_v34, %v1490_v38  ;;  %v742_v4 = vsel %vm274_vm1, %v252_v57, 0.0 }
 0x1c2   :  { %v723_v11 = vadd.f32 %v722_v0, %v721_v5  ;;  %v253_v0 = vld [vmem:[%s7684_s0 + $0x758] sm:$0xff]  ;;  %v1021_v5 = vmul.f32 %v247_v23, %v247_v23  ;;  %v1503_v12 = vsel %vm274_vm1, %v1020_v62, 0.0 }
 0x1c3   :  { %v1494_v52 = vadd.f32 %v1493_v41, %v1492_v45  ;;  %v744_v10 = vsel %vm274_vm1, %v253_v0, 0.0 }
 0x1c4   :  { %v725_v18 = vadd.f32 %v724_v7, %v723_v11  ;;  %v254_v7 = vld [vmem:[%s7684_s0 + $0x760] sm:$0xff]  ;;  %v1022_v11 = vmul.f32 %v248_v29, %v248_v29  ;;  %v1505_v19 = vsel %vm274_vm1, %v1021_v5, 0.0 }
 0x1c5   :  { %v1496_v59 = vadd.f32 %v1495_v49, %v1494_v52  ;;  %v746_v17 = vsel %vm274_vm1, %v254_v7, 0.0 }
 0x1c6   :  { %v727_v24 = vadd.f32 %v726_v13, %v725_v18  ;;  %v255_v13 = vld [vmem:[%s7684_s0 + $0x768] sm:$0xff]  ;;  %v1023_v18 = vmul.f32 %v249_v35, %v249_v35  ;;  %v1507_v25 = vsel %vm274_vm1, %v1022_v11, 0.0 }
 0x1c7   :  { %v1498_v3 = vadd.f32 %v1497_v56, %v1496_v59  ;;  %v748_v23 = vsel %vm274_vm1, %v255_v13, 0.0 }
 0x1c8   :  { %v729_v30 = vadd.f32 %v728_v20, %v727_v24  ;;  %v256_v20 = vld [vmem:[%s7684_s0 + $0x770] sm:$0xff]  ;;  %v1024_v24 = vmul.f32 %v250_v43, %v250_v43  ;;  %v1509_v31 = vsel %vm274_vm1, %v1023_v18, 0.0 }
 0x1c9   :  { %v1500_v9 = vadd.f32 %v1499_v63, %v1498_v3  ;;  %v750_v29 = vsel %vm274_vm1, %v256_v20, 0.0 }
 0x1ca   :  { %v731_v37 = vadd.f32 %v730_v26, %v729_v30  ;;  %v257_v26 = vld [vmem:[%s7684_s0 + $0x778] sm:$0xff]  ;;  %v1025_v30 = vmul.f32 %v251_v50, %v251_v50  ;;  %v1511_v38 = vsel %vm274_vm1, %v1024_v24, 0.0 }
 0x1cb   :  { %v1502_v16 = vadd.f32 %v1501_v6, %v1500_v9  ;;  %v752_v35 = vsel %vm274_vm1, %v257_v26, 0.0 }
 0x1cc   :  { %v733_v44 = vadd.f32 %v732_v32, %v731_v37  ;;  %v258_v32 = vld [vmem:[%s7684_s0 + $0x780] sm:$0xff]  ;;  %v1026_v37 = vmul.f32 %v252_v57, %v252_v57  ;;  %v1513_v45 = vsel %vm274_vm1, %v1025_v30, 0.0 }
 0x1cd   :  { %v1504_v22 = vadd.f32 %v1503_v12, %v1502_v16  ;;  %v754_v43 = vsel %vm274_vm1, %v258_v32, 0.0 }
 0x1ce   :  { %v735_v51 = vadd.f32 %v734_v39, %v733_v44  ;;  %v259_v39 = vld [vmem:[%s7684_s0 + $0x788] sm:$0xff]  ;;  %v1027_v44 = vmul.f32 %v253_v0, %v253_v0  ;;  %v1515_v52 = vsel %vm274_vm1, %v1026_v37, 0.0 }
 0x1cf   :  { %v1506_v28 = vadd.f32 %v1505_v19, %v1504_v22  ;;  %v756_v50 = vsel %vm274_vm1, %v259_v39, 0.0 }
 0x1d0   :  { %v737_v58 = vadd.f32 %v736_v46, %v735_v51  ;;  %v260_v46 = vld [vmem:[%s7684_s0 + $0x790] sm:$0xff]  ;;  %v1028_v51 = vmul.f32 %v254_v7, %v254_v7  ;;  %v1517_v59 = vsel %vm274_vm1, %v1027_v44, 0.0 }
 0x1d1   :  { %v1508_v34 = vadd.f32 %v1507_v25, %v1506_v28  ;;  %v758_v57 = vsel %vm274_vm1, %v260_v46, 0.0 }
 0x1d2   :  { %v739_v1 = vadd.f32 %v738_v53, %v737_v58  ;;  %v261_v53 = vld [vmem:[%s7684_s0 + $0x798] sm:$0xff]  ;;  %v1029_v58 = vmul.f32 %v255_v13, %v255_v13  ;;  %v1519_v3 = vsel %vm274_vm1, %v1028_v51, 0.0 }
 0x1d3   :  { %v1510_v41 = vadd.f32 %v1509_v31, %v1508_v34  ;;  %v760_v0 = vsel %vm274_vm1, %v261_v53, 0.0 }
 0x1d4   :  { %v741_v8 = vadd.f32 %v740_v61, %v739_v1  ;;  %v262_v61 = vld [vmem:[%s7684_s0 + $0x7a0] sm:$0xff]  ;;  %v1030_v1 = vmul.f32 %v256_v20, %v256_v20  ;;  %v1521_v9 = vsel %vm274_vm1, %v1029_v58, 0.0 }
 0x1d5   :  { %v1512_v49 = vadd.f32 %v1511_v38, %v1510_v41  ;;  %v762_v7 = vsel %vm274_vm1, %v262_v61, 0.0 }
 0x1d6   :  { %v743_v15 = vadd.f32 %v742_v4, %v741_v8  ;;  %v263_v4 = vld [vmem:[%s7684_s0 + $0x7a8] sm:$0xff]  ;;  %v1031_v8 = vmul.f32 %v257_v26, %v257_v26  ;;  %v1523_v16 = vsel %vm274_vm1, %v1030_v1, 0.0 }
 0x1d7   :  { %v1514_v56 = vadd.f32 %v1513_v45, %v1512_v49  ;;  %v764_v13 = vsel %vm274_vm1, %v263_v4, 0.0 }
 0x1d8   :  { %v745_v21 = vadd.f32 %v744_v10, %v743_v15  ;;  %v264_v10 = vld [vmem:[%s7684_s0 + $0x7b0] sm:$0xff]  ;;  %v1032_v15 = vmul.f32 %v258_v32, %v258_v32  ;;  %v1525_v22 = vsel %vm274_vm1, %v1031_v8, 0.0 }
 0x1d9   :  { %v1516_v63 = vadd.f32 %v1515_v52, %v1514_v56  ;;  %v766_v20 = vsel %vm274_vm1, %v264_v10, 0.0 }
 0x1da   :  { %v747_v27 = vadd.f32 %v746_v17, %v745_v21  ;;  %v265_v17 = vld [vmem:[%s7684_s0 + $0x7b8] sm:$0xff]  ;;  %v1033_v21 = vmul.f32 %v259_v39, %v259_v39  ;;  %v1527_v28 = vsel %vm274_vm1, %v1032_v15, 0.0 }
 0x1db   :  { %v1518_v6 = vadd.f32 %v1517_v59, %v1516_v63  ;;  %v768_v26 = vsel %vm274_vm1, %v265_v17, 0.0 }
 0x1dc   :  { %v749_v33 = vadd.f32 %v748_v23, %v747_v27  ;;  %v266_v23 = vld [vmem:[%s7684_s0 + $0x7c0] sm:$0xff]  ;;  %v1034_v27 = vmul.f32 %v260_v46, %v260_v46  ;;  %v1529_v34 = vsel %vm274_vm1, %v1033_v21, 0.0 }
 0x1dd   :  { %v1520_v12 = vadd.f32 %v1519_v3, %v1518_v6  ;;  %v770_v32 = vsel %vm274_vm1, %v266_v23, 0.0 }
 0x1de   :  { %v751_v40 = vadd.f32 %v750_v29, %v749_v33  ;;  %v267_v29 = vld [vmem:[%s7684_s0 + $0x7c8] sm:$0xff]  ;;  %v1035_v33 = vmul.f32 %v261_v53, %v261_v53  ;;  %v1531_v41 = vsel %vm274_vm1, %v1034_v27, 0.0 }
 0x1df   :  { %v1522_v19 = vadd.f32 %v1521_v9, %v1520_v12  ;;  %v772_v39 = vsel %vm274_vm1, %v267_v29, 0.0 }
 0x1e0   :  { %v753_v47 = vadd.f32 %v752_v35, %v751_v40  ;;  %v268_v35 = vld [vmem:[%s7684_s0 + $0x7d0] sm:$0xff]  ;;  %v1036_v40 = vmul.f32 %v262_v61, %v262_v61  ;;  %v1533_v49 = vsel %vm274_vm1, %v1035_v33, 0.0 }
 0x1e1   :  { %v1524_v25 = vadd.f32 %v1523_v16, %v1522_v19  ;;  %v774_v46 = vsel %vm274_vm1, %v268_v35, 0.0 }
 0x1e2   :  { %v755_v55 = vadd.f32 %v754_v43, %v753_v47  ;;  %v269_v43 = vld [vmem:[%s7684_s0 + $0x7d8] sm:$0xff]  ;;  %v1037_v47 = vmul.f32 %v263_v4, %v263_v4  ;;  %v1535_v56 = vsel %vm274_vm1, %v1036_v40, 0.0 }
 0x1e3   :  { %v1526_v31 = vadd.f32 %v1525_v22, %v1524_v25  ;;  %v776_v53 = vsel %vm274_vm1, %v269_v43, 0.0  ;;  %v1043_v21 = vmul.f32 %v269_v43, %v269_v43 }
 0x1e4   :  { %v757_v62 = vadd.f32 %v756_v50, %v755_v55  ;;  %v270_v50 = vld [vmem:[%s7684_s0 + $0x7e0] sm:$0xff]  ;;  %v1038_v55 = vmul.f32 %v264_v10, %v264_v10  ;;  %v1537_v63 = vsel %vm274_vm1, %v1037_v47, 0.0 }
 0x1e5   :  { %v1528_v38 = vadd.f32 %v1527_v28, %v1526_v31  ;;  %v778_v61 = vsel %vm274_vm1, %v270_v50, 0.0  ;;  %v1044_v25 = vmul.f32 %v270_v50, %v270_v50 }
 0x1e6   :  { %v759_v5 = vadd.f32 %v758_v57, %v757_v62  ;;  %v271_v57 = vld [vmem:[%s7684_s0 + $0x7e8] sm:$0xff]  ;;  %v1039_v62 = vmul.f32 %v265_v17, %v265_v17  ;;  %v1539_v6 = vsel %vm274_vm1, %v1038_v55, 0.0  ;;  %v1042_v17 = vmul.f32 %v268_v35, %v268_v35 }
 0x1e7   :  { %v1530_v45 = vadd.f32 %v1529_v34, %v1528_v38  ;;  %v780_v4 = vsel %vm274_vm1, %v271_v57, 0.0  ;;  %v1551_v34 = vsel %vm274_vm1, %v1044_v25, 0.0 }
 0x1e8   :  { %v761_v11 = vadd.f32 %v760_v0, %v759_v5  ;;  %v272_v0 = vld [vmem:[%s7684_s0 + $0x7f0] sm:$0xff]  ;;  %v1040_v5 = vmul.f32 %v266_v23, %v266_v23  ;;  %v1541_v12 = vsel %vm274_vm1, %v1039_v62, 0.0 }
 0x1e9   :  { %v1532_v52 = vadd.f32 %v1531_v41, %v1530_v45  ;;  %v782_v10 = vsel %vm274_vm1, %v272_v0, 0.0  ;;  %v1046_v33 = vmul.f32 %v272_v0, %v272_v0 }
 0x1ea   :  { %v763_v18 = vadd.f32 %v762_v7, %v761_v11  ;;  %v273_v7 = vld [vmem:[%s7684_s0 + $0x7f8] sm:$0xff]  ;;  %v1041_v11 = vmul.f32 %v267_v29, %v267_v29  ;;  %v1045_v29 = vmul.f32 %v271_v57, %v271_v57 }
 0x1eb   :  { %v1534_v59 = vadd.f32 %v1533_v49, %v1532_v52  ;;  %v784_v16 = vsel %vm274_vm1, %v273_v7, 0.0  ;;  %v1047_v38 = vmul.f32 %v273_v7, %v273_v7  ;;  %v1555_v41 = vsel %vm274_vm1, %v1046_v33, 0.0  ;;  %v1570_v7 = vld [vmem:[%s7685_s1] sm:$0x1] }
 0x1ec   :  { %v765_v24 = vadd.f32 %v764_v13, %v763_v18  ;;  %v1543_v18 = vsel %vm274_vm1, %v1040_v5, 0.0  ;;  %v1545_v22 = vsel %vm274_vm1, %v1041_v11, 0.0  ;;  %v1583_v11 = vld [vmem:[%s7686_s2] sm:$0x1] }
 0x1ed   :  { %v1536_v3 = vadd.f32 %v1535_v56, %v1534_v59  ;;  %v1557_v45 = vsel %vm274_vm1, %v1047_v38, 0.0 }
 0x1ee   :  { %v767_v30 = vadd.f32 %v766_v20, %v765_v24 }
 0x1ef   :  { %v1538_v9 = vadd.f32 %v1537_v63, %v1536_v3 }
 0x1f0   :  { %v769_v37 = vadd.f32 %v768_v26, %v767_v30  ;;  %v1547_v26 = vsel %vm274_vm1, %v1042_v17, 0.0  ;;  %v1549_v30 = vsel %vm274_vm1, %v1043_v21, 0.0 }
 0x1f1   :  { %v1540_v15 = vadd.f32 %v1539_v6, %v1538_v9 }
 0x1f2   :  { %v771_v44 = vadd.f32 %v770_v32, %v769_v37 }
 0x1f3   :  { %v1542_v20 = vadd.f32 %v1541_v12, %v1540_v15 }
 0x1f4   :  { %v773_v51 = vadd.f32 %v772_v39, %v771_v44  ;;  %v1553_v39 = vsel %vm274_vm1, %v1045_v29, 0.0 }
 0x1f5   :  { %v1544_v24 = vadd.f32 %v1543_v18, %v1542_v20  ;;  %v3920_v18 = vld [vmem:[%s7684_s0 + $0x8] sm:$0xff]  ;;  %v3921_v20 = vld [vmem:[%s7684_s0 + $0x200] sm:$0xff] }
 0x1f6   :  { %v775_v58 = vadd.f32 %v774_v46, %v773_v51 }
 0x1f7   :  { %v1546_v28 = vadd.f32 %v1545_v22, %v1544_v24  ;;  %v3922_v22 = vld [vmem:[%s7684_s0 + $0x208] sm:$0xff]  ;;  %v3923_v24 = vld [vmem:[%s7684_s0 + $0x400] sm:$0xff] }
 0x1f8   :  { %v777_v1 = vadd.f32 %v776_v53, %v775_v58 }
 0x1f9   :  { %v1548_v32 = vadd.f32 %v1547_v26, %v1546_v28  ;;  %v3924_v26 = vld [vmem:[%s7684_s0 + $0x408] sm:$0xff] }
 0x1fa   :  { %v779_v8 = vadd.f32 %v778_v61, %v777_v1 }
 0x1fb   :  { %v1550_v37 = vadd.f32 %v1549_v30, %v1548_v32 }
 0x1fc   :  { %v781_v13 = vadd.f32 %v780_v4, %v779_v8 }
 0x1fd   :  { %v1552_v40 = vadd.f32 %v1551_v34, %v1550_v37 }
 0x1fe   :  { %v783_v19 = vadd.f32 %v782_v10, %v781_v13 }
 0x1ff   :  { %v1554_v44 = vadd.f32 %v1553_v39, %v1552_v40 }
 0x200   :  { %v785_v23 = vadd.f32 %v784_v16, %v783_v19  ;;  %v3919_v16 = vld [vmem:[%s7684_s0] sm:$0xff] }
 0x201   :  { %v1556_v46 = vadd.f32 %v1555_v41, %v1554_v44 }
 0x202   :  { %v786_v27 = vrot.slane %v785_v23, 4 }
 0x203   :  { %v1558_v49 = vadd.f32 %v1557_v45, %v1556_v46 }
 0x204   :  { %v787_v31 = vadd.f32 %v786_v27, %v785_v23 }
 0x205   :  { %v1559_v50 = vrot.slane %v1558_v49, 4 }
 0x206   :  { %v788_v35 = vrot.slane %v787_v31, 2 }
 0x207   :  { %v1560_v52 = vadd.f32 %v1559_v50, %v1558_v49 }
 0x208   :  { %v789_v43 = vadd.f32 %v788_v35, %v787_v31 }
 0x209   :  { %v1561_v53 = vrot.slane %v1560_v52, 2 }
 0x20a   :  { %v790_v47 = vrot.slane %v789_v43, 1 }
 0x20b   :  { %v1562_v55 = vadd.f32 %v1561_v53, %v1560_v52  ;;  %v3925_v52 = vld [vmem:[%s7684_s0 + $0x10] sm:$0xff] }
 0x20c   :  { %v791_v51 = vadd.f32 %v790_v47, %v789_v43 }
 0x20d   :  { %v1563_v57 = vrot.slane %v1562_v55, 1 }
 0x20e   :  { %v1565_v56 = vmul.f32 0.00048828125, %v791_v51 }
 0x20f   :  { %v1564_v58 = vadd.f32 %v1563_v57, %v1562_v55  ;;  %v3926_v55 = vld [vmem:[%s7684_s0 + $0x18] sm:$0xff]  ;;  %v3927_v57 = vld [vmem:[%s7684_s0 + $0x210] sm:$0xff] }
 0x210   :  { %v1567_v59 = vmul.f32 %v1565_v56, %v1565_v56 }
 0x211   :  { %v1566_v61 = vmul.f32 0.00048828125, %v1564_v58 }
 0x213   :  { %v1568_v62 = vsub.f32 %v1566_v61, %v1567_v59  ;;  %v3928_v59 = vld [vmem:[%s7684_s0 + $0x218] sm:$0xff] }
 0x215   :  { %v1569_v63 = vmax.f32 %v1568_v62, 0.0  ;;  %v3929_v62 = vld [vmem:[%s7684_s0 + $0x410] sm:$0xff] }
 0x217   :  { %v1571_v0 = vadd.f32 1e-05, %v1569_v63 }
 0x219   :  { %3917 = vrsqrt.f32 %v1571_v0  ;;  %vm1578_vm2 = vweird.f32 %v1571_v0 }
 0x21f   :  { %v3918_v1 = vpop.eup %3917 }
 0x220   :  { %v1573_v3 = vmul.f32 %v3918_v1, %v1571_v0  ;;  %vm1579_vm3 = vweird.f32 %v3918_v1  ;;  %v3930_v0 = vld [vmem:[%s7684_s0 + $0x418] sm:$0xff] }
 0x221   :  { %vm1580_vm4 = vmor %vm1578_vm2, %vm1579_vm3 }
 0x222   :  { %v1574_v4 = vmul.f32 %v3918_v1, %v1573_v3 }
 0x224   :  { %v1575_v5 = vmul.f32 0.5, %v1574_v4 }
 0x226   :  { %v1576_v6 = vsub.f32 1.5, %v1575_v5 }
 0x228   :  { %v1577_v8 = vmul.f32 %v3918_v1, %v1576_v6 }
 0x22a   :  { %v1581_v9 = vsel %vm1580_vm4, %v3918_v1, %v1577_v8 }
 0x22b   :  { %v1582_v10 = vmul.f32 %v1581_v9, %v1570_v7 }
 0x22d   :  { %v1584_v12 = vmul.f32 %v1582_v10, %v1565_v56  ;;  %v5517_v13 = vperm.slane %v1582_v10, 0 }
 0x22f   :  { %v1585_v15 = vsub.f32 %v1583_v11, %v1584_v12  ;;  %v1589_v17 = vmul.f32 %v3919_v16, %v5517_v13  ;;  %v1590_v19 = vmul.f32 %v3920_v18, %v5517_v13  ;;  %v1653_v21 = vmul.f32 %v3921_v20, %v5517_v13 }
 0x230   :  { %v1654_v23 = vmul.f32 %v3922_v22, %v5517_v13  ;;  %v1717_v25 = vmul.f32 %v3923_v24, %v5517_v13  ;;  %v1718_v27 = vmul.f32 %v3924_v26, %v5517_v13  ;;  %v1781_v28 = vmul.f32 %v5517_v13, %v5150_v36 }
 0x231   :  { %v5545_v29 = vperm.slane %v1585_v15, 0  ;;  %v1782_v30 = vmul.f32 %v5517_v13, %v5157_v42  ;;  %v1591_v53 = vmul.f32 %v3925_v52, %v5517_v13  ;;  %v1592_v56 = vmul.f32 %v3926_v55, %v5517_v13 }
 0x232   :  { %v1655_v58 = vmul.f32 %v3927_v57, %v5517_v13  ;;  %v1656_v61 = vmul.f32 %v3928_v59, %v5517_v13  ;;  %v1719_v63 = vmul.f32 %v3929_v62, %v5517_v13  ;;  %v1720_v1 = vmul.f32 %v3930_v0, %v5517_v13 }
 0x233   :  { %v1848_v31 = vadd.f32 %v5545_v29, %v1589_v17  ;;  %v1849_v32 = vadd.f32 %v5545_v29, %v1590_v19  ;;  %v1912_v33 = vadd.f32 %v5545_v29, %v1653_v21  ;;  %v1913_v34 = vadd.f32 %v5545_v29, %v1654_v23 }
 0x234   :  { %v1976_v35 = vadd.f32 %v5545_v29, %v1717_v25  ;;  %v1977_v37 = vadd.f32 %v5545_v29, %v1718_v27  ;;  %v2040_v38 = vadd.f32 %v5545_v29, %v1781_v28  ;;  %v2041_v36 = vadd.f32 %v5545_v29, %v1782_v30  ;;  %v3931_v25 = vld [vmem:[%s7684_s0 + $0x20] sm:$0xff]  ;;  %v3932_v27 = vld [vmem:[%s7684_s0 + $0x28] sm:$0xff] }
 0x235   :  { %v2104_v39 = vmax.f32 %v1848_v31, 0.0  ;;  %v2105_v40 = vmax.f32 %v1849_v32, 0.0  ;;  %v2168_v41 = vmax.f32 %v1912_v33, 0.0  ;;  %v2169_v42 = vmax.f32 %v1913_v34, 0.0  ;;  %v3933_v30 = vld [vmem:[%s7684_s0 + $0x220] sm:$0xff]  ;;  %v3934_v32 = vld [vmem:[%s7684_s0 + $0x228] sm:$0xff] }
 0x236   :  { %v2232_v43 = vmax.f32 %v1976_v35, 0.0  ;;  %v2233_v44 = vmax.f32 %v1977_v37, 0.0  ;;  %v2296_v45 = vmax.f32 %v2040_v38, 0.0  ;;  %v2297_v46 = vmax.f32 %v2041_v36, 0.0  ;;  %v3935_v34 = vld [vmem:[%s7684_s0 + $0x420] sm:$0xff]  ;;  %v3936_v37 = vld [vmem:[%s7684_s0 + $0x428] sm:$0xff] }
 0x237   :  { %v2360_v47 = vpack.c.bf16 %v2105_v40, %v2104_v39  ;;  %v2392_v49 = vpack.c.bf16 %v2169_v42, %v2168_v41  ;;  %v1783_v3 = vmul.f32 %v5517_v13, %v5165_v48  ;;  %v1784_v4 = vmul.f32 %v5517_v13, %v5173_v54 }
 0x238   :  { %v2424_v50 = vpack.c.bf16 %v2233_v44, %v2232_v43  ;;  %v2456_v51 = vpack.c.bf16 %v2297_v46, %v2296_v45  ;;  %v1850_v5 = vadd.f32 %v5545_v29, %v1591_v53  ;;  %v1851_v6 = vadd.f32 %v5545_v29, %v1592_v56 }
 0x239   :  { %3786 = vmatmul.msk.bf16.vlgmr.msra.gmra.mxu0 %vm274_vm1, %v2360_v47  ;;  %3818 = vmatmul.msk.bf16.vlgmr.msra.gmra.mxu1 %vm274_vm1, %v2392_v49  ;;  %v1914_v7 = vadd.f32 %v5545_v29, %v1655_v58  ;;  %v1915_v8 = vadd.f32 %v5545_v29, %v1656_v61  ;;  %v1978_v9 = vadd.f32 %v5545_v29, %v1719_v63  ;;  %v3937_v61 = vld [vmem:[%s7684_s0 + $0x30] sm:$0xff]  ;;  %v3938_v63 = vld [vmem:[%s7684_s0 + $0x38] sm:$0xff] }
 0x23a   :  { %3850 = vmatmul.msk.bf16.vlgmr.msra.gmra.mxu2 %vm274_vm1, %v2424_v50  ;;  %3882 = vmatmul.msk.bf16.vlgmr.msra.gmra.mxu3 %vm274_vm1, %v2456_v51  ;;  %v1979_v10 = vadd.f32 %v5545_v29, %v1720_v1  ;;  %v2042_v11 = vadd.f32 %v5545_v29, %v1783_v3  ;;  %v2043_v12 = vadd.f32 %v5545_v29, %v1784_v4  ;;  %v2106_v48 = vmax.f32 %v1850_v5, 0.0  ;;  %v3939_v1 = vld [vmem:[%s7684_s0 + $0x230] sm:$0xff]  ;;  %v3940_v4 = vld [vmem:[%s7684_s0 + $0x238] sm:$0xff] }
 0x23b   :  { %v2107_v15 = vmax.f32 %v1851_v6, 0.0  ;;  %v2170_v16 = vmax.f32 %v1914_v7, 0.0  ;;  %v2171_v54 = vmax.f32 %v1915_v8, 0.0  ;;  %v2234_v17 = vmax.f32 %v1978_v9, 0.0  ;;  %v3941_v6 = vld [vmem:[%s7684_s0 + $0x430] sm:$0xff]  ;;  %v3942_v8 = vld [vmem:[%s7684_s0 + $0x438] sm:$0xff] }
 0x23c   :  { %v2235_v18 = vmax.f32 %v1979_v10, 0.0  ;;  %v2298_v19 = vmax.f32 %v2042_v11, 0.0  ;;  %v2299_v20 = vmax.f32 %v2043_v12, 0.0  ;;  %v1593_v26 = vmul.f32 %v3931_v25, %v5517_v13  ;;  %v3943_v10 = vld [vmem:[%s7684_s0 + $0x630] sm:$0xff] }
 0x23d   :  { %v2361_v21 = vpack.c.bf16 %v2107_v15, %v2106_v48  ;;  %v2393_v22 = vpack.c.bf16 %v2171_v54, %v2170_v16  ;;  %v1594_v28 = vmul.f32 %v3932_v27, %v5517_v13  ;;  %v1657_v31 = vmul.f32 %v3933_v30, %v5517_v13 }
 0x23e   :  { %v2425_v23 = vpack.c.bf16 %v2235_v18, %v2234_v17  ;;  %v2457_v24 = vpack.c.bf16 %v2299_v20, %v2298_v19  ;;  %v1658_v33 = vmul.f32 %v3934_v32, %v5517_v13  ;;  %v1721_v35 = vmul.f32 %v3935_v34, %v5517_v13 }
 0x23f   :  { %v1722_v38 = vmul.f32 %v3936_v37, %v5517_v13  ;;  %v1785_v36 = vmul.f32 %v5517_v13, %v5181_v60  ;;  %v1786_v39 = vmul.f32 %v5517_v13, %v5189_v2  ;;  %v1852_v40 = vadd.f32 %v5545_v29, %v1593_v26 }
 0x240   :  { %v1853_v41 = vadd.f32 %v5545_v29, %v1594_v28  ;;  %v1916_v42 = vadd.f32 %v5545_v29, %v1657_v31  ;;  %v1917_v43 = vadd.f32 %v5545_v29, %v1658_v33  ;;  %v1980_v44 = vadd.f32 %v5545_v29, %v1721_v35  ;;  %v3944_v33 = vld [vmem:[%s7684_s0 + $0x40] sm:$0xff]  ;;  %v3945_v35 = vld [vmem:[%s7684_s0 + $0x48] sm:$0xff] }
 0x241   :  { %v1981_v45 = vadd.f32 %v5545_v29, %v1722_v38  ;;  %v2044_v46 = vadd.f32 %v5545_v29, %v1785_v36  ;;  %v2045_v47 = vadd.f32 %v5545_v29, %v1786_v39  ;;  %v2108_v60 = vmax.f32 %v1852_v40, 0.0  ;;  %v3946_v38 = vld [vmem:[%s7684_s0 + $0x240] sm:$0xff]  ;;  %v3947_v39 = vld [vmem:[%s7684_s0 + $0x248] sm:$0xff] }
 0x242   :  { %v2109_v49 = vmax.f32 %v1853_v41, 0.0  ;;  %v2172_v50 = vmax.f32 %v1916_v42, 0.0  ;;  %v2173_v2 = vmax.f32 %v1917_v43, 0.0  ;;  %v2236_v51 = vmax.f32 %v1980_v44, 0.0  ;;  %v3948_v41 = vld [vmem:[%s7684_s0 + $0x440] sm:$0xff]  ;;  %v3949_v43 = vld [vmem:[%s7684_s0 + $0x448] sm:$0xff] }
 0x243   :  { %v2237_v52 = vmax.f32 %v1981_v45, 0.0  ;;  %v2300_v53 = vmax.f32 %v2044_v46, 0.0  ;;  %v2301_v55 = vmax.f32 %v2045_v47, 0.0  ;;  %v1595_v62 = vmul.f32 %v3937_v61, %v5517_v13  ;;  %v3950_v45 = vld [vmem:[%s7684_s0 + $0x640] sm:$0xff]  ;;  %v3951_v47 = vld [vmem:[%s7684_s0 + $0x648] sm:$0xff] }
 0x244   :  { %v2362_v56 = vpack.c.bf16 %v2109_v49, %v2108_v60  ;;  %v2394_v57 = vpack.c.bf16 %v2173_v2, %v2172_v50  ;;  %v1596_v0 = vmul.f32 %v3938_v63, %v5517_v13  ;;  %v1659_v3 = vmul.f32 %v3939_v1, %v5517_v13 }
 0x245   :  { %v2426_v58 = vpack.c.bf16 %v2237_v52, %v2236_v51  ;;  %v2458_v59 = vpack.c.bf16 %v2301_v55, %v2300_v53  ;;  %v1660_v5 = vmul.f32 %v3940_v4, %v5517_v13  ;;  %v1723_v7 = vmul.f32 %v3941_v6, %v5517_v13 }
 0x246   :  { %v1724_v9 = vmul.f32 %v3942_v8, %v5517_v13  ;;  %v1787_v11 = vmul.f32 %v3943_v10, %v5517_v13  ;;  %v1788_v12 = vmul.f32 %v5517_v13, %v5205_v14  ;;  %v1854_v48 = vadd.f32 %v5545_v29, %v1595_v62 }
 0x247   :  { %v1855_v15 = vadd.f32 %v5545_v29, %v1596_v0  ;;  %v1918_v16 = vadd.f32 %v5545_v29, %v1659_v3  ;;  %v1919_v54 = vadd.f32 %v5545_v29, %v1660_v5  ;;  %v1982_v17 = vadd.f32 %v5545_v29, %v1723_v7  ;;  %v3952_v7 = vld [vmem:[%s7684_s0 + $0x50] sm:$0xff] }
 0x248   :  { %v1983_v18 = vadd.f32 %v5545_v29, %v1724_v9  ;;  %v2046_v19 = vadd.f32 %v5545_v29, %v1787_v11  ;;  %v2047_v20 = vadd.f32 %v5545_v29, %v1788_v12  ;;  %v1597_v34 = vmul.f32 %v3944_v33, %v5517_v13  ;;  %v3953_v9 = vld [vmem:[%s7684_s0 + $0x58] sm:$0xff]  ;;  %v3954_v11 = vld [vmem:[%s7684_s0 + $0x250] sm:$0xff] }
 0x249   :  { %3787 = vmatmul.msk.bf16.gmra.mxu0 %vm274_vm1, %v2361_v21  ;;  %3819 = vmatmul.msk.bf16.gmra.mxu1 %vm274_vm1, %v2393_v22  ;;  %v2110_v21 = vmax.f32 %v1854_v48, 0.0  ;;  %v2111_v22 = vmax.f32 %v1855_v15, 0.0  ;;  %v2175_v14 = vmax.f32 %v1919_v54, 0.0  ;;  %v1598_v37 = vmul.f32 %v3945_v35, %v5517_v13  ;;  %v3955_v48 = vld [vmem:[%s7684_s0 + $0x258] sm:$0xff] }
 0x24a   :  { %3851 = vmatmul.msk.bf16.gmra.mxu2 %vm274_vm1, %v2425_v23  ;;  %3883 = vmatmul.msk.bf16.gmra.mxu3 %vm274_vm1, %v2457_v24  ;;  %v2174_v23 = vmax.f32 %v1918_v16, 0.0  ;;  %v2238_v24 = vmax.f32 %v1982_v17, 0.0  ;;  %v2239_v25 = vmax.f32 %v1983_v18, 0.0  ;;  %v2302_v26 = vmax.f32 %v2046_v19, 0.0  ;;  %v3956_v16 = vld [vmem:[%s7684_s0 + $0x450] sm:$0xff]  ;;  %v3957_v17 = vld [vmem:[%s7684_s0 + $0x458] sm:$0xff] }
 0x24b   :  { %v2303_v27 = vmax.f32 %v2047_v20, 0.0  ;;  %v2363_v28 = vpack.c.bf16 %v2111_v22, %v2110_v21  ;;  %v1661_v36 = vmul.f32 %v3946_v38, %v5517_v13  ;;  %v1662_v40 = vmul.f32 %v3947_v39, %v5517_v13  ;;  %v3958_v19 = vld [vmem:[%s7684_s0 + $0x650] sm:$0xff]  ;;  %v3959_v21 = vld [vmem:[%s7684_s0 + $0x658] sm:$0xff] }
 0x24c   :  { %v2395_v30 = vpack.c.bf16 %v2175_v14, %v2174_v23  ;;  %v2427_v31 = vpack.c.bf16 %v2239_v25, %v2238_v24  ;;  %v1725_v42 = vmul.f32 %v3948_v41, %v5517_v13  ;;  %v1726_v44 = vmul.f32 %v3949_v43, %v5517_v13  ;;  %v3960_v43 = vld [vmem:[%s7684_s0 + $0x60] sm:$0xff] }
 0x24d   :  { %v2459_v32 = vpack.c.bf16 %v2303_v27, %v2302_v26  ;;  %v1789_v46 = vmul.f32 %v3950_v45, %v5517_v13  ;;  %v1790_v60 = vmul.f32 %v3951_v47, %v5517_v13  ;;  %v1856_v49 = vadd.f32 %v5545_v29, %v1597_v34  ;;  %v3961_v45 = vld [vmem:[%s7684_s0 + $0x68] sm:$0xff]  ;;  %v3962_v47 = vld [vmem:[%s7684_s0 + $0x260] sm:$0xff] }
 0x24e   :  { %v1857_v50 = vadd.f32 %v5545_v29, %v1598_v37  ;;  %v1920_v2 = vadd.f32 %v5545_v29, %v1661_v36  ;;  %v1921_v51 = vadd.f32 %v5545_v29, %v1662_v40  ;;  %v1984_v52 = vadd.f32 %v5545_v29, %v1725_v42 }
 0x24f   :  { %v1985_v53 = vadd.f32 %v5545_v29, %v1726_v44  ;;  %v2048_v55 = vadd.f32 %v5545_v29, %v1789_v46  ;;  %v1599_v8 = vmul.f32 %v3952_v7, %v5517_v13  ;;  %v1600_v10 = vmul.f32 %v3953_v9, %v5517_v13 }
 0x250   :  { %v2177_v61 = vmax.f32 %v1921_v51, 0.0  ;;  %v2240_v62 = vmax.f32 %v1984_v52, 0.0  ;;  %v1663_v12 = vmul.f32 %v3954_v11, %v5517_v13  ;;  %v1664_v15 = vmul.f32 %v3955_v48, %v5517_v13  ;;  %v3965_v52 = vld [vmem:[%s7684_s0 + $0x468] sm:$0xff] }
 0x251   :  { %v2241_v63 = vmax.f32 %v1985_v53, 0.0  ;;  %v2304_v0 = vmax.f32 %v2048_v55, 0.0  ;;  %v1727_v54 = vmul.f32 %v3956_v16, %v5517_v13  ;;  %v1728_v18 = vmul.f32 %v3957_v17, %v5517_v13  ;;  %v3966_v55 = vld [vmem:[%s7684_s0 + $0x660] sm:$0xff]  ;;  %v3968_v17 = vld [vmem:[%s7684_s0 + $0x70] sm:$0xff] }
 0x252   :  { %v1791_v20 = vmul.f32 %v3958_v19, %v5517_v13  ;;  %v1792_v22 = vmul.f32 %v3959_v21, %v5517_v13  ;;  %v1858_v23 = vadd.f32 %v5545_v29, %v1599_v8  ;;  %v1859_v14 = vadd.f32 %v5545_v29, %v1600_v10  ;;  %v3969_v19 = vld [vmem:[%s7684_s0 + $0x78] sm:$0xff]  ;;  %v3970_v21 = vld [vmem:[%s7684_s0 + $0x270] sm:$0xff] }
 0x253   :  { %v2428_v5 = vpack.c.bf16 %v2241_v63, %v2240_v62  ;;  %v1922_v24 = vadd.f32 %v5545_v29, %v1663_v12  ;;  %v1923_v25 = vadd.f32 %v5545_v29, %v1664_v15  ;;  %v1986_v26 = vadd.f32 %v5545_v29, %v1727_v54 }
 0x254   :  { %v1987_v27 = vadd.f32 %v5545_v29, %v1728_v18  ;;  %v1601_v44 = vmul.f32 %v3960_v43, %v5517_v13  ;;  %v1602_v46 = vmul.f32 %v3961_v45, %v5517_v13  ;;  %v1730_v53 = vmul.f32 %v3965_v52, %v5517_v13  ;;  %v3976_v52 = vld [vmem:[%s7684_s0 + $0x80] sm:$0xff] }
 0x255   :  { %v2178_v33 = vmax.f32 %v1922_v24, 0.0  ;;  %v2179_v34 = vmax.f32 %v1923_v25, 0.0  ;;  %v2242_v35 = vmax.f32 %v1986_v26, 0.0  ;;  %v1603_v18 = vmul.f32 %v3968_v17, %v5517_v13  ;;  %v3972_v24 = vld [vmem:[%s7684_s0 + $0x470] sm:$0xff]  ;;  %v3973_v26 = vld [vmem:[%s7684_s0 + $0x478] sm:$0xff] }
 0x256   :  { %v2243_v37 = vmax.f32 %v1987_v27, 0.0  ;;  %v1731_v25 = vmul.f32 %v3972_v24, %v5517_v13  ;;  %v1732_v27 = vmul.f32 %v3973_v26, %v5517_v13 }
 0x257   :  { %v2397_v40 = vpack.c.bf16 %v2179_v34, %v2178_v33  ;;  %v1862_v33 = vadd.f32 %v5545_v29, %v1603_v18 }
 0x258   :  { %v2429_v41 = vpack.c.bf16 %v2243_v37, %v2242_v35 }
 0x259   :  { %3788 = vmatmul.msk.bf16.gmra.mxu0 %vm274_vm1, %v2362_v56  ;;  %3820 = vmatmul.msk.bf16.gmra.mxu1 %vm274_vm1, %v2394_v57  ;;  %v2049_v56 = vadd.f32 %v5545_v29, %v1790_v60  ;;  %v2112_v57 = vmax.f32 %v1856_v49, 0.0  ;;  %v1665_v60 = vmul.f32 %v3962_v47, %v5517_v13  ;;  %v3963_v49 = vld [vmem:[%s7684_s0 + $0x268] sm:$0xff] }
 0x25a   :  { %3852 = vmatmul.msk.bf16.gmra.mxu2 %vm274_vm1, %v2426_v58  ;;  %3884 = vmatmul.msk.bf16.gmra.mxu3 %vm274_vm1, %v2458_v59  ;;  %v2113_v58 = vmax.f32 %v1857_v50, 0.0  ;;  %v2176_v59 = vmax.f32 %v1920_v2, 0.0  ;;  %v1666_v50 = vmul.f32 %v3963_v49, %v5517_v13  ;;  %v3964_v2 = vld [vmem:[%s7684_s0 + $0x460] sm:$0xff] }
 0x25b   :  { %v2305_v1 = vmax.f32 %v2049_v56, 0.0  ;;  %v1729_v51 = vmul.f32 %v3964_v2, %v5517_v13  ;;  %v1793_v56 = vmul.f32 %v3966_v55, %v5517_v13  ;;  %v1924_v62 = vadd.f32 %v5545_v29, %v1665_v60  ;;  %v3977_v55 = vld [vmem:[%s7684_s0 + $0x88] sm:$0xff] }
 0x25c   :  { %v2364_v3 = vpack.c.bf16 %v2113_v58, %v2112_v57  ;;  %v2396_v4 = vpack.c.bf16 %v2177_v61, %v2176_v59  ;;  %v3967_v57 = vld [vmem:[%s7684_s0 + $0x668] sm:$0xff]  ;;  %v1860_v59 = vadd.f32 %v5545_v29, %v1601_v44  ;;  %v1861_v61 = vadd.f32 %v5545_v29, %v1602_v46 }
 0x25d   :  { %v2460_v6 = vpack.c.bf16 %v2305_v1, %v2304_v0  ;;  %v1794_v58 = vmul.f32 %v3967_v57, %v5517_v13  ;;  %v1925_v63 = vadd.f32 %v5545_v29, %v1666_v50  ;;  %v1988_v0 = vadd.f32 %v5545_v29, %v1729_v51  ;;  %v3978_v57 = vld [vmem:[%s7684_s0 + $0x280] sm:$0xff] }
 0x25e   :  { %v1989_v1 = vadd.f32 %v5545_v29, %v1730_v53  ;;  %v2180_v7 = vmax.f32 %v1924_v62, 0.0  ;;  %v1605_v53 = vmul.f32 %v3976_v52, %v5517_v13  ;;  %v3980_v62 = vld [vmem:[%s7684_s0 + $0x480] sm:$0xff] }
 0x25f   :  { %v2181_v8 = vmax.f32 %v1925_v63, 0.0  ;;  %v2244_v9 = vmax.f32 %v1988_v0, 0.0  ;;  %v1733_v63 = vmul.f32 %v3980_v62, %v5517_v13  ;;  %v3981_v0 = vld [vmem:[%s7684_s0 + $0x488] sm:$0xff] }
 0x260   :  { %v2245_v10 = vmax.f32 %v1989_v1, 0.0  ;;  %v1734_v1 = vmul.f32 %v3981_v0, %v5517_v13 }
 0x261   :  { %v2398_v15 = vpack.c.bf16 %v2181_v8, %v2180_v7  ;;  %v1864_v7 = vadd.f32 %v5545_v29, %v1605_v53 }
 0x262   :  { %v2430_v16 = vpack.c.bf16 %v2245_v10, %v2244_v9 }
 0x269   :  { %3789 = vmatmul.msk.bf16.gmra.mxu0 %vm274_vm1, %v2363_v28  ;;  %3821 = vmatmul.msk.bf16.gmra.mxu1 %vm274_vm1, %v2395_v30  ;;  %v2050_v28 = vadd.f32 %v5545_v29, %v1791_v20  ;;  %v2051_v30 = vadd.f32 %v5545_v29, %v1792_v22  ;;  %v1604_v20 = vmul.f32 %v3969_v19, %v5517_v13 }
 0x26a   :  { %3853 = vmatmul.msk.bf16.gmra.mxu2 %vm274_vm1, %v2427_v31  ;;  %3885 = vmatmul.msk.bf16.gmra.mxu3 %vm274_vm1, %v2459_v32  ;;  %v2114_v31 = vmax.f32 %v1858_v23, 0.0  ;;  %v2115_v32 = vmax.f32 %v1859_v14, 0.0  ;;  %v1667_v22 = vmul.f32 %v3970_v21, %v5517_v13  ;;  %v3971_v23 = vld [vmem:[%s7684_s0 + $0x278] sm:$0xff] }
 0x26b   :  { %v2306_v38 = vmax.f32 %v2050_v28, 0.0  ;;  %v2307_v36 = vmax.f32 %v2051_v30, 0.0  ;;  %v1668_v14 = vmul.f32 %v3971_v23, %v5517_v13  ;;  %v3974_v28 = vld [vmem:[%s7684_s0 + $0x670] sm:$0xff]  ;;  %v1863_v34 = vadd.f32 %v5545_v29, %v1604_v20 }
 0x26c   :  { %v2365_v39 = vpack.c.bf16 %v2115_v32, %v2114_v31  ;;  %v1795_v30 = vmul.f32 %v3974_v28, %v5517_v13  ;;  %v3975_v31 = vld [vmem:[%s7684_s0 + $0x678] sm:$0xff]  ;;  %v1926_v35 = vadd.f32 %v5545_v29, %v1667_v22  ;;  %v3984_v28 = vld [vmem:[%s7684_s0 + $0x90] sm:$0xff] }
 0x26d   :  { %v2461_v42 = vpack.c.bf16 %v2307_v36, %v2306_v38  ;;  %v1796_v32 = vmul.f32 %v3975_v31, %v5517_v13  ;;  %v1927_v37 = vadd.f32 %v5545_v29, %v1668_v14  ;;  %v1990_v38 = vadd.f32 %v5545_v29, %v1731_v25  ;;  %v3985_v31 = vld [vmem:[%s7684_s0 + $0x98] sm:$0xff] }
 0x26e   :  { %v1991_v36 = vadd.f32 %v5545_v29, %v1732_v27  ;;  %v2182_v43 = vmax.f32 %v1926_v35, 0.0  ;;  %v3987_v35 = vld [vmem:[%s7684_s0 + $0x298] sm:$0xff] }
 0x26f   :  { %v2183_v44 = vmax.f32 %v1927_v37, 0.0  ;;  %v2246_v45 = vmax.f32 %v1990_v38, 0.0  ;;  %v1672_v37 = vmul.f32 %v3987_v35, %v5517_v13  ;;  %v3988_v38 = vld [vmem:[%s7684_s0 + $0x490] sm:$0xff] }
 0x270   :  { %v2247_v46 = vmax.f32 %v1991_v36, 0.0  ;;  %v1735_v36 = vmul.f32 %v3988_v38, %v5517_v13 }
 0x271   :  { %v2399_v50 = vpack.c.bf16 %v2183_v44, %v2182_v43  ;;  %v3991_v43 = vld [vmem:[%s7684_s0 + $0x698] sm:$0xff] }
 0x272   :  { %v2431_v2 = vpack.c.bf16 %v2247_v46, %v2246_v45  ;;  %v1800_v44 = vmul.f32 %v3991_v43, %v5517_v13  ;;  %v1994_v52 = vadd.f32 %v5545_v29, %v1735_v36 }
 0x274   :  { %v2250_v62 = vmax.f32 %v1994_v52, 0.0 }
 0x279   :  { %3790 = vmatmul.msk.bf16.gmra.mxu0 %vm274_vm1, %v2364_v3  ;;  %3822 = vmatmul.msk.bf16.gmra.mxu1 %vm274_vm1, %v2396_v4  ;;  %v2052_v3 = vadd.f32 %v5545_v29, %v1793_v56  ;;  %v2053_v4 = vadd.f32 %v5545_v29, %v1794_v58  ;;  %v1606_v56 = vmul.f32 %v3977_v55, %v5517_v13 }
 0x27a   :  { %3854 = vmatmul.msk.bf16.gmra.mxu2 %vm274_vm1, %v2428_v5  ;;  %3886 = vmatmul.msk.bf16.gmra.mxu3 %vm274_vm1, %v2460_v6  ;;  %v2116_v5 = vmax.f32 %v1860_v59, 0.0  ;;  %v2117_v6 = vmax.f32 %v1861_v61, 0.0  ;;  %v1669_v58 = vmul.f32 %v3978_v57, %v5517_v13  ;;  %v3979_v59 = vld [vmem:[%s7684_s0 + $0x288] sm:$0xff] }
 0x27b   :  { %v2308_v11 = vmax.f32 %v2052_v3, 0.0  ;;  %v2309_v12 = vmax.f32 %v2053_v4, 0.0  ;;  %v1670_v61 = vmul.f32 %v3979_v59, %v5517_v13  ;;  %v3982_v3 = vld [vmem:[%s7684_s0 + $0x680] sm:$0xff]  ;;  %v1865_v8 = vadd.f32 %v5545_v29, %v1606_v56 }
 0x27c   :  { %v2366_v48 = vpack.c.bf16 %v2117_v6, %v2116_v5  ;;  %v1797_v4 = vmul.f32 %v3982_v3, %v5517_v13  ;;  %v3983_v5 = vld [vmem:[%s7684_s0 + $0x688] sm:$0xff]  ;;  %v1928_v9 = vadd.f32 %v5545_v29, %v1669_v58  ;;  %v2059_v56 = vadd.f32 %v5545_v29, %v1800_v44 }
 0x27d   :  { %v2462_v54 = vpack.c.bf16 %v2309_v12, %v2308_v11  ;;  %v1798_v6 = vmul.f32 %v3983_v5, %v5517_v13  ;;  %v1929_v10 = vadd.f32 %v5545_v29, %v1670_v61  ;;  %v1992_v11 = vadd.f32 %v5545_v29, %v1733_v63 }
 0x27e   :  { %v1993_v12 = vadd.f32 %v5545_v29, %v1734_v1  ;;  %v2184_v17 = vmax.f32 %v1928_v9, 0.0  ;;  %v2315_v1 = vmax.f32 %v2059_v56, 0.0 }
 0x27f   :  { %v2185_v18 = vmax.f32 %v1929_v10, 0.0  ;;  %v2248_v19 = vmax.f32 %v1992_v11, 0.0  ;;  %v3992_v11 = vld [vmem:[%s7684_s0 + $0xa0] sm:$0xff] }
 0x280   :  { %v2249_v20 = vmax.f32 %v1993_v12, 0.0  ;;  %v1609_v12 = vmul.f32 %v3992_v11, %v5517_v13 }
 0x281   :  { %v2400_v14 = vpack.c.bf16 %v2185_v18, %v2184_v17  ;;  %v3995_v17 = vld [vmem:[%s7684_s0 + $0x2a8] sm:$0xff] }
 0x282   :  { %v2432_v26 = vpack.c.bf16 %v2249_v20, %v2248_v19  ;;  %v1674_v18 = vmul.f32 %v3995_v17, %v5517_v13  ;;  %v3996_v19 = vld [vmem:[%s7684_s0 + $0x4a0] sm:$0xff] }
 0x283   :  { %v1737_v20 = vmul.f32 %v3996_v19, %v5517_v13 }
 0x285   :  { %v1996_v35 = vadd.f32 %v5545_v29, %v1737_v20 }
 0x287   :  { %v2252_v43 = vmax.f32 %v1996_v35, 0.0 }
 0x289   :  { %3791 = vmatmul.msk.bf16.gmra.mxu0 %vm274_vm1, %v2365_v39  ;;  %3823 = vmatmul.msk.bf16.gmra.mxu1 %vm274_vm1, %v2397_v40  ;;  %v2054_v39 = vadd.f32 %v5545_v29, %v1795_v30  ;;  %v2055_v40 = vadd.f32 %v5545_v29, %v1796_v32  ;;  %v1607_v30 = vmul.f32 %v3984_v28, %v5517_v13 }
 0x28a   :  { %3855 = vmatmul.msk.bf16.gmra.mxu2 %vm274_vm1, %v2429_v41  ;;  %3887 = vmatmul.msk.bf16.gmra.mxu3 %vm274_vm1, %v2461_v42  ;;  %v2118_v41 = vmax.f32 %v1862_v33, 0.0  ;;  %v2119_v42 = vmax.f32 %v1863_v34, 0.0  ;;  %v1608_v32 = vmul.f32 %v3985_v31, %v5517_v13  ;;  %v3986_v33 = vld [vmem:[%s7684_s0 + $0x290] sm:$0xff]  ;;  %v1868_v28 = vadd.f32 %v5545_v29, %v1609_v12 }
 0x28b   :  { %v2310_v47 = vmax.f32 %v2054_v39, 0.0  ;;  %v2311_v60 = vmax.f32 %v2055_v40, 0.0  ;;  %v1671_v34 = vmul.f32 %v3986_v33, %v5517_v13  ;;  %v3989_v39 = vld [vmem:[%s7684_s0 + $0x498] sm:$0xff] }
 0x28c   :  { %v2367_v49 = vpack.c.bf16 %v2119_v42, %v2118_v41  ;;  %v1736_v40 = vmul.f32 %v3989_v39, %v5517_v13  ;;  %v3990_v41 = vld [vmem:[%s7684_s0 + $0x690] sm:$0xff]  ;;  %v2124_v39 = vmax.f32 %v1868_v28, 0.0 }
 0x28d   :  { %v2463_v51 = vpack.c.bf16 %v2311_v60, %v2310_v47  ;;  %v1799_v42 = vmul.f32 %v3990_v41, %v5517_v13  ;;  %v1866_v47 = vadd.f32 %v5545_v29, %v1607_v30  ;;  %v1867_v60 = vadd.f32 %v5545_v29, %v1608_v32 }
 0x28e   :  { %v1995_v53 = vadd.f32 %v5545_v29, %v1736_v40  ;;  %v1933_v32 = vadd.f32 %v5545_v29, %v1674_v18 }
 0x28f   :  { %v2058_v55 = vadd.f32 %v5545_v29, %v1799_v42  ;;  %v2122_v57 = vmax.f32 %v1866_v47, 0.0  ;;  %v2123_v58 = vmax.f32 %v1867_v60, 0.0 }
 0x290   :  { %v2251_v63 = vmax.f32 %v1995_v53, 0.0  ;;  %v2189_v42 = vmax.f32 %v1933_v32, 0.0 }
 0x291   :  { %v2314_v0 = vmax.f32 %v2058_v55, 0.0  ;;  %v2369_v5 = vpack.c.bf16 %v2123_v58, %v2122_v57  ;;  %v4000_v55 = vld [vmem:[%s7684_s0 + $0xb0] sm:$0xff]  ;;  %v4001_v57 = vld [vmem:[%s7684_s0 + $0xb8] sm:$0xff] }
 0x292   :  { %v2433_v9 = vpack.c.bf16 %v2251_v63, %v2250_v62  ;;  %v1611_v56 = vmul.f32 %v4000_v55, %v5517_v13  ;;  %v1612_v58 = vmul.f32 %v4001_v57, %v5517_v13  ;;  %v4003_v62 = vld [vmem:[%s7684_s0 + $0x2b8] sm:$0xff] }
 0x293   :  { %v2465_v10 = vpack.c.bf16 %v2315_v1, %v2314_v0  ;;  %v1676_v63 = vmul.f32 %v4003_v62, %v5517_v13  ;;  %v4004_v0 = vld [vmem:[%s7684_s0 + $0x4b0] sm:$0xff] }
 0x294   :  { %v1739_v1 = vmul.f32 %v4004_v0, %v5517_v13  ;;  %v1870_v11 = vadd.f32 %v5545_v29, %v1611_v56  ;;  %v1871_v12 = vadd.f32 %v5545_v29, %v1612_v58 }
 0x296   :  { %v1998_v17 = vadd.f32 %v5545_v29, %v1739_v1 }
 0x299   :  { %3792 = vmatmul.msk.bf16.gmra.mxu0 %vm274_vm1, %v2366_v48  ;;  %3824 = vmatmul.msk.bf16.gmra.mxu1 %vm274_vm1, %v2398_v15  ;;  %v2056_v48 = vadd.f32 %v5545_v29, %v1797_v4  ;;  %v2057_v15 = vadd.f32 %v5545_v29, %v1798_v6 }
 0x29a   :  { %3856 = vmatmul.msk.bf16.gmra.mxu2 %vm274_vm1, %v2430_v16  ;;  %3888 = vmatmul.msk.bf16.gmra.mxu3 %vm274_vm1, %v2462_v54  ;;  %v2120_v16 = vmax.f32 %v1864_v7, 0.0  ;;  %v2121_v54 = vmax.f32 %v1865_v8, 0.0 }
 0x29b   :  { %v2312_v21 = vmax.f32 %v2056_v48, 0.0  ;;  %v2313_v22 = vmax.f32 %v2057_v15, 0.0  ;;  %v3993_v48 = vld [vmem:[%s7684_s0 + $0xa8] sm:$0xff] }
 0x29c   :  { %v2368_v23 = vpack.c.bf16 %v2121_v54, %v2120_v16  ;;  %v1610_v15 = vmul.f32 %v3993_v48, %v5517_v13  ;;  %v3994_v16 = vld [vmem:[%s7684_s0 + $0x2a0] sm:$0xff] }
 0x29d   :  { %v2464_v27 = vpack.c.bf16 %v2313_v22, %v2312_v21  ;;  %v1673_v54 = vmul.f32 %v3994_v16, %v5517_v13  ;;  %v3997_v21 = vld [vmem:[%s7684_s0 + $0x4a8] sm:$0xff] }
 0x29e   :  { %v1738_v22 = vmul.f32 %v3997_v21, %v5517_v13  ;;  %v1869_v30 = vadd.f32 %v5545_v29, %v1610_v15  ;;  %v1935_v15 = vadd.f32 %v5545_v29, %v1676_v63  ;;  %v2126_v21 = vmax.f32 %v1870_v11, 0.0 }
 0x29f   :  { %v1932_v31 = vadd.f32 %v5545_v29, %v1673_v54 }
 0x2a0   :  { %v2125_v40 = vmax.f32 %v1869_v30, 0.0 }
 0x2a1   :  { %v2188_v41 = vmax.f32 %v1932_v31, 0.0 }
 0x2a9   :  { %3793 = vmatmul.msk.bf16.gmra.mxu0 %vm274_vm1, %v2367_v49  ;;  %3825 = vmatmul.msk.bf16.gmra.mxu1 %vm274_vm1, %v2399_v50  ;;  %v1930_v49 = vadd.f32 %v5545_v29, %v1671_v34  ;;  %v1931_v50 = vadd.f32 %v5545_v29, %v1672_v37  ;;  %v1997_v37 = vadd.f32 %v5545_v29, %v1738_v22  ;;  %v2127_v22 = vmax.f32 %v1871_v12, 0.0 }
 0x2aa   :  { %3857 = vmatmul.msk.bf16.gmra.mxu2 %vm274_vm1, %v2431_v2  ;;  %3889 = vmatmul.msk.bf16.gmra.mxu3 %vm274_vm1, %v2463_v51 }
 0x2ab   :  { %v2186_v59 = vmax.f32 %v1930_v49, 0.0  ;;  %v2187_v61 = vmax.f32 %v1931_v50, 0.0  ;;  %v2253_v44 = vmax.f32 %v1997_v37, 0.0  ;;  %v2370_v49 = vpack.c.bf16 %v2125_v40, %v2124_v39  ;;  %v4009_v39 = vld [vmem:[%s7684_s0 + $0xc8] sm:$0xff] }
 0x2ac   :  { %v2402_v50 = vpack.c.bf16 %v2189_v42, %v2188_v41  ;;  %v2371_v31 = vpack.c.bf16 %v2127_v22, %v2126_v21  ;;  %v1614_v40 = vmul.f32 %v4009_v39, %v5517_v13  ;;  %v4010_v41 = vld [vmem:[%s7684_s0 + $0x2c0] sm:$0xff]  ;;  %v4017_v21 = vld [vmem:[%s7684_s0 + $0xd8] sm:$0xff] }
 0x2ad   :  { %v2401_v6 = vpack.c.bf16 %v2187_v61, %v2186_v59  ;;  %v2434_v52 = vpack.c.bf16 %v2253_v44, %v2252_v43  ;;  %v4002_v59 = vld [vmem:[%s7684_s0 + $0x2b0] sm:$0xff]  ;;  %v1677_v42 = vmul.f32 %v4010_v41, %v5517_v13  ;;  %v4011_v43 = vld [vmem:[%s7684_s0 + $0x2c8] sm:$0xff]  ;;  %v1616_v22 = vmul.f32 %v4017_v21, %v5517_v13 }
 0x2ae   :  { %v1675_v61 = vmul.f32 %v4002_v59, %v5517_v13  ;;  %v1678_v44 = vmul.f32 %v4011_v43, %v5517_v13  ;;  %v1873_v56 = vadd.f32 %v5545_v29, %v1614_v40 }
 0x2af   :  { %v1936_v57 = vadd.f32 %v5545_v29, %v1677_v42 }
 0x2b0   :  { %v1934_v48 = vadd.f32 %v5545_v29, %v1675_v61  ;;  %v1937_v58 = vadd.f32 %v5545_v29, %v1678_v44 }
 0x2b6   :  { %v2886_v24 = vpop.f32.mrf.mxu0  ;;  %v3046_v25 = vpop.f32.mrf.mxu1 }
 0x2b7   :  { %3526 = vst [vmem:[%s7687_s4] sm:$0xff] %v2886_v24  ;;  %v3999_v24 = vld [vmem:[%s7684_s0 + $0x6a8] sm:$0xff] }
 0x2b8   :  { %3590 = vst [vmem:[%s7687_s4 + $0x200] sm:$0xff] %v3046_v25  ;;  %v1802_v25 = vmul.f32 %v3999_v24, %v5517_v13  ;;  %v2254_v24 = vmax.f32 %v1998_v17, 0.0 }
 0x2b9   :  { %3794 = vmatmul.msk.bf16.gmra.mxu0 %vm274_vm1, %v2368_v23  ;;  %3826 = vmatmul.msk.bf16.gmra.mxu1 %vm274_vm1, %v2400_v14  ;;  %v3998_v23 = vld [vmem:[%s7684_s0 + $0x6a0] sm:$0xff] }
 0x2ba   :  { %3858 = vmatmul.msk.bf16.gmra.mxu2 %vm274_vm1, %v2432_v26  ;;  %3890 = vmatmul.msk.bf16.gmra.mxu3 %vm274_vm1, %v2464_v27  ;;  %v1801_v14 = vmul.f32 %v3998_v23, %v5517_v13  ;;  %v2061_v36 = vadd.f32 %v5545_v29, %v1802_v25  ;;  %v2190_v23 = vmax.f32 %v1934_v48, 0.0 }
 0x2bc   :  { %v2060_v38 = vadd.f32 %v5545_v29, %v1801_v14  ;;  %v2191_v14 = vmax.f32 %v1935_v15, 0.0 }
 0x2bd   :  { %v3206_v45 = vpop.f32.mrf.mxu2  ;;  %v3366_v46 = vpop.f32.mrf.mxu3 }
 0x2be   :  { %3654 = vst [vmem:[%s7687_s4 + $0x400] sm:$0xff] %v3206_v45  ;;  %v2888_v2 = vpop.f32.mrf.mxu0  ;;  %v3048_v51 = vpop.f32.mrf.mxu1  ;;  %v2316_v45 = vmax.f32 %v2060_v38, 0.0  ;;  %v2403_v32 = vpack.c.bf16 %v2191_v14, %v2190_v23  ;;  %v4008_v38 = vld [vmem:[%s7684_s0 + $0xc0] sm:$0xff]  ;;  %v4018_v23 = vld [vmem:[%s7684_s0 + $0x2d0] sm:$0xff] }
 0x2bf   :  { %3718 = vst [vmem:[%s7687_s4 + $0x600] sm:$0xff] %v3366_v46  ;;  %v2317_v46 = vmax.f32 %v2061_v36, 0.0  ;;  %v1613_v36 = vmul.f32 %v4008_v38, %v5517_v13  ;;  %v1679_v14 = vmul.f32 %v4018_v23, %v5517_v13 }
 0x2c0   :  { %3527 = vst [vmem:[%s7687_s4 + $0x8] sm:$0xff] %v2888_v2 }
 0x2c1   :  { %3591 = vst [vmem:[%s7687_s4 + $0x208] sm:$0xff] %v3048_v51  ;;  %v2466_v53 = vpack.c.bf16 %v2317_v46, %v2316_v45  ;;  %v4012_v45 = vld [vmem:[%s7684_s0 + $0x4c0] sm:$0xff]  ;;  %v1872_v55 = vadd.f32 %v5545_v29, %v1613_v36  ;;  %v1875_v36 = vadd.f32 %v5545_v29, %v1616_v22  ;;  %v1938_v39 = vadd.f32 %v5545_v29, %v1679_v14 }
 0x2c2   :  { %v1741_v46 = vmul.f32 %v4012_v45, %v5517_v13 }
 0x2c4   :  { %v2000_v62 = vadd.f32 %v5545_v29, %v1741_v46 }
 0x2c5   :  { %v3208_v3 = vpop.f32.mrf.mxu2  ;;  %v3368_v4 = vpop.f32.mrf.mxu3 }
 0x2c6   :  { %3655 = vst [vmem:[%s7687_s4 + $0x408] sm:$0xff] %v3208_v3  ;;  %v2891_v7 = vpop.f32.mrf.mxu0  ;;  %v3051_v8 = vpop.f32.mrf.mxu1  ;;  %v4005_v3 = vld [vmem:[%s7684_s0 + $0x4b8] sm:$0xff] }
 0x2c7   :  { %3719 = vst [vmem:[%s7687_s4 + $0x608] sm:$0xff] %v3368_v4  ;;  %v1740_v4 = vmul.f32 %v4005_v3, %v5517_v13  ;;  %v2128_v3 = vmax.f32 %v1872_v55, 0.0 }
 0x2c8   :  { %3528 = vst [vmem:[%s7687_s4 + $0x10] sm:$0xff] %v2891_v7  ;;  %v4007_v7 = vld [vmem:[%s7684_s0 + $0x6b8] sm:$0xff] }
 0x2c9   :  { %3592 = vst [vmem:[%s7687_s4 + $0x210] sm:$0xff] %v3051_v8  ;;  %3795 = vmatmul.msk.bf16.gmra.mxu0 %vm274_vm1, %v2369_v5  ;;  %3827 = vmatmul.msk.bf16.gmra.mxu1 %vm274_vm1, %v2401_v6  ;;  %v4006_v5 = vld [vmem:[%s7684_s0 + $0x6b0] sm:$0xff]  ;;  %v1804_v8 = vmul.f32 %v4007_v7, %v5517_v13  ;;  %v1999_v18 = vadd.f32 %v5545_v29, %v1740_v4  ;;  %v2129_v4 = vmax.f32 %v1873_v56, 0.0  ;;  %v2256_v7 = vmax.f32 %v2000_v62, 0.0 }
 0x2ca   :  { %3859 = vmatmul.msk.bf16.gmra.mxu2 %vm274_vm1, %v2433_v9  ;;  %3891 = vmatmul.msk.bf16.gmra.mxu3 %vm274_vm1, %v2465_v10  ;;  %v1803_v6 = vmul.f32 %v4006_v5, %v5517_v13  ;;  %v2192_v5 = vmax.f32 %v1936_v57, 0.0 }
 0x2cb   :  { %v2063_v20 = vadd.f32 %v5545_v29, %v1804_v8  ;;  %v2255_v25 = vmax.f32 %v1999_v18, 0.0  ;;  %v2372_v48 = vpack.c.bf16 %v2129_v4, %v2128_v3  ;;  %v4025_v3 = vld [vmem:[%s7684_s0 + $0xe8] sm:$0xff] }
 0x2cc   :  { %v2062_v19 = vadd.f32 %v5545_v29, %v1803_v6  ;;  %v2193_v6 = vmax.f32 %v1937_v58, 0.0  ;;  %v1618_v4 = vmul.f32 %v4025_v3, %v5517_v13 }
 0x2cd   :  { %v3211_v26 = vpop.f32.mrf.mxu2  ;;  %v3371_v27 = vpop.f32.mrf.mxu3  ;;  %v2435_v35 = vpack.c.bf16 %v2255_v25, %v2254_v24  ;;  %v4019_v24 = vld [vmem:[%s7684_s0 + $0x2d8] sm:$0xff] }
 0x2ce   :  { %3656 = vst [vmem:[%s7687_s4 + $0x410] sm:$0xff] %v3211_v26  ;;  %v2893_v33 = vpop.f32.mrf.mxu0  ;;  %v3053_v34 = vpop.f32.mrf.mxu1  ;;  %v2318_v26 = vmax.f32 %v2062_v19, 0.0  ;;  %v2404_v15 = vpack.c.bf16 %v2193_v6, %v2192_v5  ;;  %v4016_v19 = vld [vmem:[%s7684_s0 + $0xd0] sm:$0xff]  ;;  %v1680_v25 = vmul.f32 %v4019_v24, %v5517_v13  ;;  %v4026_v5 = vld [vmem:[%s7684_s0 + $0x2e0] sm:$0xff] }
 0x2cf   :  { %3720 = vst [vmem:[%s7687_s4 + $0x610] sm:$0xff] %v3371_v27  ;;  %v2319_v27 = vmax.f32 %v2063_v20, 0.0  ;;  %v1615_v20 = vmul.f32 %v4016_v19, %v5517_v13  ;;  %v1681_v6 = vmul.f32 %v4026_v5, %v5517_v13 }
 0x2d0   :  { %3529 = vst [vmem:[%s7687_s4 + $0x18] sm:$0xff] %v2893_v33  ;;  %v1939_v40 = vadd.f32 %v5545_v29, %v1680_v25 }
 0x2d1   :  { %3593 = vst [vmem:[%s7687_s4 + $0x218] sm:$0xff] %v3053_v34  ;;  %v2467_v37 = vpack.c.bf16 %v2319_v27, %v2318_v26  ;;  %v4020_v26 = vld [vmem:[%s7684_s0 + $0x4d0] sm:$0xff]  ;;  %v1874_v38 = vadd.f32 %v5545_v29, %v1615_v20  ;;  %v1877_v20 = vadd.f32 %v5545_v29, %v1618_v4  ;;  %v1940_v21 = vadd.f32 %v5545_v29, %v1681_v6 }
 0x2d2   :  { %v1743_v27 = vmul.f32 %v4020_v26, %v5517_v13 }
 0x2d4   :  { %v2002_v43 = vadd.f32 %v5545_v29, %v1743_v27 }
 0x2d5   :  { %v3213_v47 = vpop.f32.mrf.mxu2  ;;  %v3373_v60 = vpop.f32.mrf.mxu3 }
 0x2d6   :  { %3657 = vst [vmem:[%s7687_s4 + $0x418] sm:$0xff] %v3213_v47  ;;  %v2896_v2 = vpop.f32.mrf.mxu0  ;;  %v3056_v51 = vpop.f32.mrf.mxu1  ;;  %v4013_v47 = vld [vmem:[%s7684_s0 + $0x4c8] sm:$0xff] }
 0x2d7   :  { %3721 = vst [vmem:[%s7687_s4 + $0x618] sm:$0xff] %v3373_v60  ;;  %v1742_v60 = vmul.f32 %v4013_v47, %v5517_v13  ;;  %v2130_v47 = vmax.f32 %v1874_v38, 0.0 }
 0x2d8   :  { %3530 = vst [vmem:[%s7687_s4 + $0x20] sm:$0xff] %v2896_v2  ;;  %v4015_v2 = vld [vmem:[%s7684_s0 + $0x6c8] sm:$0xff] }
 0x2d9   :  { %3594 = vst [vmem:[%s7687_s4 + $0x220] sm:$0xff] %v3056_v51  ;;  %3796 = vmatmul.msk.bf16.gmra.mxu0 %vm274_vm1, %v2370_v49  ;;  %3828 = vmatmul.msk.bf16.gmra.mxu1 %vm274_vm1, %v2402_v50  ;;  %v4014_v49 = vld [vmem:[%s7684_s0 + $0x6c0] sm:$0xff]  ;;  %v1806_v51 = vmul.f32 %v4015_v2, %v5517_v13  ;;  %v2001_v63 = vadd.f32 %v5545_v29, %v1742_v60  ;;  %v2131_v60 = vmax.f32 %v1875_v36, 0.0  ;;  %v2258_v2 = vmax.f32 %v2002_v43, 0.0 }
 0x2da   :  { %3860 = vmatmul.msk.bf16.gmra.mxu2 %vm274_vm1, %v2434_v52  ;;  %3892 = vmatmul.msk.bf16.gmra.mxu3 %vm274_vm1, %v2466_v53  ;;  %v1805_v50 = vmul.f32 %v4014_v49, %v5517_v13  ;;  %v2194_v49 = vmax.f32 %v1938_v39, 0.0 }
 0x2db   :  { %v2065_v1 = vadd.f32 %v5545_v29, %v1806_v51  ;;  %v2257_v8 = vmax.f32 %v2001_v63, 0.0  ;;  %v2373_v57 = vpack.c.bf16 %v2131_v60, %v2130_v47  ;;  %v4033_v47 = vld [vmem:[%s7684_s0 + $0xf8] sm:$0xff] }
 0x2dc   :  { %v2064_v0 = vadd.f32 %v5545_v29, %v1805_v50  ;;  %v2195_v50 = vmax.f32 %v1939_v40, 0.0  ;;  %v1620_v60 = vmul.f32 %v4033_v47, %v5517_v13 }
 0x2dd   :  { %v3216_v9 = vpop.f32.mrf.mxu2  ;;  %v3376_v10 = vpop.f32.mrf.mxu3  ;;  %v2436_v17 = vpack.c.bf16 %v2257_v8, %v2256_v7  ;;  %v4027_v7 = vld [vmem:[%s7684_s0 + $0x2e8] sm:$0xff] }
 0x2de   :  { %3658 = vst [vmem:[%s7687_s4 + $0x420] sm:$0xff] %v3216_v9  ;;  %v2898_v16 = vpop.f32.mrf.mxu0  ;;  %v3058_v54 = vpop.f32.mrf.mxu1  ;;  %v2320_v9 = vmax.f32 %v2064_v0, 0.0  ;;  %v2405_v58 = vpack.c.bf16 %v2195_v50, %v2194_v49  ;;  %v4024_v0 = vld [vmem:[%s7684_s0 + $0xe0] sm:$0xff]  ;;  %v1682_v8 = vmul.f32 %v4027_v7, %v5517_v13  ;;  %v4034_v49 = vld [vmem:[%s7684_s0 + $0x2f0] sm:$0xff] }
 0x2df   :  { %3722 = vst [vmem:[%s7687_s4 + $0x620] sm:$0xff] %v3376_v10  ;;  %v2321_v10 = vmax.f32 %v2065_v1, 0.0  ;;  %v1617_v1 = vmul.f32 %v4024_v0, %v5517_v13  ;;  %v1683_v50 = vmul.f32 %v4034_v49, %v5517_v13 }
 0x2e0   :  { %3531 = vst [vmem:[%s7687_s4 + $0x28] sm:$0xff] %v2898_v16  ;;  %v1941_v22 = vadd.f32 %v5545_v29, %v1682_v8 }
 0x2e1   :  { %3595 = vst [vmem:[%s7687_s4 + $0x228] sm:$0xff] %v3058_v54  ;;  %v2468_v18 = vpack.c.bf16 %v2321_v10, %v2320_v9  ;;  %v4028_v9 = vld [vmem:[%s7684_s0 + $0x4e0] sm:$0xff]  ;;  %v1876_v19 = vadd.f32 %v5545_v29, %v1617_v1  ;;  %v1879_v1 = vadd.f32 %v5545_v29, %v1620_v60  ;;  %v1942_v3 = vadd.f32 %v5545_v29, %v1683_v50 }
 0x2e2   :  { %v1745_v10 = vmul.f32 %v4028_v9, %v5517_v13 }
 0x2e4   :  { %v2004_v24 = vadd.f32 %v5545_v29, %v1745_v10 }
 0x2e5   :  { %v3218_v28 = vpop.f32.mrf.mxu2  ;;  %v3378_v30 = vpop.f32.mrf.mxu3 }
 0x2e6   :  { %3659 = vst [vmem:[%s7687_s4 + $0x428] sm:$0xff] %v3218_v28  ;;  %v2901_v33 = vpop.f32.mrf.mxu0  ;;  %v3061_v34 = vpop.f32.mrf.mxu1  ;;  %v4021_v28 = vld [vmem:[%s7684_s0 + $0x4d8] sm:$0xff] }
 0x2e7   :  { %3723 = vst [vmem:[%s7687_s4 + $0x628] sm:$0xff] %v3378_v30  ;;  %v1744_v30 = vmul.f32 %v4021_v28, %v5517_v13  ;;  %v2132_v28 = vmax.f32 %v1876_v19, 0.0 }
 0x2e8   :  { %3532 = vst [vmem:[%s7687_s4 + $0x30] sm:$0xff] %v2901_v33  ;;  %v4023_v33 = vld [vmem:[%s7684_s0 + $0x6d8] sm:$0xff] }
 0x2e9   :  { %3596 = vst [vmem:[%s7687_s4 + $0x230] sm:$0xff] %v3061_v34  ;;  %3797 = vmatmul.msk.bf16.gmra.mxu0 %vm274_vm1, %v2371_v31  ;;  %3829 = vmatmul.msk.bf16.gmra.mxu1 %vm274_vm1, %v2403_v32  ;;  %v4022_v31 = vld [vmem:[%s7684_s0 + $0x6d0] sm:$0xff]  ;;  %v1808_v34 = vmul.f32 %v4023_v33, %v5517_v13  ;;  %v2003_v44 = vadd.f32 %v5545_v29, %v1744_v30  ;;  %v2133_v30 = vmax.f32 %v1877_v20, 0.0  ;;  %v2260_v33 = vmax.f32 %v2004_v24, 0.0 }
 0x2ea   :  { %3861 = vmatmul.msk.bf16.gmra.mxu2 %vm274_vm1, %v2435_v35  ;;  %3893 = vmatmul.msk.bf16.gmra.mxu3 %vm274_vm1, %v2467_v37  ;;  %v1807_v32 = vmul.f32 %v4022_v31, %v5517_v13  ;;  %v2196_v31 = vmax.f32 %v1940_v21, 0.0 }
 0x2eb   :  { %v2067_v46 = vadd.f32 %v5545_v29, %v1808_v34  ;;  %v2259_v51 = vmax.f32 %v2003_v44, 0.0  ;;  %v2374_v39 = vpack.c.bf16 %v2133_v30, %v2132_v28  ;;  %v4041_v28 = vld [vmem:[%s7684_s0 + $0x108] sm:$0xff] }
 0x2ec   :  { %v2066_v45 = vadd.f32 %v5545_v29, %v1807_v32  ;;  %v2197_v32 = vmax.f32 %v1941_v22, 0.0  ;;  %v1622_v30 = vmul.f32 %v4041_v28, %v5517_v13 }
 0x2ed   :  { %v3221_v52 = vpop.f32.mrf.mxu2  ;;  %v3381_v53 = vpop.f32.mrf.mxu3  ;;  %v2437_v62 = vpack.c.bf16 %v2259_v51, %v2258_v2  ;;  %v4035_v2 = vld [vmem:[%s7684_s0 + $0x2f8] sm:$0xff] }
 0x2ee   :  { %3660 = vst [vmem:[%s7687_s4 + $0x430] sm:$0xff] %v3221_v52  ;;  %v2903_v59 = vpop.f32.mrf.mxu0  ;;  %v3063_v61 = vpop.f32.mrf.mxu1  ;;  %v2322_v52 = vmax.f32 %v2066_v45, 0.0  ;;  %v2406_v40 = vpack.c.bf16 %v2197_v32, %v2196_v31  ;;  %v4032_v45 = vld [vmem:[%s7684_s0 + $0xf0] sm:$0xff]  ;;  %v1684_v51 = vmul.f32 %v4035_v2, %v5517_v13  ;;  %v4042_v31 = vld [vmem:[%s7684_s0 + $0x300] sm:$0xff] }
 0x2ef   :  { %3724 = vst [vmem:[%s7687_s4 + $0x630] sm:$0xff] %v3381_v53  ;;  %v2323_v53 = vmax.f32 %v2067_v46, 0.0  ;;  %v1619_v46 = vmul.f32 %v4032_v45, %v5517_v13  ;;  %v1685_v32 = vmul.f32 %v4042_v31, %v5517_v13 }
 0x2f0   :  { %3533 = vst [vmem:[%s7687_s4 + $0x38] sm:$0xff] %v2903_v59  ;;  %v1943_v4 = vadd.f32 %v5545_v29, %v1684_v51 }
 0x2f1   :  { %3597 = vst [vmem:[%s7687_s4 + $0x238] sm:$0xff] %v3063_v61  ;;  %v2469_v63 = vpack.c.bf16 %v2323_v53, %v2322_v52  ;;  %v4036_v52 = vld [vmem:[%s7684_s0 + $0x4f0] sm:$0xff]  ;;  %v1878_v0 = vadd.f32 %v5545_v29, %v1619_v46  ;;  %v1881_v46 = vadd.f32 %v5545_v29, %v1622_v30  ;;  %v1944_v47 = vadd.f32 %v5545_v29, %v1685_v32 }
 0x2f2   :  { %v1747_v53 = vmul.f32 %v4036_v52, %v5517_v13 }
 0x2f4   :  { %v2006_v7 = vadd.f32 %v5545_v29, %v1747_v53 }
 0x2f5   :  { %v3223_v11 = vpop.f32.mrf.mxu2  ;;  %v3383_v12 = vpop.f32.mrf.mxu3 }
 0x2f6   :  { %3661 = vst [vmem:[%s7687_s4 + $0x438] sm:$0xff] %v3223_v11  ;;  %v2906_v16 = vpop.f32.mrf.mxu0  ;;  %v3066_v54 = vpop.f32.mrf.mxu1  ;;  %v4029_v11 = vld [vmem:[%s7684_s0 + $0x4e8] sm:$0xff] }
 0x2f7   :  { %3725 = vst [vmem:[%s7687_s4 + $0x638] sm:$0xff] %v3383_v12  ;;  %v1746_v12 = vmul.f32 %v4029_v11, %v5517_v13  ;;  %v2134_v11 = vmax.f32 %v1878_v0, 0.0 }
 0x2f8   :  { %3534 = vst [vmem:[%s7687_s4 + $0x40] sm:$0xff] %v2906_v16  ;;  %v4031_v16 = vld [vmem:[%s7684_s0 + $0x6e8] sm:$0xff] }
 0x2f9   :  { %3598 = vst [vmem:[%s7687_s4 + $0x240] sm:$0xff] %v3066_v54  ;;  %3798 = vmatmul.msk.bf16.gmra.mxu0 %vm274_vm1, %v2372_v48  ;;  %3830 = vmatmul.msk.bf16.gmra.mxu1 %vm274_vm1, %v2404_v15  ;;  %v4030_v48 = vld [vmem:[%s7684_s0 + $0x6e0] sm:$0xff]  ;;  %v1810_v54 = vmul.f32 %v4031_v16, %v5517_v13  ;;  %v2005_v25 = vadd.f32 %v5545_v29, %v1746_v12  ;;  %v2135_v12 = vmax.f32 %v1879_v1, 0.0  ;;  %v2262_v16 = vmax.f32 %v2006_v7, 0.0 }
 0x2fa   :  { %3862 = vmatmul.msk.bf16.gmra.mxu2 %vm274_vm1, %v2436_v17  ;;  %3894 = vmatmul.msk.bf16.gmra.mxu3 %vm274_vm1, %v2468_v18  ;;  %v1809_v15 = vmul.f32 %v4030_v48, %v5517_v13  ;;  %v2198_v48 = vmax.f32 %v1942_v3, 0.0 }
 0x2fb   :  { %v2069_v27 = vadd.f32 %v5545_v29, %v1810_v54  ;;  %v2261_v34 = vmax.f32 %v2005_v25, 0.0  ;;  %v2375_v21 = vpack.c.bf16 %v2135_v12, %v2134_v11  ;;  %v4049_v11 = vld [vmem:[%s7684_s0 + $0x118] sm:$0xff] }
 0x2fc   :  { %v2068_v26 = vadd.f32 %v5545_v29, %v1809_v15  ;;  %v2199_v15 = vmax.f32 %v1943_v4, 0.0  ;;  %v1624_v12 = vmul.f32 %v4049_v11, %v5517_v13 }
 0x2fd   :  { %v3226_v35 = vpop.f32.mrf.mxu2  ;;  %v3386_v37 = vpop.f32.mrf.mxu3  ;;  %v2438_v43 = vpack.c.bf16 %v2261_v34, %v2260_v33  ;;  %v4043_v33 = vld [vmem:[%s7684_s0 + $0x308] sm:$0xff] }
 0x2fe   :  { %3662 = vst [vmem:[%s7687_s4 + $0x440] sm:$0xff] %v3226_v35  ;;  %v2908_v41 = vpop.f32.mrf.mxu0  ;;  %v3068_v42 = vpop.f32.mrf.mxu1  ;;  %v2324_v35 = vmax.f32 %v2068_v26, 0.0  ;;  %v2407_v22 = vpack.c.bf16 %v2199_v15, %v2198_v48  ;;  %v4040_v26 = vld [vmem:[%s7684_s0 + $0x100] sm:$0xff]  ;;  %v1686_v34 = vmul.f32 %v4043_v33, %v5517_v13  ;;  %v4050_v48 = vld [vmem:[%s7684_s0 + $0x310] sm:$0xff] }
 0x2ff   :  { %3726 = vst [vmem:[%s7687_s4 + $0x640] sm:$0xff] %v3386_v37  ;;  %v2325_v37 = vmax.f32 %v2069_v27, 0.0  ;;  %v1621_v27 = vmul.f32 %v4040_v26, %v5517_v13  ;;  %v1687_v15 = vmul.f32 %v4050_v48, %v5517_v13 }
 0x300   :  { %3535 = vst [vmem:[%s7687_s4 + $0x48] sm:$0xff] %v2908_v41  ;;  %v1945_v60 = vadd.f32 %v5545_v29, %v1686_v34 }
 0x301   :  { %3599 = vst [vmem:[%s7687_s4 + $0x248] sm:$0xff] %v3068_v42  ;;  %v2470_v44 = vpack.c.bf16 %v2325_v37, %v2324_v35  ;;  %v4044_v35 = vld [vmem:[%s7684_s0 + $0x500] sm:$0xff]  ;;  %v1880_v45 = vadd.f32 %v5545_v29, %v1621_v27  ;;  %v1883_v27 = vadd.f32 %v5545_v29, %v1624_v12  ;;  %v1946_v28 = vadd.f32 %v5545_v29, %v1687_v15 }
 0x302   :  { %v1749_v37 = vmul.f32 %v4044_v35, %v5517_v13 }
 0x304   :  { %v2008_v2 = vadd.f32 %v5545_v29, %v1749_v37 }
 0x305   :  { %v3228_v55 = vpop.f32.mrf.mxu2  ;;  %v3388_v56 = vpop.f32.mrf.mxu3 }
 0x306   :  { %3663 = vst [vmem:[%s7687_s4 + $0x448] sm:$0xff] %v3228_v55  ;;  %v2911_v59 = vpop.f32.mrf.mxu0  ;;  %v3071_v61 = vpop.f32.mrf.mxu1  ;;  %v4037_v55 = vld [vmem:[%s7684_s0 + $0x4f8] sm:$0xff] }
 0x307   :  { %3727 = vst [vmem:[%s7687_s4 + $0x648] sm:$0xff] %v3388_v56  ;;  %v1748_v56 = vmul.f32 %v4037_v55, %v5517_v13  ;;  %v2136_v55 = vmax.f32 %v1880_v45, 0.0 }
 0x308   :  { %3536 = vst [vmem:[%s7687_s4 + $0x50] sm:$0xff] %v2911_v59  ;;  %v4039_v59 = vld [vmem:[%s7684_s0 + $0x6f8] sm:$0xff] }
 0x309   :  { %3600 = vst [vmem:[%s7687_s4 + $0x250] sm:$0xff] %v3071_v61  ;;  %3799 = vmatmul.msk.bf16.gmra.mxu0 %vm274_vm1, %v2373_v57  ;;  %3831 = vmatmul.msk.bf16.gmra.mxu1 %vm274_vm1, %v2405_v58  ;;  %v4038_v57 = vld [vmem:[%s7684_s0 + $0x6f0] sm:$0xff]  ;;  %v1812_v61 = vmul.f32 %v4039_v59, %v5517_v13  ;;  %v2007_v8 = vadd.f32 %v5545_v29, %v1748_v56  ;;  %v2137_v56 = vmax.f32 %v1881_v46, 0.0  ;;  %v2264_v59 = vmax.f32 %v2008_v2, 0.0 }
 0x30a   :  { %3863 = vmatmul.msk.bf16.gmra.mxu2 %vm274_vm1, %v2437_v62  ;;  %3895 = vmatmul.msk.bf16.gmra.mxu3 %vm274_vm1, %v2469_v63  ;;  %v1811_v58 = vmul.f32 %v4038_v57, %v5517_v13  ;;  %v2200_v57 = vmax.f32 %v1944_v47, 0.0 }
 0x30b   :  { %v2071_v10 = vadd.f32 %v5545_v29, %v1812_v61  ;;  %v2263_v54 = vmax.f32 %v2007_v8, 0.0  ;;  %v2376_v3 = vpack.c.bf16 %v2137_v56, %v2136_v55  ;;  %v4057_v55 = vld [vmem:[%s7684_s0 + $0x128] sm:$0xff] }
 0x30c   :  { %v2070_v9 = vadd.f32 %v5545_v29, %v1811_v58  ;;  %v2201_v58 = vmax.f32 %v1945_v60, 0.0  ;;  %v1626_v56 = vmul.f32 %v4057_v55, %v5517_v13 }
 0x30d   :  { %v3231_v17 = vpop.f32.mrf.mxu2  ;;  %v3391_v18 = vpop.f32.mrf.mxu3  ;;  %v2439_v24 = vpack.c.bf16 %v2263_v54, %v2262_v16  ;;  %v4051_v16 = vld [vmem:[%s7684_s0 + $0x318] sm:$0xff] }
 0x30e   :  { %3664 = vst [vmem:[%s7687_s4 + $0x450] sm:$0xff] %v3231_v17  ;;  %v2913_v23 = vpop.f32.mrf.mxu0  ;;  %v3073_v14 = vpop.f32.mrf.mxu1  ;;  %v2326_v17 = vmax.f32 %v2070_v9, 0.0  ;;  %v2408_v4 = vpack.c.bf16 %v2201_v58, %v2200_v57  ;;  %v4048_v9 = vld [vmem:[%s7684_s0 + $0x110] sm:$0xff]  ;;  %v1688_v54 = vmul.f32 %v4051_v16, %v5517_v13  ;;  %v4058_v57 = vld [vmem:[%s7684_s0 + $0x320] sm:$0xff] }
 0x30f   :  { %3728 = vst [vmem:[%s7687_s4 + $0x650] sm:$0xff] %v3391_v18  ;;  %v2327_v18 = vmax.f32 %v2071_v10, 0.0  ;;  %v1623_v10 = vmul.f32 %v4048_v9, %v5517_v13  ;;  %v1689_v58 = vmul.f32 %v4058_v57, %v5517_v13 }
 0x310   :  { %3537 = vst [vmem:[%s7687_s4 + $0x58] sm:$0xff] %v2913_v23  ;;  %v1947_v30 = vadd.f32 %v5545_v29, %v1688_v54 }
 0x311   :  { %3601 = vst [vmem:[%s7687_s4 + $0x258] sm:$0xff] %v3073_v14  ;;  %v2471_v25 = vpack.c.bf16 %v2327_v18, %v2326_v17  ;;  %v4052_v17 = vld [vmem:[%s7684_s0 + $0x510] sm:$0xff]  ;;  %v1882_v26 = vadd.f32 %v5545_v29, %v1623_v10  ;;  %v1885_v10 = vadd.f32 %v5545_v29, %v1626_v56  ;;  %v1948_v11 = vadd.f32 %v5545_v29, %v1689_v58 }
 0x312   :  { %v1751_v18 = vmul.f32 %v4052_v17, %v5517_v13 }
 0x314   :  { %v2010_v33 = vadd.f32 %v5545_v29, %v1751_v18 }
 0x315   :  { %v3233_v38 = vpop.f32.mrf.mxu2  ;;  %v3393_v36 = vpop.f32.mrf.mxu3 }
 0x316   :  { %3665 = vst [vmem:[%s7687_s4 + $0x458] sm:$0xff] %v3233_v38  ;;  %v2916_v41 = vpop.f32.mrf.mxu0  ;;  %v3076_v42 = vpop.f32.mrf.mxu1  ;;  %v4045_v38 = vld [vmem:[%s7684_s0 + $0x508] sm:$0xff] }
 0x317   :  { %3729 = vst [vmem:[%s7687_s4 + $0x658] sm:$0xff] %v3393_v36  ;;  %v1750_v36 = vmul.f32 %v4045_v38, %v5517_v13  ;;  %v2138_v38 = vmax.f32 %v1882_v26, 0.0 }
 0x318   :  { %3538 = vst [vmem:[%s7687_s4 + $0x60] sm:$0xff] %v2916_v41  ;;  %v4047_v41 = vld [vmem:[%s7684_s0 + $0x708] sm:$0xff] }
 0x319   :  { %3602 = vst [vmem:[%s7687_s4 + $0x260] sm:$0xff] %v3076_v42  ;;  %3800 = vmatmul.msk.bf16.gmra.mxu0 %vm274_vm1, %v2374_v39  ;;  %3832 = vmatmul.msk.bf16.gmra.mxu1 %vm274_vm1, %v2406_v40  ;;  %v4046_v39 = vld [vmem:[%s7684_s0 + $0x700] sm:$0xff]  ;;  %v1814_v42 = vmul.f32 %v4047_v41, %v5517_v13  ;;  %v2009_v51 = vadd.f32 %v5545_v29, %v1750_v36  ;;  %v2139_v36 = vmax.f32 %v1883_v27, 0.0  ;;  %v2266_v41 = vmax.f32 %v2010_v33, 0.0 }
 0x31a   :  { %3864 = vmatmul.msk.bf16.gmra.mxu2 %vm274_vm1, %v2438_v43  ;;  %3896 = vmatmul.msk.bf16.gmra.mxu3 %vm274_vm1, %v2470_v44  ;;  %v1813_v40 = vmul.f32 %v4046_v39, %v5517_v13  ;;  %v2202_v39 = vmax.f32 %v1946_v28, 0.0 }
 0x31b   :  { %v2073_v53 = vadd.f32 %v5545_v29, %v1814_v42  ;;  %v2265_v61 = vmax.f32 %v2009_v51, 0.0  ;;  %v2377_v47 = vpack.c.bf16 %v2139_v36, %v2138_v38  ;;  %v4065_v38 = vld [vmem:[%s7684_s0 + $0x138] sm:$0xff] }
 0x31c   :  { %v2072_v52 = vadd.f32 %v5545_v29, %v1813_v40  ;;  %v2203_v40 = vmax.f32 %v1947_v30, 0.0  ;;  %v1628_v36 = vmul.f32 %v4065_v38, %v5517_v13 }
 0x31d   :  { %v3236_v62 = vpop.f32.mrf.mxu2  ;;  %v3396_v63 = vpop.f32.mrf.mxu3  ;;  %v2440_v7 = vpack.c.bf16 %v2265_v61, %v2264_v59  ;;  %v4059_v59 = vld [vmem:[%s7684_s0 + $0x328] sm:$0xff] }
 0x31e   :  { %3666 = vst [vmem:[%s7687_s4 + $0x460] sm:$0xff] %v3236_v62  ;;  %v2918_v5 = vpop.f32.mrf.mxu0  ;;  %v3078_v6 = vpop.f32.mrf.mxu1  ;;  %v2328_v62 = vmax.f32 %v2072_v52, 0.0  ;;  %v2409_v60 = vpack.c.bf16 %v2203_v40, %v2202_v39  ;;  %v4056_v52 = vld [vmem:[%s7684_s0 + $0x120] sm:$0xff]  ;;  %v1690_v61 = vmul.f32 %v4059_v59, %v5517_v13  ;;  %v4066_v39 = vld [vmem:[%s7684_s0 + $0x330] sm:$0xff] }
 0x31f   :  { %3730 = vst [vmem:[%s7687_s4 + $0x660] sm:$0xff] %v3396_v63  ;;  %v2329_v63 = vmax.f32 %v2073_v53, 0.0  ;;  %v1625_v53 = vmul.f32 %v4056_v52, %v5517_v13  ;;  %v1691_v40 = vmul.f32 %v4066_v39, %v5517_v13 }
 0x320   :  { %3539 = vst [vmem:[%s7687_s4 + $0x68] sm:$0xff] %v2918_v5  ;;  %v1949_v12 = vadd.f32 %v5545_v29, %v1690_v61 }
 0x321   :  { %3603 = vst [vmem:[%s7687_s4 + $0x268] sm:$0xff] %v3078_v6  ;;  %v2472_v8 = vpack.c.bf16 %v2329_v63, %v2328_v62  ;;  %v4060_v62 = vld [vmem:[%s7684_s0 + $0x520] sm:$0xff]  ;;  %v1884_v9 = vadd.f32 %v5545_v29, %v1625_v53  ;;  %v1887_v53 = vadd.f32 %v5545_v29, %v1628_v36  ;;  %v1950_v55 = vadd.f32 %v5545_v29, %v1691_v40 }
 0x322   :  { %v1753_v63 = vmul.f32 %v4060_v62, %v5517_v13 }
 0x324   :  { %v2012_v16 = vadd.f32 %v5545_v29, %v1753_v63 }
 0x325   :  { %v3238_v19 = vpop.f32.mrf.mxu2  ;;  %v3398_v20 = vpop.f32.mrf.mxu3 }
 0x326   :  { %3667 = vst [vmem:[%s7687_s4 + $0x468] sm:$0xff] %v3238_v19  ;;  %v2921_v23 = vpop.f32.mrf.mxu0  ;;  %v3081_v14 = vpop.f32.mrf.mxu1  ;;  %v4053_v19 = vld [vmem:[%s7684_s0 + $0x518] sm:$0xff] }
 0x327   :  { %3731 = vst [vmem:[%s7687_s4 + $0x668] sm:$0xff] %v3398_v20  ;;  %v1752_v20 = vmul.f32 %v4053_v19, %v5517_v13  ;;  %v2140_v19 = vmax.f32 %v1884_v9, 0.0 }
 0x328   :  { %3540 = vst [vmem:[%s7687_s4 + $0x70] sm:$0xff] %v2921_v23  ;;  %v4055_v23 = vld [vmem:[%s7684_s0 + $0x718] sm:$0xff] }
 0x329   :  { %3604 = vst [vmem:[%s7687_s4 + $0x270] sm:$0xff] %v3081_v14  ;;  %3801 = vmatmul.msk.bf16.gmra.mxu0 %vm274_vm1, %v2375_v21  ;;  %3833 = vmatmul.msk.bf16.gmra.mxu1 %vm274_vm1, %v2407_v22  ;;  %v4054_v21 = vld [vmem:[%s7684_s0 + $0x710] sm:$0xff]  ;;  %v1816_v14 = vmul.f32 %v4055_v23, %v5517_v13  ;;  %v2011_v34 = vadd.f32 %v5545_v29, %v1752_v20  ;;  %v2141_v20 = vmax.f32 %v1885_v10, 0.0  ;;  %v2268_v23 = vmax.f32 %v2012_v16, 0.0 }
 0x32a   :  { %3865 = vmatmul.msk.bf16.gmra.mxu2 %vm274_vm1, %v2439_v24  ;;  %3897 = vmatmul.msk.bf16.gmra.mxu3 %vm274_vm1, %v2471_v25  ;;  %v1815_v22 = vmul.f32 %v4054_v21, %v5517_v13  ;;  %v2204_v21 = vmax.f32 %v1948_v11, 0.0 }
 0x32b   :  { %v2075_v37 = vadd.f32 %v5545_v29, %v1816_v14  ;;  %v2267_v42 = vmax.f32 %v2011_v34, 0.0  ;;  %v2378_v28 = vpack.c.bf16 %v2141_v20, %v2140_v19  ;;  %v4073_v19 = vld [vmem:[%s7684_s0 + $0x148] sm:$0xff] }
 0x32c   :  { %v2074_v35 = vadd.f32 %v5545_v29, %v1815_v22  ;;  %v2205_v22 = vmax.f32 %v1949_v12, 0.0  ;;  %v1630_v20 = vmul.f32 %v4073_v19, %v5517_v13 }
 0x32d   :  { %v3241_v43 = vpop.f32.mrf.mxu2  ;;  %v3401_v44 = vpop.f32.mrf.mxu3  ;;  %v2441_v2 = vpack.c.bf16 %v2267_v42, %v2266_v41  ;;  %v4067_v41 = vld [vmem:[%s7684_s0 + $0x338] sm:$0xff] }
 0x32e   :  { %3668 = vst [vmem:[%s7687_s4 + $0x470] sm:$0xff] %v3241_v43  ;;  %v2923_v49 = vpop.f32.mrf.mxu0  ;;  %v3083_v50 = vpop.f32.mrf.mxu1  ;;  %v2330_v43 = vmax.f32 %v2074_v35, 0.0  ;;  %v2410_v30 = vpack.c.bf16 %v2205_v22, %v2204_v21  ;;  %v4064_v35 = vld [vmem:[%s7684_s0 + $0x130] sm:$0xff]  ;;  %v1692_v42 = vmul.f32 %v4067_v41, %v5517_v13  ;;  %v4074_v21 = vld [vmem:[%s7684_s0 + $0x340] sm:$0xff] }
 0x32f   :  { %3732 = vst [vmem:[%s7687_s4 + $0x670] sm:$0xff] %v3401_v44  ;;  %v2331_v44 = vmax.f32 %v2075_v37, 0.0  ;;  %v1627_v37 = vmul.f32 %v4064_v35, %v5517_v13  ;;  %v1693_v22 = vmul.f32 %v4074_v21, %v5517_v13 }
 0x330   :  { %3541 = vst [vmem:[%s7687_s4 + $0x78] sm:$0xff] %v2923_v49  ;;  %v1951_v56 = vadd.f32 %v5545_v29, %v1692_v42 }
 0x331   :  { %3605 = vst [vmem:[%s7687_s4 + $0x278] sm:$0xff] %v3083_v50  ;;  %v2473_v51 = vpack.c.bf16 %v2331_v44, %v2330_v43  ;;  %v4068_v43 = vld [vmem:[%s7684_s0 + $0x530] sm:$0xff]  ;;  %v1886_v52 = vadd.f32 %v5545_v29, %v1627_v37  ;;  %v1889_v37 = vadd.f32 %v5545_v29, %v1630_v20  ;;  %v1952_v38 = vadd.f32 %v5545_v29, %v1693_v22 }
 0x332   :  { %v1755_v44 = vmul.f32 %v4068_v43, %v5517_v13 }
 0x334   :  { %v2014_v59 = vadd.f32 %v5545_v29, %v1755_v44 }
 0x335   :  { %v3243_v0 = vpop.f32.mrf.mxu2  ;;  %v3403_v1 = vpop.f32.mrf.mxu3 }
 0x336   :  { %3669 = vst [vmem:[%s7687_s4 + $0x478] sm:$0xff] %v3243_v0  ;;  %v2926_v5 = vpop.f32.mrf.mxu0  ;;  %v3086_v6 = vpop.f32.mrf.mxu1  ;;  %v4061_v0 = vld [vmem:[%s7684_s0 + $0x528] sm:$0xff] }
 0x337   :  { %3733 = vst [vmem:[%s7687_s4 + $0x678] sm:$0xff] %v3403_v1  ;;  %v1754_v1 = vmul.f32 %v4061_v0, %v5517_v13  ;;  %v2142_v0 = vmax.f32 %v1886_v52, 0.0 }
 0x338   :  { %3542 = vst [vmem:[%s7687_s4 + $0x80] sm:$0xff] %v2926_v5  ;;  %v4063_v5 = vld [vmem:[%s7684_s0 + $0x728] sm:$0xff] }
 0x339   :  { %3606 = vst [vmem:[%s7687_s4 + $0x280] sm:$0xff] %v3086_v6  ;;  %3802 = vmatmul.msk.bf16.gmra.mxu0 %vm274_vm1, %v2376_v3  ;;  %3834 = vmatmul.msk.bf16.gmra.mxu1 %vm274_vm1, %v2408_v4  ;;  %v4062_v3 = vld [vmem:[%s7684_s0 + $0x720] sm:$0xff]  ;;  %v1818_v6 = vmul.f32 %v4063_v5, %v5517_v13  ;;  %v2013_v54 = vadd.f32 %v5545_v29, %v1754_v1  ;;  %v2143_v1 = vmax.f32 %v1887_v53, 0.0  ;;  %v2270_v5 = vmax.f32 %v2014_v59, 0.0 }
 0x33a   :  { %3866 = vmatmul.msk.bf16.gmra.mxu2 %vm274_vm1, %v2440_v7  ;;  %3898 = vmatmul.msk.bf16.gmra.mxu3 %vm274_vm1, %v2472_v8  ;;  %v1817_v4 = vmul.f32 %v4062_v3, %v5517_v13  ;;  %v2206_v3 = vmax.f32 %v1950_v55, 0.0 }
 0x33b   :  { %v2077_v18 = vadd.f32 %v5545_v29, %v1818_v6  ;;  %v2269_v14 = vmax.f32 %v2013_v54, 0.0  ;;  %v2379_v11 = vpack.c.bf16 %v2143_v1, %v2142_v0  ;;  %v4081_v0 = vld [vmem:[%s7684_s0 + $0x158] sm:$0xff] }
 0x33c   :  { %v2076_v17 = vadd.f32 %v5545_v29, %v1817_v4  ;;  %v2207_v4 = vmax.f32 %v1951_v56, 0.0  ;;  %v1632_v1 = vmul.f32 %v4081_v0, %v5517_v13 }
 0x33d   :  { %v3246_v24 = vpop.f32.mrf.mxu2  ;;  %v3406_v25 = vpop.f32.mrf.mxu3  ;;  %v2442_v33 = vpack.c.bf16 %v2269_v14, %v2268_v23  ;;  %v4075_v23 = vld [vmem:[%s7684_s0 + $0x348] sm:$0xff] }
 0x33e   :  { %3670 = vst [vmem:[%s7687_s4 + $0x480] sm:$0xff] %v3246_v24  ;;  %v2928_v31 = vpop.f32.mrf.mxu0  ;;  %v3088_v32 = vpop.f32.mrf.mxu1  ;;  %v2332_v24 = vmax.f32 %v2076_v17, 0.0  ;;  %v2411_v12 = vpack.c.bf16 %v2207_v4, %v2206_v3  ;;  %v4072_v17 = vld [vmem:[%s7684_s0 + $0x140] sm:$0xff]  ;;  %v1694_v14 = vmul.f32 %v4075_v23, %v5517_v13  ;;  %v4082_v3 = vld [vmem:[%s7684_s0 + $0x350] sm:$0xff] }
 0x33f   :  { %3734 = vst [vmem:[%s7687_s4 + $0x680] sm:$0xff] %v3406_v25  ;;  %v2333_v25 = vmax.f32 %v2077_v18, 0.0  ;;  %v1629_v18 = vmul.f32 %v4072_v17, %v5517_v13  ;;  %v1695_v4 = vmul.f32 %v4082_v3, %v5517_v13 }
 0x340   :  { %3543 = vst [vmem:[%s7687_s4 + $0x88] sm:$0xff] %v2928_v31  ;;  %v1953_v36 = vadd.f32 %v5545_v29, %v1694_v14 }
 0x341   :  { %3607 = vst [vmem:[%s7687_s4 + $0x288] sm:$0xff] %v3088_v32  ;;  %v2474_v34 = vpack.c.bf16 %v2333_v25, %v2332_v24  ;;  %v4076_v24 = vld [vmem:[%s7684_s0 + $0x540] sm:$0xff]  ;;  %v1888_v35 = vadd.f32 %v5545_v29, %v1629_v18  ;;  %v1891_v18 = vadd.f32 %v5545_v29, %v1632_v1  ;;  %v1954_v19 = vadd.f32 %v5545_v29, %v1695_v4 }
 0x342   :  { %v1757_v25 = vmul.f32 %v4076_v24, %v5517_v13 }
 0x344   :  { %v2016_v41 = vadd.f32 %v5545_v29, %v1757_v25 }
 0x345   :  { %v3248_v45 = vpop.f32.mrf.mxu2  ;;  %v3408_v46 = vpop.f32.mrf.mxu3 }
 0x346   :  { %3671 = vst [vmem:[%s7687_s4 + $0x488] sm:$0xff] %v3248_v45  ;;  %v2931_v49 = vpop.f32.mrf.mxu0  ;;  %v3091_v50 = vpop.f32.mrf.mxu1  ;;  %v4069_v45 = vld [vmem:[%s7684_s0 + $0x538] sm:$0xff] }
 0x347   :  { %3735 = vst [vmem:[%s7687_s4 + $0x688] sm:$0xff] %v3408_v46  ;;  %v1756_v46 = vmul.f32 %v4069_v45, %v5517_v13  ;;  %v2144_v45 = vmax.f32 %v1888_v35, 0.0 }
 0x348   :  { %3544 = vst [vmem:[%s7687_s4 + $0x90] sm:$0xff] %v2931_v49  ;;  %v4071_v49 = vld [vmem:[%s7684_s0 + $0x738] sm:$0xff] }
 0x349   :  { %3608 = vst [vmem:[%s7687_s4 + $0x290] sm:$0xff] %v3091_v50  ;;  %3803 = vmatmul.msk.bf16.gmra.mxu0 %vm274_vm1, %v2377_v47  ;;  %3835 = vmatmul.msk.bf16.gmra.mxu1 %vm274_vm1, %v2409_v60  ;;  %v4070_v47 = vld [vmem:[%s7684_s0 + $0x730] sm:$0xff]  ;;  %v1820_v50 = vmul.f32 %v4071_v49, %v5517_v13  ;;  %v2015_v61 = vadd.f32 %v5545_v29, %v1756_v46  ;;  %v2145_v46 = vmax.f32 %v1889_v37, 0.0  ;;  %v2272_v49 = vmax.f32 %v2016_v41, 0.0 }
 0x34a   :  { %3867 = vmatmul.msk.bf16.gmra.mxu2 %vm274_vm1, %v2441_v2  ;;  %3899 = vmatmul.msk.bf16.gmra.mxu3 %vm274_vm1, %v2473_v51  ;;  %v1819_v60 = vmul.f32 %v4070_v47, %v5517_v13  ;;  %v2208_v47 = vmax.f32 %v1952_v38, 0.0 }
 0x34b   :  { %v2079_v63 = vadd.f32 %v5545_v29, %v1820_v50  ;;  %v2271_v6 = vmax.f32 %v2015_v61, 0.0  ;;  %v2380_v55 = vpack.c.bf16 %v2145_v46, %v2144_v45  ;;  %v4089_v45 = vld [vmem:[%s7684_s0 + $0x168] sm:$0xff] }
 0x34c   :  { %v2078_v62 = vadd.f32 %v5545_v29, %v1819_v60  ;;  %v2209_v60 = vmax.f32 %v1953_v36, 0.0  ;;  %v1634_v46 = vmul.f32 %v4089_v45, %v5517_v13 }
 0x34d   :  { %v3251_v7 = vpop.f32.mrf.mxu2  ;;  %v3411_v8 = vpop.f32.mrf.mxu3  ;;  %v2443_v16 = vpack.c.bf16 %v2271_v6, %v2270_v5  ;;  %v4083_v5 = vld [vmem:[%s7684_s0 + $0x358] sm:$0xff] }
 0x34e   :  { %3672 = vst [vmem:[%s7687_s4 + $0x490] sm:$0xff] %v3251_v7  ;;  %v2933_v48 = vpop.f32.mrf.mxu0  ;;  %v3093_v15 = vpop.f32.mrf.mxu1  ;;  %v2334_v7 = vmax.f32 %v2078_v62, 0.0  ;;  %v2412_v56 = vpack.c.bf16 %v2209_v60, %v2208_v47  ;;  %v4080_v62 = vld [vmem:[%s7684_s0 + $0x150] sm:$0xff]  ;;  %v1696_v6 = vmul.f32 %v4083_v5, %v5517_v13  ;;  %v4090_v47 = vld [vmem:[%s7684_s0 + $0x360] sm:$0xff] }
 0x34f   :  { %3736 = vst [vmem:[%s7687_s4 + $0x690] sm:$0xff] %v3411_v8  ;;  %v2335_v8 = vmax.f32 %v2079_v63, 0.0  ;;  %v1631_v63 = vmul.f32 %v4080_v62, %v5517_v13  ;;  %v1697_v60 = vmul.f32 %v4090_v47, %v5517_v13 }
 0x350   :  { %3545 = vst [vmem:[%s7687_s4 + $0x98] sm:$0xff] %v2933_v48  ;;  %v1955_v20 = vadd.f32 %v5545_v29, %v1696_v6 }
 0x351   :  { %3609 = vst [vmem:[%s7687_s4 + $0x298] sm:$0xff] %v3093_v15  ;;  %v2475_v54 = vpack.c.bf16 %v2335_v8, %v2334_v7  ;;  %v4084_v7 = vld [vmem:[%s7684_s0 + $0x550] sm:$0xff]  ;;  %v1890_v17 = vadd.f32 %v5545_v29, %v1631_v63  ;;  %v1893_v63 = vadd.f32 %v5545_v29, %v1634_v46  ;;  %v1956_v0 = vadd.f32 %v5545_v29, %v1697_v60 }
 0x352   :  { %v1759_v8 = vmul.f32 %v4084_v7, %v5517_v13 }
 0x354   :  { %v2018_v23 = vadd.f32 %v5545_v29, %v1759_v8 }
 0x355   :  { %v3253_v26 = vpop.f32.mrf.mxu2  ;;  %v3413_v27 = vpop.f32.mrf.mxu3 }
 0x356   :  { %3673 = vst [vmem:[%s7687_s4 + $0x498] sm:$0xff] %v3253_v26  ;;  %v2936_v31 = vpop.f32.mrf.mxu0  ;;  %v3096_v32 = vpop.f32.mrf.mxu1  ;;  %v4077_v26 = vld [vmem:[%s7684_s0 + $0x548] sm:$0xff] }
 0x357   :  { %3737 = vst [vmem:[%s7687_s4 + $0x698] sm:$0xff] %v3413_v27  ;;  %v1758_v27 = vmul.f32 %v4077_v26, %v5517_v13  ;;  %v2146_v26 = vmax.f32 %v1890_v17, 0.0 }
 0x358   :  { %3546 = vst [vmem:[%s7687_s4 + $0xa0] sm:$0xff] %v2936_v31  ;;  %v4079_v31 = vld [vmem:[%s7684_s0 + $0x748] sm:$0xff] }
 0x359   :  { %3610 = vst [vmem:[%s7687_s4 + $0x2a0] sm:$0xff] %v3096_v32  ;;  %3804 = vmatmul.msk.bf16.gmra.mxu0 %vm274_vm1, %v2378_v28  ;;  %3836 = vmatmul.msk.bf16.gmra.mxu1 %vm274_vm1, %v2410_v30  ;;  %v4078_v28 = vld [vmem:[%s7684_s0 + $0x740] sm:$0xff]  ;;  %v1822_v32 = vmul.f32 %v4079_v31, %v5517_v13  ;;  %v2017_v42 = vadd.f32 %v5545_v29, %v1758_v27  ;;  %v2147_v27 = vmax.f32 %v1891_v18, 0.0  ;;  %v2274_v31 = vmax.f32 %v2018_v23, 0.0 }
 0x35a   :  { %3868 = vmatmul.msk.bf16.gmra.mxu2 %vm274_vm1, %v2442_v33  ;;  %3900 = vmatmul.msk.bf16.gmra.mxu3 %vm274_vm1, %v2474_v34  ;;  %v1821_v30 = vmul.f32 %v4078_v28, %v5517_v13  ;;  %v2210_v28 = vmax.f32 %v1954_v19, 0.0 }
 0x35b   :  { %v2081_v44 = vadd.f32 %v5545_v29, %v1822_v32  ;;  %v2273_v50 = vmax.f32 %v2017_v42, 0.0  ;;  %v2381_v38 = vpack.c.bf16 %v2147_v27, %v2146_v26  ;;  %v4097_v26 = vld [vmem:[%s7684_s0 + $0x178] sm:$0xff] }
 0x35c   :  { %v2080_v43 = vadd.f32 %v5545_v29, %v1821_v30  ;;  %v2211_v30 = vmax.f32 %v1955_v20, 0.0  ;;  %v1636_v27 = vmul.f32 %v4097_v26, %v5517_v13 }
 0x35d   :  { %v3256_v2 = vpop.f32.mrf.mxu2  ;;  %v3416_v51 = vpop.f32.mrf.mxu3  ;;  %v2444_v59 = vpack.c.bf16 %v2273_v50, %v2272_v49  ;;  %v4091_v49 = vld [vmem:[%s7684_s0 + $0x368] sm:$0xff] }
 0x35e   :  { %3674 = vst [vmem:[%s7687_s4 + $0x4a0] sm:$0xff] %v3256_v2  ;;  %v2938_v57 = vpop.f32.mrf.mxu0  ;;  %v3098_v58 = vpop.f32.mrf.mxu1  ;;  %v2336_v2 = vmax.f32 %v2080_v43, 0.0  ;;  %v2413_v36 = vpack.c.bf16 %v2211_v30, %v2210_v28  ;;  %v4088_v43 = vld [vmem:[%s7684_s0 + $0x160] sm:$0xff]  ;;  %v1698_v50 = vmul.f32 %v4091_v49, %v5517_v13  ;;  %v4098_v28 = vld [vmem:[%s7684_s0 + $0x370] sm:$0xff] }
 0x35f   :  { %3738 = vst [vmem:[%s7687_s4 + $0x6a0] sm:$0xff] %v3416_v51  ;;  %v2337_v51 = vmax.f32 %v2081_v44, 0.0  ;;  %v1633_v44 = vmul.f32 %v4088_v43, %v5517_v13  ;;  %v1699_v30 = vmul.f32 %v4098_v28, %v5517_v13 }
 0x360   :  { %3547 = vst [vmem:[%s7687_s4 + $0xa8] sm:$0xff] %v2938_v57  ;;  %v1957_v1 = vadd.f32 %v5545_v29, %v1698_v50 }
 0x361   :  { %3611 = vst [vmem:[%s7687_s4 + $0x2a8] sm:$0xff] %v3098_v58  ;;  %v2476_v61 = vpack.c.bf16 %v2337_v51, %v2336_v2  ;;  %v4092_v2 = vld [vmem:[%s7684_s0 + $0x560] sm:$0xff]  ;;  %v1892_v62 = vadd.f32 %v5545_v29, %v1633_v44  ;;  %v1895_v44 = vadd.f32 %v5545_v29, %v1636_v27  ;;  %v1958_v45 = vadd.f32 %v5545_v29, %v1699_v30 }
 0x362   :  { %v1761_v51 = vmul.f32 %v4092_v2, %v5517_v13 }
 0x364   :  { %v2020_v5 = vadd.f32 %v5545_v29, %v1761_v51 }
 0x365   :  { %v3258_v9 = vpop.f32.mrf.mxu2  ;;  %v3418_v10 = vpop.f32.mrf.mxu3 }
 0x366   :  { %3675 = vst [vmem:[%s7687_s4 + $0x4a8] sm:$0xff] %v3258_v9  ;;  %v2941_v48 = vpop.f32.mrf.mxu0  ;;  %v3101_v15 = vpop.f32.mrf.mxu1  ;;  %v4085_v9 = vld [vmem:[%s7684_s0 + $0x558] sm:$0xff] }
 0x367   :  { %3739 = vst [vmem:[%s7687_s4 + $0x6a8] sm:$0xff] %v3418_v10  ;;  %v1760_v10 = vmul.f32 %v4085_v9, %v5517_v13  ;;  %v2148_v9 = vmax.f32 %v1892_v62, 0.0 }
 0x368   :  { %3548 = vst [vmem:[%s7687_s4 + $0xb0] sm:$0xff] %v2941_v48  ;;  %v4087_v48 = vld [vmem:[%s7684_s0 + $0x758] sm:$0xff] }
 0x369   :  { %3612 = vst [vmem:[%s7687_s4 + $0x2b0] sm:$0xff] %v3101_v15  ;;  %3805 = vmatmul.msk.bf16.gmra.mxu0 %vm274_vm1, %v2379_v11  ;;  %3837 = vmatmul.msk.bf16.gmra.mxu1 %vm274_vm1, %v2411_v12  ;;  %v4086_v11 = vld [vmem:[%s7684_s0 + $0x750] sm:$0xff]  ;;  %v1824_v15 = vmul.f32 %v4087_v48, %v5517_v13  ;;  %v2019_v14 = vadd.f32 %v5545_v29, %v1760_v10  ;;  %v2149_v10 = vmax.f32 %v1893_v63, 0.0  ;;  %v2276_v48 = vmax.f32 %v2020_v5, 0.0 }
 0x36a   :  { %3869 = vmatmul.msk.bf16.gmra.mxu2 %vm274_vm1, %v2443_v16  ;;  %3901 = vmatmul.msk.bf16.gmra.mxu3 %vm274_vm1, %v2475_v54  ;;  %v1823_v12 = vmul.f32 %v4086_v11, %v5517_v13  ;;  %v2212_v11 = vmax.f32 %v1956_v0, 0.0 }
 0x36b   :  { %v2083_v25 = vadd.f32 %v5545_v29, %v1824_v15  ;;  %v2275_v32 = vmax.f32 %v2019_v14, 0.0  ;;  %v2382_v19 = vpack.c.bf16 %v2149_v10, %v2148_v9  ;;  %v4105_v9 = vld [vmem:[%s7684_s0 + $0x188] sm:$0xff] }
 0x36c   :  { %v2082_v24 = vadd.f32 %v5545_v29, %v1823_v12  ;;  %v2213_v12 = vmax.f32 %v1957_v1, 0.0  ;;  %v1638_v10 = vmul.f32 %v4105_v9, %v5517_v13 }
 0x36d   :  { %v3261_v33 = vpop.f32.mrf.mxu2  ;;  %v3421_v34 = vpop.f32.mrf.mxu3  ;;  %v2445_v41 = vpack.c.bf16 %v2275_v32, %v2274_v31  ;;  %v4099_v31 = vld [vmem:[%s7684_s0 + $0x378] sm:$0xff] }
 0x36e   :  { %3676 = vst [vmem:[%s7687_s4 + $0x4b0] sm:$0xff] %v3261_v33  ;;  %v2943_v39 = vpop.f32.mrf.mxu0  ;;  %v3103_v40 = vpop.f32.mrf.mxu1  ;;  %v2338_v33 = vmax.f32 %v2082_v24, 0.0  ;;  %v2414_v20 = vpack.c.bf16 %v2213_v12, %v2212_v11  ;;  %v4096_v24 = vld [vmem:[%s7684_s0 + $0x170] sm:$0xff]  ;;  %v1700_v32 = vmul.f32 %v4099_v31, %v5517_v13  ;;  %v4106_v11 = vld [vmem:[%s7684_s0 + $0x380] sm:$0xff] }
 0x36f   :  { %3740 = vst [vmem:[%s7687_s4 + $0x6b0] sm:$0xff] %v3421_v34  ;;  %v2339_v34 = vmax.f32 %v2083_v25, 0.0  ;;  %v1635_v25 = vmul.f32 %v4096_v24, %v5517_v13  ;;  %v1701_v12 = vmul.f32 %v4106_v11, %v5517_v13 }
 0x370   :  { %3549 = vst [vmem:[%s7687_s4 + $0xb8] sm:$0xff] %v2943_v39  ;;  %v1959_v46 = vadd.f32 %v5545_v29, %v1700_v32 }
 0x371   :  { %3613 = vst [vmem:[%s7687_s4 + $0x2b8] sm:$0xff] %v3103_v40  ;;  %v2477_v42 = vpack.c.bf16 %v2339_v34, %v2338_v33  ;;  %v4100_v33 = vld [vmem:[%s7684_s0 + $0x570] sm:$0xff]  ;;  %v1894_v43 = vadd.f32 %v5545_v29, %v1635_v25  ;;  %v1897_v25 = vadd.f32 %v5545_v29, %v1638_v10  ;;  %v1960_v26 = vadd.f32 %v5545_v29, %v1701_v12 }
 0x372   :  { %v1763_v34 = vmul.f32 %v4100_v33, %v5517_v13 }
 0x374   :  { %v2022_v49 = vadd.f32 %v5545_v29, %v1763_v34 }
 0x375   :  { %v3263_v52 = vpop.f32.mrf.mxu2  ;;  %v3423_v53 = vpop.f32.mrf.mxu3 }
 0x376   :  { %3677 = vst [vmem:[%s7687_s4 + $0x4b8] sm:$0xff] %v3263_v52  ;;  %v2946_v57 = vpop.f32.mrf.mxu0  ;;  %v3106_v58 = vpop.f32.mrf.mxu1  ;;  %v4093_v52 = vld [vmem:[%s7684_s0 + $0x568] sm:$0xff] }
 0x377   :  { %3741 = vst [vmem:[%s7687_s4 + $0x6b8] sm:$0xff] %v3423_v53  ;;  %v1762_v53 = vmul.f32 %v4093_v52, %v5517_v13  ;;  %v2150_v52 = vmax.f32 %v1894_v43, 0.0 }
 0x378   :  { %3550 = vst [vmem:[%s7687_s4 + $0xc0] sm:$0xff] %v2946_v57  ;;  %v4095_v57 = vld [vmem:[%s7684_s0 + $0x768] sm:$0xff] }
 0x379   :  { %3614 = vst [vmem:[%s7687_s4 + $0x2c0] sm:$0xff] %v3106_v58  ;;  %3806 = vmatmul.msk.bf16.gmra.mxu0 %vm274_vm1, %v2380_v55  ;;  %3838 = vmatmul.msk.bf16.gmra.mxu1 %vm274_vm1, %v2412_v56  ;;  %v4094_v55 = vld [vmem:[%s7684_s0 + $0x760] sm:$0xff]  ;;  %v1826_v58 = vmul.f32 %v4095_v57, %v5517_v13  ;;  %v2021_v6 = vadd.f32 %v5545_v29, %v1762_v53  ;;  %v2151_v53 = vmax.f32 %v1895_v44, 0.0  ;;  %v2278_v57 = vmax.f32 %v2022_v49, 0.0 }
 0x37a   :  { %3870 = vmatmul.msk.bf16.gmra.mxu2 %vm274_vm1, %v2444_v59  ;;  %3902 = vmatmul.msk.bf16.gmra.mxu3 %vm274_vm1, %v2476_v61  ;;  %v1825_v56 = vmul.f32 %v4094_v55, %v5517_v13  ;;  %v2214_v55 = vmax.f32 %v1958_v45, 0.0 }
 0x37b   :  { %v2085_v8 = vadd.f32 %v5545_v29, %v1826_v58  ;;  %v2277_v15 = vmax.f32 %v2021_v6, 0.0  ;;  %v2383_v0 = vpack.c.bf16 %v2151_v53, %v2150_v52  ;;  %v4113_v52 = vld [vmem:[%s7684_s0 + $0x198] sm:$0xff] }
 0x37c   :  { %v2084_v7 = vadd.f32 %v5545_v29, %v1825_v56  ;;  %v2215_v56 = vmax.f32 %v1959_v46, 0.0  ;;  %v1640_v53 = vmul.f32 %v4113_v52, %v5517_v13 }
 0x37d   :  { %v3266_v16 = vpop.f32.mrf.mxu2  ;;  %v3426_v54 = vpop.f32.mrf.mxu3  ;;  %v2446_v23 = vpack.c.bf16 %v2277_v15, %v2276_v48  ;;  %v4107_v48 = vld [vmem:[%s7684_s0 + $0x388] sm:$0xff] }
 0x37e   :  { %3678 = vst [vmem:[%s7687_s4 + $0x4c0] sm:$0xff] %v3266_v16  ;;  %v2948_v21 = vpop.f32.mrf.mxu0  ;;  %v3108_v22 = vpop.f32.mrf.mxu1  ;;  %v2340_v16 = vmax.f32 %v2084_v7, 0.0  ;;  %v2415_v1 = vpack.c.bf16 %v2215_v56, %v2214_v55  ;;  %v4104_v7 = vld [vmem:[%s7684_s0 + $0x180] sm:$0xff]  ;;  %v1702_v15 = vmul.f32 %v4107_v48, %v5517_v13  ;;  %v4114_v55 = vld [vmem:[%s7684_s0 + $0x390] sm:$0xff] }
 0x37f   :  { %3742 = vst [vmem:[%s7687_s4 + $0x6c0] sm:$0xff] %v3426_v54  ;;  %v2341_v54 = vmax.f32 %v2085_v8, 0.0  ;;  %v1637_v8 = vmul.f32 %v4104_v7, %v5517_v13  ;;  %v1703_v56 = vmul.f32 %v4114_v55, %v5517_v13 }
 0x380   :  { %3551 = vst [vmem:[%s7687_s4 + $0xc8] sm:$0xff] %v2948_v21  ;;  %v1961_v27 = vadd.f32 %v5545_v29, %v1702_v15 }
 0x381   :  { %3615 = vst [vmem:[%s7687_s4 + $0x2c8] sm:$0xff] %v3108_v22  ;;  %v2478_v14 = vpack.c.bf16 %v2341_v54, %v2340_v16  ;;  %v4108_v16 = vld [vmem:[%s7684_s0 + $0x580] sm:$0xff]  ;;  %v1896_v24 = vadd.f32 %v5545_v29, %v1637_v8  ;;  %v1899_v8 = vadd.f32 %v5545_v29, %v1640_v53  ;;  %v1962_v9 = vadd.f32 %v5545_v29, %v1703_v56 }
 0x382   :  { %v1765_v54 = vmul.f32 %v4108_v16, %v5517_v13 }
 0x384   :  { %v2024_v31 = vadd.f32 %v5545_v29, %v1765_v54 }
 0x385   :  { %v3268_v35 = vpop.f32.mrf.mxu2  ;;  %v3428_v37 = vpop.f32.mrf.mxu3 }
 0x386   :  { %3679 = vst [vmem:[%s7687_s4 + $0x4c8] sm:$0xff] %v3268_v35  ;;  %v2951_v39 = vpop.f32.mrf.mxu0  ;;  %v3111_v40 = vpop.f32.mrf.mxu1  ;;  %v4101_v35 = vld [vmem:[%s7684_s0 + $0x578] sm:$0xff] }
 0x387   :  { %3743 = vst [vmem:[%s7687_s4 + $0x6c8] sm:$0xff] %v3428_v37  ;;  %v1764_v37 = vmul.f32 %v4101_v35, %v5517_v13  ;;  %v2152_v35 = vmax.f32 %v1896_v24, 0.0 }
 0x388   :  { %3552 = vst [vmem:[%s7687_s4 + $0xd0] sm:$0xff] %v2951_v39  ;;  %v4103_v39 = vld [vmem:[%s7684_s0 + $0x778] sm:$0xff] }
 0x389   :  { %3616 = vst [vmem:[%s7687_s4 + $0x2d0] sm:$0xff] %v3111_v40  ;;  %3807 = vmatmul.msk.bf16.gmra.mxu0 %vm274_vm1, %v2381_v38  ;;  %3839 = vmatmul.msk.bf16.gmra.mxu1 %vm274_vm1, %v2413_v36  ;;  %v4102_v38 = vld [vmem:[%s7684_s0 + $0x770] sm:$0xff]  ;;  %v1828_v40 = vmul.f32 %v4103_v39, %v5517_v13  ;;  %v2023_v50 = vadd.f32 %v5545_v29, %v1764_v37  ;;  %v2153_v37 = vmax.f32 %v1897_v25, 0.0  ;;  %v2280_v39 = vmax.f32 %v2024_v31, 0.0 }
 0x38a   :  { %3871 = vmatmul.msk.bf16.gmra.mxu2 %vm274_vm1, %v2445_v41  ;;  %3903 = vmatmul.msk.bf16.gmra.mxu3 %vm274_vm1, %v2477_v42  ;;  %v1827_v36 = vmul.f32 %v4102_v38, %v5517_v13  ;;  %v2216_v38 = vmax.f32 %v1960_v26, 0.0 }
 0x38b   :  { %v2087_v51 = vadd.f32 %v5545_v29, %v1828_v40  ;;  %v2279_v58 = vmax.f32 %v2023_v50, 0.0  ;;  %v2384_v45 = vpack.c.bf16 %v2153_v37, %v2152_v35  ;;  %v4121_v35 = vld [vmem:[%s7684_s0 + $0x1a8] sm:$0xff] }
 0x38c   :  { %v2086_v2 = vadd.f32 %v5545_v29, %v1827_v36  ;;  %v2217_v36 = vmax.f32 %v1961_v27, 0.0  ;;  %v1642_v37 = vmul.f32 %v4121_v35, %v5517_v13 }
 0x38d   :  { %v3271_v59 = vpop.f32.mrf.mxu2  ;;  %v3431_v61 = vpop.f32.mrf.mxu3  ;;  %v2447_v5 = vpack.c.bf16 %v2279_v58, %v2278_v57  ;;  %v4115_v57 = vld [vmem:[%s7684_s0 + $0x398] sm:$0xff] }
 0x38e   :  { %3680 = vst [vmem:[%s7687_s4 + $0x4d0] sm:$0xff] %v3271_v59  ;;  %v2953_v3 = vpop.f32.mrf.mxu0  ;;  %v3113_v4 = vpop.f32.mrf.mxu1  ;;  %v2342_v59 = vmax.f32 %v2086_v2, 0.0  ;;  %v2416_v46 = vpack.c.bf16 %v2217_v36, %v2216_v38  ;;  %v4112_v2 = vld [vmem:[%s7684_s0 + $0x190] sm:$0xff]  ;;  %v1704_v58 = vmul.f32 %v4115_v57, %v5517_v13  ;;  %v4122_v38 = vld [vmem:[%s7684_s0 + $0x3a0] sm:$0xff] }
 0x38f   :  { %3744 = vst [vmem:[%s7687_s4 + $0x6d0] sm:$0xff] %v3431_v61  ;;  %v2343_v61 = vmax.f32 %v2087_v51, 0.0  ;;  %v1639_v51 = vmul.f32 %v4112_v2, %v5517_v13  ;;  %v1705_v36 = vmul.f32 %v4122_v38, %v5517_v13 }
 0x390   :  { %3553 = vst [vmem:[%s7687_s4 + $0xd8] sm:$0xff] %v2953_v3  ;;  %v1963_v10 = vadd.f32 %v5545_v29, %v1704_v58 }
 0x391   :  { %3617 = vst [vmem:[%s7687_s4 + $0x2d8] sm:$0xff] %v3113_v4  ;;  %v2479_v6 = vpack.c.bf16 %v2343_v61, %v2342_v59  ;;  %v4116_v59 = vld [vmem:[%s7684_s0 + $0x590] sm:$0xff]  ;;  %v1898_v7 = vadd.f32 %v5545_v29, %v1639_v51  ;;  %v1901_v51 = vadd.f32 %v5545_v29, %v1642_v37  ;;  %v1964_v52 = vadd.f32 %v5545_v29, %v1705_v36 }
 0x392   :  { %v1767_v61 = vmul.f32 %v4116_v59, %v5517_v13 }
 0x394   :  { %v2026_v48 = vadd.f32 %v5545_v29, %v1767_v61 }
 0x395   :  { %v3273_v17 = vpop.f32.mrf.mxu2  ;;  %v3433_v18 = vpop.f32.mrf.mxu3 }
 0x396   :  { %3681 = vst [vmem:[%s7687_s4 + $0x4d8] sm:$0xff] %v3273_v17  ;;  %v2956_v21 = vpop.f32.mrf.mxu0  ;;  %v3116_v22 = vpop.f32.mrf.mxu1  ;;  %v4109_v17 = vld [vmem:[%s7684_s0 + $0x588] sm:$0xff] }
 0x397   :  { %3745 = vst [vmem:[%s7687_s4 + $0x6d8] sm:$0xff] %v3433_v18  ;;  %v1766_v18 = vmul.f32 %v4109_v17, %v5517_v13  ;;  %v2154_v17 = vmax.f32 %v1898_v7, 0.0 }
 0x398   :  { %3554 = vst [vmem:[%s7687_s4 + $0xe0] sm:$0xff] %v2956_v21  ;;  %v4111_v21 = vld [vmem:[%s7684_s0 + $0x788] sm:$0xff] }
 0x399   :  { %3618 = vst [vmem:[%s7687_s4 + $0x2e0] sm:$0xff] %v3116_v22  ;;  %3808 = vmatmul.msk.bf16.gmra.mxu0 %vm274_vm1, %v2382_v19  ;;  %3840 = vmatmul.msk.bf16.gmra.mxu1 %vm274_vm1, %v2414_v20  ;;  %v4110_v19 = vld [vmem:[%s7684_s0 + $0x780] sm:$0xff]  ;;  %v1830_v22 = vmul.f32 %v4111_v21, %v5517_v13  ;;  %v2025_v32 = vadd.f32 %v5545_v29, %v1766_v18  ;;  %v2155_v18 = vmax.f32 %v1899_v8, 0.0  ;;  %v2282_v21 = vmax.f32 %v2026_v48, 0.0 }
 0x39a   :  { %3872 = vmatmul.msk.bf16.gmra.mxu2 %vm274_vm1, %v2446_v23  ;;  %3904 = vmatmul.msk.bf16.gmra.mxu3 %vm274_vm1, %v2478_v14  ;;  %v1829_v20 = vmul.f32 %v4110_v19, %v5517_v13  ;;  %v2218_v19 = vmax.f32 %v1962_v9, 0.0 }
 0x39b   :  { %v2089_v34 = vadd.f32 %v5545_v29, %v1830_v22  ;;  %v2281_v40 = vmax.f32 %v2025_v32, 0.0  ;;  %v2385_v26 = vpack.c.bf16 %v2155_v18, %v2154_v17  ;;  %v4129_v17 = vld [vmem:[%s7684_s0 + $0x1b8] sm:$0xff] }
 0x39c   :  { %v2088_v33 = vadd.f32 %v5545_v29, %v1829_v20  ;;  %v2219_v20 = vmax.f32 %v1963_v10, 0.0  ;;  %v1644_v18 = vmul.f32 %v4129_v17, %v5517_v13 }
 0x39d   :  { %v3276_v41 = vpop.f32.mrf.mxu2  ;;  %v3436_v42 = vpop.f32.mrf.mxu3  ;;  %v2448_v49 = vpack.c.bf16 %v2281_v40, %v2280_v39  ;;  %v4123_v39 = vld [vmem:[%s7684_s0 + $0x3a8] sm:$0xff] }
 0x39e   :  { %3682 = vst [vmem:[%s7687_s4 + $0x4e0] sm:$0xff] %v3276_v41  ;;  %v2958_v47 = vpop.f32.mrf.mxu0  ;;  %v3118_v60 = vpop.f32.mrf.mxu1  ;;  %v2344_v41 = vmax.f32 %v2088_v33, 0.0  ;;  %v2417_v27 = vpack.c.bf16 %v2219_v20, %v2218_v19  ;;  %v4120_v33 = vld [vmem:[%s7684_s0 + $0x1a0] sm:$0xff]  ;;  %v1706_v40 = vmul.f32 %v4123_v39, %v5517_v13  ;;  %v4130_v19 = vld [vmem:[%s7684_s0 + $0x3b0] sm:$0xff] }
 0x39f   :  { %3746 = vst [vmem:[%s7687_s4 + $0x6e0] sm:$0xff] %v3436_v42  ;;  %v2345_v42 = vmax.f32 %v2089_v34, 0.0  ;;  %v1641_v34 = vmul.f32 %v4120_v33, %v5517_v13  ;;  %v1707_v20 = vmul.f32 %v4130_v19, %v5517_v13 }
 0x3a0   :  { %3555 = vst [vmem:[%s7687_s4 + $0xe8] sm:$0xff] %v2958_v47  ;;  %v1965_v53 = vadd.f32 %v5545_v29, %v1706_v40 }
 0x3a1   :  { %3619 = vst [vmem:[%s7687_s4 + $0x2e8] sm:$0xff] %v3118_v60  ;;  %v2480_v50 = vpack.c.bf16 %v2345_v42, %v2344_v41  ;;  %v4124_v41 = vld [vmem:[%s7684_s0 + $0x5a0] sm:$0xff]  ;;  %v1900_v2 = vadd.f32 %v5545_v29, %v1641_v34  ;;  %v1903_v34 = vadd.f32 %v5545_v29, %v1644_v18  ;;  %v1966_v35 = vadd.f32 %v5545_v29, %v1707_v20 }
 0x3a2   :  { %v1769_v42 = vmul.f32 %v4124_v41, %v5517_v13 }
 0x3a4   :  { %v2028_v57 = vadd.f32 %v5545_v29, %v1769_v42 }
 0x3a5   :  { %v3278_v62 = vpop.f32.mrf.mxu2  ;;  %v3438_v63 = vpop.f32.mrf.mxu3 }
 0x3a6   :  { %3683 = vst [vmem:[%s7687_s4 + $0x4e8] sm:$0xff] %v3278_v62  ;;  %v2961_v3 = vpop.f32.mrf.mxu0  ;;  %v3121_v4 = vpop.f32.mrf.mxu1  ;;  %v4117_v62 = vld [vmem:[%s7684_s0 + $0x598] sm:$0xff] }
 0x3a7   :  { %3747 = vst [vmem:[%s7687_s4 + $0x6e8] sm:$0xff] %v3438_v63  ;;  %v1768_v63 = vmul.f32 %v4117_v62, %v5517_v13  ;;  %v2156_v62 = vmax.f32 %v1900_v2, 0.0 }
 0x3a8   :  { %3556 = vst [vmem:[%s7687_s4 + $0xf0] sm:$0xff] %v2961_v3  ;;  %v4119_v3 = vld [vmem:[%s7684_s0 + $0x798] sm:$0xff] }
 0x3a9   :  { %3620 = vst [vmem:[%s7687_s4 + $0x2f0] sm:$0xff] %v3121_v4  ;;  %3809 = vmatmul.msk.bf16.gmra.mxu0 %vm274_vm1, %v2383_v0  ;;  %3841 = vmatmul.msk.bf16.gmra.mxu1 %vm274_vm1, %v2415_v1  ;;  %v4118_v0 = vld [vmem:[%s7684_s0 + $0x790] sm:$0xff]  ;;  %v1832_v4 = vmul.f32 %v4119_v3, %v5517_v13  ;;  %v2027_v15 = vadd.f32 %v5545_v29, %v1768_v63  ;;  %v2157_v63 = vmax.f32 %v1901_v51, 0.0  ;;  %v2284_v3 = vmax.f32 %v2028_v57, 0.0 }
 0x3aa   :  { %3873 = vmatmul.msk.bf16.gmra.mxu2 %vm274_vm1, %v2447_v5  ;;  %3905 = vmatmul.msk.bf16.gmra.mxu3 %vm274_vm1, %v2479_v6  ;;  %v1831_v1 = vmul.f32 %v4118_v0, %v5517_v13  ;;  %v2220_v0 = vmax.f32 %v1964_v52, 0.0 }
 0x3ab   :  { %v2091_v54 = vadd.f32 %v5545_v29, %v1832_v4  ;;  %v2283_v22 = vmax.f32 %v2027_v15, 0.0  ;;  %v2386_v9 = vpack.c.bf16 %v2157_v63, %v2156_v62  ;;  %v4137_v62 = vld [vmem:[%s7684_s0 + $0x1c8] sm:$0xff] }
 0x3ac   :  { %v2090_v16 = vadd.f32 %v5545_v29, %v1831_v1  ;;  %v2221_v1 = vmax.f32 %v1965_v53, 0.0  ;;  %v1646_v63 = vmul.f32 %v4137_v62, %v5517_v13 }
 0x3ad   :  { %v3281_v23 = vpop.f32.mrf.mxu2  ;;  %v3441_v14 = vpop.f32.mrf.mxu3  ;;  %v2449_v31 = vpack.c.bf16 %v2283_v22, %v2282_v21  ;;  %v4131_v21 = vld [vmem:[%s7684_s0 + $0x3b8] sm:$0xff] }
 0x3ae   :  { %3684 = vst [vmem:[%s7687_s4 + $0x4f0] sm:$0xff] %v3281_v23  ;;  %v2963_v28 = vpop.f32.mrf.mxu0  ;;  %v3123_v30 = vpop.f32.mrf.mxu1  ;;  %v2346_v23 = vmax.f32 %v2090_v16, 0.0  ;;  %v2418_v10 = vpack.c.bf16 %v2221_v1, %v2220_v0  ;;  %v4128_v16 = vld [vmem:[%s7684_s0 + $0x1b0] sm:$0xff]  ;;  %v1708_v22 = vmul.f32 %v4131_v21, %v5517_v13  ;;  %v4138_v0 = vld [vmem:[%s7684_s0 + $0x3c0] sm:$0xff] }
 0x3af   :  { %3748 = vst [vmem:[%s7687_s4 + $0x6f0] sm:$0xff] %v3441_v14  ;;  %v2347_v14 = vmax.f32 %v2091_v54, 0.0  ;;  %v1643_v54 = vmul.f32 %v4128_v16, %v5517_v13  ;;  %v1709_v1 = vmul.f32 %v4138_v0, %v5517_v13 }
 0x3b0   :  { %3557 = vst [vmem:[%s7687_s4 + $0xf8] sm:$0xff] %v2963_v28  ;;  %v1967_v37 = vadd.f32 %v5545_v29, %v1708_v22 }
 0x3b1   :  { %3621 = vst [vmem:[%s7687_s4 + $0x2f8] sm:$0xff] %v3123_v30  ;;  %v2481_v32 = vpack.c.bf16 %v2347_v14, %v2346_v23  ;;  %v4132_v23 = vld [vmem:[%s7684_s0 + $0x5b0] sm:$0xff]  ;;  %v1902_v33 = vadd.f32 %v5545_v29, %v1643_v54  ;;  %v1905_v54 = vadd.f32 %v5545_v29, %v1646_v63  ;;  %v1968_v17 = vadd.f32 %v5545_v29, %v1709_v1 }
 0x3b2   :  { %v1771_v14 = vmul.f32 %v4132_v23, %v5517_v13 }
 0x3b4   :  { %v2030_v39 = vadd.f32 %v5545_v29, %v1771_v14 }
 0x3b5   :  { %v3283_v43 = vpop.f32.mrf.mxu2  ;;  %v3443_v44 = vpop.f32.mrf.mxu3 }
 0x3b6   :  { %3685 = vst [vmem:[%s7687_s4 + $0x4f8] sm:$0xff] %v3283_v43  ;;  %v2966_v47 = vpop.f32.mrf.mxu0  ;;  %v3126_v60 = vpop.f32.mrf.mxu1  ;;  %v4125_v43 = vld [vmem:[%s7684_s0 + $0x5a8] sm:$0xff] }
 0x3b7   :  { %3749 = vst [vmem:[%s7687_s4 + $0x6f8] sm:$0xff] %v3443_v44  ;;  %v1770_v44 = vmul.f32 %v4125_v43, %v5517_v13  ;;  %v2158_v43 = vmax.f32 %v1902_v33, 0.0 }
 0x3b8   :  { %3558 = vst [vmem:[%s7687_s4 + $0x100] sm:$0xff] %v2966_v47  ;;  %v4127_v47 = vld [vmem:[%s7684_s0 + $0x7a8] sm:$0xff] }
 0x3b9   :  { %3622 = vst [vmem:[%s7687_s4 + $0x300] sm:$0xff] %v3126_v60  ;;  %3810 = vmatmul.msk.bf16.gmra.mxu0 %vm274_vm1, %v2384_v45  ;;  %3842 = vmatmul.msk.bf16.gmra.mxu1 %vm274_vm1, %v2416_v46  ;;  %v4126_v45 = vld [vmem:[%s7684_s0 + $0x7a0] sm:$0xff]  ;;  %v1834_v60 = vmul.f32 %v4127_v47, %v5517_v13  ;;  %v2029_v58 = vadd.f32 %v5545_v29, %v1770_v44  ;;  %v2159_v44 = vmax.f32 %v1903_v34, 0.0  ;;  %v2286_v47 = vmax.f32 %v2030_v39, 0.0 }
 0x3ba   :  { %3874 = vmatmul.msk.bf16.gmra.mxu2 %vm274_vm1, %v2448_v49  ;;  %3906 = vmatmul.msk.bf16.gmra.mxu3 %vm274_vm1, %v2480_v50  ;;  %v1833_v46 = vmul.f32 %v4126_v45, %v5517_v13  ;;  %v2222_v45 = vmax.f32 %v1966_v35, 0.0 }
 0x3bb   :  { %v2093_v61 = vadd.f32 %v5545_v29, %v1834_v60  ;;  %v2285_v4 = vmax.f32 %v2029_v58, 0.0  ;;  %v2387_v52 = vpack.c.bf16 %v2159_v44, %v2158_v43  ;;  %v4145_v43 = vld [vmem:[%s7684_s0 + $0x1d8] sm:$0xff] }
 0x3bc   :  { %v2092_v59 = vadd.f32 %v5545_v29, %v1833_v46  ;;  %v2223_v46 = vmax.f32 %v1967_v37, 0.0  ;;  %v1648_v44 = vmul.f32 %v4145_v43, %v5517_v13 }
 0x3bd   :  { %v3286_v5 = vpop.f32.mrf.mxu2  ;;  %v3446_v6 = vpop.f32.mrf.mxu3  ;;  %v2450_v48 = vpack.c.bf16 %v2285_v4, %v2284_v3  ;;  %v4139_v3 = vld [vmem:[%s7684_s0 + $0x3c8] sm:$0xff] }
 0x3be   :  { %3686 = vst [vmem:[%s7687_s4 + $0x500] sm:$0xff] %v3286_v5  ;;  %v2968_v11 = vpop.f32.mrf.mxu0  ;;  %v3128_v12 = vpop.f32.mrf.mxu1  ;;  %v2348_v5 = vmax.f32 %v2092_v59, 0.0  ;;  %v2419_v53 = vpack.c.bf16 %v2223_v46, %v2222_v45  ;;  %v4136_v59 = vld [vmem:[%s7684_s0 + $0x1c0] sm:$0xff]  ;;  %v1710_v4 = vmul.f32 %v4139_v3, %v5517_v13  ;;  %v4146_v45 = vld [vmem:[%s7684_s0 + $0x3d0] sm:$0xff] }
 0x3bf   :  { %3750 = vst [vmem:[%s7687_s4 + $0x700] sm:$0xff] %v3446_v6  ;;  %v2349_v6 = vmax.f32 %v2093_v61, 0.0  ;;  %v1645_v61 = vmul.f32 %v4136_v59, %v5517_v13  ;;  %v1711_v46 = vmul.f32 %v4146_v45, %v5517_v13 }
 0x3c0   :  { %3559 = vst [vmem:[%s7687_s4 + $0x108] sm:$0xff] %v2968_v11  ;;  %v1969_v18 = vadd.f32 %v5545_v29, %v1710_v4 }
 0x3c1   :  { %3623 = vst [vmem:[%s7687_s4 + $0x308] sm:$0xff] %v3128_v12  ;;  %v2482_v15 = vpack.c.bf16 %v2349_v6, %v2348_v5  ;;  %v4140_v5 = vld [vmem:[%s7684_s0 + $0x5c0] sm:$0xff]  ;;  %v1904_v16 = vadd.f32 %v5545_v29, %v1645_v61  ;;  %v1907_v61 = vadd.f32 %v5545_v29, %v1648_v44  ;;  %v1970_v62 = vadd.f32 %v5545_v29, %v1711_v46 }
 0x3c2   :  { %v1773_v6 = vmul.f32 %v4140_v5, %v5517_v13 }
 0x3c4   :  { %v2032_v21 = vadd.f32 %v5545_v29, %v1773_v6 }
 0x3c5   :  { %v3288_v24 = vpop.f32.mrf.mxu2  ;;  %v3448_v25 = vpop.f32.mrf.mxu3 }
 0x3c6   :  { %3687 = vst [vmem:[%s7687_s4 + $0x508] sm:$0xff] %v3288_v24  ;;  %v2971_v28 = vpop.f32.mrf.mxu0  ;;  %v3131_v30 = vpop.f32.mrf.mxu1  ;;  %v4133_v24 = vld [vmem:[%s7684_s0 + $0x5b8] sm:$0xff] }
 0x3c7   :  { %3751 = vst [vmem:[%s7687_s4 + $0x708] sm:$0xff] %v3448_v25  ;;  %v1772_v25 = vmul.f32 %v4133_v24, %v5517_v13  ;;  %v2160_v24 = vmax.f32 %v1904_v16, 0.0 }
 0x3c8   :  { %3560 = vst [vmem:[%s7687_s4 + $0x110] sm:$0xff] %v2971_v28  ;;  %v4135_v28 = vld [vmem:[%s7684_s0 + $0x7b8] sm:$0xff] }
 0x3c9   :  { %3624 = vst [vmem:[%s7687_s4 + $0x310] sm:$0xff] %v3131_v30  ;;  %3811 = vmatmul.msk.bf16.gmra.mxu0 %vm274_vm1, %v2385_v26  ;;  %3843 = vmatmul.msk.bf16.gmra.mxu1 %vm274_vm1, %v2417_v27  ;;  %v4134_v26 = vld [vmem:[%s7684_s0 + $0x7b0] sm:$0xff]  ;;  %v1836_v30 = vmul.f32 %v4135_v28, %v5517_v13  ;;  %v2031_v40 = vadd.f32 %v5545_v29, %v1772_v25  ;;  %v2161_v25 = vmax.f32 %v1905_v54, 0.0  ;;  %v2288_v28 = vmax.f32 %v2032_v21, 0.0 }
 0x3ca   :  { %3875 = vmatmul.msk.bf16.gmra.mxu2 %vm274_vm1, %v2449_v31  ;;  %3907 = vmatmul.msk.bf16.gmra.mxu3 %vm274_vm1, %v2481_v32  ;;  %v1835_v27 = vmul.f32 %v4134_v26, %v5517_v13  ;;  %v2224_v26 = vmax.f32 %v1968_v17, 0.0 }
 0x3cb   :  { %v2095_v42 = vadd.f32 %v5545_v29, %v1836_v30  ;;  %v2287_v60 = vmax.f32 %v2031_v40, 0.0  ;;  %v2388_v35 = vpack.c.bf16 %v2161_v25, %v2160_v24  ;;  %v4153_v24 = vld [vmem:[%s7684_s0 + $0x1e8] sm:$0xff] }
 0x3cc   :  { %v2094_v41 = vadd.f32 %v5545_v29, %v1835_v27  ;;  %v2225_v27 = vmax.f32 %v1969_v18, 0.0  ;;  %v1650_v25 = vmul.f32 %v4153_v24, %v5517_v13 }
 0x3cd   :  { %v3291_v49 = vpop.f32.mrf.mxu2  ;;  %v3451_v50 = vpop.f32.mrf.mxu3  ;;  %v2451_v57 = vpack.c.bf16 %v2287_v60, %v2286_v47  ;;  %v4147_v47 = vld [vmem:[%s7684_s0 + $0x3d8] sm:$0xff] }
 0x3ce   :  { %3688 = vst [vmem:[%s7687_s4 + $0x510] sm:$0xff] %v3291_v49  ;;  %v2973_v55 = vpop.f32.mrf.mxu0  ;;  %v3133_v56 = vpop.f32.mrf.mxu1  ;;  %v2350_v49 = vmax.f32 %v2094_v41, 0.0  ;;  %v2420_v37 = vpack.c.bf16 %v2225_v27, %v2224_v26  ;;  %v4144_v41 = vld [vmem:[%s7684_s0 + $0x1d0] sm:$0xff]  ;;  %v1712_v60 = vmul.f32 %v4147_v47, %v5517_v13  ;;  %v4154_v26 = vld [vmem:[%s7684_s0 + $0x3e0] sm:$0xff] }
 0x3cf   :  { %3752 = vst [vmem:[%s7687_s4 + $0x710] sm:$0xff] %v3451_v50  ;;  %v2351_v50 = vmax.f32 %v2095_v42, 0.0  ;;  %v1647_v42 = vmul.f32 %v4144_v41, %v5517_v13  ;;  %v1713_v27 = vmul.f32 %v4154_v26, %v5517_v13 }
 0x3d0   :  { %3561 = vst [vmem:[%s7687_s4 + $0x118] sm:$0xff] %v2973_v55  ;;  %v1971_v63 = vadd.f32 %v5545_v29, %v1712_v60 }
 0x3d1   :  { %3625 = vst [vmem:[%s7687_s4 + $0x318] sm:$0xff] %v3133_v56  ;;  %v2483_v58 = vpack.c.bf16 %v2351_v50, %v2350_v49  ;;  %v4148_v49 = vld [vmem:[%s7684_s0 + $0x5d0] sm:$0xff]  ;;  %v1906_v59 = vadd.f32 %v5545_v29, %v1647_v42  ;;  %v1909_v42 = vadd.f32 %v5545_v29, %v1650_v25  ;;  %v1972_v43 = vadd.f32 %v5545_v29, %v1713_v27 }
 0x3d2   :  { %v1775_v50 = vmul.f32 %v4148_v49, %v5517_v13 }
 0x3d4   :  { %v2034_v3 = vadd.f32 %v5545_v29, %v1775_v50 }
 0x3d5   :  { %v3293_v7 = vpop.f32.mrf.mxu2  ;;  %v3453_v8 = vpop.f32.mrf.mxu3 }
 0x3d6   :  { %3689 = vst [vmem:[%s7687_s4 + $0x518] sm:$0xff] %v3293_v7  ;;  %v2976_v11 = vpop.f32.mrf.mxu0  ;;  %v3136_v12 = vpop.f32.mrf.mxu1  ;;  %v4141_v7 = vld [vmem:[%s7684_s0 + $0x5c8] sm:$0xff] }
 0x3d7   :  { %3753 = vst [vmem:[%s7687_s4 + $0x718] sm:$0xff] %v3453_v8  ;;  %v1774_v8 = vmul.f32 %v4141_v7, %v5517_v13  ;;  %v2162_v7 = vmax.f32 %v1906_v59, 0.0 }
 0x3d8   :  { %3562 = vst [vmem:[%s7687_s4 + $0x120] sm:$0xff] %v2976_v11  ;;  %v4143_v11 = vld [vmem:[%s7684_s0 + $0x7c8] sm:$0xff] }
 0x3d9   :  { %3626 = vst [vmem:[%s7687_s4 + $0x320] sm:$0xff] %v3136_v12  ;;  %3812 = vmatmul.msk.bf16.gmra.mxu0 %vm274_vm1, %v2386_v9  ;;  %3844 = vmatmul.msk.bf16.gmra.mxu1 %vm274_vm1, %v2418_v10  ;;  %v4142_v9 = vld [vmem:[%s7684_s0 + $0x7c0] sm:$0xff]  ;;  %v1838_v12 = vmul.f32 %v4143_v11, %v5517_v13  ;;  %v2033_v22 = vadd.f32 %v5545_v29, %v1774_v8  ;;  %v2163_v8 = vmax.f32 %v1907_v61, 0.0  ;;  %v2290_v11 = vmax.f32 %v2034_v3, 0.0 }
 0x3da   :  { %3876 = vmatmul.msk.bf16.gmra.mxu2 %vm274_vm1, %v2450_v48  ;;  %3908 = vmatmul.msk.bf16.gmra.mxu3 %vm274_vm1, %v2482_v15  ;;  %v1837_v10 = vmul.f32 %v4142_v9, %v5517_v13  ;;  %v2226_v9 = vmax.f32 %v1970_v62, 0.0 }
 0x3db   :  { %v2097_v14 = vadd.f32 %v5545_v29, %v1838_v12  ;;  %v2289_v30 = vmax.f32 %v2033_v22, 0.0  ;;  %v2389_v17 = vpack.c.bf16 %v2163_v8, %v2162_v7  ;;  %v4161_v7 = vld [vmem:[%s7684_s0 + $0x1f8] sm:$0xff] }
 0x3dc   :  { %v2096_v23 = vadd.f32 %v5545_v29, %v1837_v10  ;;  %v2227_v10 = vmax.f32 %v1971_v63, 0.0  ;;  %v1652_v8 = vmul.f32 %v4161_v7, %v5517_v13 }
 0x3dd   :  { %v3296_v31 = vpop.f32.mrf.mxu2  ;;  %v3456_v32 = vpop.f32.mrf.mxu3  ;;  %v2452_v39 = vpack.c.bf16 %v2289_v30, %v2288_v28  ;;  %v4155_v28 = vld [vmem:[%s7684_s0 + $0x3e8] sm:$0xff] }
 0x3de   :  { %3690 = vst [vmem:[%s7687_s4 + $0x520] sm:$0xff] %v3296_v31  ;;  %v2978_v38 = vpop.f32.mrf.mxu0  ;;  %v3138_v36 = vpop.f32.mrf.mxu1  ;;  %v2352_v31 = vmax.f32 %v2096_v23, 0.0  ;;  %v2421_v18 = vpack.c.bf16 %v2227_v10, %v2226_v9  ;;  %v4152_v23 = vld [vmem:[%s7684_s0 + $0x1e0] sm:$0xff]  ;;  %v1714_v30 = vmul.f32 %v4155_v28, %v5517_v13  ;;  %v4162_v9 = vld [vmem:[%s7684_s0 + $0x3f0] sm:$0xff] }
 0x3df   :  { %3754 = vst [vmem:[%s7687_s4 + $0x720] sm:$0xff] %v3456_v32  ;;  %v2353_v32 = vmax.f32 %v2097_v14, 0.0  ;;  %v1649_v14 = vmul.f32 %v4152_v23, %v5517_v13  ;;  %v1715_v10 = vmul.f32 %v4162_v9, %v5517_v13 }
 0x3e0   :  { %3563 = vst [vmem:[%s7687_s4 + $0x128] sm:$0xff] %v2978_v38  ;;  %v1973_v44 = vadd.f32 %v5545_v29, %v1714_v30 }
 0x3e1   :  { %3627 = vst [vmem:[%s7687_s4 + $0x328] sm:$0xff] %v3138_v36  ;;  %v2484_v40 = vpack.c.bf16 %v2353_v32, %v2352_v31  ;;  %v4156_v31 = vld [vmem:[%s7684_s0 + $0x5e0] sm:$0xff]  ;;  %v1908_v41 = vadd.f32 %v5545_v29, %v1649_v14  ;;  %v1911_v14 = vadd.f32 %v5545_v29, %v1652_v8  ;;  %v1974_v24 = vadd.f32 %v5545_v29, %v1715_v10 }
 0x3e2   :  { %v1777_v32 = vmul.f32 %v4156_v31, %v5517_v13 }
 0x3e4   :  { %v2036_v47 = vadd.f32 %v5545_v29, %v1777_v32 }
 0x3e5   :  { %v3298_v2 = vpop.f32.mrf.mxu2  ;;  %v3458_v51 = vpop.f32.mrf.mxu3 }
 0x3e6   :  { %3691 = vst [vmem:[%s7687_s4 + $0x528] sm:$0xff] %v3298_v2  ;;  %v2981_v55 = vpop.f32.mrf.mxu0  ;;  %v3141_v56 = vpop.f32.mrf.mxu1  ;;  %v4149_v2 = vld [vmem:[%s7684_s0 + $0x5d8] sm:$0xff] }
 0x3e7   :  { %3755 = vst [vmem:[%s7687_s4 + $0x728] sm:$0xff] %v3458_v51  ;;  %v1776_v51 = vmul.f32 %v4149_v2, %v5517_v13  ;;  %v2164_v2 = vmax.f32 %v1908_v41, 0.0 }
 0x3e8   :  { %3564 = vst [vmem:[%s7687_s4 + $0x130] sm:$0xff] %v2981_v55  ;;  %v4151_v55 = vld [vmem:[%s7684_s0 + $0x7d8] sm:$0xff] }
 0x3e9   :  { %3628 = vst [vmem:[%s7687_s4 + $0x330] sm:$0xff] %v3141_v56  ;;  %3813 = vmatmul.msk.bf16.gmra.mxu0 %vm274_vm1, %v2387_v52  ;;  %3845 = vmatmul.msk.bf16.gmra.mxu1 %vm274_vm1, %v2419_v53  ;;  %v4150_v52 = vld [vmem:[%s7684_s0 + $0x7d0] sm:$0xff]  ;;  %v1840_v56 = vmul.f32 %v4151_v55, %v5517_v13  ;;  %v2035_v4 = vadd.f32 %v5545_v29, %v1776_v51  ;;  %v2165_v51 = vmax.f32 %v1909_v42, 0.0  ;;  %v2292_v55 = vmax.f32 %v2036_v47, 0.0 }
 0x3ea   :  { %3877 = vmatmul.msk.bf16.gmra.mxu2 %vm274_vm1, %v2451_v57  ;;  %3909 = vmatmul.msk.bf16.gmra.mxu3 %vm274_vm1, %v2483_v58  ;;  %v1839_v53 = vmul.f32 %v4150_v52, %v5517_v13  ;;  %v2228_v52 = vmax.f32 %v1972_v43, 0.0 }
 0x3eb   :  { %v2099_v6 = vadd.f32 %v5545_v29, %v1840_v56  ;;  %v2291_v12 = vmax.f32 %v2035_v4, 0.0  ;;  %v2390_v62 = vpack.c.bf16 %v2165_v51, %v2164_v2 }
 0x3ec   :  { %v2098_v5 = vadd.f32 %v5545_v29, %v1839_v53  ;;  %v2229_v53 = vmax.f32 %v1973_v44, 0.0 }
 0x3ed   :  { %v3301_v48 = vpop.f32.mrf.mxu2  ;;  %v3461_v15 = vpop.f32.mrf.mxu3  ;;  %v2453_v21 = vpack.c.bf16 %v2291_v12, %v2290_v11  ;;  %v4163_v11 = vld [vmem:[%s7684_s0 + $0x3f8] sm:$0xff] }
 0x3ee   :  { %3692 = vst [vmem:[%s7687_s4 + $0x530] sm:$0xff] %v3301_v48  ;;  %v2983_v19 = vpop.f32.mrf.mxu0  ;;  %v3143_v20 = vpop.f32.mrf.mxu1  ;;  %v2354_v48 = vmax.f32 %v2098_v5, 0.0  ;;  %v2422_v63 = vpack.c.bf16 %v2229_v53, %v2228_v52  ;;  %v4160_v5 = vld [vmem:[%s7684_s0 + $0x1f0] sm:$0xff]  ;;  %v1716_v12 = vmul.f32 %v4163_v11, %v5517_v13 }
 0x3ef   :  { %3756 = vst [vmem:[%s7687_s4 + $0x730] sm:$0xff] %v3461_v15  ;;  %v2355_v15 = vmax.f32 %v2099_v6, 0.0  ;;  %v1651_v6 = vmul.f32 %v4160_v5, %v5517_v13 }
 0x3f0   :  { %3565 = vst [vmem:[%s7687_s4 + $0x138] sm:$0xff] %v2983_v19  ;;  %v1975_v25 = vadd.f32 %v5545_v29, %v1716_v12 }
 0x3f1   :  { %3629 = vst [vmem:[%s7687_s4 + $0x338] sm:$0xff] %v3143_v20  ;;  %v2485_v22 = vpack.c.bf16 %v2355_v15, %v2354_v48  ;;  %v4164_v48 = vld [vmem:[%s7684_s0 + $0x5f0] sm:$0xff]  ;;  %v1910_v23 = vadd.f32 %v5545_v29, %v1651_v6 }
 0x3f2   :  { %v1779_v15 = vmul.f32 %v4164_v48, %v5517_v13 }
 0x3f3   :  { %v2166_v32 = vmax.f32 %v1910_v23, 0.0 }
 0x3f4   :  { %v2038_v28 = vadd.f32 %v5545_v29, %v1779_v15 }
 0x3f5   :  { %v3303_v33 = vpop.f32.mrf.mxu2  ;;  %v3463_v34 = vpop.f32.mrf.mxu3 }
 0x3f6   :  { %3693 = vst [vmem:[%s7687_s4 + $0x538] sm:$0xff] %v3303_v33  ;;  %v2986_v38 = vpop.f32.mrf.mxu0  ;;  %v3146_v36 = vpop.f32.mrf.mxu1  ;;  %v4157_v33 = vld [vmem:[%s7684_s0 + $0x5e8] sm:$0xff] }
 0x3f7   :  { %3757 = vst [vmem:[%s7687_s4 + $0x738] sm:$0xff] %v3463_v34  ;;  %v1778_v34 = vmul.f32 %v4157_v33, %v5517_v13  ;;  %v2167_v33 = vmax.f32 %v1911_v14, 0.0 }
 0x3f8   :  { %3566 = vst [vmem:[%s7687_s4 + $0x140] sm:$0xff] %v2986_v38  ;;  %v4159_v38 = vld [vmem:[%s7684_s0 + $0x7e8] sm:$0xff] }
 0x3f9   :  { %3630 = vst [vmem:[%s7687_s4 + $0x340] sm:$0xff] %v3146_v36  ;;  %3814 = vmatmul.msk.bf16.gmra.mxu0 %vm274_vm1, %v2388_v35  ;;  %3846 = vmatmul.msk.bf16.gmra.mxu1 %vm274_vm1, %v2420_v37  ;;  %v4158_v35 = vld [vmem:[%s7684_s0 + $0x7e0] sm:$0xff]  ;;  %v1842_v36 = vmul.f32 %v4159_v38, %v5517_v13  ;;  %v2037_v60 = vadd.f32 %v5545_v29, %v1778_v34  ;;  %v2230_v34 = vmax.f32 %v1974_v24, 0.0 }
 0x3fa   :  { %3878 = vmatmul.msk.bf16.gmra.mxu2 %vm274_vm1, %v2452_v39  ;;  %3910 = vmatmul.msk.bf16.gmra.mxu3 %vm274_vm1, %v2484_v40  ;;  %v1841_v37 = vmul.f32 %v4158_v35, %v5517_v13  ;;  %v2231_v35 = vmax.f32 %v1975_v25, 0.0  ;;  %v2391_v41 = vpack.c.bf16 %v2167_v33, %v2166_v32 }
 0x3fb   :  { %v2101_v50 = vadd.f32 %v5545_v29, %v1842_v36  ;;  %v2293_v56 = vmax.f32 %v2037_v60, 0.0 }
 0x3fc   :  { %v2100_v49 = vadd.f32 %v5545_v29, %v1841_v37  ;;  %v2294_v37 = vmax.f32 %v2038_v28, 0.0  ;;  %v2423_v42 = vpack.c.bf16 %v2231_v35, %v2230_v34 }
 0x3fd   :  { %v3306_v57 = vpop.f32.mrf.mxu2  ;;  %v3466_v58 = vpop.f32.mrf.mxu3  ;;  %v2454_v3 = vpack.c.bf16 %v2293_v56, %v2292_v55 }
 0x3fe   :  { %3694 = vst [vmem:[%s7687_s4 + $0x540] sm:$0xff] %v3306_v57  ;;  %v2988_v0 = vpop.f32.mrf.mxu0  ;;  %v3148_v1 = vpop.f32.mrf.mxu1  ;;  %v2356_v57 = vmax.f32 %v2100_v49, 0.0 }
 0x3ff   :  { %3758 = vst [vmem:[%s7687_s4 + $0x740] sm:$0xff] %v3466_v58  ;;  %v2357_v58 = vmax.f32 %v2101_v50, 0.0 }
 0x400   :  { %3567 = vst [vmem:[%s7687_s4 + $0x148] sm:$0xff] %v2988_v0 }
 0x401   :  { %3631 = vst [vmem:[%s7687_s4 + $0x348] sm:$0xff] %v3148_v1  ;;  %v2486_v4 = vpack.c.bf16 %v2357_v58, %v2356_v57 }
 0x405   :  { %v3308_v16 = vpop.f32.mrf.mxu2  ;;  %v3468_v54 = vpop.f32.mrf.mxu3 }
 0x406   :  { %3695 = vst [vmem:[%s7687_s4 + $0x548] sm:$0xff] %v3308_v16  ;;  %v2991_v19 = vpop.f32.mrf.mxu0  ;;  %v3151_v20 = vpop.f32.mrf.mxu1  ;;  %v4165_v16 = vld [vmem:[%s7684_s0 + $0x5f8] sm:$0xff] }
 0x407   :  { %3759 = vst [vmem:[%s7687_s4 + $0x748] sm:$0xff] %v3468_v54  ;;  %v1780_v54 = vmul.f32 %v4165_v16, %v5517_v13 }
 0x408   :  { %3568 = vst [vmem:[%s7687_s4 + $0x150] sm:$0xff] %v2991_v19  ;;  %v4167_v19 = vld [vmem:[%s7684_s0 + $0x7f8] sm:$0xff] }
 0x409   :  { %3632 = vst [vmem:[%s7687_s4 + $0x350] sm:$0xff] %v3151_v20  ;;  %3815 = vmatmul.msk.bf16.gmra.mxu0 %vm274_vm1, %v2389_v17  ;;  %3847 = vmatmul.msk.bf16.gmra.mxu1 %vm274_vm1, %v2421_v18  ;;  %v4166_v17 = vld [vmem:[%s7684_s0 + $0x7f0] sm:$0xff]  ;;  %v1844_v20 = vmul.f32 %v4167_v19, %v5517_v13 }
 0x40a   :  { %3879 = vmatmul.msk.bf16.gmra.mxu2 %vm274_vm1, %v2453_v21  ;;  %3911 = vmatmul.msk.bf16.gmra.mxu3 %vm274_vm1, %v2485_v22  ;;  %v1843_v18 = vmul.f32 %v4166_v17, %v5517_v13  ;;  %v2039_v13 = vadd.f32 %v5545_v29, %v1780_v54 }
 0x40b   :  { %v2103_v31 = vadd.f32 %v5545_v29, %v1844_v20 }
 0x40c   :  { %v2102_v30 = vadd.f32 %v5545_v29, %v1843_v18  ;;  %v2295_v38 = vmax.f32 %v2039_v13, 0.0 }
 0x40d   :  { %v3311_v39 = vpop.f32.mrf.mxu2  ;;  %v3471_v40 = vpop.f32.mrf.mxu3  ;;  %v2359_v29 = vmax.f32 %v2103_v31, 0.0 }
 0x40e   :  { %3696 = vst [vmem:[%s7687_s4 + $0x550] sm:$0xff] %v3311_v39  ;;  %v2993_v45 = vpop.f32.mrf.mxu0  ;;  %v3153_v46 = vpop.f32.mrf.mxu1  ;;  %v2358_v36 = vmax.f32 %v2102_v30, 0.0 }
 0x40f   :  { %3760 = vst [vmem:[%s7687_s4 + $0x750] sm:$0xff] %v3471_v40 }
 0x410   :  { %3569 = vst [vmem:[%s7687_s4 + $0x158] sm:$0xff] %v2993_v45  ;;  %v2455_v45 = vpack.c.bf16 %v2295_v38, %v2294_v37 }
 0x411   :  { %3633 = vst [vmem:[%s7687_s4 + $0x358] sm:$0xff] %v3153_v46  ;;  %v2487_v46 = vpack.c.bf16 %v2359_v29, %v2358_v36 }
 0x415   :  { %v3313_v59 = vpop.f32.mrf.mxu2  ;;  %v3473_v61 = vpop.f32.mrf.mxu3 }
 0x416   :  { %3697 = vst [vmem:[%s7687_s4 + $0x558] sm:$0xff] %v3313_v59  ;;  %v2996_v0 = vpop.f32.mrf.mxu0  ;;  %v3156_v1 = vpop.f32.mrf.mxu1 }
 0x417   :  { %3761 = vst [vmem:[%s7687_s4 + $0x758] sm:$0xff] %v3473_v61 }
 0x418   :  { %3570 = vst [vmem:[%s7687_s4 + $0x160] sm:$0xff] %v2996_v0 }
 0x419   :  { %3634 = vst [vmem:[%s7687_s4 + $0x360] sm:$0xff] %v3156_v1  ;;  %3816 = vmatmul.msk.bf16.gmra.mxu0 %vm274_vm1, %v2390_v62  ;;  %3848 = vmatmul.msk.bf16.gmra.mxu1 %vm274_vm1, %v2422_v63 }
 0x41a   :  { %3880 = vmatmul.msk.bf16.gmra.mxu2 %vm274_vm1, %v2454_v3  ;;  %3912 = vmatmul.msk.bf16.gmra.mxu3 %vm274_vm1, %v2486_v4 }
 0x41d   :  { %v3316_v21 = vpop.f32.mrf.mxu2  ;;  %v3476_v22 = vpop.f32.mrf.mxu3 }
 0x41e   :  { %3698 = vst [vmem:[%s7687_s4 + $0x560] sm:$0xff] %v3316_v21  ;;  %v2998_v26 = vpop.f32.mrf.mxu0  ;;  %v3158_v27 = vpop.f32.mrf.mxu1 }
 0x41f   :  { %3762 = vst [vmem:[%s7687_s4 + $0x760] sm:$0xff] %v3476_v22 }
 0x420   :  { %3571 = vst [vmem:[%s7687_s4 + $0x168] sm:$0xff] %v2998_v26 }
 0x421   :  { %3635 = vst [vmem:[%s7687_s4 + $0x368] sm:$0xff] %v3158_v27 }
 0x425   :  { %v3318_v39 = vpop.f32.mrf.mxu2  ;;  %v3478_v40 = vpop.f32.mrf.mxu3 }
 0x426   :  { %3699 = vst [vmem:[%s7687_s4 + $0x568] sm:$0xff] %v3318_v39  ;;  %v3001_v43 = vpop.f32.mrf.mxu0  ;;  %v3161_v44 = vpop.f32.mrf.mxu1 }
 0x427   :  { %3763 = vst [vmem:[%s7687_s4 + $0x768] sm:$0xff] %v3478_v40 }
 0x428   :  { %3572 = vst [vmem:[%s7687_s4 + $0x170] sm:$0xff] %v3001_v43 }
 0x429   :  { %3636 = vst [vmem:[%s7687_s4 + $0x370] sm:$0xff] %v3161_v44  ;;  %3817 = vmatmul.msk.bf16.gmra.mxu0 %vm274_vm1, %v2391_v41  ;;  %3849 = vmatmul.msk.bf16.gmra.mxu1 %vm274_vm1, %v2423_v42 }
 0x42a   :  { %3881 = vmatmul.msk.bf16.gmra.mxu2 %vm274_vm1, %v2455_v45  ;;  %3913 = vmatmul.msk.bf16.gmra.mxu3 %vm274_vm1, %v2487_v46 }
 0x42d   :  { %v3321_v47 = vpop.f32.mrf.mxu2  ;;  %v3481_v60 = vpop.f32.mrf.mxu3 }
 0x42e   :  { %3700 = vst [vmem:[%s7687_s4 + $0x570] sm:$0xff] %v3321_v47  ;;  %v3003_v49 = vpop.f32.mrf.mxu0  ;;  %v3163_v50 = vpop.f32.mrf.mxu1 }
 0x42f   :  { %3764 = vst [vmem:[%s7687_s4 + $0x770] sm:$0xff] %v3481_v60 }
 0x430   :  { %3573 = vst [vmem:[%s7687_s4 + $0x178] sm:$0xff] %v3003_v49 }
 0x431   :  { %3637 = vst [vmem:[%s7687_s4 + $0x378] sm:$0xff] %v3163_v50 }
 0x435   :  { %v3323_v2 = vpop.f32.mrf.mxu2  ;;  %v3483_v51 = vpop.f32.mrf.mxu3 }
 0x436   :  { %3701 = vst [vmem:[%s7687_s4 + $0x578] sm:$0xff] %v3323_v2  ;;  %v3006_v52 = vpop.f32.mrf.mxu0  ;;  %v3166_v53 = vpop.f32.mrf.mxu1 }
 0x437   :  { %3765 = vst [vmem:[%s7687_s4 + $0x778] sm:$0xff] %v3483_v51 }
 0x438   :  { %3574 = vst [vmem:[%s7687_s4 + $0x180] sm:$0xff] %v3006_v52 }
 0x439   :  { %3638 = vst [vmem:[%s7687_s4 + $0x380] sm:$0xff] %v3166_v53 }
 0x43d   :  { %v3326_v55 = vpop.f32.mrf.mxu2  ;;  %v3486_v56 = vpop.f32.mrf.mxu3 }
 0x43e   :  { %3702 = vst [vmem:[%s7687_s4 + $0x580] sm:$0xff] %v3326_v55  ;;  %v3008_v57 = vpop.f32.mrf.mxu0  ;;  %v3168_v58 = vpop.f32.mrf.mxu1 }
 0x43f   :  { %3766 = vst [vmem:[%s7687_s4 + $0x780] sm:$0xff] %v3486_v56 }
 0x440   :  { %3575 = vst [vmem:[%s7687_s4 + $0x188] sm:$0xff] %v3008_v57 }
 0x441   :  { %3639 = vst [vmem:[%s7687_s4 + $0x388] sm:$0xff] %v3168_v58 }
 0x445   :  { %v3328_v59 = vpop.f32.mrf.mxu2  ;;  %v3488_v61 = vpop.f32.mrf.mxu3 }
 0x446   :  { %3703 = vst [vmem:[%s7687_s4 + $0x588] sm:$0xff] %v3328_v59  ;;  %v3011_v62 = vpop.f32.mrf.mxu0  ;;  %v3171_v63 = vpop.f32.mrf.mxu1 }
 0x447   :  { %3767 = vst [vmem:[%s7687_s4 + $0x788] sm:$0xff] %v3488_v61 }
 0x448   :  { %3576 = vst [vmem:[%s7687_s4 + $0x190] sm:$0xff] %v3011_v62 }
 0x449   :  { %3640 = vst [vmem:[%s7687_s4 + $0x390] sm:$0xff] %v3171_v63 }
 0x44d   :  { %v3331_v0 = vpop.f32.mrf.mxu2  ;;  %v3491_v1 = vpop.f32.mrf.mxu3 }
 0x44e   :  { %3704 = vst [vmem:[%s7687_s4 + $0x590] sm:$0xff] %v3331_v0  ;;  %v3013_v3 = vpop.f32.mrf.mxu0  ;;  %v3173_v4 = vpop.f32.mrf.mxu1 }
 0x44f   :  { %3768 = vst [vmem:[%s7687_s4 + $0x790] sm:$0xff] %v3491_v1 }
 0x450   :  { %3577 = vst [vmem:[%s7687_s4 + $0x198] sm:$0xff] %v3013_v3 }
 0x451   :  { %3641 = vst [vmem:[%s7687_s4 + $0x398] sm:$0xff] %v3173_v4 }
 0x455   :  { %v3333_v5 = vpop.f32.mrf.mxu2  ;;  %v3493_v6 = vpop.f32.mrf.mxu3 }
 0x456   :  { %3705 = vst [vmem:[%s7687_s4 + $0x598] sm:$0xff] %v3333_v5  ;;  %v3016_v7 = vpop.f32.mrf.mxu0  ;;  %v3176_v8 = vpop.f32.mrf.mxu1 }
 0x457   :  { %3769 = vst [vmem:[%s7687_s4 + $0x798] sm:$0xff] %v3493_v6 }
 0x458   :  { %3578 = vst [vmem:[%s7687_s4 + $0x1a0] sm:$0xff] %v3016_v7 }
 0x459   :  { %3642 = vst [vmem:[%s7687_s4 + $0x3a0] sm:$0xff] %v3176_v8 }
 0x45d   :  { %v3336_v9 = vpop.f32.mrf.mxu2  ;;  %v3496_v10 = vpop.f32.mrf.mxu3 }
 0x45e   :  { %3706 = vst [vmem:[%s7687_s4 + $0x5a0] sm:$0xff] %v3336_v9  ;;  %v3018_v11 = vpop.f32.mrf.mxu0  ;;  %v3178_v12 = vpop.f32.mrf.mxu1 }
 0x45f   :  { %3770 = vst [vmem:[%s7687_s4 + $0x7a0] sm:$0xff] %v3496_v10 }
 0x460   :  { %3579 = vst [vmem:[%s7687_s4 + $0x1a8] sm:$0xff] %v3018_v11 }
 0x461   :  { %3643 = vst [vmem:[%s7687_s4 + $0x3a8] sm:$0xff] %v3178_v12 }
 0x465   :  { %v3338_v48 = vpop.f32.mrf.mxu2  ;;  %v3498_v15 = vpop.f32.mrf.mxu3 }
 0x466   :  { %3707 = vst [vmem:[%s7687_s4 + $0x5a8] sm:$0xff] %v3338_v48  ;;  %v3021_v16 = vpop.f32.mrf.mxu0  ;;  %v3181_v54 = vpop.f32.mrf.mxu1 }
 0x467   :  { %3771 = vst [vmem:[%s7687_s4 + $0x7a8] sm:$0xff] %v3498_v15 }
 0x468   :  { %3580 = vst [vmem:[%s7687_s4 + $0x1b0] sm:$0xff] %v3021_v16 }
 0x469   :  { %3644 = vst [vmem:[%s7687_s4 + $0x3b0] sm:$0xff] %v3181_v54 }
 0x46d   :  { %v3341_v17 = vpop.f32.mrf.mxu2  ;;  %v3501_v18 = vpop.f32.mrf.mxu3 }
 0x46e   :  { %3708 = vst [vmem:[%s7687_s4 + $0x5b0] sm:$0xff] %v3341_v17  ;;  %v3023_v19 = vpop.f32.mrf.mxu0  ;;  %v3183_v20 = vpop.f32.mrf.mxu1 }
 0x46f   :  { %3772 = vst [vmem:[%s7687_s4 + $0x7b0] sm:$0xff] %v3501_v18 }
 0x470   :  { %3581 = vst [vmem:[%s7687_s4 + $0x1b8] sm:$0xff] %v3023_v19 }
 0x471   :  { %3645 = vst [vmem:[%s7687_s4 + $0x3b8] sm:$0xff] %v3183_v20 }
 0x475   :  { %v3343_v21 = vpop.f32.mrf.mxu2  ;;  %v3503_v22 = vpop.f32.mrf.mxu3 }
 0x476   :  { %3709 = vst [vmem:[%s7687_s4 + $0x5b8] sm:$0xff] %v3343_v21  ;;  %v3026_v23 = vpop.f32.mrf.mxu0  ;;  %v3186_v14 = vpop.f32.mrf.mxu1 }
 0x477   :  { %3773 = vst [vmem:[%s7687_s4 + $0x7b8] sm:$0xff] %v3503_v22 }
 0x478   :  { %3582 = vst [vmem:[%s7687_s4 + $0x1c0] sm:$0xff] %v3026_v23 }
 0x479   :  { %3646 = vst [vmem:[%s7687_s4 + $0x3c0] sm:$0xff] %v3186_v14 }
 0x47d   :  { %v3346_v24 = vpop.f32.mrf.mxu2  ;;  %v3506_v25 = vpop.f32.mrf.mxu3 }
 0x47e   :  { %3710 = vst [vmem:[%s7687_s4 + $0x5c0] sm:$0xff] %v3346_v24  ;;  %v3028_v26 = vpop.f32.mrf.mxu0  ;;  %v3188_v27 = vpop.f32.mrf.mxu1 }
 0x47f   :  { %3774 = vst [vmem:[%s7687_s4 + $0x7c0] sm:$0xff] %v3506_v25 }
 0x480   :  { %3583 = vst [vmem:[%s7687_s4 + $0x1c8] sm:$0xff] %v3028_v26 }
 0x481   :  { %3647 = vst [vmem:[%s7687_s4 + $0x3c8] sm:$0xff] %v3188_v27 }
 0x485   :  { %v3348_v28 = vpop.f32.mrf.mxu2  ;;  %v3508_v13 = vpop.f32.mrf.mxu3 }
 0x486   :  { %3711 = vst [vmem:[%s7687_s4 + $0x5c8] sm:$0xff] %v3348_v28  ;;  %v3031_v30 = vpop.f32.mrf.mxu0  ;;  %v3191_v31 = vpop.f32.mrf.mxu1 }
 0x487   :  { %3775 = vst [vmem:[%s7687_s4 + $0x7c8] sm:$0xff] %v3508_v13 }
 0x488   :  { %3584 = vst [vmem:[%s7687_s4 + $0x1d0] sm:$0xff] %v3031_v30 }
 0x489   :  { %3648 = vst [vmem:[%s7687_s4 + $0x3d0] sm:$0xff] %v3191_v31 }
 0x48d   :  { %v3351_v32 = vpop.f32.mrf.mxu2  ;;  %v3511_v33 = vpop.f32.mrf.mxu3 }
 0x48e   :  { %3712 = vst [vmem:[%s7687_s4 + $0x5d0] sm:$0xff] %v3351_v32  ;;  %v3033_v34 = vpop.f32.mrf.mxu0  ;;  %v3193_v35 = vpop.f32.mrf.mxu1 }
 0x48f   :  { %3776 = vst [vmem:[%s7687_s4 + $0x7d0] sm:$0xff] %v3511_v33 }
 0x490   :  { %3585 = vst [vmem:[%s7687_s4 + $0x1d8] sm:$0xff] %v3033_v34 }
 0x491   :  { %3649 = vst [vmem:[%s7687_s4 + $0x3d8] sm:$0xff] %v3193_v35 }
 0x495   :  { %v3353_v37 = vpop.f32.mrf.mxu2  ;;  %v3513_v38 = vpop.f32.mrf.mxu3 }
 0x496   :  { %3713 = vst [vmem:[%s7687_s4 + $0x5d8] sm:$0xff] %v3353_v37  ;;  %v3036_v36 = vpop.f32.mrf.mxu0  ;;  %v3196_v29 = vpop.f32.mrf.mxu1 }
 0x497   :  { %3777 = vst [vmem:[%s7687_s4 + $0x7d8] sm:$0xff] %v3513_v38 }
 0x498   :  { %3586 = vst [vmem:[%s7687_s4 + $0x1e0] sm:$0xff] %v3036_v36 }
 0x499   :  { %3650 = vst [vmem:[%s7687_s4 + $0x3e0] sm:$0xff] %v3196_v29 }
 0x49d   :  { %v3356_v39 = vpop.f32.mrf.mxu2  ;;  %v3516_v40 = vpop.f32.mrf.mxu3 }
 0x49e   :  { %3714 = vst [vmem:[%s7687_s4 + $0x5e0] sm:$0xff] %v3356_v39  ;;  %v3038_v41 = vpop.f32.mrf.mxu0  ;;  %v3198_v42 = vpop.f32.mrf.mxu1 }
 0x49f   :  { %3778 = vst [vmem:[%s7687_s4 + $0x7e0] sm:$0xff] %v3516_v40 }
 0x4a0   :  { %3587 = vst [vmem:[%s7687_s4 + $0x1e8] sm:$0xff] %v3038_v41 }
 0x4a1   :  { %3651 = vst [vmem:[%s7687_s4 + $0x3e8] sm:$0xff] %v3198_v42 }
 0x4a5   :  { %v3358_v43 = vpop.f32.mrf.mxu2  ;;  %v3518_v44 = vpop.f32.mrf.mxu3 }
 0x4a6   :  { %3715 = vst [vmem:[%s7687_s4 + $0x5e8] sm:$0xff] %v3358_v43  ;;  %v3041_v45 = vpop.f32.mrf.mxu0  ;;  %v3201_v46 = vpop.f32.mrf.mxu1 }
 0x4a7   :  { %3779 = vst [vmem:[%s7687_s4 + $0x7e8] sm:$0xff] %v3518_v44 }
 0x4a8   :  { %3588 = vst [vmem:[%s7687_s4 + $0x1f0] sm:$0xff] %v3041_v45 }
 0x4a9   :  { %3652 = vst [vmem:[%s7687_s4 + $0x3f0] sm:$0xff] %v3201_v46 }
 0x4ad   :  { %v3361_v47 = vpop.f32.mrf.mxu2  ;;  %v3521_v60 = vpop.f32.mrf.mxu3 }
 0x4ae   :  { %3716 = vst [vmem:[%s7687_s4 + $0x5f0] sm:$0xff] %v3361_v47  ;;  %v3043_v49 = vpop.f32.mrf.mxu0  ;;  %v3203_v50 = vpop.f32.mrf.mxu1 }
 0x4af   :  { %3780 = vst [vmem:[%s7687_s4 + $0x7f0] sm:$0xff] %v3521_v60 }
 0x4b0   :  { %3589 = vst [vmem:[%s7687_s4 + $0x1f8] sm:$0xff] %v3043_v49 }
 0x4b1   :  { %3653 = vst [vmem:[%s7687_s4 + $0x3f8] sm:$0xff] %v3203_v50 }
 0x4b5   :  { %v3363_v2 = vpop.f32.mrf.mxu2  ;;  %v3523_v51 = vpop.f32.mrf.mxu3 }
 0x4b6   :  { %3717 = vst [vmem:[%s7687_s4 + $0x5f8] sm:$0xff] %v3363_v2 }
 0x4b7   :  { %3781 = vst [vmem:[%s7687_s4 + $0x7f8] sm:$0xff] %v3523_v51 }

// kernel: gnet_forward.11
= control target key start
LH: loop header
LB: loop body
LE: loop exit
PB: predicated region body
PF: predicated region fallthrough
CT: control target
= control target key end

     0   :  { %s346_s6 = smov 0   ;;  %s421_s0 = inlined_call_operand.vmem [shape: f32[432,128], index: 0, kind: input, shape index: {}]   ;;  %s422_s1 = inlined_call_operand.vmem [shape: f32[432,128], index: 1, kind: output, shape index: {}]  }
   0x1 LB: > { %s257_s7 = sadd.s32 4294967295, %s334_s6   ;;  %p261_p0 = scmp.ge.s32.totalorder %s334_s6, 1  ;;  %s334_s6 = sphi %s346_s6, %s11_s6  }
   0x2   : > { %p88_p1 = scmp.lt.s32.totalorder %s334_s6, 3 }
   0x4   : > { %p89_p2 = pnand %p261_p0, %p88_p1 }
   0x5   : > { %s108_s8 = smul.u32 (!%p89_p2), 27, %s257_s7 }
   0x6   : > { %92 = sbr.rel (%p89_p2) target bundleno = 49 (0x31), region = 24 }
   0x7   : > { %p109_p3 = scmp.lt.s32.totalorder (!%p89_p2), %s108_s8, 53 }
   0xb   : > { %s424_s8 = smov (!%p109_p3, %s108_s8), 53 }
   0xc   : > { %s262_s9 = sshll.u32 %s424_s8, 3 }
   0xd   : > { %s357_s12 = scalar_lea.vmem %s421_s0, %s262_s9  ;;  %s369_s15 = scalar_lea.vmem %s422_s1, %s262_s9 }
   0xe   : > { %v120_v0 = vld [vmem:[%s357_s12] sm:$0xff]  ;;  %v121_v1 = vld [vmem:[%s357_s12 + $0x8] sm:$0xff]  ;;  %v122_v2 = vld [vmem:[%s357_s12 + $0x10] sm:$0xff] }
   0xf   : > { %274 = vtanh.f32 %v120_v0  ;;  %v123_v3 = vld [vmem:[%s357_s12 + $0x18] sm:$0xff]  ;;  %v124_v4 = vld [vmem:[%s357_s12 + $0x20] sm:$0xff]  ;;  %v125_v5 = vld [vmem:[%s357_s12 + $0x28] sm:$0xff] }
  0x10   : > { %276 = vtanh.f32 %v121_v1  ;;  %v126_v6 = vld [vmem:[%s357_s12 + $0x30] sm:$0xff]  ;;  %v127_v7 = vld [vmem:[%s357_s12 + $0x38] sm:$0xff]  ;;  %v128_v8 = vld [vmem:[%s357_s12 + $0x40] sm:$0xff] }
  0x11   : > { %278 = vtanh.f32 %v122_v2  ;;  %v129_v10 = vld [vmem:[%s357_s12 + $0x48] sm:$0xff]  ;;  %v130_v12 = vld [vmem:[%s357_s12 + $0x50] sm:$0xff]  ;;  %v131_v14 = vld [vmem:[%s357_s12 + $0x58] sm:$0xff] }
  0x12   : > { %280 = vtanh.f32 %v123_v3  ;;  %v132_v16 = vld [vmem:[%s357_s12 + $0x60] sm:$0xff]  ;;  %v133_v18 = vld [vmem:[%s357_s12 + $0x68] sm:$0xff]  ;;  %v134_v20 = vld [vmem:[%s357_s12 + $0x70] sm:$0xff] }
  0x13   : > { %282 = vtanh.f32 %v124_v4  ;;  %v135_v22 = vld [vmem:[%s357_s12 + $0x78] sm:$0xff]  ;;  %v136_v24 = vld [vmem:[%s357_s12 + $0x80] sm:$0xff]  ;;  %v137_v26 = vld [vmem:[%s357_s12 + $0x88] sm:$0xff] }
  0x14   : > { %284 = vtanh.f32 %v125_v5  ;;  %v138_v28 = vld [vmem:[%s357_s12 + $0x90] sm:$0xff]  ;;  %v139_v30 = vld [vmem:[%s357_s12 + $0x98] sm:$0xff]  ;;  %v140_v32 = vld [vmem:[%s357_s12 + $0xa0] sm:$0xff] }
  0x15   : > { %v275_v9 = vpop.eup %274  ;;  %286 = vtanh.f32 %v126_v6  ;;  %v141_v34 = vld [vmem:[%s357_s12 + $0xa8] sm:$0xff]  ;;  %v142_v36 = vld [vmem:[%s357_s12 + $0xb0] sm:$0xff]  ;;  %v143_v38 = vld [vmem:[%s357_s12 + $0xb8] sm:$0xff] }
  0x16   : > { %v277_v11 = vpop.eup %276  ;;  %174 = vst [vmem:[%s369_s15] sm:$0xff] %v275_v9  ;;  %288 = vtanh.f32 %v127_v7  ;;  %v144_v40 = vld [vmem:[%s357_s12 + $0xc0] sm:$0xff]  ;;  %v145_v42 = vld [vmem:[%s357_s12 + $0xc8] sm:$0xff]  ;;  %v146_v44 = vld [vmem:[%s357_s12 + $0xd0] sm:$0xff] }
  0x17   : > { %v279_v13 = vpop.eup %278  ;;  %175 = vst [vmem:[%s369_s15 + $0x8] sm:$0xff] %v277_v11  ;;  %290 = vtanh.f32 %v128_v8 }
  0x18   : > { %v281_v15 = vpop.eup %280  ;;  %176 = vst [vmem:[%s369_s15 + $0x10] sm:$0xff] %v279_v13  ;;  %292 = vtanh.f32 %v129_v10 }
  0x19   : > { %v283_v17 = vpop.eup %282  ;;  %177 = vst [vmem:[%s369_s15 + $0x18] sm:$0xff] %v281_v15  ;;  %294 = vtanh.f32 %v130_v12 }
  0x1a   : > { %v285_v19 = vpop.eup %284  ;;  %178 = vst [vmem:[%s369_s15 + $0x20] sm:$0xff] %v283_v17  ;;  %296 = vtanh.f32 %v131_v14 }
  0x1b   : > { %v287_v21 = vpop.eup %286  ;;  %179 = vst [vmem:[%s369_s15 + $0x28] sm:$0xff] %v285_v19  ;;  %298 = vtanh.f32 %v132_v16 }
  0x1c   : > { %v289_v23 = vpop.eup %288  ;;  %180 = vst [vmem:[%s369_s15 + $0x30] sm:$0xff] %v287_v21  ;;  %300 = vtanh.f32 %v133_v18 }
  0x1d   : > { %v291_v25 = vpop.eup %290  ;;  %181 = vst [vmem:[%s369_s15 + $0x38] sm:$0xff] %v289_v23  ;;  %302 = vtanh.f32 %v134_v20 }
  0x1e   : > { %v293_v27 = vpop.eup %292  ;;  %182 = vst [vmem:[%s369_s15 + $0x40] sm:$0xff] %v291_v25  ;;  %304 = vtanh.f32 %v135_v22 }
  0x1f   : > { %v295_v29 = vpop.eup %294  ;;  %183 = vst [vmem:[%s369_s15 + $0x48] sm:$0xff] %v293_v27  ;;  %306 = vtanh.f32 %v136_v24 }
  0x20   : > { %v297_v31 = vpop.eup %296  ;;  %184 = vst [vmem:[%s369_s15 + $0x50] sm:$0xff] %v295_v29  ;;  %308 = vtanh.f32 %v137_v26 }
  0x21   : > { %v299_v33 = vpop.eup %298  ;;  %185 = vst [vmem:[%s369_s15 + $0x58] sm:$0xff] %v297_v31  ;;  %310 = vtanh.f32 %v138_v28 }
  0x22   : > { %v301_v35 = vpop.eup %300  ;;  %186 = vst [vmem:[%s369_s15 + $0x60] sm:$0xff] %v299_v33  ;;  %312 = vtanh.f32 %v139_v30 }
  0x23   : > { %v303_v37 = vpop.eup %302  ;;  %187 = vst [vmem:[%s369_s15 + $0x68] sm:$0xff] %v301_v35  ;;  %314 = vtanh.f32 %v140_v32 }
  0x24   : > { %v305_v39 = vpop.eup %304  ;;  %188 = vst [vmem:[%s369_s15 + $0x70] sm:$0xff] %v303_v37  ;;  %316 = vtanh.f32 %v141_v34 }
  0x25   : > { %v307_v41 = vpop.eup %306  ;;  %189 = vst [vmem:[%s369_s15 + $0x78] sm:$0xff] %v305_v39  ;;  %318 = vtanh.f32 %v142_v36 }
  0x26   : > { %v309_v43 = vpop.eup %308  ;;  %190 = vst [vmem:[%s369_s15 + $0x80] sm:$0xff] %v307_v41  ;;  %320 = vtanh.f32 %v143_v38 }
  0x27   : > { %v311_v45 = vpop.eup %310  ;;  %191 = vst [vmem:[%s369_s15 + $0x88] sm:$0xff] %v309_v43  ;;  %322 = vtanh.f32 %v144_v40 }
  0x28   : > { %v313_v46 = vpop.eup %312  ;;  %192 = vst [vmem:[%s369_s15 + $0x90] sm:$0xff] %v311_v45  ;;  %324 = vtanh.f32 %v145_v42 }
  0x29   : > { %v315_v47 = vpop.eup %314  ;;  %193 = vst [vmem:[%s369_s15 + $0x98] sm:$0xff] %v313_v46  ;;  %326 = vtanh.f32 %v146_v44 }
  0x2a   : > { %v317_v48 = vpop.eup %316  ;;  %194 = vst [vmem:[%s369_s15 + $0xa0] sm:$0xff] %v315_v47 }
  0x2b   : > { %v319_v49 = vpop.eup %318  ;;  %195 = vst [vmem:[%s369_s15 + $0xa8] sm:$0xff] %v317_v48 }
  0x2c   : > { %v321_v50 = vpop.eup %320  ;;  %196 = vst [vmem:[%s369_s15 + $0xb0] sm:$0xff] %v319_v49 }
  0x2d   : > { %v323_v51 = vpop.eup %322  ;;  %197 = vst [vmem:[%s369_s15 + $0xb8] sm:$0xff] %v321_v50 }
  0x2e   : > { %v325_v52 = vpop.eup %324  ;;  %198 = vst [vmem:[%s369_s15 + $0xc0] sm:$0xff] %v323_v51 }
  0x2f   : > { %v327_v53 = vpop.eup %326  ;;  %199 = vst [vmem:[%s369_s15 + $0xc8] sm:$0xff] %v325_v52 }
  0x30   : > { %200 = vst [vmem:[%s369_s15 + $0xd0] sm:$0xff] %v327_v53 }
  0x31 PF: > { %s11_s6 = sadd.s32 1, %s334_s6  }
  0x32   : > { %p8_p4 = scmp.ge.s32.totalorder %s11_s6, 4  }
  0x34   :  { %10 = sbr.rel (!%p8_p4) target bundleno = 1 (0x1), region = 54 }

</bundles_post_ra>
